<compile_context>
chip_gen: v6e
topology: v6e:2x2x1
jax: 0.10.0
libtpu: 0.0.40
codegen_flags: <defaults>
</compile_context>

<pallas_src>
import math

import jax
import jax.numpy as jnp
import numpy as np
from jax.experimental import pallas as pl
from jax.experimental.pallas import tpu as pltpu


def mfn_kernel(u_ref, z_ref, w_ref, b_ref, o_ref):
    """One grid step = all L layers applied to one lane-dense row tile.

    u_ref : (L+1, TR, lane)  filter inputs for this tile (all layers at once)
    z_ref : (TR, lane)       input activations for this tile
    w_ref : (L, lane, lane)  block-diagonal weights (VMEM-resident)
    b_ref : (L, 1, lane)     tiled biases          (VMEM-resident)
    o_ref : (TR, lane)       output tile (lane-dense -> unmasked stores)
    """
    n_layers = w_ref.shape[0]
    z = z_ref[...] + jnp.sin(u_ref[0])                       # layer-0 init (fourier)
    for l in range(n_layers):                                # static unroll; carry in vregs
        zw = jnp.dot(z, w_ref[l], preferred_element_type=jnp.float32) + b_ref[l]
        z = jnp.sin(u_ref[l + 1]) * zw                       # multiplicative filter
    o_ref[...] = z


def _pick_tile_rows(n_rows, lane, n_row_streams, *, max_tile_bytes=4 << 20):
    """Rows per grid tile: a multiple of 8 that divides n_rows, keeps >= 2
    tiles when possible (v7x megacore), and caps per-tile streamed bytes so
    the double-buffered working set stays far below VMEM on v5e/v6e/v7x."""
    assert n_rows % 8 == 0
    cap = max(8, (max_tile_bytes // (n_row_streams * lane * 4)) // 8 * 8)
    target = min(cap, n_rows)
    if n_rows >= 16:                                         # leave >= 2 tiles for 2 TCs
        target = min(target, (n_rows // 2) // 8 * 8)
    tr = max(8, (target // 8) * 8)
    while n_rows % tr:
        tr -= 8
    return tr


def mfn_forward(z, u, weights, biases):
    """z: (N, C) f32; u: (L+1, N, C) f32; weights: (L, C, C) (out, in);
    biases: (L, C).  Returns (N, C) f32."""
    N, C = z.shape
    L = weights.shape[0]

    # Lane-dense layout: pack `factor` consecutive points into one 128-lane row
    # via a free row-major reshape (no transposes anywhere).
    lane = 128 if 128 % C == 0 else C
    factor = lane // C

    # Pad N so the packed row count is an integer multiple of 8 (sublanes).
    row_quant = (8 * lane) // math.gcd(8 * lane, C)
    n_pad = (-N) % row_quant
    if n_pad:
        z = jnp.pad(z, ((0, n_pad), (0, 0)))
        u = jnp.pad(u, ((0, 0), (0, n_pad), (0, 0)))
    n_tot = N + n_pad
    n_rows = (n_tot * C) // lane

    z2 = z.reshape(n_rows, lane)                             # free contiguous reshape
    u2 = u.reshape(L + 1, n_rows, lane)

    # Block-diagonal weights so that  z2 @ W_eff[l]  ==  per-point  z @ W_l.T.
    wt = jnp.transpose(weights, (0, 2, 1))                   # (L, C_in, C_out)
    if factor > 1:
        eye = jnp.eye(factor, dtype=weights.dtype)
        w_eff = jnp.einsum("pq,lij->lpiqj", eye, wt).reshape(L, lane, lane)
    else:
        w_eff = wt
    b_eff = jnp.tile(biases, (1, factor)).reshape(L, 1, lane)

    tr = _pick_tile_rows(n_rows, lane, n_row_streams=(L + 1) + 2)
    grid = (n_rows // tr,)

    out2 = pl.pallas_call(
        mfn_kernel,
        out_shape=jax.ShapeDtypeStruct((n_rows, lane), jnp.float32),
        grid_spec=pltpu.PrefetchScalarGridSpec(
            num_scalar_prefetch=0,
            grid=grid,                                       # 1-D: row tiles only
            in_specs=[
                # u: the only per-tile streamed input (all L+1 layers at once).
                pl.BlockSpec((L + 1, tr, lane), lambda i: (0, i, 0)),
                pl.BlockSpec((tr, lane), lambda i: (i, 0)),
                # weights / biases resident in VMEM (constant block index).
                pl.BlockSpec((L, lane, lane), lambda i: (0, 0, 0)),
                pl.BlockSpec((L, 1, lane), lambda i: (0, 0, 0)),
            ],
            out_specs=pl.BlockSpec((tr, lane), lambda i: (i, 0)),
        ),
        compiler_params=pltpu.CompilerParams(
            dimension_semantics=("parallel",),               # tiles shard across TCs on v7x
        ),
    )(u2, z2, w_eff, b_eff)

    out = out2.reshape(n_tot, C)                             # free reshape back
    if n_pad:
        out = out[:N]
    return out


def mfn_reference(z, u, weights, biases):
    """Pure-JAX reference matching the PyTorch forward."""
    z = z + jnp.sin(u[0])                                    # z_init = ones -> sin(u0)
    for i in range(weights.shape[0]):
        z = jnp.sin(u[i + 1]) * (z @ weights[i].T + biases[i])
    return z


if __name__ == "__main__":
    interm_channels = 32   # C
    n_layers = 3           # L
    n_points = 1024        # N (coordinates)

    key = jax.random.PRNGKey(0)
    k_z, k_u, k_w, k_b = jax.random.split(key, 4)

    z = jax.random.normal(k_z, (n_points, interm_channels), dtype=jnp.float32)
    u = jax.random.normal(
        k_u, (n_layers + 1, n_points, interm_channels), dtype=jnp.float32)

    # nn.Linear weights: uniform(-sqrt(1/C), sqrt(1/C)) per the module's init;
    # biases: default PyTorch Linear init uniform(-1/sqrt(C), 1/sqrt(C)).
    bound = float(np.sqrt(1.0 / interm_channels))
    weights = jax.random.uniform(
        k_w, (n_layers, interm_channels, interm_channels),
        minval=-bound, maxval=bound, dtype=jnp.float32)
    biases = jax.random.uniform(
        k_b, (n_layers, interm_channels),
        minval=-bound, maxval=bound, dtype=jnp.float32)

    mfn = jax.jit(mfn_forward)
    out = jax.block_until_ready(mfn(z, u, weights, biases))

    ref = mfn_reference(z, u, weights, biases)
    np.testing.assert_allclose(np.asarray(out), np.asarray(ref),
                               rtol=1e-4, atol=1e-4)
    print("KERNEL_OK")
</pallas_src>

<mosaic_0001>
module attributes {stable_mosaic.version = 11 : i64} {
  func.func @mfn_kernel(%arg0: i32, %arg1: memref<4x128x128xf32, #tpu.memory_space<vmem>>, %arg2: memref<128x128xf32, #tpu.memory_space<vmem>>, %arg3: memref<3x128x128xf32, #tpu.memory_space<vmem>>, %arg4: memref<3x1x128xf32, #tpu.memory_space<vmem>>, %arg5: memref<128x128xf32, #tpu.memory_space<vmem>>) attributes {dimension_semantics = [#tpu.dimension_semantics<parallel>], iteration_bounds = array<i64: 2>, scalar_prefetch = 0 : i64, scratch_operands = 0 : i64, tpu.core_type = #tpu.core_type<tc>, window_params = [{transform_indices = @transform_0, window_bounds = array<i64: 4, 128, 128>}, {transform_indices = @transform_1, window_bounds = array<i64: 128, 128>}, {pipeline_mode = #tpu.pipeline_mode<synchronous>, transform_indices = @transform_2, window_bounds = array<i64: 3, 128, 128>}, {pipeline_mode = #tpu.pipeline_mode<synchronous>, transform_indices = @transform_3, window_bounds = array<i64: 3, 1, 128>}, {transform_indices = @transform_4, window_bounds = array<i64: 128, 128>}]} {
    %c0 = arith.constant 0 : index
    %c0_0 = arith.constant 0 : index
    %0 = vector.load %arg2[%c0, %c0_0] : memref<128x128xf32, #tpu.memory_space<vmem>>, vector<128x128xf32>
    %c0_1 = arith.constant 0 : index
    %c0_2 = arith.constant 0 : index
    %c0_3 = arith.constant 0 : index
    %1 = vector.load %arg1[%c0_1, %c0_2, %c0_3] : memref<4x128x128xf32, #tpu.memory_space<vmem>>, vector<1x128x128xf32>
    %2 = vector.shape_cast %1 : vector<1x128x128xf32> to vector<128x128xf32>
    %3 = math.sin %2 : vector<128x128xf32>
    %4 = arith.addf %0, %3 : vector<128x128xf32>
    %c0_4 = arith.constant 0 : index
    %c0_5 = arith.constant 0 : index
    %c0_6 = arith.constant 0 : index
    %5 = vector.load %arg3[%c0_4, %c0_5, %c0_6] : memref<3x128x128xf32, #tpu.memory_space<vmem>>, vector<1x128x128xf32>
    %6 = vector.shape_cast %5 : vector<1x128x128xf32> to vector<128x128xf32>
    %cst = arith.constant dense<0.000000e+00> : vector<128x128xf32>
    %7 = tpu.matmul %4, %6, %cst {dimension_numbers = #tpu.dot_dimension_numbers<[1], [0], [0], [1], [0, 0, 1, 1], [], []>} : vector<128x128xf32>, vector<128x128xf32>, vector<128x128xf32> -> vector<128x128xf32>
    %c0_7 = arith.constant 0 : index
    %c0_8 = arith.constant 0 : index
    %c0_9 = arith.constant 0 : index
    %8 = vector.load %arg4[%c0_7, %c0_8, %c0_9] : memref<3x1x128xf32, #tpu.memory_space<vmem>>, vector<1x1x128xf32>
    %9 = vector.shape_cast %8 : vector<1x1x128xf32> to vector<1x128xf32>
    %10 = vector.broadcast %9 : vector<1x128xf32> to vector<128x128xf32>
    %11 = arith.addf %7, %10 : vector<128x128xf32>
    %c1 = arith.constant 1 : index
    %c0_10 = arith.constant 0 : index
    %c0_11 = arith.constant 0 : index
    %12 = vector.load %arg1[%c1, %c0_10, %c0_11] : memref<4x128x128xf32, #tpu.memory_space<vmem>>, vector<1x128x128xf32>
    %13 = vector.shape_cast %12 : vector<1x128x128xf32> to vector<128x128xf32>
    %14 = math.sin %13 : vector<128x128xf32>
    %15 = arith.mulf %14, %11 : vector<128x128xf32>
    %c1_12 = arith.constant 1 : index
    %c0_13 = arith.constant 0 : index
    %c0_14 = arith.constant 0 : index
    %16 = vector.load %arg3[%c1_12, %c0_13, %c0_14] : memref<3x128x128xf32, #tpu.memory_space<vmem>>, vector<1x128x128xf32>
    %17 = vector.shape_cast %16 : vector<1x128x128xf32> to vector<128x128xf32>
    %cst_15 = arith.constant dense<0.000000e+00> : vector<128x128xf32>
    %18 = tpu.matmul %15, %17, %cst_15 {dimension_numbers = #tpu.dot_dimension_numbers<[1], [0], [0], [1], [0, 0, 1, 1], [], []>} : vector<128x128xf32>, vector<128x128xf32>, vector<128x128xf32> -> vector<128x128xf32>
    %c1_16 = arith.constant 1 : index
    %c0_17 = arith.constant 0 : index
    %c0_18 = arith.constant 0 : index
    %19 = vector.load %arg4[%c1_16, %c0_17, %c0_18] : memref<3x1x128xf32, #tpu.memory_space<vmem>>, vector<1x1x128xf32>
    %20 = vector.shape_cast %19 : vector<1x1x128xf32> to vector<1x128xf32>
    %21 = vector.broadcast %20 : vector<1x128xf32> to vector<128x128xf32>
    %22 = arith.addf %18, %21 : vector<128x128xf32>
    %c2 = arith.constant 2 : index
    %c0_19 = arith.constant 0 : index
    %c0_20 = arith.constant 0 : index
    %23 = vector.load %arg1[%c2, %c0_19, %c0_20] : memref<4x128x128xf32, #tpu.memory_space<vmem>>, vector<1x128x128xf32>
    %24 = vector.shape_cast %23 : vector<1x128x128xf32> to vector<128x128xf32>
    %25 = math.sin %24 : vector<128x128xf32>
    %26 = arith.mulf %25, %22 : vector<128x128xf32>
    %c2_21 = arith.constant 2 : index
    %c0_22 = arith.constant 0 : index
    %c0_23 = arith.constant 0 : index
    %27 = vector.load %arg3[%c2_21, %c0_22, %c0_23] : memref<3x128x128xf32, #tpu.memory_space<vmem>>, vector<1x128x128xf32>
    %28 = vector.shape_cast %27 : vector<1x128x128xf32> to vector<128x128xf32>
    %cst_24 = arith.constant dense<0.000000e+00> : vector<128x128xf32>
    %29 = tpu.matmul %26, %28, %cst_24 {dimension_numbers = #tpu.dot_dimension_numbers<[1], [0], [0], [1], [0, 0, 1, 1], [], []>} : vector<128x128xf32>, vector<128x128xf32>, vector<128x128xf32> -> vector<128x128xf32>
    %c2_25 = arith.constant 2 : index
    %c0_26 = arith.constant 0 : index
    %c0_27 = arith.constant 0 : index
    %30 = vector.load %arg4[%c2_25, %c0_26, %c0_27] : memref<3x1x128xf32, #tpu.memory_space<vmem>>, vector<1x1x128xf32>
    %31 = vector.shape_cast %30 : vector<1x1x128xf32> to vector<1x128xf32>
    %32 = vector.broadcast %31 : vector<1x128xf32> to vector<128x128xf32>
    %33 = arith.addf %29, %32 : vector<128x128xf32>
    %c3 = arith.constant 3 : index
    %c0_28 = arith.constant 0 : index
    %c0_29 = arith.constant 0 : index
    %34 = vector.load %arg1[%c3, %c0_28, %c0_29] : memref<4x128x128xf32, #tpu.memory_space<vmem>>, vector<1x128x128xf32>
    %35 = vector.shape_cast %34 : vector<1x128x128xf32> to vector<128x128xf32>
    %36 = math.sin %35 : vector<128x128xf32>
    %37 = arith.mulf %36, %33 : vector<128x128xf32>
    %c0_30 = arith.constant 0 : index
    %c0_31 = arith.constant 0 : index
    %38 = vector.load %arg5[%c0_30, %c0_31] : memref<128x128xf32, #tpu.memory_space<vmem>>, vector<128x128xf32>
    tpu.vector_store %arg5[%c0_30, %c0_31], %37 {strides = array<i32>} : memref<128x128xf32, #tpu.memory_space<vmem>>, vector<128x128xf32>,
    return
  }
  func.func @transform_0(%arg0: i32) -> (i32, i32, i32) {
    %c0_i32 = arith.constant 0 : i32
    %c0_i32_0 = arith.constant 0 : i32
    %c0_i32_1 = arith.constant 0 : i32
    return %c0_i32, %arg0, %c0_i32_0 : i32, i32, i32
  }
  func.func @transform_1(%arg0: i32) -> (i32, i32) {
    %c0_i32 = arith.constant 0 : i32
    %c0_i32_0 = arith.constant 0 : i32
    return %arg0, %c0_i32 : i32, i32
  }
  func.func @transform_2(%arg0: i32) -> (i32, i32, i32) {
    %c0_i32 = arith.constant 0 : i32
    %c0_i32_0 = arith.constant 0 : i32
    %c0_i32_1 = arith.constant 0 : i32
    %c0_i32_2 = arith.constant 0 : i32
    return %c0_i32, %c0_i32_0, %c0_i32_1 : i32, i32, i32
  }
  func.func @transform_3(%arg0: i32) -> (i32, i32, i32) {
    %c0_i32 = arith.constant 0 : i32
    %c0_i32_0 = arith.constant 0 : i32
    %c0_i32_1 = arith.constant 0 : i32
    %c0_i32_2 = arith.constant 0 : i32
    return %c0_i32, %c0_i32_0, %c0_i32_1 : i32, i32, i32
  }
  func.func @transform_4(%arg0: i32) -> (i32, i32) {
    %c0_i32 = arith.constant 0 : i32
    %c0_i32_0 = arith.constant 0 : i32
    return %arg0, %c0_i32 : i32, i32
  }
}

</mosaic_0001>

<bundles_post_ra>
// kernel: mfn_forward.1
= control target key start
LH: loop header
LB: loop body
LE: loop exit
PB: predicated region body
PF: predicated region fallthrough
CT: control target
= control target key end

     0   :  { %s9168_s15 = smov 0   ;;  %s9170_s16 = smov 0   ;;  %s15156_s0 = inlined_call_operand.vmem [shape: f32[4,256,128], index: 0, kind: input, shape index: {}]   ;;  %s15157_s1 = inlined_call_operand.vmem [shape: f32[256,128], index: 1, kind: input, shape index: {}]   ;;  %s15158_s2 = inlined_call_operand.vmem [shape: f32[3,128,128], index: 2, kind: input, shape index: {}]   ;;  %s15159_s3 = inlined_call_operand.vmem [shape: f32[3,1,128], index: 3, kind: input, shape index: {}]   ;;  %s15160_s4 = inlined_call_operand.vmem [shape: f32[256,128], index: 4, kind: output, shape index: {}]  }
   0x1   :  { %s9172_s17 = smov 0  }
   0x2 LB: > { %s7911_s18 = sadd.s32 4294967295, %s9135_s17   ;;  %s9185_s19 = sadd.s32 1, %s9135_s17   ;;  %s9135_s17 = sphi %s9172_s17, %s15287_s17   ;;  %s9131_s16 = sphi %s9170_s16, %s15286_s16   ;;  %s9127_s15 = sphi %s9168_s15, %s15285_s15  }
   0x3   : > { %s18_s20 = ssub.s32 %s9135_s17, %s9185_s19  ;;  %s21_s21 = sadd.s32 1, %s9131_s16 }
   0x4   : > { %p19_p0 = scmp.eq.s32.totalorder %s18_s20, 0  ;;  %p28_p1 = scmp.ne.s32.totalorder %s9131_s16, %s9127_s15 }
   0x5   : > { %p29_p2 = scmp.eq.s32.totalorder %s9135_s17, 0  ;;  %p7914_p4 = scmp.ge.s32.totalorder %s9135_s17, 2 }
   0x6   : > { %s9194_s22 = scalar_select %p19_p0, %s9131_s16, %s21_s21  }
   0x7   : > { %p30_p3 = por %p29_p2, %p28_p1  ;;  %154 = sbr.rel (%p7914_p4) target bundleno = 48 (0x30), region = 24 }
   0xc   : > { %157 = sbr.rel (!%p30_p3) target bundleno = 48 (0x30), region = 28  ;;  %s159_s23 = sand.u32 (%p30_p3), 1, %s9131_s16  }
   0xd   : > { %s8267_s24 = sshll.u32 (%p30_p3), %s9135_s17, 7  ;;  %s7915_s25 = sshll.u32 (%p30_p3), %s159_s23, 9 }
   0xe   : > { %s9202_s28 = scalar_lea.vmem (%p30_p3), %s15156_s0, %s8267_s24  ;;  %s9207_s29 = scalar_lea.vmem (%p30_p3), [#allocation2], %s7915_s25 }
   0xf   : > { %v319_v0 = vld [vmem:[%s9202_s28] sm:$0xff] (%p30_p3)  ;;  %v321_v1 = vld [vmem:[%s9202_s28 + $0x8] sm:$0xff] (%p30_p3)  ;;  %v323_v2 = vld [vmem:[%s9202_s28 + $0x10] sm:$0xff] (%p30_p3) }
  0x10   : > { %320 = vst [vmem:[%s9207_s29] sm:$0xff] (%p30_p3), %v319_v0  ;;  %322 = vst [vmem:[%s9207_s29 + $0x8] sm:$0xff] (%p30_p3), %v321_v1  ;;  %v325_v3 = vld [vmem:[%s9202_s28 + $0x18] sm:$0xff] (%p30_p3)  ;;  %v327_v4 = vld [vmem:[%s9202_s28 + $0x20] sm:$0xff] (%p30_p3) }
  0x11   : > { %324 = vst [vmem:[%s9207_s29 + $0x10] sm:$0xff] %v323_v2  ;;  %v329_v5 = vld [vmem:[%s9202_s28 + $0x28] sm:$0xff]  ;;  %326 = vst [vmem:[%s9207_s29 + $0x18] sm:$0xff] %v325_v3  ;;  %v331_v6 = vld [vmem:[%s9202_s28 + $0x30] sm:$0xff] }
  0x12   : > { %328 = vst [vmem:[%s9207_s29 + $0x20] sm:$0xff] %v327_v4  ;;  %330 = vst [vmem:[%s9207_s29 + $0x28] sm:$0xff] %v329_v5  ;;  %v333_v7 = vld [vmem:[%s9202_s28 + $0x38] sm:$0xff]  ;;  %v335_v8 = vld [vmem:[%s9202_s28 + $0x40] sm:$0xff] }
  0x13   : > { %332 = vst [vmem:[%s9207_s29 + $0x30] sm:$0xff] %v331_v6  ;;  %334 = vst [vmem:[%s9207_s29 + $0x38] sm:$0xff] %v333_v7  ;;  %v337_v9 = vld [vmem:[%s9202_s28 + $0x48] sm:$0xff]  ;;  %v339_v10 = vld [vmem:[%s9202_s28 + $0x50] sm:$0xff] }
  0x14   : > { %336 = vst [vmem:[%s9207_s29 + $0x40] sm:$0xff] %v335_v8  ;;  %v341_v11 = vld [vmem:[%s9202_s28 + $0x58] sm:$0xff]  ;;  %338 = vst [vmem:[%s9207_s29 + $0x48] sm:$0xff] %v337_v9  ;;  %v343_v12 = vld [vmem:[%s9202_s28 + $0x60] sm:$0xff] }
  0x15   : > { %340 = vst [vmem:[%s9207_s29 + $0x50] sm:$0xff] %v339_v10  ;;  %342 = vst [vmem:[%s9207_s29 + $0x58] sm:$0xff] %v341_v11  ;;  %v345_v13 = vld [vmem:[%s9202_s28 + $0x68] sm:$0xff]  ;;  %v347_v14 = vld [vmem:[%s9202_s28 + $0x70] sm:$0xff] }
  0x16   : > { %344 = vst [vmem:[%s9207_s29 + $0x60] sm:$0xff] %v343_v12  ;;  %346 = vst [vmem:[%s9207_s29 + $0x68] sm:$0xff] %v345_v13  ;;  %v349_v15 = vld [vmem:[%s9202_s28 + $0x78] sm:$0xff]  ;;  %v351_v16 = vld [vmem:[%s9202_s28 + $0x100] sm:$0xff] }
  0x17   : > { %348 = vst [vmem:[%s9207_s29 + $0x70] sm:$0xff] %v347_v14  ;;  %v353_v17 = vld [vmem:[%s9202_s28 + $0x108] sm:$0xff]  ;;  %350 = vst [vmem:[%s9207_s29 + $0x78] sm:$0xff] %v349_v15  ;;  %v355_v18 = vld [vmem:[%s9202_s28 + $0x110] sm:$0xff] }
  0x18   : > { %352 = vst [vmem:[%s9207_s29 + $0x80] sm:$0xff] %v351_v16  ;;  %354 = vst [vmem:[%s9207_s29 + $0x88] sm:$0xff] %v353_v17  ;;  %v357_v19 = vld [vmem:[%s9202_s28 + $0x118] sm:$0xff]  ;;  %v359_v20 = vld [vmem:[%s9202_s28 + $0x120] sm:$0xff] }
  0x19   : > { %356 = vst [vmem:[%s9207_s29 + $0x90] sm:$0xff] %v355_v18  ;;  %358 = vst [vmem:[%s9207_s29 + $0x98] sm:$0xff] %v357_v19  ;;  %v361_v21 = vld [vmem:[%s9202_s28 + $0x128] sm:$0xff]  ;;  %v363_v22 = vld [vmem:[%s9202_s28 + $0x130] sm:$0xff] }
  0x1a   : > { %360 = vst [vmem:[%s9207_s29 + $0xa0] sm:$0xff] %v359_v20  ;;  %v365_v23 = vld [vmem:[%s9202_s28 + $0x138] sm:$0xff]  ;;  %362 = vst [vmem:[%s9207_s29 + $0xa8] sm:$0xff] %v361_v21  ;;  %v367_v24 = vld [vmem:[%s9202_s28 + $0x140] sm:$0xff] }
  0x1b   : > { %364 = vst [vmem:[%s9207_s29 + $0xb0] sm:$0xff] %v363_v22  ;;  %366 = vst [vmem:[%s9207_s29 + $0xb8] sm:$0xff] %v365_v23  ;;  %v369_v25 = vld [vmem:[%s9202_s28 + $0x148] sm:$0xff]  ;;  %v371_v26 = vld [vmem:[%s9202_s28 + $0x150] sm:$0xff] }
  0x1c   : > { %368 = vst [vmem:[%s9207_s29 + $0xc0] sm:$0xff] %v367_v24  ;;  %370 = vst [vmem:[%s9207_s29 + $0xc8] sm:$0xff] %v369_v25  ;;  %v373_v27 = vld [vmem:[%s9202_s28 + $0x158] sm:$0xff]  ;;  %v375_v28 = vld [vmem:[%s9202_s28 + $0x160] sm:$0xff] }
  0x1d   : > { %372 = vst [vmem:[%s9207_s29 + $0xd0] sm:$0xff] %v371_v26  ;;  %v377_v29 = vld [vmem:[%s9202_s28 + $0x168] sm:$0xff]  ;;  %374 = vst [vmem:[%s9207_s29 + $0xd8] sm:$0xff] %v373_v27  ;;  %v379_v30 = vld [vmem:[%s9202_s28 + $0x170] sm:$0xff] }
  0x1e   : > { %376 = vst [vmem:[%s9207_s29 + $0xe0] sm:$0xff] %v375_v28  ;;  %378 = vst [vmem:[%s9207_s29 + $0xe8] sm:$0xff] %v377_v29  ;;  %v381_v31 = vld [vmem:[%s9202_s28 + $0x178] sm:$0xff]  ;;  %v383_v32 = vld [vmem:[%s9202_s28 + $0x200] sm:$0xff] }
  0x1f   : > { %380 = vst [vmem:[%s9207_s29 + $0xf0] sm:$0xff] %v379_v30  ;;  %382 = vst [vmem:[%s9207_s29 + $0xf8] sm:$0xff] %v381_v31  ;;  %v385_v33 = vld [vmem:[%s9202_s28 + $0x208] sm:$0xff]  ;;  %v387_v34 = vld [vmem:[%s9202_s28 + $0x210] sm:$0xff] }
  0x20   : > { %384 = vst [vmem:[%s9207_s29 + $0x100] sm:$0xff] %v383_v32  ;;  %v389_v35 = vld [vmem:[%s9202_s28 + $0x218] sm:$0xff]  ;;  %386 = vst [vmem:[%s9207_s29 + $0x108] sm:$0xff] %v385_v33  ;;  %v391_v36 = vld [vmem:[%s9202_s28 + $0x220] sm:$0xff] }
  0x21   : > { %388 = vst [vmem:[%s9207_s29 + $0x110] sm:$0xff] %v387_v34  ;;  %390 = vst [vmem:[%s9207_s29 + $0x118] sm:$0xff] %v389_v35  ;;  %v393_v37 = vld [vmem:[%s9202_s28 + $0x228] sm:$0xff]  ;;  %v395_v38 = vld [vmem:[%s9202_s28 + $0x230] sm:$0xff] }
  0x22   : > { %392 = vst [vmem:[%s9207_s29 + $0x120] sm:$0xff] %v391_v36  ;;  %394 = vst [vmem:[%s9207_s29 + $0x128] sm:$0xff] %v393_v37  ;;  %v397_v39 = vld [vmem:[%s9202_s28 + $0x238] sm:$0xff]  ;;  %v399_v40 = vld [vmem:[%s9202_s28 + $0x240] sm:$0xff] }
  0x23   : > { %396 = vst [vmem:[%s9207_s29 + $0x130] sm:$0xff] %v395_v38  ;;  %v401_v41 = vld [vmem:[%s9202_s28 + $0x248] sm:$0xff]  ;;  %398 = vst [vmem:[%s9207_s29 + $0x138] sm:$0xff] %v397_v39  ;;  %v403_v42 = vld [vmem:[%s9202_s28 + $0x250] sm:$0xff] }
  0x24   : > { %400 = vst [vmem:[%s9207_s29 + $0x140] sm:$0xff] %v399_v40  ;;  %402 = vst [vmem:[%s9207_s29 + $0x148] sm:$0xff] %v401_v41  ;;  %v405_v43 = vld [vmem:[%s9202_s28 + $0x258] sm:$0xff]  ;;  %v407_v44 = vld [vmem:[%s9202_s28 + $0x260] sm:$0xff] }
  0x25   : > { %404 = vst [vmem:[%s9207_s29 + $0x150] sm:$0xff] %v403_v42  ;;  %406 = vst [vmem:[%s9207_s29 + $0x158] sm:$0xff] %v405_v43  ;;  %v409_v45 = vld [vmem:[%s9202_s28 + $0x268] sm:$0xff]  ;;  %v411_v46 = vld [vmem:[%s9202_s28 + $0x270] sm:$0xff] }
  0x26   : > { %408 = vst [vmem:[%s9207_s29 + $0x160] sm:$0xff] %v407_v44  ;;  %v413_v47 = vld [vmem:[%s9202_s28 + $0x278] sm:$0xff]  ;;  %410 = vst [vmem:[%s9207_s29 + $0x168] sm:$0xff] %v409_v45  ;;  %v415_v48 = vld [vmem:[%s9202_s28 + $0x300] sm:$0xff] }
  0x27   : > { %412 = vst [vmem:[%s9207_s29 + $0x170] sm:$0xff] %v411_v46  ;;  %414 = vst [vmem:[%s9207_s29 + $0x178] sm:$0xff] %v413_v47  ;;  %v417_v49 = vld [vmem:[%s9202_s28 + $0x308] sm:$0xff]  ;;  %v419_v50 = vld [vmem:[%s9202_s28 + $0x310] sm:$0xff] }
  0x28   : > { %416 = vst [vmem:[%s9207_s29 + $0x180] sm:$0xff] %v415_v48  ;;  %418 = vst [vmem:[%s9207_s29 + $0x188] sm:$0xff] %v417_v49  ;;  %v421_v51 = vld [vmem:[%s9202_s28 + $0x318] sm:$0xff]  ;;  %v423_v52 = vld [vmem:[%s9202_s28 + $0x320] sm:$0xff] }
  0x29   : > { %420 = vst [vmem:[%s9207_s29 + $0x190] sm:$0xff] %v419_v50  ;;  %v425_v53 = vld [vmem:[%s9202_s28 + $0x328] sm:$0xff]  ;;  %422 = vst [vmem:[%s9207_s29 + $0x198] sm:$0xff] %v421_v51  ;;  %v427_v54 = vld [vmem:[%s9202_s28 + $0x330] sm:$0xff] }
  0x2a   : > { %424 = vst [vmem:[%s9207_s29 + $0x1a0] sm:$0xff] %v423_v52  ;;  %426 = vst [vmem:[%s9207_s29 + $0x1a8] sm:$0xff] %v425_v53  ;;  %v429_v55 = vld [vmem:[%s9202_s28 + $0x338] sm:$0xff]  ;;  %v431_v56 = vld [vmem:[%s9202_s28 + $0x340] sm:$0xff] }
  0x2b   : > { %428 = vst [vmem:[%s9207_s29 + $0x1b0] sm:$0xff] %v427_v54  ;;  %430 = vst [vmem:[%s9207_s29 + $0x1b8] sm:$0xff] %v429_v55  ;;  %v433_v57 = vld [vmem:[%s9202_s28 + $0x348] sm:$0xff]  ;;  %v435_v58 = vld [vmem:[%s9202_s28 + $0x350] sm:$0xff] }
  0x2c   : > { %432 = vst [vmem:[%s9207_s29 + $0x1c0] sm:$0xff] %v431_v56  ;;  %v437_v59 = vld [vmem:[%s9202_s28 + $0x358] sm:$0xff]  ;;  %434 = vst [vmem:[%s9207_s29 + $0x1c8] sm:$0xff] %v433_v57  ;;  %v439_v60 = vld [vmem:[%s9202_s28 + $0x360] sm:$0xff] }
  0x2d   : > { %436 = vst [vmem:[%s9207_s29 + $0x1d0] sm:$0xff] %v435_v58  ;;  %438 = vst [vmem:[%s9207_s29 + $0x1d8] sm:$0xff] %v437_v59  ;;  %v441_v61 = vld [vmem:[%s9202_s28 + $0x368] sm:$0xff]  ;;  %v443_v62 = vld [vmem:[%s9202_s28 + $0x370] sm:$0xff] }
  0x2e   : > { %440 = vst [vmem:[%s9207_s29 + $0x1e0] sm:$0xff] %v439_v60  ;;  %442 = vst [vmem:[%s9207_s29 + $0x1e8] sm:$0xff] %v441_v61  ;;  %v445_v63 = vld [vmem:[%s9202_s28 + $0x378] sm:$0xff] }
  0x2f   : > { %444 = vst [vmem:[%s9207_s29 + $0x1f0] sm:$0xff] %v443_v62  ;;  %446 = vst [vmem:[%s9207_s29 + $0x1f8] sm:$0xff] %v445_v63 }
  0x30 PF: > { %p7918_p5 = scmp.ge.s32.totalorder %s9135_s17, 1  ;;  %p460_p6 = scmp.lt.s32.totalorder %s9135_s17, 3 }
  0x32   : > { %p461_p7 = pnand %p7918_p5, %p460_p6 }
  0x33   : > { %s467_s8 = sand.u32 (!%p461_p7), 1, %s9127_s15   ;;  %s9633_s24 = sshll.u32 (!%p461_p7), %s7911_s18, 4 }
  0x34   : > { %464 = sbr.rel (%p461_p7) target bundleno = 1697 (0x6a1), region = 70  ;;  %s7919_s9 = sshll.u32 (!%p461_p7), %s467_s8, 9 }
  0x35   : > { %s9349_s14 = scalar_lea.vmem (!%p461_p7), [#allocation2], %s7919_s9  ;;  %p499_p8 = scmp.lt.s32.totalorder (!%p461_p7), %s9633_s24, 31 }
  0x39   : > { %v2237_v0 = vld [vmem:[%s15158_s2 + $0x78] sm:$0xff]  ;;  %v2236_v1 = vld [vmem:[%s15158_s2 + $0x70] sm:$0xff]  ;;  %v2235_v2 = vld [vmem:[%s15158_s2 + $0x68] sm:$0xff]  ;;  %v9137_v38 = vmov 683565275   ;;  %s15289_s24 = smov (!%p499_p8, %s9633_s24), 31 }
  0x3a   : > { %8364 = vmatprep.subr.mxu0 %v2237_v0  ;;  %v2234_v3 = vld [vmem:[%s15158_s2 + $0x60] sm:$0xff]  ;;  %v2233_v5 = vld [vmem:[%s15158_s2 + $0x58] sm:$0xff]  ;;  %v9360_v8 = vld [vmem:[%s9349_s14 + $0x8] sm:$0xff]  ;;  %v9138_v40 = vmov 2475754826   ;;  %s7921_s17 = sshll.u32 %s15289_s24, 3 }
  0x3b   : > { %8365 = vmatpush3.msra.mxu0 %v2237_v0  ;;  %v9352_v4 = vld [vmem:[%s9349_s14] sm:$0xff]  ;;  %v646_v9 = vand.u32 2147483647, %v9360_v8  ;;  %v2232_v10 = vld [vmem:[%s15158_s2 + $0x50] sm:$0xff]  ;;  %v649_v13 = vand.u32 2139095040, %v9360_v8  ;;  %v2231_v15 = vld [vmem:[%s15158_s2 + $0x48] sm:$0xff]  ;;  %s9714_s26 = scalar_lea.vmem %s15157_s1, %s7921_s17  ;;  %s14041_s28 = scalar_lea.vmem %s15160_s4, %s7921_s17 }
  0x3c   : > { %8366 = vmatprep.subr.mxu0 %v2236_v1  ;;  %v542_v6 = vand.u32 2147483647, %v9352_v4  ;;  %v545_v7 = vand.u32 2139095040, %v9352_v4  ;;  %v9375_v17 = vld [vmem:[%s9349_s14 + $0x10] sm:$0xff]  ;;  %v2230_v19 = vld [vmem:[%s15158_s2 + $0x40] sm:$0xff]  ;;  %v2229_v26 = vld [vmem:[%s15158_s2 + $0x38] sm:$0xff] }
  0x3d   : > { %8367 = vmatpush3.msra.mxu0 %v2236_v1  ;;  %v653_v14 = vand.u32 8388607, %v646_v9  ;;  %v650_v18 = vshrl.u32 %v649_v13, 23  ;;  %v750_v24 = vand.u32 2147483647, %v9375_v17  ;;  %v753_v25 = vand.u32 2139095040, %v9375_v17 }
  0x3e   : > { %8368 = vmatprep.subr.mxu0 %v2235_v2  ;;  %v546_v11 = vshrl.u32 %v545_v7, 23  ;;  %v549_v12 = vand.u32 8388607, %v542_v6  ;;  %v2228_v29 = vld [vmem:[%s15158_s2 + $0x30] sm:$0xff]  ;;  %v2227_v36 = vld [vmem:[%s15158_s2 + $0x28] sm:$0xff]  ;;  %v2226_v48 = vld [vmem:[%s15158_s2 + $0x20] sm:$0xff] }
  0x3f   : > { %8369 = vmatpush3.msra.mxu0 %v2235_v2  ;;  %v7928_v22 = vadd.s32 4294967169, %v650_v18  ;;  %v654_v23 = vor.u32 8388608, %v653_v14  ;;  %v9394_v34 = vshrl.u32 %v753_v25, 23  ;;  %v9398_v35 = vand.u32 8388607, %v750_v24  ;;  %v2225_v56 = vld [vmem:[%s15158_s2 + $0x18] sm:$0xff] }
  0x40   : > { %8370 = vmatprep.subr.mxu0 %v2234_v3  ;;  %v7924_v16 = vadd.s32 4294967169, %v546_v11  ;;  %v550_v20 = vor.u32 8388608, %v549_v12  ;;  %v9139_v42 = vmov 2131351028   ;;  %v9140_v44 = vmov 2102212464  }
  0x41   : > { %8371 = vmatpush3.msra.mxu0 %v2234_v3  ;;  %v656_v28 = vadd.s32 1, %v7928_v22  ;;  %v9392_v33 = vshll.u32 %v654_v23, 8  ;;  %v9141_v46 = vmov 920167782   ;;  %v9142_v54 = vmov 1326507024  }
  0x42   : > { %8372 = vmatprep.subr.mxu0 %v2233_v5  ;;  %v552_v21 = vadd.s32 1, %v7924_v16  ;;  %v9390_v32 = vshll.u32 %v550_v20, 8  ;;  %v2224_v1 = vld [vmem:[%s15158_s2 + $0x10] sm:$0xff]  ;;  %v2223_v14 = vld [vmem:[%s15158_s2 + $0x8] sm:$0xff]  ;;  %v2222_v25 = vld [vmem:[%s15158_s2] sm:$0xff]  ;;  %vm544_vm14 = vcmp.lt.s32.totalorder %v9352_v4, 0 }
  0x43   : > { %8373 = vmatpush3.msra.mxu0 %v2233_v5  ;;  %vm657_vm1 = vcmp.gt.s32.totalorder %v656_v28, 0  ;;  %vm9530_vm13 = vcmp.le.f32.partialorder %v542_v6, 0.7853982 }
  0x44   : > { %8374 = vmatprep.subr.mxu0 %v2232_v10  ;;  %vm553_vm0 = vcmp.gt.s32.totalorder %v552_v21, 0  ;;  %v658_v60 = vsel %vm657_vm1, %v656_v28, 0 }
  0x45   : > { %8375 = vmatpush3.msra.mxu0 %v2232_v10  ;;  %v554_v27 = vsel %vm553_vm0, %v552_v21, 0  ;;  %v9425_v63 = vshrl.u32 %v658_v60, 5  ;;  %v660_v0 = vand.u32 31, %v658_v60 }
  0x46   : > { %8376 = vmatprep.subr.mxu0 %v2231_v15  ;;  %v9388_v30 = vshrl.u32 %v554_v27, 5  ;;  %v556_v31 = vand.u32 31, %v554_v27 }
  0x47   : > { %8377 = vmatpush3.msra.mxu0 %v2231_v15  ;;  %v661_v13 = vsub.s32 32, %v660_v0  ;;  %vm678_vm6 = vcmp.lt.s32.totalorder %v9425_v63, 1  ;;  %vm679_vm8 = vcmp.lt.s32.totalorder %v9425_v63, 2  ;;  %vm680_vm9 = vcmp.lt.s32.totalorder %v9425_v63, 3 }
  0x48   : > { %8378 = vmatprep.subr.mxu0 %v2230_v19  ;;  %v557_v37 = vsub.s32 32, %v556_v31  ;;  %v559_v39 = vshll.u32 %v9137_v38, %v556_v31  ;;  %v562_v41 = vshll.u32 %v9138_v40, %v556_v31  ;;  %v565_v43 = vshll.u32 %v9139_v42, %v556_v31 }
  0x49   : > { %8379 = vmatpush3.msra.mxu0 %v2230_v19  ;;  %v568_v45 = vshll.u32 %v9140_v44, %v556_v31  ;;  %v571_v47 = vshll.u32 %v9141_v46, %v556_v31  ;;  %vm574_vm2 = vcmp.lt.s32.totalorder %v9388_v30, 1  ;;  %vm575_vm3 = vcmp.lt.s32.totalorder %v9388_v30, 2 }
  0x4a   : > { %8380 = vmatprep.subr.mxu0 %v2229_v26  ;;  %v558_v49 = vshrl.u32 %v9137_v38, %v557_v37  ;;  %v560_v50 = vshrl.u32 %v9138_v40, %v557_v37  ;;  %v563_v51 = vshrl.u32 %v9139_v42, %v557_v37  ;;  %v566_v52 = vshrl.u32 %v9140_v44, %v557_v37 }
  0x4b   : > { %8381 = vmatpush3.msra.mxu0 %v2229_v26  ;;  %v569_v53 = vshrl.u32 %v9141_v46, %v557_v37  ;;  %v572_v55 = vshrl.u32 %v9142_v54, %v557_v37  ;;  %vm576_vm4 = vcmp.lt.s32.totalorder %v9388_v30, 3  ;;  %vm577_vm5 = vcmp.lt.s32.totalorder %v9388_v30, 4 }
  0x4c   : > { %8382 = vmatprep.subr.mxu0 %v2228_v29  ;;  %v561_v57 = vor.u32 %v560_v50, %v559_v39  ;;  %v564_v58 = vor.u32 %v563_v51, %v562_v41  ;;  %v567_v59 = vor.u32 %v566_v52, %v565_v43  ;;  %v663_v19 = vshll.u32 %v9137_v38, %v660_v0 }
  0x4d   : > { %8383 = vmatpush3.msra.mxu0 %v2228_v29  ;;  %v570_v61 = vor.u32 %v569_v53, %v568_v45  ;;  %v573_v62 = vor.u32 %v572_v55, %v571_v47  ;;  %v662_v23 = vshrl.u32 %v9137_v38, %v661_v13  ;;  %v664_v30 = vshrl.u32 %v9138_v40, %v661_v13 }
  0x4e   : > { %8384 = vmatprep.subr.mxu0 %v2227_v36  ;;  %v578_v2 = vsel %vm574_vm2, %v558_v49, %v561_v57  ;;  %v579_v3 = vsel %vm577_vm5, %v567_v59, 2102212464  ;;  %v582_v5 = vsel %vm574_vm2, %v561_v57, %v564_v58  ;;  %v586_v7 = vsel %vm574_vm2, %v564_v58, %v567_v59 }
  0x4f   : > { %8385 = vmatpush3.msra.mxu0 %v2227_v36  ;;  %v580_v10 = vsel %vm576_vm4, %v564_v58, %v579_v3  ;;  %v583_v11 = vsel %vm577_vm5, %v570_v61, 920167782  ;;  %v587_v12 = vsel %vm577_vm5, %v573_v62, 1326507024  ;;  %v666_v31 = vshll.u32 %v9138_v40, %v660_v0  ;;  %v9495_v58 = vld [vmem:[%s9349_s14 + $0x18] sm:$0xff] }
  0x50   : > { %8386 = vmatprep.subr.mxu0 %v2226_v48  ;;  %v581_v15 = vsel %vm575_vm3, %v578_v2, %v580_v10  ;;  %v584_v16 = vsel %vm576_vm4, %v567_v59, %v583_v11  ;;  %v588_v18 = vsel %vm576_vm4, %v570_v61, %v587_v12  ;;  %v667_v36 = vshrl.u32 %v9139_v42, %v661_v13 }
  0x51   : > { %8387 = vmatpush3.msra.mxu0 %v2226_v48  ;;  %v585_v20 = vsel %vm575_vm3, %v582_v5, %v584_v16  ;;  %v589_v21 = vsel %vm575_vm3, %v586_v7, %v588_v18  ;;  %v597_v22 = vmul.u32 %v9390_v32, %v581_v15  ;;  %v669_v37 = vshll.u32 %v9139_v42, %v660_v0 }
  0x52   : > { %8388 = vmatprep.subr.mxu0 %v2225_v56  ;;  %v9464_v26 = vmul.u32.u64.low %v9390_v32, %v589_v21  ;;  %v9465_v27 = vmul.u32.u64.high %v9390_v32, %v589_v21, %v9464_v26  ;;  %v9468_v28 = vmul.u32.u64.low %v9390_v32, %v585_v20  ;;  %v9469_v29 = vmul.u32.u64.high %v9390_v32, %v585_v20, %v9468_v28 }
  0x53   : > { %8389 = vmatpush3.msra.mxu0 %v2225_v56  ;;  %v670_v39 = vshrl.u32 %v9140_v44, %v661_v13  ;;  %v672_v41 = vshll.u32 %v9140_v44, %v660_v0  ;;  %v673_v43 = vshrl.u32 %v9141_v46, %v661_v13  ;;  %v675_v32 = vshll.u32 %v9141_v46, %v660_v0 }
  0x54   : > { %8390 = vmatprep.subr.mxu0 %v2224_v1  ;;  %v665_v45 = vor.u32 %v664_v30, %v663_v19  ;;  %v668_v47 = vor.u32 %v667_v36, %v666_v31  ;;  %v676_v48 = vshrl.u32 %v9142_v54, %v661_v13  ;;  %vm599_vm7 = vc.u32 %v9465_v27, %v9468_v28 }
  0x55   : > { %8391 = vmatpush3.msra.mxu0 %v2224_v1  ;;  %v600_v49 = vadd.s32 1, %v9469_v29  ;;  %v671_v50 = vor.u32 %v670_v39, %v669_v37  ;;  %v7932_v51 = vadd.s32 4294967169, %v9394_v34  ;;  %v674_v52 = vor.u32 %v673_v43, %v672_v41 }
  0x56   : > { %8392 = vmatprep.subr.mxu0 %v2223_v14  ;;  %v677_v53 = vor.u32 %v676_v48, %v675_v32  ;;  %vm681_vm10 = vcmp.lt.s32.totalorder %v9425_v63, 4  ;;  %v682_v56 = vsel %vm678_vm6, %v662_v23, %v665_v45  ;;  %v686_v57 = vsel %vm678_vm6, %v665_v45, %v668_v47 }
  0x57   : > { %8393 = vmatpush3.msra.mxu0 %v2223_v14  ;;  %v601_v55 = vsel %vm599_vm7, %v600_v49, %v9469_v29  ;;  %v683_v34 = vsel %vm681_vm10, %v671_v50, 2102212464  ;;  %v687_v60 = vsel %vm681_vm10, %v674_v52, 920167782  ;;  %v690_v61 = vsel %vm678_vm6, %v668_v47, %v671_v50 }
  0x58   : > { %8394 = vmatprep.subr.mxu0 %v2222_v25  ;;  %v602_v59 = vadd.s32 %v601_v55, %v597_v22  ;;  %v684_v62 = vsel %vm680_vm9, %v668_v47, %v683_v34  ;;  %v688_v0 = vsel %vm680_vm9, %v671_v50, %v687_v60  ;;  %v691_v1 = vsel %vm681_vm10, %v677_v53, 1326507024 }
  0x59   : > { %8395 = vmatpush3.msra.mxu0 %v2222_v25  ;;  %v760_v2 = vadd.s32 1, %v7932_v51  ;;  %v689_v5 = vsel %vm679_vm8, %v686_v57, %v688_v0  ;;  %v692_v7 = vsel %vm680_vm9, %v674_v52, %v691_v1  ;;  %v857_v10 = vand.u32 2139095040, %v9495_v58 }
  0x5a   : > { %v603_v3 = vadd.s32 536870912, %v602_v59  ;;  %v685_v11 = vsel %vm679_vm8, %v682_v56, %v684_v62  ;;  %v693_v12 = vsel %vm679_vm8, %v690_v61, %v692_v7  ;;  %v758_v63 = vor.u32 8388608, %v9398_v35 }
  0x5b   : > { %v9513_v13 = vmul.u32.u64.low %v9392_v33, %v689_v5  ;;  %v9514_v14 = vmul.u32.u64.high %v9392_v33, %v689_v5, %v9513_v13  ;;  %v9518_v16 = vmul.u32.u64.low %v9392_v33, %v693_v12  ;;  %v9519_v18 = vmul.u32.u64.high %v9392_v33, %v693_v12, %v9518_v16 }
  0x5c   : > { %v604_v15 = vshrl.u32 %v603_v3, 30  ;;  %vm761_vm11 = vcmp.gt.s32.totalorder %v760_v2, 0  ;;  %v701_v21 = vmul.u32 %v9392_v33, %v685_v11  ;;  %v854_v25 = vand.u32 2147483647, %v9495_v58 }
  0x5d   : > { %v762_v19 = vsel %vm761_vm11, %v760_v2, 0  ;;  %v704_v23 = vadd.s32 1, %v9514_v14  ;;  %v858_v26 = vshrl.u32 %v857_v10, 23  ;;  %vm703_vm12 = vc.u32 %v9519_v18, %v9513_v13 }
  0x5e   : > { %v605_v20 = vshll.u32 %v604_v15, 30  ;;  %v764_v22 = vand.u32 31, %v762_v19  ;;  %v628_v30 = vsub.s32 4, %v604_v15  ;;  %v9535_v39 = vshrl.u32 %v762_v19, 5 }
  0x5f   : > { %v705_v31 = vsel %vm703_vm12, %v704_v23, %v9514_v14  ;;  %v9537_v41 = vshll.u32 %v758_v63, 8  ;;  %v7936_v43 = vadd.s32 4294967169, %v858_v26  ;;  %v9541_v32 = vand.u32 8388607, %v854_v25 }
  0x60   : > { %v606_v29 = vsub.s32 %v602_v59, %v605_v20  ;;  %v765_v36 = vsub.s32 32, %v764_v22  ;;  %v706_v37 = vadd.s32 %v705_v31, %v701_v21  ;;  %v773_v6 = vshll.u32 %v9139_v42, %v764_v22 }
  0x61   : > { %v629_v49 = vsel %vm544_vm14, %v628_v30, %v604_v15  ;;  %v767_v50 = vshll.u32 %v9137_v38, %v764_v22  ;;  %v770_v52 = vshll.u32 %v9138_v40, %v764_v22  ;;  %v776_v56 = vshll.u32 %v9140_v44, %v764_v22 }
  0x62   : > { %v608_v35 = vsub.s32 0, %v606_v29  ;;  %v707_v47 = vadd.s32 536870912, %v706_v37  ;;  %v774_v48 = vshrl.u32 %v9140_v44, %v765_v36  ;;  %v768_v51 = vshrl.u32 %v9138_v40, %v765_v36 }
  0x63   : > { %v771_v55 = vshrl.u32 %v9139_v42, %v765_v36  ;;  %v777_v57 = vshrl.u32 %v9141_v46, %v765_v36  ;;  %v598_v59 = vadd.s32 %v9468_v28, %v9465_v27  ;;  %v779_v60 = vshll.u32 %v9141_v46, %v764_v22 }
  0x64   : > { %v7925_v45 = vmin.u32 %v608_v35, %v606_v29  ;;  %v9555_v34 = vshrl.u32 %v707_v47, 30  ;;  %v864_v61 = vadd.s32 1, %v7936_v43  ;;  %v631_v0 = vsel %vm9530_vm13, 0, %v629_v49 }
  0x65   : > { %v775_v1 = vor.u32 %v774_v48, %v773_v6  ;;  %v780_v2 = vshrl.u32 %v9142_v54, %v765_v36  ;;  %v766_v5 = vshrl.u32 %v9137_v38, %v765_v36  ;;  %v769_v7 = vor.u32 %v768_v51, %v767_v50 }
  0x66   : > { %v610_v53 = vclz %v7925_v45  ;;  %v709_v3 = vshll.u32 %v9555_v34, 30  ;;  %vm785_vm15 = vcmp.lt.s32.totalorder %v9535_v39, 4  ;;  %v772_v27 = vor.u32 %v771_v55, %v770_v52 }
  0x67   : > { %v778_v28 = vor.u32 %v777_v57, %v776_v56  ;;  %v787_v10 = vsel %vm785_vm15, %v775_v1, 2102212464  ;;  %v781_v14 = vor.u32 %v780_v2, %v779_v60  ;;  %vm782_vm1 = vcmp.lt.s32.totalorder %v9535_v39, 1 }
  0x68   : > { %v7926_v62 = vadd.s32 4294967294, %v610_v53  ;;  %v9566_v12 = vsub.s32 %v706_v37, %v709_v3  ;;  %vm784_vm2 = vcmp.lt.s32.totalorder %v9535_v39, 3  ;;  %vm783_vm3 = vcmp.lt.s32.totalorder %v9535_v39, 2 }
  0x69   : > { %v786_v21 = vsel %vm782_vm1, %v766_v5, %v769_v7  ;;  %v788_v22 = vsel %vm784_vm2, %v772_v27, %v787_v10  ;;  %v790_v26 = vsel %vm782_vm1, %v769_v7, %v772_v27  ;;  %v791_v30 = vsel %vm785_vm15, %v778_v28, 920167782 }
  0x6a   : > { %vm7927_vm0 = vcmp.lt.s32.totalorder %v7926_v62, 0  ;;  %v712_v20 = vsub.s32 0, %v9566_v12  ;;  %v794_v36 = vsel %vm782_vm1, %v772_v27, %v775_v1  ;;  %v795_v35 = vsel %vm785_vm15, %v781_v14, 1326507024 }
  0x6b   : > { %v613_v11 = vsel %vm7927_vm0, 0, %v7926_v62  ;;  %vm648_vm4 = vcmp.lt.s32.totalorder %v9360_v8, 0  ;;  %v796_v45 = vsel %vm784_vm2, %v778_v28, %v795_v35  ;;  %v635_v47 = vadd.s32 3, %v631_v0 }
  0x6c   : > { %v614_v15 = vsub.s32 32, %v613_v11  ;;  %v615_v16 = vshll.u32 %v606_v29, %v613_v11  ;;  %v618_v19 = vsub.s32 4294967266, %v613_v11  ;;  %v7929_v31 = vmin.u32 %v712_v20, %v9566_v12 }
  0x6d   : > { %v792_v29 = vsel %vm784_vm2, %v775_v1, %v791_v30  ;;  %v862_v49 = vor.u32 8388608, %v9541_v32  ;;  %v789_v52 = vsel %vm783_vm3, %v786_v21, %v788_v22  ;;  %v797_v53 = vsel %vm783_vm3, %v794_v36, %v796_v45 }
  0x6e   : > { %v616_v23 = vshrl.u32 %v598_v59, %v614_v15  ;;  %v619_v63 = vadd.s32 127, %v618_v19  ;;  %v714_v6 = vclz %v7929_v31  ;;  %v793_v48 = vsel %vm783_vm3, %v790_v26, %v792_v29 }
  0x6f   : > { %v9592_v56 = vmul.u32.u64.low %v9537_v41, %v797_v53  ;;  %v9593_v57 = vmul.u32.u64.high %v9537_v41, %v797_v53, %v9592_v56  ;;  %vm865_vm5 = vcmp.gt.s32.totalorder %v864_v61, 0  ;;  %vm9602_vm6 = vcmp.le.f32.partialorder %v646_v9, 0.7853982 }
  0x70   : > { %v617_v37 = vor.u32 %v616_v23, %v615_v16  ;;  %v620_v43 = vshll.u32 %v619_v63, 23  ;;  %v7930_v55 = vadd.s32 4294967294, %v714_v6  ;;  %v866_v32 = vsel %vm865_vm5, %v864_v61, 0 }
  0x71   : > { %v9596_v60 = vmul.u32.u64.low %v9537_v41, %v793_v48  ;;  %v9597_v62 = vmul.u32.u64.high %v9537_v41, %v793_v48, %v9596_v60  ;;  %v702_v39 = vadd.s32 %v9513_v13, %v9519_v18  ;;  %v732_v1 = vsub.s32 4, %v9555_v34 }
  0x72   : > { %v621_v50 = vor.u32 4788187, %v620_v43  ;;  %v624_v51 = vcvt.s32.f32 %v617_v37  ;;  %vm7931_vm7 = vcmp.lt.s32.totalorder %v7930_v55, 0  ;;  %v868_v2 = vand.u32 31, %v866_v32 }
  0x73   : > { %v9609_v5 = vand.u32 3, %v635_v47  ;;  %v717_v7 = vsel %vm7931_vm7, 0, %v7930_v55  ;;  %v9611_v27 = vshll.u32 %v862_v49, 8  ;;  %v805_v10 = vmul.u32 %v9537_v41, %v789_v52 }
  0x74   : > { %v622_v59 = vand.u32 2147483647, %v621_v50  ;;  %v718_v61 = vsub.s32 32, %v717_v7  ;;  %v719_v28 = vshll.u32 %v9566_v12, %v717_v7  ;;  %v722_v9 = vsub.s32 4294967266, %v717_v7 }
  0x75   : > { %vm807_vm8 = vc.u32 %v9593_v57, %v9596_v60  ;;  %v808_v13 = vadd.s32 1, %v9597_v62  ;;  %v869_v18 = vsub.s32 32, %v868_v2  ;;  %v733_v16 = vsel %vm648_vm4, %v732_v1, %v9555_v34 }
  0x76   : > { %v625_v3 = vmul.f32 %v624_v51, %v622_v59  ;;  %v720_v14 = vshrl.u32 %v702_v39, %v718_v61  ;;  %v723_v15 = vadd.s32 127, %v722_v9  ;;  %v9621_v19 = vshrl.u32 %v866_v32, 5 }
  0x77   : > { %v809_v41 = vsel %vm807_vm8, %v808_v13, %v9597_v62  ;;  %v871_v20 = vshll.u32 %v9137_v38, %v868_v2  ;;  %v874_v21 = vshll.u32 %v9138_v40, %v868_v2  ;;  %v872_v34 = vshrl.u32 %v9138_v40, %v869_v18  ;;  %v9650_v62 = vld [vmem:[%s9349_s14 + $0x20] sm:$0xff] }
  0x78   : > { %v626_v11 = vxor.u32 2147483648, %v625_v3  ;;  %v721_v23 = vor.u32 %v720_v14, %v719_v28  ;;  %v724_v63 = vshll.u32 %v723_v15, 23  ;;  %v810_v26 = vadd.s32 %v809_v41, %v805_v10 }
  0x79   : > { %v875_v30 = vshrl.u32 %v9139_v42, %v869_v18  ;;  %v877_v31 = vshll.u32 %v9139_v42, %v868_v2  ;;  %v735_v33 = vsel %vm9602_vm6, 0, %v733_v16  ;;  %v878_v37 = vshrl.u32 %v9140_v44, %v869_v18 }
  0x7a   : > { %v627_v12 = vsel %vm544_vm14, %v626_v11, %v625_v3  ;;  %v725_v29 = vor.u32 4788187, %v724_v63  ;;  %v728_v36 = vcvt.s32.f32 %v721_v23  ;;  %v811_v35 = vadd.s32 536870912, %v810_v26 }
  0x7b   : > { %v630_v22 = vsel %vm9530_vm13, %v9352_v4, %v627_v12  ;;  %v880_v43 = vshll.u32 %v9140_v44, %v868_v2  ;;  %v881_v45 = vshrl.u32 %v9141_v46, %v869_v18  ;;  %v883_v48 = vshll.u32 %v9141_v46, %v868_v2 }
  0x7c   : > { %8850 = vcosq.f32 %v630_v22  ;;  %v726_v47 = vand.u32 2147483647, %v725_v29  ;;  %v812_v6 = vshrl.u32 %v811_v35, 30  ;;  %v884_v49 = vshrl.u32 %v9142_v54, %v869_v18 }
  0x7d   : > { %8852 = vsinq.f32 %v630_v22  ;;  %vm752_vm9 = vcmp.lt.s32.totalorder %v9375_v17, 0  ;;  %v870_v50 = vshrl.u32 %v9137_v38, %v869_v18  ;;  %v873_v51 = vor.u32 %v872_v34, %v871_v20 }
  0x7e   : > { %v876_v52 = vor.u32 %v875_v30, %v874_v21  ;;  %v882_v53 = vor.u32 %v881_v45, %v880_v43  ;;  %v729_v55 = vmul.f32 %v728_v36, %v726_v47  ;;  %v813_v56 = vshll.u32 %v812_v6, 30 }
  0x7f   : > { %v879_v59 = vor.u32 %v878_v37, %v877_v31  ;;  %vm886_vm10 = vcmp.lt.s32.totalorder %v9621_v19, 1  ;;  %v739_v32 = vadd.s32 3, %v735_v33  ;;  %v885_v39 = vor.u32 %v884_v49, %v883_v48 }
  0x80   : > { %vm889_vm11 = vcmp.lt.s32.totalorder %v9621_v19, 4  ;;  %v958_v1 = vand.u32 2147483647, %v9650_v62  ;;  %vm637_vm12 = vcmp.lt.s32.totalorder %v9609_v5, 2  ;;  %v730_v2 = vxor.u32 2147483648, %v729_v55 }
  0x81   : > { %v9660_v3 = vsub.s32 %v810_v26, %v813_v56  ;;  %vm888_vm13 = vcmp.lt.s32.totalorder %v9621_v19, 3  ;;  %v891_v7 = vsel %vm889_vm11, %v879_v59, 2102212464  ;;  %vm634_vm14 = vweird.f32 %v9352_v4 }
  0x82   : > { %vm9668_vm15 = vcmp.le.f32.partialorder %v750_v24, 0.7853982  ;;  %vm887_vm0 = vcmp.lt.s32.totalorder %v9621_v19, 2  ;;  %v894_v28 = vsel %vm886_vm10, %v873_v51, %v876_v52  ;;  %v895_v9 = vsel %vm889_vm11, %v882_v53, 920167782 }
  0x83   : > { %v961_v10 = vand.u32 2139095040, %v9650_v62  ;;  %v731_v11 = vsel %vm648_vm4, %v730_v2, %v729_v55  ;;  %v816_v13 = vsub.s32 0, %v9660_v3  ;;  %v836_v18 = vsub.s32 4, %v812_v6 }
  0x84   : > { %v890_v24 = vsel %vm886_vm10, %v870_v50, %v873_v51  ;;  %v734_v14 = vsel %vm9602_vm6, %v9360_v8, %v731_v11  ;;  %v892_v15 = vsel %vm888_vm13, %v876_v52, %v891_v7  ;;  %v896_v16 = vsel %vm888_vm13, %v879_v59, %v895_v9  ;;  %v510_v50 = vld [vmem:[%s9714_s26] sm:$0xff] }
  0x85   : > { %v899_v12 = vsel %vm889_vm11, %v885_v39, 1326507024  ;;  %8854 = vcosq.f32 %v734_v14  ;;  %v7933_v41 = vmin.u32 %v816_v13, %v9660_v3  ;;  %v897_v20 = vsel %vm887_vm0, %v894_v28, %v896_v16 }
  0x86   : > { %v898_v0 = vsel %vm886_vm10, %v876_v52, %v879_v59  ;;  %8856 = vsinq.f32 %v734_v14  ;;  %v900_v21 = vsel %vm888_vm13, %v882_v53, %v899_v12  ;;  %vm638_vm1 = vcmp.eq.s32.totalorder %v9609_v5, 0 }
  0x87   : > { %v9701_v22 = vmul.u32.u64.low %v9611_v27, %v897_v20  ;;  %v9702_v23 = vmul.u32.u64.high %v9611_v27, %v897_v20, %v9701_v22  ;;  %vm641_vm2 = vcmp.eq.s32.totalorder %v9609_v5, 2  ;;  %v818_v26 = vclz %v7933_v41 }
  0x88   : > { %v837_v34 = vsel %vm752_vm9, %v836_v18, %v812_v6  ;;  %v893_v29 = vsel %vm887_vm0, %v890_v24, %v892_v15  ;;  %v901_v36 = vsel %vm887_vm0, %v898_v0, %v900_v21  ;;  %v962_v35 = vshrl.u32 %v961_v10, 23  ;;  %v9747_v0 = vld [vmem:[%s9349_s14 + $0x28] sm:$0xff] }
  0x89   : > { %v8851_v63 = vpop.eup %8850  ;;  %v7934_v37 = vadd.s32 4294967294, %v818_v26  ;;  %v9721_v43 = vmul.u32.u64.low %v9611_v27, %v901_v36  ;;  %v9722_v45 = vmul.u32.u64.high %v9611_v27, %v901_v36, %v9721_v43  ;;  %v740_v6 = vand.u32 3, %v739_v32  ;;  %v511_v36 = vld [vmem:[%s9714_s26 + $0x8] sm:$0xff] }
  0x8a   : > { %v8853_v30 = vpop.eup %8852  ;;  %v642_v31 = vxor.u32 2147483648, %v8851_v63  ;;  %v806_v48 = vadd.s32 %v9596_v60, %v9593_v57  ;;  %v7940_v49 = vadd.s32 4294967169, %v962_v35  ;;  %v839_v19 = vsel %vm9668_vm15, 0, %v837_v34 }
  0x8b   : > { %v639_v33 = vxor.u32 2147483648, %v8853_v30  ;;  %vm7935_vm3 = vcmp.lt.s32.totalorder %v7934_v37, 0  ;;  %v912_v52 = vadd.s32 1, %v9702_v23  ;;  %v909_v56 = vmul.u32 %v9611_v27, %v893_v29 }
  0x8c   : > { %v643_v47 = vsel %vm641_vm2, %v642_v31, %v8853_v30  ;;  %v821_v55 = vsel %vm7935_vm3, 0, %v7934_v37  ;;  %v968_v59 = vadd.s32 1, %v7940_v49  ;;  %v843_v7 = vadd.s32 3, %v839_v19 }
  0x8d   : > { %v640_v51 = vsel %vm638_vm1, %v8851_v63, %v639_v33  ;;  %v822_v60 = vsub.s32 32, %v821_v55  ;;  %v823_v32 = vshll.u32 %v9660_v3, %v821_v55  ;;  %v826_v39 = vsub.s32 4294967266, %v821_v55 }
  0x8e   : > { %v644_v53 = vsel %vm637_vm12, %v640_v51, %v643_v47  ;;  %vm911_vm4 = vc.u32 %v9722_v45, %v9701_v22  ;;  %vm969_vm5 = vcmp.gt.s32.totalorder %v968_v59, 0  ;;  %v965_v4 = vand.u32 8388607, %v958_v1 }
  0x8f   : > { %v645_v57 = vsel %vm634_vm14, nan, %v644_v53  ;;  %v824_v28 = vshrl.u32 %v806_v48, %v822_v60  ;;  %v827_v5 = vadd.s32 127, %v826_v39  ;;  %v913_v9 = vsel %vm911_vm4, %v912_v52, %v9702_v23 }
  0x90   : > { %v2206_v2 = vadd.f32 %v645_v57, %v510_v50  ;;  %v970_v10 = vsel %vm969_vm5, %v968_v59, 0  ;;  %v914_v27 = vadd.s32 %v913_v9, %v909_v56  ;;  %vm738_vm6 = vweird.f32 %v9360_v8 }
  0x91   : > { %v972_v11 = vand.u32 31, %v970_v10  ;;  %vm741_vm7 = vcmp.lt.s32.totalorder %v740_v6, 2  ;;  %v825_v3 = vor.u32 %v824_v28, %v823_v32  ;;  %v828_v13 = vshll.u32 %v827_v5, 23 }
  0x92   : > { %8396 = vmatprep.mubr.f32.mxu0 %v2206_v2  ;;  %v8855_v18 = vpop.eup %8854  ;;  %vm742_vm8 = vcmp.eq.s32.totalorder %v740_v6, 0  ;;  %vm745_vm10 = vcmp.eq.s32.totalorder %v740_v6, 2  ;;  %v9744_v24 = vand.u32 3, %v843_v7  ;;  %v915_v14 = vadd.s32 536870912, %v914_v27 }
  0x93   : > { %v8857_v15 = vpop.eup %8856  ;;  %v746_v16 = vxor.u32 2147483648, %v8855_v18  ;;  %v829_v12 = vor.u32 4788187, %v828_v13  ;;  %v832_v41 = vcvt.s32.f32 %v825_v3  ;;  %v973_v20 = vsub.s32 32, %v972_v11 }
  0x94   : > { %v743_v21 = vxor.u32 2147483648, %v8857_v15  ;;  %v9749_v23 = vshrl.u32 %v915_v14, 30  ;;  %v966_v63 = vor.u32 8388608, %v965_v4  ;;  %v1062_v26 = vand.u32 2147483647, %v9747_v0 }
  0x95   : > { %v747_v34 = vsel %vm745_vm10, %v746_v16, %v8857_v15  ;;  %v830_v30 = vand.u32 2147483647, %v829_v12  ;;  %v9752_v31 = vshrl.u32 %v970_v10, 5  ;;  %v975_v29 = vshll.u32 %v9137_v38, %v972_v11 }
  0x96   : > { %v744_v35 = vsel %vm742_vm8, %v8855_v18, %v743_v21  ;;  %v917_v33 = vshll.u32 %v9749_v23, 30  ;;  %v978_v37 = vshll.u32 %v9138_v40, %v972_v11  ;;  %v981_v43 = vshll.u32 %v9139_v42, %v972_v11 }
  0x97   : > { %v748_v47 = vsel %vm741_vm7, %v744_v35, %v747_v34  ;;  %v833_v48 = vmul.f32 %v832_v41, %v830_v30  ;;  %v976_v49 = vshrl.u32 %v9138_v40, %v973_v20  ;;  %v979_v50 = vshrl.u32 %v9139_v42, %v973_v20 }
  0x98   : > { %v749_v51 = vsel %vm738_vm6, nan, %v748_v47  ;;  %v9765_v19 = vsub.s32 %v914_v27, %v917_v33  ;;  %v982_v52 = vshrl.u32 %v9140_v44, %v973_v20  ;;  %v984_v53 = vshll.u32 %v9140_v44, %v972_v11 }
  0x99   : > { %v2207_v55 = vadd.f32 %v749_v51, %v511_v36  ;;  %v834_v56 = vxor.u32 2147483648, %v833_v48  ;;  %v985_v59 = vshrl.u32 %v9141_v46, %v973_v20  ;;  %v1065_v6 = vand.u32 2139095040, %v9747_v0 }
  0x9a   : > { %v920_v57 = vsub.s32 0, %v9765_v19  ;;  %v974_v60 = vshrl.u32 %v9137_v38, %v973_v20  ;;  %v987_v32 = vshll.u32 %v9141_v46, %v972_v11  ;;  %v988_v8 = vshrl.u32 %v9142_v54, %v973_v20 }
  0x9b   : > { %8397 = vmatmul.mubr.f32.vlgmr.msra.gmra.mxu0 %v2207_v55  ;;  %v835_v39 = vsel %vm752_vm9, %v834_v56, %v833_v48  ;;  %v977_v2 = vor.u32 %v976_v49, %v975_v29  ;;  %v980_v7 = vor.u32 %v979_v50, %v978_v37  ;;  %v986_v28 = vor.u32 %v985_v59, %v984_v53 }
  0x9c   : > { %v838_v5 = vsel %vm9668_vm15, %v9375_v17, %v835_v39  ;;  %v7937_v9 = vmin.u32 %v920_v57, %v9765_v19  ;;  %v983_v10 = vor.u32 %v982_v52, %v981_v43  ;;  %vm990_vm11 = vcmp.lt.s32.totalorder %v9752_v31, 1 }
  0x9d   : > { %8858 = vcosq.f32 %v838_v5  ;;  %v989_v27 = vor.u32 %v988_v8, %v987_v32  ;;  %vm992_vm12 = vcmp.lt.s32.totalorder %v9752_v31, 3  ;;  %vm993_vm13 = vcmp.lt.s32.totalorder %v9752_v31, 4 }
  0x9e   : > { %8860 = vsinq.f32 %v838_v5  ;;  %v922_v4 = vclz %v7937_v9  ;;  %vm991_vm9 = vcmp.lt.s32.totalorder %v9752_v31, 2  ;;  %v1006_v11 = vshll.u32 %v966_v63, 8 }
  0x9f   : > { %v910_v61 = vadd.s32 %v9701_v22, %v9722_v45  ;;  %v995_v3 = vsel %vm993_vm13, %v983_v10, 2102212464  ;;  %v998_v13 = vsel %vm990_vm11, %v977_v2, %v980_v7  ;;  %v999_v18 = vsel %vm993_vm13, %v986_v28, 920167782 }
  0xa0   : > { %v7938_v14 = vadd.s32 4294967294, %v922_v4  ;;  %v994_v15 = vsel %vm990_vm11, %v974_v60, %v977_v2  ;;  %v1000_v16 = vsel %vm992_vm12, %v983_v10, %v999_v18  ;;  %v1002_v12 = vsel %vm990_vm11, %v980_v7, %v983_v10 }
  0xa1   : > { %v996_v41 = vsel %vm992_vm12, %v980_v7, %v995_v3  ;;  %v1001_v22 = vsel %vm991_vm9, %v998_v13, %v1000_v16  ;;  %v1003_v45 = vsel %vm993_vm13, %v989_v27, 1326507024  ;;  %v1066_v20 = vshrl.u32 %v1065_v6, 23 }
  0xa2   : > { %vm7939_vm14 = vcmp.lt.s32.totalorder %v7938_v14, 0  ;;  %v1004_v21 = vsel %vm992_vm12, %v986_v28, %v1003_v45  ;;  %v9801_v63 = vmul.u32.u64.low %v1006_v11, %v1001_v22  ;;  %v9802_v34 = vmul.u32.u64.high %v1006_v11, %v1001_v22, %v9801_v63 }
  0xa3   : > { %v925_v30 = vsel %vm7939_vm14, 0, %v7938_v14  ;;  %v940_v29 = vsub.s32 4, %v9749_v23  ;;  %v1005_v36 = vsel %vm991_vm9, %v1002_v12, %v1004_v21  ;;  %v7944_v35 = vadd.s32 4294967169, %v1066_v20  ;;  %v512_v14 = vld [vmem:[%s9714_s26 + $0x10] sm:$0xff] }
  0xa4   : > { %v926_v33 = vsub.s32 32, %v925_v30  ;;  %v927_v37 = vshll.u32 %v9765_v19, %v925_v30  ;;  %v930_v43 = vsub.s32 4294967266, %v925_v30  ;;  %v997_v47 = vsel %vm991_vm9, %v994_v15, %v996_v41 }
  0xa5   : > { %vm842_vm15 = vweird.f32 %v9375_v17  ;;  %vm856_vm0 = vcmp.lt.s32.totalorder %v9495_v58, 0  ;;  %v9813_v48 = vmul.u32.u64.low %v1006_v11, %v1005_v36  ;;  %v9814_v49 = vmul.u32.u64.high %v1006_v11, %v1005_v36, %v9813_v48 }
  0xa6   : > { %v1072_v50 = vadd.s32 1, %v7944_v35  ;;  %vm9818_vm1 = vcmp.le.f32.partialorder %v854_v25, 0.7853982  ;;  %v928_v52 = vshrl.u32 %v910_v61, %v926_v33  ;;  %v931_v19 = vadd.s32 127, %v930_v43 }
  0xa7   : > { %v1016_v53 = vadd.s32 1, %v9802_v34  ;;  %v941_v31 = vsel %vm856_vm0, %v940_v29, %v9749_v23  ;;  %v1013_v55 = vmul.u32 %v1006_v11, %v997_v47  ;;  %v1069_v56 = vand.u32 8388607, %v1062_v26  ;;  %v9855_v47 = vld [vmem:[%s9349_s14 + $0x30] sm:$0xff] }
  0xa8   : > { %vm1073_vm2 = vcmp.gt.s32.totalorder %v1072_v50, 0  ;;  %vm845_vm3 = vcmp.lt.s32.totalorder %v9744_v24, 2  ;;  %v929_v59 = vor.u32 %v928_v52, %v927_v37  ;;  %v932_v25 = vshll.u32 %v931_v19, 23 }
  0xa9   : > { %v1074_v6 = vsel %vm1073_vm2, %v1072_v50, 0  ;;  %vm846_vm4 = vcmp.eq.s32.totalorder %v9744_v24, 0  ;;  %vm849_vm5 = vcmp.eq.s32.totalorder %v9744_v24, 2  ;;  %vm1015_vm6 = vc.u32 %v9814_v49, %v9801_v63 }
  0xaa   : > { %v1076_v57 = vand.u32 31, %v1074_v6  ;;  %v8859_v60 = vpop.eup %8858  ;;  %v933_v23 = vor.u32 4788187, %v932_v25  ;;  %v936_v32 = vcvt.s32.f32 %v929_v59  ;;  %v943_v8 = vsel %vm9818_vm1, 0, %v941_v31 }
  0xab   : > { %v1017_v39 = vsel %vm1015_vm6, %v1016_v53, %v9802_v34  ;;  %v8861_v2 = vpop.eup %8860  ;;  %v850_v7 = vxor.u32 2147483648, %v8859_v60  ;;  %v1070_v5 = vor.u32 8388608, %v1069_v56  ;;  %v1075_v20 = vshrl.u32 %v1074_v6, 5 }
  0xac   : > { %v1018_v28 = vadd.s32 %v1017_v39, %v1013_v55  ;;  %v1077_v9 = vsub.s32 32, %v1076_v57  ;;  %v847_v10 = vxor.u32 2147483648, %v8861_v2  ;;  %v934_v27 = vand.u32 2147483647, %v933_v23 }
  0xad   : > { %v1079_v4 = vshll.u32 %v9137_v38, %v1076_v57  ;;  %v1082_v11 = vshll.u32 %v9138_v40, %v1076_v57  ;;  %v851_v61 = vsel %vm849_vm5, %v850_v7, %v8861_v2  ;;  %v1085_v18 = vshll.u32 %v9139_v42, %v1076_v57 }
  0xae   : > { %v1019_v3 = vadd.s32 536870912, %v1018_v28  ;;  %v1080_v13 = vshrl.u32 %v9138_v40, %v1077_v9  ;;  %v848_v15 = vsel %vm846_vm4, %v8859_v60, %v847_v10  ;;  %v937_v16 = vmul.f32 %v936_v32, %v934_v27 }
  0xaf   : > { %v1083_v12 = vshrl.u32 %v9139_v42, %v1077_v9  ;;  %v1086_v41 = vshrl.u32 %v9140_v44, %v1077_v9  ;;  %v852_v22 = vsel %vm845_vm3, %v848_v15, %v851_v61  ;;  %v1088_v21 = vshll.u32 %v9140_v44, %v1076_v57 }
  0xb0   : > { %v1020_v45 = vshrl.u32 %v1019_v3, 30  ;;  %v853_v34 = vsel %vm842_vm15, nan, %v852_v22  ;;  %v938_v30 = vxor.u32 2147483648, %v937_v16  ;;  %v1078_v29 = vshrl.u32 %v9137_v38, %v1077_v9 }
  0xb1   : > { %v1081_v36 = vor.u32 %v1080_v13, %v1079_v4  ;;  %v2208_v35 = vadd.f32 %v853_v34, %v512_v14  ;;  %v1084_v37 = vor.u32 %v1083_v12, %v1082_v11  ;;  %v1089_v43 = vshrl.u32 %v9141_v46, %v1077_v9 }
  0xb2   : > { %v1021_v33 = vshll.u32 %v1020_v45, 30  ;;  %v939_v24 = vsel %vm856_vm0, %v938_v30, %v937_v16  ;;  %v1087_v48 = vor.u32 %v1086_v41, %v1085_v18  ;;  %v1091_v50 = vshll.u32 %v9141_v46, %v1076_v57 }
  0xb3   : > { %v1092_v17 = vshrl.u32 %v9142_v54, %v1077_v9  ;;  %8399 = vmatprep.mubr.f32.mxu0 %v2208_v35  ;;  %v942_v52 = vsel %vm9818_vm1, %v9495_v58, %v939_v24  ;;  %v1090_v53 = vor.u32 %v1089_v43, %v1088_v21  ;;  %vm1094_vm7 = vcmp.lt.s32.totalorder %v1075_v20, 1 }
  0xb4   : > { %v9864_v19 = vsub.s32 %v1018_v28, %v1021_v33  ;;  %8862 = vcosq.f32 %v942_v52  ;;  %v947_v31 = vadd.s32 3, %v943_v8  ;;  %v1169_v56 = vand.u32 2139095040, %v9855_v47 }
  0xb5   : > { %v1093_v55 = vor.u32 %v1092_v17, %v1091_v50  ;;  %8864 = vsinq.f32 %v942_v52  ;;  %vm1096_vm8 = vcmp.lt.s32.totalorder %v1075_v20, 3  ;;  %v1110_v25 = vshll.u32 %v1070_v5, 8 }
  0xb6   : > { %v1024_v59 = vsub.s32 0, %v9864_v19  ;;  %vm1095_vm10 = vcmp.lt.s32.totalorder %v1075_v20, 2  ;;  %vm1097_vm11 = vcmp.lt.s32.totalorder %v1075_v20, 4  ;;  %v1098_v6 = vsel %vm1094_vm7, %v1078_v29, %v1081_v36 }
  0xb7   : > { %v1102_v51 = vsel %vm1094_vm7, %v1081_v36, %v1084_v37  ;;  %v1099_v60 = vsel %vm1097_vm11, %v1087_v48, 2102212464  ;;  %v1103_v23 = vsel %vm1097_vm11, %v1090_v53, 920167782  ;;  %v1106_v32 = vsel %vm1094_vm7, %v1084_v37, %v1087_v48 }
  0xb8   : > { %v7941_v57 = vmin.u32 %v1024_v59, %v9864_v19  ;;  %v1100_v8 = vsel %vm1096_vm8, %v1084_v37, %v1099_v60  ;;  %v1104_v39 = vsel %vm1096_vm8, %v1087_v48, %v1103_v23  ;;  %v1107_v2 = vsel %vm1097_vm11, %v1093_v55, 1326507024  ;;  %v513_v59 = vld [vmem:[%s9714_s26 + $0x18] sm:$0xff] }
  0xb9   : > { %v1170_v7 = vshrl.u32 %v1169_v56, 23  ;;  %v948_v28 = vand.u32 3, %v947_v31  ;;  %v1044_v9 = vsub.s32 4, %v1020_v45  ;;  %v1101_v10 = vsel %vm1095_vm10, %v1098_v6, %v1100_v8 }
  0xba   : > { %v1026_v5 = vclz %v7941_v57  ;;  %v1105_v27 = vsel %vm1095_vm10, %v1102_v51, %v1104_v39  ;;  %v1108_v4 = vsel %vm1096_vm8, %v1090_v53, %v1107_v2  ;;  %vm9884_vm12 = vcmp.le.f32.partialorder %v958_v1, 0.7853982 }
  0xbb   : > { %v7948_v11 = vadd.s32 4294967169, %v1170_v7  ;;  %v1109_v3 = vsel %vm1095_vm10, %v1106_v32, %v1108_v4  ;;  %v9878_v13 = vmul.u32.u64.low %v1110_v25, %v1105_v27  ;;  %v9879_v18 = vmul.u32.u64.high %v1110_v25, %v1105_v27, %v9878_v13 }
  0xbc   : > { %v7942_v61 = vadd.s32 4294967294, %v1026_v5  ;;  %vm960_vm13 = vcmp.lt.s32.totalorder %v9650_v62, 0  ;;  %v9889_v15 = vmul.u32.u64.low %v1110_v25, %v1109_v3  ;;  %v9890_v16 = vmul.u32.u64.high %v1110_v25, %v1109_v3, %v9889_v15  ;;  %v9915_v5 = vld [vmem:[%s9349_s14 + $0x38] sm:$0xff] }
  0xbd   : > { %v1014_v12 = vadd.s32 %v9801_v63, %v9814_v49  ;;  %v1045_v41 = vsel %vm960_vm13, %v1044_v9, %v1020_v45  ;;  %v1176_v22 = vadd.s32 1, %v7948_v11  ;;  %vm950_vm14 = vcmp.eq.s32.totalorder %v948_v28, 0 }
  0xbe   : > { %vm7943_vm9 = vcmp.lt.s32.totalorder %v7942_v61, 0  ;;  %v1117_v21 = vmul.u32 %v1110_v25, %v1101_v10  ;;  %v1166_v1 = vand.u32 2147483647, %v9855_v47  ;;  %v1120_v36 = vadd.s32 1, %v9879_v18 }
  0xbf   : > { %v1029_v20 = vsel %vm7943_vm9, 0, %v7942_v61  ;;  %vm953_vm15 = vcmp.eq.s32.totalorder %v948_v28, 2  ;;  %v1047_v63 = vsel %vm9884_vm12, 0, %v1045_v41  ;;  %vm1119_vm0 = vc.u32 %v9890_v16, %v9878_v13 }
  0xc0   : > { %v1030_v34 = vsub.s32 32, %v1029_v20  ;;  %v1031_v30 = vshll.u32 %v9864_v19, %v1029_v20  ;;  %v1034_v29 = vsub.s32 4294967266, %v1029_v20  ;;  %vm1177_vm1 = vcmp.gt.s32.totalorder %v1176_v22, 0 }
  0xc1   : > { %v8863_v49 = vpop.eup %8862  ;;  %v1121_v33 = vsel %vm1119_vm0, %v1120_v36, %v9879_v18  ;;  %v1178_v37 = vsel %vm1177_vm1, %v1176_v22, 0  ;;  %v1173_v50 = vand.u32 8388607, %v1166_v1  ;;  %vm949_vm2 = vcmp.lt.s32.totalorder %v948_v28, 2 }
  0xc2   : > { %v1032_v45 = vshrl.u32 %v1014_v12, %v1030_v34  ;;  %v1035_v35 = vadd.s32 127, %v1034_v29  ;;  %v8865_v43 = vpop.eup %8864  ;;  %v954_v24 = vxor.u32 2147483648, %v8863_v49  ;;  %v1122_v48 = vadd.s32 %v1121_v33, %v1117_v21 }
  0xc3   : > { %v1180_v17 = vand.u32 31, %v1178_v37  ;;  %v951_v52 = vxor.u32 2147483648, %v8865_v43  ;;  %vm946_vm3 = vweird.f32 %v9495_v58  ;;  %v9910_v57 = vadd.s32 3, %v1047_v63 }
  0xc4   : > { %v1033_v19 = vor.u32 %v1032_v45, %v1031_v30  ;;  %v1036_v53 = vshll.u32 %v1035_v35, 23  ;;  %v955_v31 = vsel %vm953_vm15, %v954_v24, %v8865_v43  ;;  %v1123_v55 = vadd.s32 536870912, %v1122_v48 }
  0xc5   : > { %v1181_v56 = vsub.s32 32, %v1180_v17  ;;  %v952_v25 = vsel %vm950_vm14, %v8863_v49, %v951_v52  ;;  %v1174_v32 = vor.u32 8388608, %v1173_v50  ;;  %v1179_v8 = vshrl.u32 %v1178_v37, 5 }
  0xc6   : > { %v1037_v6 = vor.u32 4788187, %v1036_v53  ;;  %v1040_v51 = vcvt.s32.f32 %v1033_v19  ;;  %v956_v60 = vsel %vm949_vm2, %v952_v25, %v955_v31  ;;  %v1124_v23 = vshrl.u32 %v1123_v55, 30 }
  0xc7   : > { %v957_v39 = vsel %vm946_vm3, nan, %v956_v60  ;;  %v1183_v58 = vshll.u32 %v9137_v38, %v1180_v17  ;;  %v1186_v7 = vshll.u32 %v9138_v40, %v1180_v17  ;;  %v1184_v28 = vshrl.u32 %v9138_v40, %v1181_v56 }
  0xc8   : > { %v1038_v2 = vand.u32 2147483647, %v1037_v6  ;;  %v2209_v9 = vadd.f32 %v957_v39, %v513_v59  ;;  %v1125_v10 = vshll.u32 %v1124_v23, 30  ;;  %v1187_v27 = vshrl.u32 %v9139_v42, %v1181_v56 }
  0xc9   : > { %vm1064_vm4 = vcmp.lt.s32.totalorder %v9747_v0, 0  ;;  %v1189_v11 = vshll.u32 %v9139_v42, %v1180_v17  ;;  %v1190_v61 = vshrl.u32 %v9140_v44, %v1181_v56  ;;  %v1192_v3 = vshll.u32 %v9140_v44, %v1180_v17 }
  0xca   : > { %v1041_v4 = vmul.f32 %v1040_v51, %v1038_v2  ;;  %8400 = vmatmul.mubr.f32.gmra.mxu0 %v2209_v9  ;;  %v9923_v18 = vsub.s32 %v1122_v48, %v1125_v10  ;;  %v1193_v15 = vshrl.u32 %v9141_v46, %v1181_v56  ;;  %v1195_v12 = vshll.u32 %v9141_v46, %v1180_v17 }
  0xcb   : > { %v1273_v41 = vand.u32 2139095040, %v9915_v5  ;;  %v1182_v20 = vshrl.u32 %v9137_v38, %v1181_v56  ;;  %v1196_v21 = vshrl.u32 %v9142_v54, %v1181_v56  ;;  %v1214_v34 = vshll.u32 %v1174_v32, 8 }
  0xcc   : > { %v1042_v22 = vxor.u32 2147483648, %v1041_v4  ;;  %v1128_v30 = vsub.s32 0, %v9923_v18  ;;  %v1148_v29 = vsub.s32 4, %v1124_v23  ;;  %v1185_v36 = vor.u32 %v1184_v28, %v1183_v58 }
  0xcd   : > { %v1188_v63 = vor.u32 %v1187_v27, %v1186_v7  ;;  %vm9935_vm5 = vcmp.le.f32.partialorder %v1062_v26, 0.7853982  ;;  %v1191_v35 = vor.u32 %v1190_v61, %v1189_v11  ;;  %v1194_v33 = vor.u32 %v1193_v15, %v1192_v3 }
  0xce   : > { %v1043_v49 = vsel %vm960_vm13, %v1042_v22, %v1041_v4  ;;  %vm1198_vm6 = vcmp.lt.s32.totalorder %v1179_v8, 1  ;;  %v7945_v43 = vmin.u32 %v1128_v30, %v9923_v18  ;;  %v1197_v24 = vor.u32 %v1196_v21, %v1195_v12 }
  0xcf   : > { %v1046_v37 = vsel %vm9884_vm12, %v9650_v62, %v1043_v49  ;;  %vm1201_vm7 = vcmp.lt.s32.totalorder %v1179_v8, 4  ;;  %vm1199_vm8 = vcmp.lt.s32.totalorder %v1179_v8, 2  ;;  %vm1200_vm10 = vcmp.lt.s32.totalorder %v1179_v8, 3 }
  0xd0   : > { %8866 = vcosq.f32 %v1046_v37  ;;  %v1203_v48 = vsel %vm1201_vm7, %v1191_v35, 2102212464  ;;  %v1130_v26 = vclz %v7945_v43  ;;  %v1202_v50 = vsel %vm1198_vm6, %v1182_v20, %v1185_v36 }
  0xd1   : > { %8868 = vsinq.f32 %v1046_v37  ;;  %v1206_v17 = vsel %vm1198_vm6, %v1185_v36, %v1188_v63  ;;  %v1118_v52 = vadd.s32 %v9878_v13, %v9890_v16  ;;  %v1204_v14 = vsel %vm1200_vm10, %v1188_v63, %v1203_v48  ;;  %v9979_v37 = vld [vmem:[%s9349_s14 + $0x40] sm:$0xff] }
  0xd2   : > { %v1207_v19 = vsel %vm1201_vm7, %v1194_v33, 920167782  ;;  %v1210_v53 = vsel %vm1198_vm6, %v1188_v63, %v1191_v35  ;;  %v7946_v31 = vadd.s32 4294967294, %v1130_v26  ;;  %v1149_v55 = vsel %vm1064_vm4, %v1148_v29, %v1124_v23 }
  0xd3   : > { %v1208_v56 = vsel %vm1200_vm10, %v1191_v35, %v1207_v19  ;;  %v1211_v59 = vsel %vm1201_vm7, %v1197_v24, 1326507024  ;;  %v1205_v25 = vsel %vm1199_vm8, %v1202_v50, %v1204_v14  ;;  %v1274_v16 = vshrl.u32 %v1273_v41, 23  ;;  %v514_v19 = vld [vmem:[%s9714_s26 + $0x20] sm:$0xff] }
  0xd4   : > { %v1209_v6 = vsel %vm1199_vm8, %v1206_v17, %v1208_v56  ;;  %v1212_v13 = vsel %vm1200_vm10, %v1194_v33, %v1211_v59  ;;  %vm7947_vm11 = vcmp.lt.s32.totalorder %v7946_v31, 0  ;;  %v1151_v28 = vsel %vm9935_vm5, 0, %v1149_v55 }
  0xd5   : > { %v1213_v51 = vsel %vm1199_vm8, %v1210_v53, %v1212_v13  ;;  %v9959_v60 = vmul.u32.u64.low %v1214_v34, %v1209_v6  ;;  %v9960_v32 = vmul.u32.u64.high %v1214_v34, %v1209_v6, %v9959_v60  ;;  %v1133_v39 = vsel %vm7947_vm11, 0, %v7946_v31 }
  0xd6   : > { %v9963_v23 = vmul.u32.u64.low %v1214_v34, %v1213_v51  ;;  %v9964_v2 = vmul.u32.u64.high %v1214_v34, %v1213_v51, %v9963_v23  ;;  %v7952_v58 = vadd.s32 4294967169, %v1274_v16  ;;  %v1134_v7 = vsub.s32 32, %v1133_v39 }
  0xd7   : > { %v1135_v9 = vshll.u32 %v9923_v18, %v1133_v39  ;;  %v1138_v10 = vsub.s32 4294967266, %v1133_v39  ;;  %v1221_v27 = vmul.u32 %v1214_v34, %v1205_v25  ;;  %v1270_v8 = vand.u32 2147483647, %v9915_v5 }
  0xd8   : > { %v1280_v4 = vadd.s32 1, %v7952_v58  ;;  %v1052_v11 = vand.u32 3, %v9910_v57  ;;  %v1136_v61 = vshrl.u32 %v1118_v52, %v1134_v7  ;;  %v1224_v15 = vadd.s32 1, %v9960_v32 }
  0xd9   : > { %v1139_v3 = vadd.s32 127, %v1138_v10  ;;  %v1155_v12 = vadd.s32 3, %v1151_v28  ;;  %vm1223_vm12 = vc.u32 %v9964_v2, %v9959_v60  ;;  %vm1050_vm9 = vweird.f32 %v9650_v62 }
  0xda   : > { %vm1281_vm13 = vcmp.gt.s32.totalorder %v1280_v4, 0  ;;  %v1137_v18 = vor.u32 %v1136_v61, %v1135_v9  ;;  %v1225_v22 = vsel %vm1223_vm12, %v1224_v15, %v9960_v32  ;;  %v1277_v57 = vand.u32 8388607, %v1270_v8 }
  0xdb   : > { %v1140_v41 = vshll.u32 %v1139_v3, 23  ;;  %v1282_v20 = vsel %vm1281_vm13, %v1280_v4, 0  ;;  %v1226_v21 = vadd.s32 %v1225_v22, %v1221_v27  ;;  %vm1053_vm14 = vcmp.lt.s32.totalorder %v1052_v11, 2 }
  0xdc   : > { %v1284_v34 = vand.u32 31, %v1282_v20  ;;  %vm1057_vm15 = vcmp.eq.s32.totalorder %v1052_v11, 2  ;;  %v1144_v36 = vcvt.s32.f32 %v1137_v18  ;;  %vm1054_vm0 = vcmp.eq.s32.totalorder %v1052_v11, 0 }
  0xdd   : > { %v8867_v30 = vpop.eup %8866  ;;  %v1141_v29 = vor.u32 4788187, %v1140_v41  ;;  %v1227_v35 = vadd.s32 536870912, %v1226_v21  ;;  %v9981_v48 = vand.u32 3, %v1155_v12  ;;  %v1374_v26 = vand.u32 2147483647, %v9979_v37 }
  0xde   : > { %v8869_v63 = vpop.eup %8868  ;;  %v1058_v49 = vxor.u32 2147483648, %v8867_v30  ;;  %v1285_v33 = vsub.s32 32, %v1284_v34  ;;  %v1278_v52 = vor.u32 8388608, %v1277_v57  ;;  %v1283_v14 = vshrl.u32 %v1282_v20, 5 }
  0xdf   : > { %v1055_v43 = vxor.u32 2147483648, %v8869_v63  ;;  %v1142_v24 = vand.u32 2147483647, %v1141_v29  ;;  %v9984_v17 = vshrl.u32 %v1227_v35, 30  ;;  %v1287_v55 = vshll.u32 %v9137_v38, %v1284_v34 }
  0xe0   : > { %v1059_v50 = vsel %vm1057_vm15, %v1058_v49, %v8869_v63  ;;  %v1288_v56 = vshrl.u32 %v9138_v40, %v1285_v33  ;;  %v1290_v6 = vshll.u32 %v9138_v40, %v1284_v34  ;;  %v1291_v13 = vshrl.u32 %v9139_v42, %v1285_v33 }
  0xe1   : > { %v1056_v53 = vsel %vm1054_vm0, %v8867_v30, %v1055_v43  ;;  %v1145_v31 = vmul.f32 %v1144_v36, %v1142_v24  ;;  %v1229_v25 = vshll.u32 %v9984_v17, 30  ;;  %v1293_v32 = vshll.u32 %v9139_v42, %v1284_v34 }
  0xe2   : > { %v1060_v59 = vsel %vm1053_vm14, %v1056_v53, %v1059_v50  ;;  %v1294_v39 = vshrl.u32 %v9140_v44, %v1285_v33  ;;  %v1286_v7 = vshrl.u32 %v9137_v38, %v1285_v33  ;;  %v1296_v9 = vshll.u32 %v9140_v44, %v1284_v34 }
  0xe3   : > { %v1061_v16 = vsel %vm1050_vm9, nan, %v1060_v59  ;;  %v1146_v51 = vxor.u32 2147483648, %v1145_v31  ;;  %v9997_v58 = vsub.s32 %v1226_v21, %v1229_v25  ;;  %v1289_v28 = vor.u32 %v1288_v56, %v1287_v55 }
  0xe4   : > { %v2210_v23 = vadd.f32 %v1061_v16, %v514_v19  ;;  %v1297_v27 = vshrl.u32 %v9141_v46, %v1285_v33  ;;  %v1299_v62 = vshll.u32 %v9141_v46, %v1284_v34  ;;  %v1292_v61 = vor.u32 %v1291_v13, %v1290_v6 }
  0xe5   : > { %v1147_v10 = vsel %vm1064_vm4, %v1146_v51, %v1145_v31  ;;  %v1232_v11 = vsub.s32 0, %v9997_v58  ;;  %v1300_v3 = vshrl.u32 %v9142_v54, %v1285_v33  ;;  %v1295_v15 = vor.u32 %v1294_v39, %v1293_v32 }
  0xe6   : > { %8402 = vmatprep.mubr.f32.mxu0 %v2210_v23  ;;  %v1150_v4 = vsel %vm9935_vm5, %v9747_v0, %v1147_v10  ;;  %v1298_v12 = vor.u32 %v1297_v27, %v1296_v9  ;;  %vm1302_vm1 = vcmp.lt.s32.totalorder %v1283_v14, 1  ;;  %v1222_v18 = vadd.s32 %v9959_v60, %v9964_v2 }
  0xe7   : > { %8870 = vcosq.f32 %v1150_v4  ;;  %v7949_v41 = vmin.u32 %v1232_v11, %v9997_v58  ;;  %v1301_v22 = vor.u32 %v1300_v3, %v1299_v62  ;;  %vm1304_vm2 = vcmp.lt.s32.totalorder %v1283_v14, 3 }
  0xe8   : > { %8872 = vsinq.f32 %v1150_v4  ;;  %vm1305_vm3 = vcmp.lt.s32.totalorder %v1283_v14, 4  ;;  %v1318_v45 = vshll.u32 %v1278_v52, 8  ;;  %v1377_v20 = vand.u32 2139095040, %v9979_v37 }
  0xe9   : > { %v1234_v21 = vclz %v7949_v41  ;;  %vm1303_vm4 = vcmp.lt.s32.totalorder %v1283_v14, 2  ;;  %v1306_v57 = vsel %vm1302_vm1, %v1286_v7, %v1289_v28  ;;  %v1310_v34 = vsel %vm1302_vm1, %v1289_v28, %v1292_v61 }
  0xea   : > { %v1307_v30 = vsel %vm1305_vm3, %v1295_v15, 2102212464  ;;  %v1311_v29 = vsel %vm1305_vm3, %v1298_v12, 920167782  ;;  %v1314_v36 = vsel %vm1302_vm1, %v1292_v61, %v1295_v15  ;;  %v1315_v63 = vsel %vm1305_vm3, %v1301_v22, 1326507024 }
  0xeb   : > { %v7950_v49 = vadd.s32 4294967294, %v1234_v21  ;;  %v1308_v35 = vsel %vm1304_vm2, %v1292_v61, %v1307_v30  ;;  %v1312_v33 = vsel %vm1304_vm2, %v1295_v15, %v1311_v29  ;;  %v1316_v60 = vsel %vm1304_vm2, %v1298_v12, %v1315_v63 }
  0xec   : > { %v1252_v2 = vsub.s32 4, %v9984_v17  ;;  %v1313_v43 = vsel %vm1303_vm4, %v1310_v34, %v1312_v33  ;;  %v1317_v24 = vsel %vm1303_vm4, %v1314_v36, %v1316_v60  ;;  %v1378_v50 = vshrl.u32 %v1377_v20, 23  ;;  %v515_v20 = vld [vmem:[%s9714_s26 + $0x28] sm:$0xff] }
  0xed   : > { %vm7951_vm5 = vcmp.lt.s32.totalorder %v7950_v49, 0  ;;  %v1309_v52 = vsel %vm1303_vm4, %v1306_v57, %v1308_v35  ;;  %v10018_v19 = vmul.u32.u64.low %v1318_v45, %v1317_v24  ;;  %v10019_v53 = vmul.u32.u64.high %v1318_v45, %v1317_v24, %v10018_v19 }
  0xee   : > { %vm1154_vm6 = vweird.f32 %v9747_v0  ;;  %v1237_v31 = vsel %vm7951_vm5, 0, %v7950_v49  ;;  %v10022_v55 = vmul.u32.u64.low %v1318_v45, %v1313_v43  ;;  %v10023_v56 = vmul.u32.u64.high %v1318_v45, %v1313_v43, %v10022_v55 }
  0xef   : > { %v7956_v59 = vadd.s32 4294967169, %v1378_v50  ;;  %vm1168_vm7 = vcmp.lt.s32.totalorder %v9855_v47, 0  ;;  %v1238_v25 = vsub.s32 32, %v1237_v31  ;;  %v1239_v6 = vshll.u32 %v9997_v58, %v1237_v31 }
  0xf0   : > { %v1242_v13 = vsub.s32 4294967266, %v1237_v31  ;;  %vm1157_vm8 = vcmp.lt.s32.totalorder %v9981_v48, 2  ;;  %vm10031_vm10 = vcmp.le.f32.partialorder %v1166_v1, 0.7853982  ;;  %v1253_v16 = vsel %vm1168_vm7, %v1252_v2, %v9984_v17 }
  0xf1   : > { %v1384_v51 = vadd.s32 1, %v7956_v59  ;;  %v1240_v32 = vshrl.u32 %v1222_v18, %v1238_v25  ;;  %v1325_v23 = vmul.u32 %v1318_v45, %v1309_v52  ;;  %vm1327_vm11 = vc.u32 %v10019_v53, %v10022_v55 }
  0xf2   : > { %v1243_v39 = vadd.s32 127, %v1242_v13  ;;  %vm1158_vm12 = vcmp.eq.s32.totalorder %v9981_v48, 0  ;;  %v1328_v58 = vadd.s32 1, %v10023_v56  ;;  %v1381_v1 = vand.u32 8388607, %v1374_v26  ;;  %v10069_v13 = vld [vmem:[%s9349_s14 + $0x48] sm:$0xff] }
  0xf3   : > { %vm1385_vm13 = vcmp.gt.s32.totalorder %v1384_v51, 0  ;;  %vm1161_vm9 = vcmp.eq.s32.totalorder %v9981_v48, 2  ;;  %v1241_v9 = vor.u32 %v1240_v32, %v1239_v6  ;;  %v1255_v62 = vsel %vm10031_vm10, 0, %v1253_v16 }
  0xf4   : > { %v8871_v7 = vpop.eup %8870  ;;  %v1244_v17 = vshll.u32 %v1243_v39, 23  ;;  %v1386_v10 = vsel %vm1385_vm13, %v1384_v51, 0  ;;  %v1329_v4 = vsel %vm1327_vm11, %v1328_v58, %v10023_v56  ;;  %v1382_v41 = vor.u32 8388608, %v1381_v1 }
  0xf5   : > { %v8873_v28 = vpop.eup %8872  ;;  %v1162_v27 = vxor.u32 2147483648, %v8871_v7  ;;  %v1388_v11 = vand.u32 31, %v1386_v10  ;;  %v1248_v15 = vcvt.s32.f32 %v1241_v9  ;;  %v1330_v12 = vadd.s32 %v1329_v4, %v1325_v23 }
  0xf6   : > { %v1159_v61 = vxor.u32 2147483648, %v8873_v28  ;;  %v1245_v3 = vor.u32 4788187, %v1244_v17  ;;  %v1259_v24 = vadd.s32 3, %v1255_v62  ;;  %v1387_v50 = vshrl.u32 %v1386_v10, 5 }
  0xf7   : > { %v1163_v18 = vsel %vm1161_vm9, %v1162_v27, %v8873_v28  ;;  %v1389_v22 = vsub.s32 32, %v1388_v11  ;;  %v1391_v45 = vshll.u32 %v9137_v38, %v1388_v11  ;;  %v1331_v34 = vadd.s32 536870912, %v1330_v12 }
  0xf8   : > { %v1160_v21 = vsel %vm1158_vm12, %v8871_v7, %v1159_v61  ;;  %v1246_v57 = vand.u32 2147483647, %v1245_v3  ;;  %v1394_v30 = vshll.u32 %v9138_v40, %v1388_v11  ;;  %v1397_v49 = vshll.u32 %v9139_v42, %v1388_v11 }
  0xf9   : > { %v1164_v29 = vsel %vm1157_vm8, %v1160_v21, %v1163_v18  ;;  %v1392_v36 = vshrl.u32 %v9138_v40, %v1389_v22  ;;  %v1395_v63 = vshrl.u32 %v9139_v42, %v1389_v22  ;;  %v1332_v60 = vshrl.u32 %v1331_v34, 30 }
  0xfa   : > { %v1165_v35 = vsel %vm1154_vm6, nan, %v1164_v29  ;;  %v1249_v33 = vmul.f32 %v1248_v15, %v1246_v57  ;;  %v1398_v2 = vshrl.u32 %v9140_v44, %v1389_v22  ;;  %v1400_v48 = vshll.u32 %v9140_v44, %v1388_v11 }
  0xfb   : > { %v2211_v43 = vadd.f32 %v1165_v35, %v515_v20  ;;  %v1333_v19 = vshll.u32 %v1332_v60, 30  ;;  %v1390_v31 = vshrl.u32 %v9137_v38, %v1389_v22  ;;  %v10063_v56 = vshll.u32 %v1382_v41, 8 }
  0xfc   : > { %v1250_v52 = vxor.u32 2147483648, %v1249_v33  ;;  %v1393_v59 = vor.u32 %v1392_v36, %v1391_v45  ;;  %v1401_v0 = vshrl.u32 %v9141_v46, %v1389_v22  ;;  %v1403_v25 = vshll.u32 %v9141_v46, %v1388_v11 }
  0xfd   : > { %8403 = vmatmul.mubr.f32.gmra.mxu0 %v2211_v43  ;;  %v1404_v6 = vshrl.u32 %v9142_v54, %v1389_v22  ;;  %v10073_v51 = vsub.s32 %v1330_v12, %v1333_v19  ;;  %v1396_v32 = vor.u32 %v1395_v63, %v1394_v30  ;;  %v1399_v39 = vor.u32 %v1398_v2, %v1397_v49 }
  0xfe   : > { %v1251_v16 = vsel %vm1168_vm7, %v1250_v52, %v1249_v33  ;;  %v1402_v58 = vor.u32 %v1401_v0, %v1400_v48  ;;  %vm1406_vm14 = vcmp.lt.s32.totalorder %v1387_v50, 1  ;;  %vm1408_vm15 = vcmp.lt.s32.totalorder %v1387_v50, 3 }
  0xff   : > { %v1254_v23 = vsel %vm10031_vm10, %v9855_v47, %v1251_v16  ;;  %v1405_v1 = vor.u32 %v1404_v6, %v1403_v25  ;;  %v1336_v7 = vsub.s32 0, %v10073_v51  ;;  %v1481_v9 = vand.u32 2139095040, %v10069_v13 }
 0x100   : > { %8874 = vcosq.f32 %v1254_v23  ;;  %vm1407_vm0 = vcmp.lt.s32.totalorder %v1387_v50, 2  ;;  %vm1409_vm1 = vcmp.lt.s32.totalorder %v1387_v50, 4  ;;  %v1410_v17 = vsel %vm1406_vm14, %v1390_v31, %v1393_v59 }
 0x101   : > { %8876 = vsinq.f32 %v1254_v23  ;;  %v7953_v10 = vmin.u32 %v1336_v7, %v10073_v51  ;;  %v1411_v28 = vsel %vm1409_vm1, %v1399_v39, 2102212464  ;;  %v1414_v27 = vsel %vm1406_vm14, %v1393_v59, %v1396_v32 }
 0x102   : > { %v1415_v62 = vsel %vm1409_vm1, %v1402_v58, 920167782  ;;  %v1412_v14 = vsel %vm1408_vm15, %v1396_v32, %v1411_v28  ;;  %v1418_v11 = vsel %vm1406_vm14, %v1396_v32, %v1399_v39  ;;  %v1419_v61 = vsel %vm1409_vm1, %v1405_v1, 1326507024 }
 0x103   : > { %v1416_v4 = vsel %vm1408_vm15, %v1399_v39, %v1415_v62  ;;  %v1338_v3 = vclz %v7953_v10  ;;  %v1356_v15 = vsub.s32 4, %v1332_v60  ;;  %v1413_v12 = vsel %vm1407_vm0, %v1410_v17, %v1412_v14  ;;  %v516_v17 = vld [vmem:[%s9714_s26 + $0x30] sm:$0xff] }
 0x104   : > { %v1417_v18 = vsel %vm1407_vm0, %v1414_v27, %v1416_v4  ;;  %v1420_v41 = vsel %vm1408_vm15, %v1402_v58, %v1419_v61  ;;  %v1482_v22 = vshrl.u32 %v1481_v9, 23  ;;  %v1260_v34 = vand.u32 3, %v1259_v24 }
 0x105   : > { %v7954_v45 = vadd.s32 4294967294, %v1338_v3  ;;  %v1421_v20 = vsel %vm1407_vm0, %v1418_v11, %v1420_v41  ;;  %v10088_v21 = vmul.u32.u64.low %v10063_v56, %v1417_v18  ;;  %v10089_v57 = vmul.u32.u64.high %v10063_v56, %v1417_v18, %v10088_v21  ;;  %v10133_v41 = vld [vmem:[%s9349_s14 + $0x50] sm:$0xff] }
 0x106   : > { %v10093_v30 = vmul.u32.u64.low %v10063_v56, %v1421_v20  ;;  %v10094_v29 = vmul.u32.u64.high %v10063_v56, %v1421_v20, %v10093_v30  ;;  %v7960_v36 = vadd.s32 4294967169, %v1482_v22  ;;  %vm1258_vm2 = vweird.f32 %v9855_v47 }
 0x107   : > { %vm1272_vm3 = vcmp.lt.s32.totalorder %v9915_v5, 0  ;;  %v1326_v63 = vadd.s32 %v10022_v55, %v10019_v53  ;;  %vm7955_vm4 = vcmp.lt.s32.totalorder %v7954_v45, 0  ;;  %v1429_v33 = vmul.u32 %v10063_v56, %v1413_v12 }
 0x108   : > { %v1341_v49 = vsel %vm7955_vm4, 0, %v7954_v45  ;;  %v1357_v35 = vsel %vm1272_vm3, %v1356_v15, %v1332_v60  ;;  %v1488_v2 = vadd.s32 1, %v7960_v36  ;;  %v1432_v48 = vadd.s32 1, %v10089_v57 }
 0x109   : > { %v1342_v43 = vsub.s32 32, %v1341_v49  ;;  %v1343_v24 = vshll.u32 %v10073_v51, %v1341_v49  ;;  %v1346_v50 = vsub.s32 4294967266, %v1341_v49  ;;  %vm1265_vm5 = vcmp.eq.s32.totalorder %v1260_v34, 2 }
 0x10a   : > { %vm10107_vm6 = vcmp.le.f32.partialorder %v1270_v8, 0.7853982  ;;  %vm1431_vm7 = vc.u32 %v10094_v29, %v10088_v21  ;;  %vm1489_vm8 = vcmp.gt.s32.totalorder %v1488_v2, 0  ;;  %v1478_v8 = vand.u32 2147483647, %v10069_v13 }
 0x10b   : > { %v1344_v53 = vshrl.u32 %v1326_v63, %v1342_v43  ;;  %v1347_v55 = vadd.s32 127, %v1346_v50  ;;  %v1433_v60 = vsel %vm1431_vm7, %v1432_v48, %v10089_v57  ;;  %v1490_v19 = vsel %vm1489_vm8, %v1488_v2, 0 }
 0x10c   : > { %v1359_v56 = vsel %vm10107_vm6, 0, %v1357_v35  ;;  %v1434_v59 = vadd.s32 %v1433_v60, %v1429_v33  ;;  %v1492_v0 = vand.u32 31, %v1490_v19  ;;  %vm1262_vm10 = vcmp.eq.s32.totalorder %v1260_v34, 0 }
 0x10d   : > { %v8875_v31 = vpop.eup %8874  ;;  %v1345_v16 = vor.u32 %v1344_v53, %v1343_v24  ;;  %v1348_v51 = vshll.u32 %v1347_v55, 23  ;;  %vm1261_vm11 = vcmp.lt.s32.totalorder %v1260_v34, 2  ;;  %v10118_v9 = vadd.s32 3, %v1359_v56 }
 0x10e   : > { %v8877_v25 = vpop.eup %8876  ;;  %v1266_v6 = vxor.u32 2147483648, %v8875_v31  ;;  %v1435_v39 = vadd.s32 536870912, %v1434_v59  ;;  %v1493_v23 = vsub.s32 32, %v1492_v0  ;;  %v1485_v27 = vand.u32 8388607, %v1478_v8 }
 0x10f   : > { %v1263_v32 = vxor.u32 2147483648, %v8877_v25  ;;  %v1349_v1 = vor.u32 4788187, %v1348_v51  ;;  %v1352_v7 = vcvt.s32.f32 %v1345_v16  ;;  %v1491_v62 = vshrl.u32 %v1490_v19, 5 }
 0x110   : > { %v1267_v58 = vsel %vm1265_vm5, %v1266_v6, %v8877_v25  ;;  %v10121_v28 = vshrl.u32 %v1435_v39, 30  ;;  %v1495_v11 = vshll.u32 %v9137_v38, %v1492_v0  ;;  %v1498_v61 = vshll.u32 %v9138_v40, %v1492_v0 }
 0x111   : > { %v1264_v10 = vsel %vm1262_vm10, %v8875_v31, %v1263_v32  ;;  %v1350_v4 = vand.u32 2147483647, %v1349_v1  ;;  %v1496_v12 = vshrl.u32 %v9138_v40, %v1493_v23  ;;  %v1499_v18 = vshrl.u32 %v9139_v42, %v1493_v23 }
 0x112   : > { %v1268_v14 = vsel %vm1261_vm11, %v1264_v10, %v1267_v58  ;;  %v1437_v15 = vshll.u32 %v10121_v28, 30  ;;  %v1501_v20 = vshll.u32 %v9139_v42, %v1492_v0  ;;  %v1502_v57 = vshrl.u32 %v9140_v44, %v1493_v23 }
 0x113   : > { %v1269_v3 = vsel %vm1258_vm2, nan, %v1268_v14  ;;  %v1353_v45 = vmul.f32 %v1352_v7, %v1350_v4  ;;  %v1486_v30 = vor.u32 8388608, %v1485_v27  ;;  %v1504_v47 = vshll.u32 %v9140_v44, %v1492_v0 }
 0x114   : > { %v2212_v22 = vadd.f32 %v1269_v3, %v516_v17  ;;  %v10137_v34 = vsub.s32 %v1434_v59, %v1437_v15  ;;  %v1505_v36 = vshrl.u32 %v9141_v46, %v1493_v23  ;;  %v1494_v49 = vshrl.u32 %v9137_v38, %v1493_v23 }
 0x115   : > { %v1354_v63 = vxor.u32 2147483648, %v1353_v45  ;;  %v1507_v35 = vshll.u32 %v9141_v46, %v1492_v0  ;;  %v1585_v33 = vand.u32 2139095040, %v10133_v41  ;;  %v1497_v43 = vor.u32 %v1496_v12, %v1495_v11 }
 0x116   : > { %8405 = vmatprep.mubr.f32.mxu0 %v2212_v22  ;;  %v1440_v2 = vsub.s32 0, %v10137_v34  ;;  %v1500_v24 = vor.u32 %v1499_v18, %v1498_v61  ;;  %v1508_v50 = vshrl.u32 %v9142_v54, %v1493_v23  ;;  %v1503_v53 = vor.u32 %v1502_v57, %v1501_v20 }
 0x117   : > { %v1355_v48 = vsel %vm1272_vm3, %v1354_v63, %v1353_v45  ;;  %v1506_v55 = vor.u32 %v1505_v36, %v1504_v47  ;;  %vm1510_vm12 = vcmp.lt.s32.totalorder %v1491_v62, 1  ;;  %v1526_v56 = vshll.u32 %v1486_v30, 8 }
 0x118   : > { %v1358_v60 = vsel %vm10107_vm6, %v9915_v5, %v1355_v48  ;;  %v7957_v19 = vmin.u32 %v1440_v2, %v10137_v34  ;;  %v1509_v31 = vor.u32 %v1508_v50, %v1507_v35  ;;  %vm1511_vm13 = vcmp.lt.s32.totalorder %v1491_v62, 2 }
 0x119   : > { %8878 = vcosq.f32 %v1358_v60  ;;  %vm1512_vm9 = vcmp.lt.s32.totalorder %v1491_v62, 3  ;;  %vm1513_vm14 = vcmp.lt.s32.totalorder %v1491_v62, 4  ;;  %v1514_v0 = vsel %vm1510_vm12, %v1494_v49, %v1497_v43 }
 0x11a   : > { %8880 = vsinq.f32 %v1358_v60  ;;  %v1442_v59 = vclz %v7957_v19  ;;  %v1518_v25 = vsel %vm1510_vm12, %v1497_v43, %v1500_v24  ;;  %v1430_v6 = vadd.s32 %v10088_v21, %v10094_v29 }
 0x11b   : > { %v1515_v16 = vsel %vm1513_vm14, %v1503_v53, 2102212464  ;;  %v1519_v52 = vsel %vm1513_vm14, %v1506_v55, 920167782  ;;  %v1522_v51 = vsel %vm1510_vm12, %v1500_v24, %v1503_v53  ;;  %v1523_v58 = vsel %vm1513_vm14, %v1509_v31, 1326507024 }
 0x11c   : > { %v7958_v32 = vadd.s32 4294967294, %v1442_v59  ;;  %v1516_v39 = vsel %vm1512_vm9, %v1500_v24, %v1515_v16  ;;  %v1520_v23 = vsel %vm1512_vm9, %v1503_v53, %v1519_v52  ;;  %v1524_v17 = vsel %vm1512_vm9, %v1506_v55, %v1523_v58 }
 0x11d   : > { %v1517_v1 = vsel %vm1511_vm13, %v1514_v0, %v1516_v39  ;;  %v1521_v7 = vsel %vm1511_vm13, %v1518_v25, %v1520_v23  ;;  %v1586_v10 = vshrl.u32 %v1585_v33, 23  ;;  %v1525_v21 = vsel %vm1511_vm13, %v1522_v51, %v1524_v17  ;;  %v10200_v39 = vld [vmem:[%s9349_s14 + $0x58] sm:$0xff] }
 0x11e   : > { %vm7959_vm15 = vcmp.lt.s32.totalorder %v7958_v32, 0  ;;  %v10163_v29 = vmul.u32.u64.low %v1526_v56, %v1521_v7  ;;  %v10164_v27 = vmul.u32.u64.high %v1526_v56, %v1521_v7, %v10163_v29  ;;  %v1460_v4 = vsub.s32 4, %v10121_v28 }
 0x11f   : > { %v1445_v14 = vsel %vm7959_vm15, 0, %v7958_v32  ;;  %v10168_v11 = vmul.u32.u64.low %v1526_v56, %v1525_v21  ;;  %v10169_v61 = vmul.u32.u64.high %v1526_v56, %v1525_v21, %v10168_v11  ;;  %v7964_v18 = vadd.s32 4294967169, %v1586_v10 }
 0x120   : > { %v1446_v3 = vsub.s32 32, %v1445_v14  ;;  %v1447_v15 = vshll.u32 %v10137_v34, %v1445_v14  ;;  %v1450_v12 = vsub.s32 4294967266, %v1445_v14  ;;  %v1364_v22 = vand.u32 3, %v10118_v9 }
 0x121   : > { %vm1376_vm0 = vcmp.lt.s32.totalorder %v9979_v37, 0  ;;  %v1533_v62 = vmul.u32 %v1526_v56, %v1517_v1  ;;  %v1582_v45 = vand.u32 2147483647, %v10133_v41  ;;  %v1536_v30 = vadd.s32 1, %v10164_v27 }
 0x122   : > { %v1448_v20 = vshrl.u32 %v1430_v6, %v1446_v3  ;;  %v1451_v57 = vadd.s32 127, %v1450_v12  ;;  %v1592_v47 = vadd.s32 1, %v7964_v18  ;;  %vm10178_vm1 = vcmp.le.f32.partialorder %v1374_v26, 0.7853982  ;;  %v517_v6 = vld [vmem:[%s9714_s26 + $0x38] sm:$0xff] }
 0x123   : > { %v1461_v9 = vsel %vm1376_vm0, %v1460_v4, %v10121_v28  ;;  %vm1535_vm2 = vc.u32 %v10169_v61, %v10163_v29  ;;  %vm1369_vm4 = vcmp.eq.s32.totalorder %v1364_v22, 2  ;;  %v1589_v26 = vand.u32 8388607, %v1582_v45 }
 0x124   : > { %v1449_v34 = vor.u32 %v1448_v20, %v1447_v15  ;;  %v1452_v63 = vshll.u32 %v1451_v57, 23  ;;  %v1537_v49 = vsel %vm1535_vm2, %v1536_v30, %v10164_v27  ;;  %vm1593_vm3 = vcmp.gt.s32.totalorder %v1592_v47, 0 }
 0x125   : > { %v1538_v35 = vadd.s32 %v1537_v49, %v1533_v62  ;;  %v1594_v33 = vsel %vm1593_vm3, %v1592_v47, 0  ;;  %v1463_v28 = vsel %vm10178_vm1, 0, %v1461_v9  ;;  %vm1362_vm5 = vweird.f32 %v9915_v5 }
 0x126   : > { %v8879_v2 = vpop.eup %8878  ;;  %v1453_v43 = vor.u32 4788187, %v1452_v63  ;;  %v1456_v24 = vcvt.s32.f32 %v1449_v34  ;;  %v1596_v50 = vand.u32 31, %v1594_v33  ;;  %vm1366_vm6 = vcmp.eq.s32.totalorder %v1364_v22, 0 }
 0x127   : > { %v8881_v48 = vpop.eup %8880  ;;  %v1370_v53 = vxor.u32 2147483648, %v8879_v2  ;;  %v1539_v55 = vadd.s32 536870912, %v1538_v35  ;;  %vm1365_vm7 = vcmp.lt.s32.totalorder %v1364_v22, 2  ;;  %v1467_v59 = vadd.s32 3, %v1463_v28 }
 0x128   : > { %v1367_v60 = vxor.u32 2147483648, %v8881_v48  ;;  %v1454_v19 = vand.u32 2147483647, %v1453_v43  ;;  %v1597_v31 = vsub.s32 32, %v1596_v50  ;;  %v1590_v25 = vor.u32 8388608, %v1589_v26 }
 0x129   : > { %v1371_v56 = vsel %vm1369_vm4, %v1370_v53, %v8881_v48  ;;  %v10194_v0 = vshrl.u32 %v1539_v55, 30  ;;  %v1599_v51 = vshll.u32 %v9137_v38, %v1596_v50  ;;  %v1602_v1 = vshll.u32 %v9138_v40, %v1596_v50 }
 0x12a   : > { %v1368_v16 = vsel %vm1366_vm6, %v8879_v2, %v1367_v60  ;;  %v1457_v52 = vmul.f32 %v1456_v24, %v1454_v19  ;;  %v1600_v32 = vshrl.u32 %v9138_v40, %v1597_v31  ;;  %v1603_v7 = vshrl.u32 %v9139_v42, %v1597_v31 }
 0x12b   : > { %v1372_v23 = vsel %vm1365_vm7, %v1368_v16, %v1371_v56  ;;  %v1541_v58 = vshll.u32 %v10194_v0, 30  ;;  %v1605_v21 = vshll.u32 %v9139_v42, %v1596_v50  ;;  %v1606_v27 = vshrl.u32 %v9140_v44, %v1597_v31 }
 0x12c   : > { %v1373_v17 = vsel %vm1362_vm5, nan, %v1372_v23  ;;  %v1458_v10 = vxor.u32 2147483648, %v1457_v52  ;;  %v1595_v11 = vshrl.u32 %v1594_v33, 5  ;;  %v1689_v3 = vand.u32 2139095040, %v10200_v39 }
 0x12d   : > { %v2213_v14 = vadd.f32 %v1373_v17, %v517_v6  ;;  %v10209_v4 = vsub.s32 %v1538_v35, %v1541_v58  ;;  %v1598_v12 = vshrl.u32 %v9137_v38, %v1597_v31  ;;  %v1601_v18 = vor.u32 %v1600_v32, %v1599_v51 }
 0x12e   : > { %v1459_v15 = vsel %vm1376_vm0, %v1458_v10, %v1457_v52  ;;  %v1608_v5 = vshll.u32 %v9140_v44, %v1596_v50  ;;  %v1604_v20 = vor.u32 %v1603_v7, %v1602_v1  ;;  %v1609_v57 = vshrl.u32 %v9141_v46, %v1597_v31 }
 0x12f   : > { %8406 = vmatmul.mubr.f32.gmra.mxu0 %v2213_v14  ;;  %v1462_v22 = vsel %vm10178_vm1, %v9979_v37, %v1459_v15  ;;  %v1544_v62 = vsub.s32 0, %v10209_v4  ;;  %v1607_v30 = vor.u32 %v1606_v27, %v1605_v21  ;;  %v1611_v47 = vshll.u32 %v9141_v46, %v1596_v50 }
 0x130   : > { %8882 = vcosq.f32 %v1462_v22  ;;  %v1612_v9 = vshrl.u32 %v9142_v54, %v1597_v31  ;;  %v1610_v63 = vor.u32 %v1609_v57, %v1608_v5  ;;  %vm1614_vm8 = vcmp.lt.s32.totalorder %v1595_v11, 1 }
 0x131   : > { %8884 = vsinq.f32 %v1462_v22  ;;  %v7961_v34 = vmin.u32 %v1544_v62, %v10209_v4  ;;  %vm1616_vm10 = vcmp.lt.s32.totalorder %v1595_v11, 3  ;;  %vm1617_vm11 = vcmp.lt.s32.totalorder %v1595_v11, 4 }
 0x132   : > { %v1613_v49 = vor.u32 %v1612_v9, %v1611_v47  ;;  %v1690_v36 = vshrl.u32 %v1689_v3, 23  ;;  %v10224_v35 = vand.u32 3, %v1467_v59  ;;  %vm1615_vm12 = vcmp.lt.s32.totalorder %v1595_v11, 2 }
 0x133   : > { %v1546_v26 = vclz %v7961_v34  ;;  %v1630_v33 = vshll.u32 %v1590_v25, 8  ;;  %vm1480_vm13 = vcmp.lt.s32.totalorder %v10069_v13, 0  ;;  %v1618_v2 = vsel %vm1614_vm8, %v1598_v12, %v1601_v18 }
 0x134   : > { %v1619_v43 = vsel %vm1617_vm11, %v1607_v30, 2102212464  ;;  %v1622_v24 = vsel %vm1614_vm8, %v1601_v18, %v1604_v20  ;;  %v1623_v28 = vsel %vm1617_vm11, %v1610_v63, 920167782  ;;  %v1626_v55 = vsel %vm1614_vm8, %v1604_v20, %v1607_v30 }
 0x135   : > { %v7962_v50 = vadd.s32 4294967294, %v1546_v26  ;;  %v1620_v48 = vsel %vm1616_vm10, %v1604_v20, %v1619_v43  ;;  %v1624_v53 = vsel %vm1616_vm10, %v1607_v30, %v1623_v28  ;;  %v1534_v60 = vadd.s32 %v10163_v29, %v10169_v61 }
 0x136   : > { %v1625_v19 = vsel %vm1615_vm12, %v1622_v24, %v1624_v53  ;;  %v1627_v31 = vsel %vm1617_vm11, %v1613_v49, 1326507024  ;;  %v7968_v56 = vadd.s32 4294967169, %v1690_v36  ;;  %vm1466_vm14 = vweird.f32 %v9979_v37  ;;  %v518_v49 = vld [vmem:[%s9714_s26 + $0x40] sm:$0xff] }
 0x137   : > { %vm7963_vm9 = vcmp.lt.s32.totalorder %v7962_v50, 0  ;;  %v1628_v59 = vsel %vm1616_vm10, %v1610_v63, %v1627_v31  ;;  %v10239_v25 = vmul.u32.u64.low %v1630_v33, %v1625_v19  ;;  %v10240_v6 = vmul.u32.u64.high %v1630_v33, %v1625_v19, %v10239_v25 }
 0x138   : > { %v1549_v16 = vsel %vm7963_vm9, 0, %v7962_v50  ;;  %v1564_v52 = vsub.s32 4, %v10194_v0  ;;  %v1621_v51 = vsel %vm1615_vm12, %v1618_v2, %v1620_v48  ;;  %v1629_v29 = vsel %vm1615_vm12, %v1626_v55, %v1628_v59  ;;  %v10281_v48 = vld [vmem:[%s9349_s14 + $0x60] sm:$0xff] }
 0x139   : > { %v1550_v61 = vsub.s32 32, %v1549_v16  ;;  %v1551_v32 = vshll.u32 %v10209_v4, %v1549_v16  ;;  %v1554_v23 = vsub.s32 4294967266, %v1549_v16  ;;  %v1696_v58 = vadd.s32 1, %v7968_v56 }
 0x13a   : > { %vm10250_vm15 = vcmp.le.f32.partialorder %v1478_v8, 0.7853982  ;;  %v10254_v7 = vmul.u32.u64.low %v1630_v33, %v1629_v29  ;;  %v10255_v17 = vmul.u32.u64.high %v1630_v33, %v1629_v29, %v10254_v7  ;;  %v1686_v10 = vand.u32 2147483647, %v10200_v39 }
 0x13b   : > { %v1552_v21 = vshrl.u32 %v1534_v60, %v1550_v61  ;;  %v1555_v27 = vadd.s32 127, %v1554_v23  ;;  %v1640_v14 = vadd.s32 1, %v10240_v6  ;;  %vm1697_vm0 = vcmp.gt.s32.totalorder %v1696_v58, 0 }
 0x13c   : > { %vm1469_vm1 = vcmp.lt.s32.totalorder %v10224_v35, 2  ;;  %vm1473_vm2 = vcmp.eq.s32.totalorder %v10224_v35, 2  ;;  %v1637_v4 = vmul.u32 %v1630_v33, %v1621_v51  ;;  %v1698_v11 = vsel %vm1697_vm0, %v1696_v58, 0 }
 0x13d   : > { %v8883_v8 = vpop.eup %8882  ;;  %v1553_v3 = vor.u32 %v1552_v21, %v1551_v32  ;;  %v1556_v15 = vshll.u32 %v1555_v27, 23  ;;  %v1565_v12 = vsel %vm1480_vm13, %v1564_v52, %v10194_v0  ;;  %v1700_v18 = vand.u32 31, %v1698_v11 }
 0x13e   : > { %v8885_v5 = vpop.eup %8884  ;;  %vm1470_vm3 = vcmp.eq.s32.totalorder %v10224_v35, 0  ;;  %v1474_v22 = vxor.u32 2147483648, %v8883_v8  ;;  %vm1639_vm4 = vc.u32 %v10255_v17, %v10239_v25  ;;  %v1693_v62 = vand.u32 8388607, %v1686_v10 }
 0x13f   : > { %v1471_v20 = vxor.u32 2147483648, %v8885_v5  ;;  %v1557_v57 = vor.u32 4788187, %v1556_v15  ;;  %v1560_v30 = vcvt.s32.f32 %v1553_v3  ;;  %v1641_v47 = vsel %vm1639_vm4, %v1640_v14, %v10240_v6 }
 0x140   : > { %v1475_v0 = vsel %vm1473_vm2, %v1474_v22, %v8885_v5  ;;  %v1567_v9 = vsel %vm10250_vm15, 0, %v1565_v12  ;;  %v1642_v34 = vadd.s32 %v1641_v47, %v1637_v4  ;;  %v1701_v63 = vsub.s32 32, %v1700_v18 }
 0x141   : > { %v1472_v36 = vsel %vm1470_vm3, %v8883_v8, %v1471_v20  ;;  %v1558_v26 = vand.u32 2147483647, %v1557_v57  ;;  %v1699_v33 = vshrl.u32 %v1698_v11, 5  ;;  %v1703_v2 = vshll.u32 %v9137_v38, %v1700_v18 }
 0x142   : > { %v1476_v43 = vsel %vm1469_vm1, %v1472_v36, %v1475_v0  ;;  %v1643_v24 = vadd.s32 536870912, %v1642_v34  ;;  %v1706_v28 = vshll.u32 %v9138_v40, %v1700_v18  ;;  %v1709_v50 = vshll.u32 %v9139_v42, %v1700_v18 }
 0x143   : > { %v1477_v53 = vsel %vm1466_vm14, nan, %v1476_v43  ;;  %v1561_v55 = vmul.f32 %v1560_v30, %v1558_v26  ;;  %v1704_v60 = vshrl.u32 %v9138_v40, %v1701_v63  ;;  %v1707_v19 = vshrl.u32 %v9139_v42, %v1701_v63 }
 0x144   : > { %v2214_v31 = vadd.f32 %v1477_v53, %v518_v49  ;;  %v10287_v56 = vshrl.u32 %v1643_v24, 30  ;;  %v1710_v35 = vshrl.u32 %v9140_v44, %v1701_v63  ;;  %v1712_v59 = vshll.u32 %v9140_v44, %v1700_v18 }
 0x145   : > { %v1562_v6 = vxor.u32 2147483648, %v1561_v55  ;;  %v1694_v16 = vor.u32 8388608, %v1693_v62  ;;  %v1713_v52 = vshrl.u32 %v9141_v46, %v1701_v63  ;;  %v1793_v51 = vand.u32 2139095040, %v10281_v48 }
 0x146   : > { %8408 = vmatprep.mubr.f32.mxu0 %v2214_v31  ;;  %v1645_v37 = vshll.u32 %v10287_v56, 30  ;;  %v1702_v29 = vshrl.u32 %v9137_v38, %v1701_v63  ;;  %v1715_v61 = vshll.u32 %v9141_v46, %v1700_v18  ;;  %v1716_v32 = vshrl.u32 %v9142_v54, %v1701_v63 }
 0x147   : > { %v1563_v23 = vsel %vm1480_vm13, %v1562_v6, %v1561_v55  ;;  %v1705_v58 = vor.u32 %v1704_v60, %v1703_v2  ;;  %v1708_v7 = vor.u32 %v1707_v19, %v1706_v28  ;;  %v1714_v21 = vor.u32 %v1713_v52, %v1712_v59 }
 0x148   : > { %v1566_v27 = vsel %vm10250_vm15, %v10069_v13, %v1563_v23  ;;  %v10302_v14 = vsub.s32 %v1642_v34, %v1645_v37  ;;  %v1711_v4 = vor.u32 %v1710_v35, %v1709_v50  ;;  %vm1718_vm5 = vcmp.lt.s32.totalorder %v1699_v33, 1 }
 0x149   : > { %8886 = vcosq.f32 %v1566_v27  ;;  %v1717_v11 = vor.u32 %v1716_v32, %v1715_v61  ;;  %vm1720_vm6 = vcmp.lt.s32.totalorder %v1699_v33, 3  ;;  %vm1721_vm7 = vcmp.lt.s32.totalorder %v1699_v33, 4 }
 0x14a   : > { %8888 = vsinq.f32 %v1566_v27  ;;  %v1571_v8 = vadd.s32 3, %v1567_v9  ;;  %v1648_v3 = vsub.s32 0, %v10302_v14  ;;  %vm1719_vm8 = vcmp.lt.s32.totalorder %v1699_v33, 2 }
 0x14b   : > { %v1723_v15 = vsel %vm1721_vm7, %v1711_v4, 2102212464  ;;  %v1726_v12 = vsel %vm1718_vm5, %v1705_v58, %v1708_v7  ;;  %v1727_v18 = vsel %vm1721_vm7, %v1714_v21, 920167782  ;;  %v1734_v5 = vshll.u32 %v1694_v16, 8 }
 0x14c   : > { %v7965_v1 = vmin.u32 %v1648_v3, %v10302_v14  ;;  %v1722_v22 = vsel %vm1718_vm5, %v1702_v29, %v1705_v58  ;;  %v1728_v62 = vsel %vm1720_vm6, %v1711_v4, %v1727_v18  ;;  %v1730_v20 = vsel %vm1718_vm5, %v1708_v7, %v1711_v4 }
 0x14d   : > { %v1724_v57 = vsel %vm1720_vm6, %v1708_v7, %v1723_v15  ;;  %v1729_v30 = vsel %vm1719_vm8, %v1726_v12, %v1728_v62  ;;  %v1731_v47 = vsel %vm1721_vm7, %v1717_v11, 1326507024  ;;  %v1794_v0 = vshrl.u32 %v1793_v51, 23  ;;  %v519_v15 = vld [vmem:[%s9714_s26 + $0x48] sm:$0xff] }
 0x14e   : > { %vm1584_vm10 = vcmp.lt.s32.totalorder %v10133_v41, 0  ;;  %v1650_v9 = vclz %v7965_v1  ;;  %v1572_v34 = vand.u32 3, %v1571_v8  ;;  %v1732_v63 = vsel %vm1720_vm6, %v1714_v21, %v1731_v47 }
 0x14f   : > { %v10314_v49 = vmul.u32.u64.low %v1734_v5, %v1729_v30  ;;  %v10315_v36 = vmul.u32.u64.high %v1734_v5, %v1729_v30, %v10314_v49  ;;  %v1725_v2 = vsel %vm1719_vm8, %v1722_v22, %v1724_v57  ;;  %v1733_v43 = vsel %vm1719_vm8, %v1730_v20, %v1732_v63  ;;  %v10353_v22 = vld [vmem:[%s9349_s14 + $0x68] sm:$0xff] }
 0x150   : > { %v7966_v26 = vadd.s32 4294967294, %v1650_v9  ;;  %v7972_v24 = vadd.s32 4294967169, %v1794_v0  ;;  %vm1570_vm11 = vweird.f32 %v10069_v13  ;;  %v1668_v28 = vsub.s32 4, %v10287_v56 }
 0x151   : > { %v10322_v50 = vmul.u32.u64.low %v1734_v5, %v1733_v43  ;;  %v10323_v53 = vmul.u32.u64.high %v1734_v5, %v1733_v43, %v10322_v50  ;;  %v1790_v55 = vand.u32 2147483647, %v10281_v48  ;;  %vm10328_vm12 = vcmp.le.f32.partialorder %v1582_v45, 0.7853982 }
 0x152   : > { %v1638_v33 = vadd.s32 %v10239_v25, %v10255_v17  ;;  %vm7967_vm13 = vcmp.lt.s32.totalorder %v7966_v26, 0  ;;  %v1800_v19 = vadd.s32 1, %v7972_v24  ;;  %vm1573_vm9 = vcmp.lt.s32.totalorder %v1572_v34, 2 }
 0x153   : > { %v1653_v31 = vsel %vm7967_vm13, 0, %v7966_v26  ;;  %v1741_v35 = vmul.u32 %v1734_v5, %v1725_v2  ;;  %v1744_v59 = vadd.s32 1, %v10315_v36  ;;  %v10339_v45 = vsel %vm1584_vm10, %v1668_v28, %v10287_v56 }
 0x154   : > { %v1654_v6 = vsub.s32 32, %v1653_v31  ;;  %v1655_v16 = vshll.u32 %v10302_v14, %v1653_v31  ;;  %v1658_v52 = vsub.s32 4294967266, %v1653_v31  ;;  %vm1801_vm14 = vcmp.gt.s32.totalorder %v1800_v19, 0 }
 0x155   : > { %vm1743_vm15 = vc.u32 %v10323_v53, %v10314_v49  ;;  %v1797_v25 = vand.u32 8388607, %v1790_v55  ;;  %v1802_v17 = vsel %vm1801_vm14, %v1800_v19, 0  ;;  %vm1577_vm0 = vcmp.eq.s32.totalorder %v1572_v34, 2 }
 0x156   : > { %v8887_v51 = vpop.eup %8886  ;;  %v1656_v37 = vshrl.u32 %v1638_v33, %v1654_v6  ;;  %v1659_v29 = vadd.s32 127, %v1658_v52  ;;  %v1745_v61 = vsel %vm1743_vm15, %v1744_v59, %v10315_v36  ;;  %vm1574_vm1 = vcmp.eq.s32.totalorder %v1572_v34, 0 }
 0x157   : > { %v8889_v32 = vpop.eup %8888  ;;  %v1578_v23 = vxor.u32 2147483648, %v8887_v51  ;;  %v1746_v56 = vadd.s32 %v1745_v61, %v1741_v35  ;;  %v1804_v58 = vand.u32 31, %v1802_v17  ;;  %v1671_v14 = vsel %vm10328_vm12, 0, %v10339_v45 }
 0x158   : > { %v1575_v7 = vxor.u32 2147483648, %v8889_v32  ;;  %v1657_v21 = vor.u32 %v1656_v37, %v1655_v16  ;;  %v1660_v27 = vshll.u32 %v1659_v29, 23  ;;  %v1798_v8 = vor.u32 8388608, %v1797_v25 }
 0x159   : > { %v1579_v4 = vsel %vm1577_vm0, %v1578_v23, %v8889_v32  ;;  %v1747_v11 = vadd.s32 536870912, %v1746_v56  ;;  %v1805_v3 = vsub.s32 32, %v1804_v58  ;;  %v10350_v1 = vshrl.u32 %v1802_v17, 5 }
 0x15a   : > { %v1576_v12 = vsel %vm1574_vm1, %v8887_v51, %v1575_v7  ;;  %v1661_v18 = vor.u32 4788187, %v1660_v27  ;;  %v1664_v5 = vcvt.s32.f32 %v1657_v21  ;;  %v1807_v57 = vshll.u32 %v9137_v38, %v1804_v58 }
 0x15b   : > { %v1580_v62 = vsel %vm1573_vm9, %v1576_v12, %v1579_v4  ;;  %v1748_v20 = vshrl.u32 %v1747_v11, 30  ;;  %v1810_v30 = vshll.u32 %v9138_v40, %v1804_v58  ;;  %v1808_v9 = vshrl.u32 %v9138_v40, %v1805_v3 }
 0x15c   : > { %v1581_v47 = vsel %vm1570_vm11, nan, %v1580_v62  ;;  %v1662_v0 = vand.u32 2147483647, %v1661_v18  ;;  %v1811_v63 = vshrl.u32 %v9139_v42, %v1805_v3  ;;  %v10362_v2 = vshll.u32 %v1798_v8, 8 }
 0x15d   : > { %v2215_v36 = vadd.f32 %v1581_v47, %v519_v15  ;;  %v1749_v26 = vshll.u32 %v1748_v20, 30  ;;  %v1897_v34 = vand.u32 2139095040, %v10353_v22  ;;  %v1813_v24 = vshll.u32 %v9139_v42, %v1804_v58 }
 0x15e   : > { %v1665_v43 = vmul.f32 %v1664_v5, %v1662_v0  ;;  %v1814_v28 = vshrl.u32 %v9140_v44, %v1805_v3  ;;  %v1816_v50 = vshll.u32 %v9140_v44, %v1804_v58  ;;  %vm1688_vm2 = vcmp.lt.s32.totalorder %v10200_v39, 0 }
 0x15f   : > { %8409 = vmatmul.mubr.f32.gmra.mxu0 %v2215_v36  ;;  %v10369_v13 = vsub.s32 %v1746_v56, %v1749_v26  ;;  %v1817_v33 = vshrl.u32 %v9141_v46, %v1805_v3  ;;  %v1819_v19 = vshll.u32 %v9141_v46, %v1804_v58  ;;  %vm1822_vm3 = vcmp.lt.s32.totalorder %v10350_v1, 1 }
 0x160   : > { %v1666_v31 = vxor.u32 2147483648, %v1665_v43  ;;  %v1809_v35 = vor.u32 %v1808_v9, %v1807_v57  ;;  %v1812_v59 = vor.u32 %v1811_v63, %v1810_v30  ;;  %v1820_v6 = vshrl.u32 %v9142_v54, %v1805_v3 }
 0x161   : > { %v1752_v16 = vsub.s32 0, %v10369_v13  ;;  %v1772_v52 = vsub.s32 4, %v1748_v20  ;;  %v1806_v45 = vshrl.u32 %v9137_v38, %v1805_v3  ;;  %v1818_v25 = vor.u32 %v1817_v33, %v1816_v50 }
 0x162   : > { %v1667_v17 = vsel %vm1584_vm10, %v1666_v31, %v1665_v43  ;;  %vm10381_vm4 = vcmp.le.f32.partialorder %v1686_v10, 0.7853982  ;;  %v1815_v37 = vor.u32 %v1814_v28, %v1813_v24  ;;  %vm1823_vm5 = vcmp.lt.s32.totalorder %v10350_v1, 2 }
 0x163   : > { %vm1825_vm6 = vcmp.lt.s32.totalorder %v10350_v1, 4  ;;  %v1670_v29 = vsel %vm10328_vm12, %v10133_v41, %v1667_v17  ;;  %v7969_v61 = vmin.u32 %v1752_v16, %v10369_v13  ;;  %v1821_v32 = vor.u32 %v1820_v6, %v1819_v19 }
 0x164   : > { %vm1824_vm7 = vcmp.lt.s32.totalorder %v10350_v1, 3  ;;  %8890 = vcosq.f32 %v1670_v29  ;;  %v1827_v10 = vsel %vm1825_vm6, %v1815_v37, 2102212464  ;;  %v1830_v23 = vsel %vm1822_vm3, %v1809_v35, %v1812_v59 }
 0x165   : > { %v1831_v56 = vsel %vm1825_vm6, %v1818_v25, 920167782  ;;  %8892 = vsinq.f32 %v1670_v29  ;;  %v1675_v58 = vadd.s32 3, %v1671_v14  ;;  %v1754_v7 = vclz %v7969_v61 }
 0x166   : > { %v1898_v60 = vshrl.u32 %v1897_v34, 23  ;;  %v1826_v21 = vsel %vm1822_vm3, %v1806_v45, %v1809_v35  ;;  %v1828_v27 = vsel %vm1824_vm7, %v1812_v59, %v1827_v10  ;;  %v1832_v4 = vsel %vm1824_vm7, %v1815_v37, %v1831_v56 }
 0x167   : > { %v1834_v11 = vsel %vm1822_vm3, %v1812_v59, %v1815_v37  ;;  %v1742_v8 = vadd.s32 %v10314_v49, %v10323_v53  ;;  %v7970_v3 = vadd.s32 4294967294, %v1754_v7  ;;  %v1833_v14 = vsel %vm1823_vm5, %v1830_v23, %v1832_v4  ;;  %v8084_v4 = vld [vmem:[%s15158_s2 + $0xf8] sm:$0xff] }
 0x168   : > { %v1835_v15 = vsel %vm1825_vm6, %v1821_v32, 1326507024  ;;  %v1773_v12 = vsel %vm1688_vm2, %v1772_v52, %v1748_v20  ;;  %v10417_v5 = vmul.u32.u64.low %v10362_v2, %v1833_v14  ;;  %v10418_v62 = vmul.u32.u64.high %v10362_v2, %v1833_v14, %v10417_v5  ;;  %8420 = vmatprep.subr.mxu1 %v8084_v4 }
 0x169   : > { %v1836_v18 = vsel %vm1824_vm7, %v1818_v25, %v1835_v15  ;;  %vm7971_vm8 = vcmp.lt.s32.totalorder %v7970_v3, 0  ;;  %v1829_v49 = vsel %vm1823_vm5, %v1826_v21, %v1828_v27  ;;  %v7976_v57 = vadd.s32 4294967169, %v1898_v60  ;;  %v10444_v25 = vld [vmem:[%s9349_s14 + $0x70] sm:$0xff]  ;;  %8421 = vmatpush3.msra.mxu1 %v8084_v4 }
 0x16a   : > { %v1837_v53 = vsel %vm1823_vm5, %v1834_v11, %v1836_v18  ;;  %v1757_v30 = vsel %vm7971_vm8, 0, %v7970_v3  ;;  %v1894_v0 = vand.u32 2147483647, %v10353_v22  ;;  %v1775_v26 = vsel %vm10381_vm4, 0, %v1773_v12  ;;  %v8083_v11 = vld [vmem:[%s15158_s2 + $0xf0] sm:$0xff] }
 0x16b   : > { %v10426_v47 = vmul.u32.u64.low %v10362_v2, %v1837_v53  ;;  %v10427_v20 = vmul.u32.u64.high %v10362_v2, %v1837_v53, %v10426_v47  ;;  %v1758_v9 = vsub.s32 32, %v1757_v30  ;;  %v1759_v63 = vshll.u32 %v10369_v13, %v1757_v30  ;;  %8422 = vmatprep.subr.mxu1 %v8083_v11 }
 0x16c   : > { %v1762_v36 = vsub.s32 4294967266, %v1757_v30  ;;  %v1676_v34 = vand.u32 3, %v1675_v58  ;;  %v1845_v43 = vmul.u32 %v10362_v2, %v1829_v49  ;;  %v1848_v1 = vadd.s32 1, %v10418_v62  ;;  %8423 = vmatpush3.msra.mxu1 %v8083_v11 }
 0x16d   : > { %v1904_v24 = vadd.s32 1, %v7976_v57  ;;  %v1760_v28 = vshrl.u32 %v1742_v8, %v1758_v9  ;;  %v1779_v33 = vadd.s32 3, %v1775_v26  ;;  %vm1847_vm10 = vc.u32 %v10427_v20, %v10417_v5  ;;  %v520_v8 = vld [vmem:[%s9714_s26 + $0x50] sm:$0xff]  ;;  %v8082_v57 = vld [vmem:[%s15158_s2 + $0xe8] sm:$0xff] }
 0x16e   : > { %v1763_v50 = vadd.s32 127, %v1762_v36  ;;  %v10439_v13 = vand.u32 8388607, %v1894_v0  ;;  %v1849_v35 = vsel %vm1847_vm10, %v1848_v1, %v10418_v62  ;;  %vm1674_vm12 = vweird.f32 %v10133_v41  ;;  %v8081_v1 = vld [vmem:[%s15158_s2 + $0xe0] sm:$0xff]  ;;  %8424 = vmatprep.subr.mxu1 %v8082_v57 }
 0x16f   : > { %vm1905_vm11 = vcmp.gt.s32.totalorder %v1904_v24, 0  ;;  %v1761_v19 = vor.u32 %v1760_v28, %v1759_v63  ;;  %vm1677_vm13 = vcmp.lt.s32.totalorder %v1676_v34, 2  ;;  %v1850_v59 = vadd.s32 %v1849_v35, %v1845_v43  ;;  %8425 = vmatpush3.msra.mxu1 %v8082_v57  ;;  %v8080_v35 = vld [vmem:[%s15158_s2 + $0xd8] sm:$0xff] }
 0x170   : > { %v1764_v31 = vshll.u32 %v1763_v50, 23  ;;  %v1906_v2 = vsel %vm1905_vm11, %v1904_v24, 0  ;;  %vm1678_vm9 = vcmp.eq.s32.totalorder %v1676_v34, 0  ;;  %vm1681_vm14 = vcmp.eq.s32.totalorder %v1676_v34, 2  ;;  %8426 = vmatprep.subr.mxu1 %v8081_v1 }
 0x171   : > { %v1908_v6 = vand.u32 31, %v1906_v2  ;;  %v8891_v16 = vpop.eup %8890  ;;  %v1768_v45 = vcvt.s32.f32 %v1761_v19  ;;  %v10446_v29 = vand.u32 3, %v1779_v33  ;;  %v1851_v61 = vadd.s32 536870912, %v1850_v59  ;;  %8427 = vmatpush3.msra.mxu1 %v8081_v1 }
 0x172   : > { %v1765_v52 = vor.u32 4788187, %v1764_v31  ;;  %v8893_v17 = vpop.eup %8892  ;;  %v1682_v37 = vxor.u32 2147483648, %v8891_v16  ;;  %v1902_v56 = vor.u32 8388608, %v10439_v13  ;;  %v1998_v58 = vand.u32 2147483647, %v10444_v25  ;;  %8428 = vmatprep.subr.mxu1 %v8080_v35 }
 0x173   : > { %v1909_v32 = vsub.s32 32, %v1908_v6  ;;  %v1679_v10 = vxor.u32 2147483648, %v8893_v17  ;;  %v10450_v60 = vshrl.u32 %v1851_v61, 30  ;;  %v10452_v21 = vshrl.u32 %v1906_v2, 5  ;;  %8429 = vmatpush3.msra.mxu1 %v8080_v35  ;;  %v8073_v35 = vld [vmem:[%s15158_s2 + $0xa0] sm:$0xff] }
 0x174   : > { %v1766_v23 = vand.u32 2147483647, %v1765_v52  ;;  %v1683_v7 = vsel %vm1681_vm14, %v1682_v37, %v8893_v17  ;;  %v2001_v27 = vand.u32 2139095040, %v10444_v25  ;;  %v1911_v15 = vshll.u32 %v9137_v38, %v1908_v6 }
 0x175   : > { %v1680_v3 = vsel %vm1678_vm9, %v8891_v16, %v1679_v10  ;;  %v1912_v12 = vshrl.u32 %v9138_v40, %v1909_v32  ;;  %v1853_v62 = vshll.u32 %v10450_v60, 30  ;;  %v1914_v49 = vshll.u32 %v9138_v40, %v1908_v6  ;;  %v8078_v10 = vld [vmem:[%s15158_s2 + $0xc8] sm:$0xff] }
 0x176   : > { %v1769_v14 = vmul.f32 %v1768_v45, %v1766_v23  ;;  %v1684_v18 = vsel %vm1677_vm13, %v1680_v3, %v1683_v7  ;;  %v1915_v53 = vshrl.u32 %v9139_v42, %v1909_v32  ;;  %v1917_v9 = vshll.u32 %v9139_v42, %v1908_v6  ;;  %v8079_v45 = vld [vmem:[%s15158_s2 + $0xd0] sm:$0xff] }
 0x177   : > { %v1685_v30 = vsel %vm1674_vm12, nan, %v1684_v18  ;;  %v1918_v63 = vshrl.u32 %v9140_v44, %v1909_v32  ;;  %v10476_v26 = vsub.s32 %v1850_v59, %v1853_v62  ;;  %v1910_v34 = vshrl.u32 %v9137_v38, %v1909_v32  ;;  %8430 = vmatprep.subr.mxu1 %v8079_v45 }
 0x178   : > { %v1770_v47 = vxor.u32 2147483648, %v1769_v14  ;;  %v2216_v36 = vadd.f32 %v1685_v30, %v520_v8  ;;  %v1920_v43 = vshll.u32 %v9140_v44, %v1908_v6  ;;  %vm1792_vm15 = vcmp.lt.s32.totalorder %v10281_v48, 0  ;;  %8431 = vmatpush3.msra.mxu1 %v8079_v45 }
 0x179   : > { %v1913_v24 = vor.u32 %v1912_v12, %v1911_v15  ;;  %v1921_v28 = vshrl.u32 %v9141_v46, %v1909_v32  ;;  %v1923_v50 = vshll.u32 %v9141_v46, %v1908_v6  ;;  %v1856_v13 = vsub.s32 0, %v10476_v26  ;;  %8432 = vmatprep.subr.mxu1 %v8078_v10 }
 0x17a   : > { %v1771_v41 = vsel %vm1688_vm2, %v1770_v47, %v1769_v14  ;;  %8411 = vmatprep.mubr.f32.mxu0 %v2216_v36  ;;  %v1916_v19 = vor.u32 %v1915_v53, %v1914_v49  ;;  %v1924_v31 = vshrl.u32 %v9142_v54, %v1909_v32  ;;  %v1919_v2 = vor.u32 %v1918_v63, %v1917_v9  ;;  %v8077_v14 = vld [vmem:[%s15158_s2 + $0xc0] sm:$0xff] }
 0x17b   : > { %v1774_v33 = vsel %vm10381_vm4, %v10200_v39, %v1771_v41  ;;  %v1922_v59 = vor.u32 %v1921_v28, %v1920_v43  ;;  %vm1926_vm0 = vcmp.lt.s32.totalorder %v10452_v21, 1  ;;  %vm10499_vm1 = vcmp.le.f32.partialorder %v1790_v55, 0.7853982  ;;  %8433 = vmatpush3.msra.mxu1 %v8078_v10  ;;  %v8075_v43 = vld [vmem:[%s15158_s2 + $0xb0] sm:$0xff] }
 0x17c   : > { %8894 = vcosq.f32 %v1774_v33  ;;  %v7973_v6 = vmin.u32 %v1856_v13, %v10476_v26  ;;  %v1925_v16 = vor.u32 %v1924_v31, %v1923_v50  ;;  %v10504_v52 = vshll.u32 %v1902_v56, 8  ;;  %8434 = vmatprep.subr.mxu1 %v8077_v14 }
 0x17d   : > { %8896 = vsinq.f32 %v1774_v33  ;;  %v1876_v17 = vsub.s32 4, %v10450_v60  ;;  %vm1928_vm2 = vcmp.lt.s32.totalorder %v10452_v21, 3  ;;  %vm1929_vm3 = vcmp.lt.s32.totalorder %v10452_v21, 4  ;;  %8435 = vmatpush3.msra.mxu1 %v8077_v14 }
 0x17e   : > { %v2002_v55 = vshrl.u32 %v2001_v27, 23  ;;  %v1858_v37 = vclz %v7973_v6  ;;  %vm1927_vm4 = vcmp.lt.s32.totalorder %v10452_v21, 2  ;;  %v1930_v61 = vsel %vm1926_vm0, %v1910_v34, %v1913_v24 }
 0x17f   : > { %v1934_v32 = vsel %vm1926_vm0, %v1913_v24, %v1916_v19  ;;  %v1931_v23 = vsel %vm1929_vm3, %v1919_v2, 2102212464  ;;  %v1935_v56 = vsel %vm1929_vm3, %v1922_v59, 920167782  ;;  %v1938_v7 = vsel %vm1926_vm0, %v1916_v19, %v1919_v2 }
 0x180   : > { %v1939_v27 = vsel %vm1929_vm3, %v1925_v16, 1326507024  ;;  %v7974_v4 = vadd.s32 4294967294, %v1858_v37  ;;  %v1932_v11 = vsel %vm1928_vm2, %v1916_v19, %v1931_v23  ;;  %v1936_v8 = vsel %vm1928_vm2, %v1919_v2, %v1935_v56  ;;  %v521_v56 = vld [vmem:[%s9714_s26 + $0x58] sm:$0xff] }
 0x181   : > { %v1940_v3 = vsel %vm1928_vm2, %v1922_v59, %v1939_v27  ;;  %v1846_v15 = vadd.s32 %v10417_v5, %v10427_v20  ;;  %v1937_v12 = vsel %vm1927_vm4, %v1934_v32, %v1936_v8  ;;  %v7980_v62 = vadd.s32 4294967169, %v2002_v55  ;;  %v8076_v5 = vld [vmem:[%s15158_s2 + $0xb8] sm:$0xff] }
 0x182   : > { %v1941_v18 = vsel %vm1927_vm4, %v1938_v7, %v1940_v3  ;;  %vm7975_vm5 = vcmp.lt.s32.totalorder %v7974_v4, 0  ;;  %v1877_v49 = vsel %vm1792_vm15, %v1876_v17, %v10450_v60  ;;  %v1933_v30 = vsel %vm1927_vm4, %v1930_v61, %v1932_v11  ;;  %8436 = vmatprep.subr.mxu1 %v8076_v5  ;;  %v10590_v8 = vld [vmem:[%s9349_s14 + $0x78] sm:$0xff] }
 0x183   : > { %v10541_v53 = vmul.u32.u64.low %v10504_v52, %v1941_v18  ;;  %v10542_v57 = vmul.u32.u64.high %v10504_v52, %v1941_v18, %v10541_v53  ;;  %v1861_v20 = vsel %vm7975_vm5, 0, %v7974_v4  ;;  %v2008_v34 = vadd.s32 1, %v7980_v62  ;;  %8437 = vmatpush3.msra.mxu1 %v8076_v5  ;;  %v8072_v18 = vld [vmem:[%s15158_s2 + $0x98] sm:$0xff]  ;;  %v8071_v62 = vld [vmem:[%s15158_s2 + $0x90] sm:$0xff] }
 0x184   : > { %v10550_v47 = vmul.u32.u64.low %v10504_v52, %v1937_v12  ;;  %v10551_v9 = vmul.u32.u64.high %v10504_v52, %v1937_v12, %v10550_v47  ;;  %v1862_v60 = vsub.s32 32, %v1861_v20  ;;  %v1863_v63 = vshll.u32 %v10476_v26, %v1861_v20  ;;  %v8074_v26 = vld [vmem:[%s15158_s2 + $0xa8] sm:$0xff]  ;;  %8438 = vmatprep.subr.mxu1 %v8075_v43 }
 0x185   : > { %v1866_v36 = vsub.s32 4294967266, %v1861_v20  ;;  %vm1778_vm6 = vweird.f32 %v10200_v39  ;;  %vm1781_vm7 = vcmp.lt.s32.totalorder %v10446_v29, 2  ;;  %v1879_v21 = vsel %vm10499_vm1, 0, %v1877_v49  ;;  %8439 = vmatpush3.msra.mxu1 %v8075_v43 }
 0x186   : > { %v1864_v1 = vshrl.u32 %v1846_v15, %v1862_v60  ;;  %v1949_v24 = vmul.u32 %v10504_v52, %v1933_v30  ;;  %vm1951_vm8 = vc.u32 %v10542_v57, %v10550_v47  ;;  %vm1782_vm10 = vcmp.eq.s32.totalorder %v10446_v29, 0  ;;  %8440 = vmatprep.subr.mxu1 %v8074_v26 }
 0x187   : > { %v1867_v41 = vadd.s32 127, %v1866_v36  ;;  %v1952_v28 = vadd.s32 1, %v10551_v9  ;;  %v2005_v50 = vand.u32 8388607, %v1998_v58  ;;  %vm2009_vm11 = vcmp.gt.s32.totalorder %v2008_v34, 0  ;;  %8441 = vmatpush3.msra.mxu1 %v8074_v26 }
 0x188   : > { %vm1785_vm12 = vcmp.eq.s32.totalorder %v10446_v29, 2  ;;  %v1865_v13 = vor.u32 %v1864_v1, %v1863_v63  ;;  %v2010_v31 = vsel %vm2009_vm11, %v2008_v34, 0  ;;  %v10576_v6 = vadd.s32 3, %v1879_v21  ;;  %8442 = vmatprep.subr.mxu1 %v8073_v35 }
 0x189   : > { %v8895_v33 = vpop.eup %8894  ;;  %v1868_v19 = vshll.u32 %v1867_v41, 23  ;;  %v1953_v16 = vsel %vm1951_vm8, %v1952_v28, %v10551_v9  ;;  %v2012_v52 = vand.u32 31, %v2010_v31  ;;  %v2006_v32 = vor.u32 8388608, %v2005_v50  ;;  %8443 = vmatpush3.msra.mxu1 %v8073_v35 }
 0x18a   : > { %v8897_v2 = vpop.eup %8896  ;;  %v1786_v59 = vxor.u32 2147483648, %v8895_v33  ;;  %v1872_v55 = vcvt.s32.f32 %v1865_v13  ;;  %v1954_v37 = vadd.s32 %v1953_v16, %v1949_v24  ;;  %8444 = vmatprep.subr.mxu1 %v8072_v18  ;;  %v2011_v30 = vshrl.u32 %v2010_v31, 5 }
 0x18b   : > { %v1783_v45 = vxor.u32 2147483648, %v8897_v2  ;;  %v1869_v17 = vor.u32 4788187, %v1868_v19  ;;  %v2013_v10 = vsub.s32 32, %v2012_v52  ;;  %v2015_v23 = vshll.u32 %v9137_v38, %v2012_v52  ;;  %8445 = vmatpush3.msra.mxu1 %v8072_v18 }
 0x18c   : > { %v1787_v61 = vsel %vm1785_vm12, %v1786_v59, %v8897_v2  ;;  %v1955_v4 = vadd.s32 536870912, %v1954_v37  ;;  %v2018_v11 = vshll.u32 %v9138_v40, %v2012_v52  ;;  %v2021_v12 = vshll.u32 %v9139_v42, %v2012_v52  ;;  %8446 = vmatprep.subr.mxu1 %v8071_v62 }
 0x18d   : > { %v1784_v7 = vsel %vm1782_vm10, %v8895_v33, %v1783_v45  ;;  %v1870_v27 = vand.u32 2147483647, %v1869_v17  ;;  %v2016_v14 = vshrl.u32 %v9138_v40, %v2013_v10  ;;  %v2019_v15 = vshrl.u32 %v9139_v42, %v2013_v10  ;;  %8447 = vmatpush3.msra.mxu1 %v8071_v62 }
 0x18e   : > { %v1788_v3 = vsel %vm1781_vm7, %v1784_v7, %v1787_v61  ;;  %v10605_v29 = vshrl.u32 %v1955_v4, 30  ;;  %v2022_v5 = vshrl.u32 %v9140_v44, %v2013_v10  ;;  %v2024_v9 = vshll.u32 %v9140_v44, %v2012_v52 }
 0x18f   : > { %v1789_v49 = vsel %vm1778_vm6, nan, %v1788_v3  ;;  %v1873_v53 = vmul.f32 %v1872_v55, %v1870_v27  ;;  %v2105_v60 = vand.u32 2139095040, %v10590_v8  ;;  %v2014_v34 = vshrl.u32 %v9137_v38, %v2013_v10 }
 0x190   : > { %v2217_v20 = vadd.f32 %v1789_v49, %v521_v56  ;;  %v1957_v36 = vshll.u32 %v10605_v29, 30  ;;  %v2017_v39 = vor.u32 %v2016_v14, %v2015_v23  ;;  %v2025_v43 = vshrl.u32 %v9141_v46, %v2013_v10 }
 0x191   : > { %v1874_v63 = vxor.u32 2147483648, %v1873_v53  ;;  %v2027_v21 = vshll.u32 %v9141_v46, %v2012_v52  ;;  %v2028_v1 = vshrl.u32 %v9142_v54, %v2013_v10  ;;  %v10615_v41 = vshll.u32 %v2006_v32, 8 }
 0x192   : > { %8412 = vmatmul.mubr.f32.gmra.mxu0 %v2217_v20  ;;  %v10619_v26 = vsub.s32 %v1954_v37, %v1957_v36  ;;  %v2020_v28 = vor.u32 %v2019_v15, %v2018_v11  ;;  %v2023_v50 = vor.u32 %v2022_v5, %v2021_v12  ;;  %v2026_v13 = vor.u32 %v2025_v43, %v2024_v9 }
 0x193   : > { %v1875_v24 = vsel %vm1792_vm15, %v1874_v63, %v1873_v53  ;;  %v2029_v19 = vor.u32 %v2028_v1, %v2027_v21  ;;  %vm2030_vm13 = vcmp.lt.s32.totalorder %v2011_v30, 1  ;;  %vm2032_vm9 = vcmp.lt.s32.totalorder %v2011_v30, 3 }
 0x194   : > { %v1878_v33 = vsel %vm10499_vm1, %v10281_v48, %v1875_v24  ;;  %v1960_v31 = vsub.s32 0, %v10619_v26  ;;  %v2106_v35 = vshrl.u32 %v2105_v60, 23  ;;  %vm2031_vm14 = vcmp.lt.s32.totalorder %v2011_v30, 2 }
 0x195   : > { %8898 = vcosq.f32 %v1878_v33  ;;  %vm2033_vm0 = vcmp.lt.s32.totalorder %v2011_v30, 4  ;;  %v2034_v2 = vsel %vm2030_vm13, %v2014_v34, %v2017_v39  ;;  %v2038_v52 = vsel %vm2030_vm13, %v2017_v39, %v2020_v28 }
 0x196   : > { %8900 = vsinq.f32 %v1878_v33  ;;  %v7977_v59 = vmin.u32 %v1960_v31, %v10619_v26  ;;  %v2035_v16 = vsel %vm2033_vm0, %v2023_v50, 2102212464  ;;  %v2039_v45 = vsel %vm2033_vm0, %v2026_v13, 920167782 }
 0x197   : > { %v2036_v51 = vsel %vm2032_vm9, %v2020_v28, %v2035_v16  ;;  %v2040_v17 = vsel %vm2032_vm9, %v2023_v50, %v2039_v45  ;;  %v2042_v55 = vsel %vm2030_vm13, %v2020_v28, %v2023_v50  ;;  %v2043_v37 = vsel %vm2033_vm0, %v2029_v19, 1326507024  ;;  %v522_v16 = vld [vmem:[%s9714_s26 + $0x60] sm:$0xff] }
 0x198   : > { %v1962_v61 = vclz %v7977_v59  ;;  %v1980_v32 = vsub.s32 4, %v10605_v29  ;;  %v2102_v10 = vand.u32 2147483647, %v10590_v8  ;;  %v2037_v23 = vsel %vm2031_vm14, %v2034_v2, %v2036_v51  ;;  %v8070_v59 = vld [vmem:[%s15158_s2 + $0x88] sm:$0xff] }
 0x199   : > { %v2041_v56 = vsel %vm2031_vm14, %v2038_v52, %v2040_v17  ;;  %v2044_v7 = vsel %vm2032_vm9, %v2026_v13, %v2043_v37  ;;  %v7984_v27 = vadd.s32 4294967169, %v2106_v35  ;;  %v1884_v15 = vand.u32 3, %v10576_v6  ;;  %8448 = vmatprep.subr.mxu1 %v8070_v59 }
 0x19a   : > { %v7978_v4 = vadd.s32 4294967294, %v1962_v61  ;;  %v2045_v11 = vsel %vm2031_vm14, %v2042_v55, %v2044_v7  ;;  %v10635_v3 = vmul.u32.u64.low %v10615_v41, %v2041_v56  ;;  %v10636_v14 = vmul.u32.u64.high %v10615_v41, %v2041_v56, %v10635_v3  ;;  %8449 = vmatpush3.msra.mxu1 %v8070_v59 }
 0x19b   : > { %v10641_v12 = vmul.u32.u64.low %v10615_v41, %v2045_v11  ;;  %v10642_v18 = vmul.u32.u64.high %v10615_v41, %v2045_v11, %v10641_v12  ;;  %vm1882_vm15 = vweird.f32 %v10281_v48  ;;  %vm1896_vm1 = vcmp.lt.s32.totalorder %v10353_v22, 0 }
 0x19c   : > { %v1950_v62 = vadd.s32 %v10550_v47, %v10542_v57  ;;  %vm7979_vm2 = vcmp.lt.s32.totalorder %v7978_v4, 0  ;;  %v2112_v49 = vadd.s32 1, %v7984_v27  ;;  %v1981_v5 = vsel %vm1896_vm1, %v1980_v32, %v10605_v29 }
 0x19d   : > { %v1965_v53 = vsel %vm7979_vm2, 0, %v7978_v4  ;;  %v2053_v6 = vmul.u32 %v10615_v41, %v2037_v23  ;;  %v2109_v20 = vand.u32 8388607, %v2102_v10  ;;  %v2056_v63 = vadd.s32 1, %v10636_v14 }
 0x19e   : > { %v1966_v30 = vsub.s32 32, %v1965_v53  ;;  %v1967_v9 = vshll.u32 %v10619_v26, %v1965_v53  ;;  %v1970_v60 = vsub.s32 4294967266, %v1965_v53  ;;  %vm1889_vm3 = vcmp.eq.s32.totalorder %v1884_v15, 2 }
 0x19f   : > { %vm10658_vm4 = vcmp.le.f32.partialorder %v1894_v0, 0.7853982  ;;  %vm2055_vm5 = vc.u32 %v10642_v18, %v10635_v3  ;;  %vm2113_vm6 = vcmp.gt.s32.totalorder %v2112_v49, 0  ;;  %v2110_v1 = vor.u32 8388608, %v2109_v20 }
 0x1a0   : > { %v1968_v47 = vshrl.u32 %v1950_v62, %v1966_v30  ;;  %v1971_v29 = vadd.s32 127, %v1970_v60  ;;  %v2057_v36 = vsel %vm2055_vm5, %v2056_v63, %v10636_v14  ;;  %v2114_v34 = vsel %vm2113_vm6, %v2112_v49, 0  ;;  %v10692_v30 = vld [vmem:[%s9349_s14 + $0x88] sm:$0xff] }
 0x1a1   : > { %v1983_v43 = vsel %vm10658_vm4, 0, %v1981_v5  ;;  %v2058_v21 = vadd.s32 %v2057_v36, %v2053_v6  ;;  %v2116_v0 = vand.u32 31, %v2114_v34  ;;  %vm1886_vm7 = vcmp.eq.s32.totalorder %v1884_v15, 0 }
 0x1a2   : > { %v8899_v39 = vpop.eup %8898  ;;  %v1969_v26 = vor.u32 %v1968_v47, %v1967_v9  ;;  %v1972_v28 = vshll.u32 %v1971_v29, 23  ;;  %vm1885_vm8 = vcmp.lt.s32.totalorder %v1884_v15, 2  ;;  %v10668_v2 = vadd.s32 3, %v1983_v43 }
 0x1a3   : > { %v8901_v41 = vpop.eup %8900  ;;  %v1890_v24 = vxor.u32 2147483648, %v8899_v39  ;;  %v2059_v33 = vadd.s32 536870912, %v2058_v21  ;;  %v2117_v13 = vsub.s32 32, %v2116_v0  ;;  %v2115_v51 = vshrl.u32 %v2114_v34, 5 }
 0x1a4   : > { %v1887_v50 = vxor.u32 2147483648, %v8901_v41  ;;  %v1973_v31 = vor.u32 4788187, %v1972_v28  ;;  %v1976_v35 = vcvt.s32.f32 %v1969_v26  ;;  %v10674_v17 = vshll.u32 %v2110_v1, 8 }
 0x1a5   : > { %v1891_v19 = vsel %vm1889_vm3, %v1890_v24, %v8901_v41  ;;  %v2060_v45 = vshrl.u32 %v2059_v33, 30  ;;  %v2119_v61 = vshll.u32 %v9137_v38, %v2116_v0  ;;  %v2122_v32 = vshll.u32 %v9138_v40, %v2116_v0 }
 0x1a6   : > { %v1888_v52 = vsel %vm1886_vm7, %v8899_v39, %v1887_v50  ;;  %v1974_v37 = vand.u32 2147483647, %v1973_v31  ;;  %vm2000_vm10 = vcmp.lt.s32.totalorder %v10444_v25, 0  ;;  %v2120_v7 = vshrl.u32 %v9138_v40, %v2117_v13 }
 0x1a7   : > { %v1892_v55 = vsel %vm1885_vm8, %v1888_v52, %v1891_v19  ;;  %v2061_v56 = vshll.u32 %v2060_v45, 30  ;;  %v2123_v27 = vshrl.u32 %v9139_v42, %v2117_v13  ;;  %v2125_v14 = vshll.u32 %v9139_v42, %v2116_v0 }
 0x1a8   : > { %v1893_v23 = vsel %vm1882_vm15, nan, %v1892_v55  ;;  %v1977_v11 = vmul.f32 %v1976_v35, %v1974_v37  ;;  %v2126_v15 = vshrl.u32 %v9140_v44, %v2117_v13  ;;  %v2054_v12 = vadd.s32 %v10635_v3, %v10642_v18 }
 0x1a9   : > { %v2218_v4 = vadd.f32 %v1893_v23, %v522_v16  ;;  %v2062_v62 = vsub.s32 %v2058_v21, %v2061_v56  ;;  %v2128_v48 = vshll.u32 %v9140_v44, %v2116_v0  ;;  %v2129_v49 = vshrl.u32 %v9141_v46, %v2117_v13 }
 0x1aa   : > { %v1978_v53 = vxor.u32 2147483648, %v1977_v11  ;;  %v2084_v5 = vsub.s32 4, %v2060_v45  ;;  %v2118_v6 = vshrl.u32 %v9137_v38, %v2117_v13  ;;  %v2131_v20 = vshll.u32 %v9141_v46, %v2116_v0 }
 0x1ab   : > { %8414 = vmatprep.mubr.f32.mxu0 %v2218_v4  ;;  %v2064_v9 = vsub.s32 0, %v2062_v62  ;;  %v2121_v60 = vor.u32 %v2120_v7, %v2119_v61  ;;  %v2124_v63 = vor.u32 %v2123_v27, %v2122_v32  ;;  %v2132_v47 = vshrl.u32 %v9142_v54, %v2117_v13 }
 0x1ac   : > { %v1979_v3 = vsel %vm1896_vm1, %v1978_v53, %v1977_v11  ;;  %v2127_v18 = vor.u32 %v2126_v15, %v2125_v14  ;;  %v2130_v29 = vor.u32 %v2129_v49, %v2128_v48  ;;  %vm2134_vm11 = vcmp.lt.s32.totalorder %v2115_v51, 1 }
 0x1ad   : > { %v1982_v36 = vsel %vm10658_vm4, %v10353_v22, %v1979_v3  ;;  %v7981_v34 = vmin.u32 %v2064_v9, %v2062_v62  ;;  %v2133_v39 = vor.u32 %v2132_v47, %v2131_v20  ;;  %v2514_v43 = vand.u32 2139095040, %v10692_v30 }
 0x1ae   : > { %8902 = vcosq.f32 %v1982_v36  ;;  %vm2135_vm12 = vcmp.lt.s32.totalorder %v2115_v51, 2  ;;  %vm2136_vm13 = vcmp.lt.s32.totalorder %v2115_v51, 3  ;;  %vm2137_vm9 = vcmp.lt.s32.totalorder %v2115_v51, 4 }
 0x1af   : > { %8904 = vsinq.f32 %v1982_v36  ;;  %v2066_v21 = vclz %v7981_v34  ;;  %v2138_v1 = vsel %vm2134_vm11, %v2118_v6, %v2121_v60  ;;  %v2142_v0 = vsel %vm2134_vm11, %v2121_v60, %v2124_v63 }
 0x1b0   : > { %v2085_v41 = vsel %vm2000_vm10, %v2084_v5, %v2060_v45  ;;  %v2139_v24 = vsel %vm2137_vm9, %v2127_v18, 2102212464  ;;  %v2143_v57 = vsel %vm2137_vm9, %v2130_v29, 920167782  ;;  %v2146_v26 = vsel %vm2134_vm11, %v2124_v63, %v2127_v18 }
 0x1b1   : > { %v7982_v28 = vadd.s32 4294967294, %v2066_v21  ;;  %v2140_v50 = vsel %vm2136_vm13, %v2124_v63, %v2139_v24  ;;  %v2144_v33 = vsel %vm2136_vm13, %v2127_v18, %v2143_v57  ;;  %v2147_v13 = vsel %vm2137_vm9, %v2133_v39, 1326507024 }
 0x1b2   : > { %v2141_v19 = vsel %vm2135_vm12, %v2138_v1, %v2140_v50  ;;  %v2145_v31 = vsel %vm2135_vm12, %v2142_v0, %v2144_v33  ;;  %v2148_v35 = vsel %vm2136_vm13, %v2130_v29, %v2147_v13  ;;  %v2515_v59 = vshrl.u32 %v2514_v43, 23  ;;  %v523_v1 = vld [vmem:[%s9714_s26 + $0x68] sm:$0xff] }
 0x1b3   : > { %vm7983_vm14 = vcmp.lt.s32.totalorder %v7982_v28, 0  ;;  %v2149_v16 = vsel %vm2135_vm12, %v2146_v26, %v2148_v35  ;;  %v10713_v52 = vmul.u32.u64.low %v10674_v17, %v2145_v31  ;;  %v10714_v45 = vmul.u32.u64.high %v10674_v17, %v2145_v31, %v10713_v52  ;;  %v8069_v26 = vld [vmem:[%s15158_s2 + $0x80] sm:$0xff] }
 0x1b4   : > { %vm10719_vm0 = vcmp.le.f32.partialorder %v1998_v58, 0.7853982  ;;  %v2069_v37 = vsel %vm7983_vm14, 0, %v7982_v28  ;;  %v10724_v61 = vmul.u32.u64.low %v10674_v17, %v2149_v16  ;;  %v10725_v32 = vmul.u32.u64.high %v10674_v17, %v2149_v16, %v10724_v61  ;;  %8450 = vmatprep.subr.mxu1 %v8069_v26 }
 0x1b5   : > { %v2070_v23 = vsub.s32 32, %v2069_v37  ;;  %v2071_v56 = vshll.u32 %v2062_v62, %v2069_v37  ;;  %v2074_v51 = vsub.s32 4294967266, %v2069_v37  ;;  %v8009_v7 = vadd.s32 4294967169, %v2515_v59  ;;  %8451 = vmatpush3.msra.mxu1 %v8069_v26 }
 0x1b6   : > { %v1988_v27 = vand.u32 3, %v10668_v2  ;;  %v2087_v4 = vsel %vm10719_vm0, 0, %v2085_v41  ;;  %v2157_v11 = vmul.u32 %v10674_v17, %v2141_v19  ;;  %v2160_v15 = vadd.s32 1, %v10714_v45 }
 0x1b7   : > { %v2072_v58 = vshrl.u32 %v2054_v12, %v2070_v23  ;;  %v2075_v14 = vadd.s32 127, %v2074_v51  ;;  %v2521_v48 = vadd.s32 1, %v8009_v7  ;;  %vm2159_vm15 = vc.u32 %v10725_v32, %v10713_v52 }
 0x1b8   : > { %v2161_v62 = vsel %vm2159_vm15, %v2160_v15, %v10714_v45  ;;  %v2091_v5 = vadd.s32 3, %v2087_v4  ;;  %v2511_v6 = vand.u32 2147483647, %v10692_v30  ;;  %vm1993_vm2 = vcmp.eq.s32.totalorder %v1988_v27, 2 }
 0x1b9   : > { %v2073_v49 = vor.u32 %v2072_v58, %v2071_v56  ;;  %v2076_v53 = vshll.u32 %v2075_v14, 23  ;;  %vm2522_vm1 = vcmp.gt.s32.totalorder %v2521_v48, 0  ;;  %v2162_v2 = vadd.s32 %v2161_v62, %v2157_v11  ;;  %v10768_v58 = vld [vmem:[%s9349_s14 + $0x98] sm:$0xff] }
 0x1ba   : > { %v2523_v20 = vsel %vm2522_vm1, %v2521_v48, 0  ;;  %vm1986_vm3 = vweird.f32 %v10353_v22  ;;  %vm1990_vm4 = vcmp.eq.s32.totalorder %v1988_v27, 0  ;;  %vm1989_vm5 = vcmp.lt.s32.totalorder %v1988_v27, 2 }
 0x1bb   : > { %v8903_v9 = vpop.eup %8902  ;;  %v2077_v17 = vor.u32 4788187, %v2076_v53  ;;  %v2080_v12 = vcvt.s32.f32 %v2073_v49  ;;  %v2525_v60 = vand.u32 31, %v2523_v20  ;;  %v2163_v3 = vadd.s32 536870912, %v2162_v2 }
 0x1bc   : > { %v8905_v63 = vpop.eup %8904  ;;  %v1994_v47 = vxor.u32 2147483648, %v8903_v9  ;;  %v10737_v39 = vand.u32 3, %v2091_v5  ;;  %v2518_v21 = vand.u32 8388607, %v2511_v6  ;;  %v2524_v61 = vshrl.u32 %v2523_v20, 5 }
 0x1bd   : > { %v1991_v18 = vxor.u32 2147483648, %v8905_v63  ;;  %v2078_v29 = vand.u32 2147483647, %v2077_v17  ;;  %v2526_v36 = vsub.s32 32, %v2525_v60  ;;  %v10739_v43 = vshrl.u32 %v2163_v3, 30 }
 0x1be   : > { %v1995_v34 = vsel %vm1993_vm2, %v1994_v47, %v8905_v63  ;;  %v2528_v24 = vshll.u32 %v9137_v38, %v2525_v60  ;;  %v2531_v33 = vshll.u32 %v9138_v40, %v2525_v60  ;;  %v2534_v35 = vshll.u32 %v9139_v42, %v2525_v60 }
 0x1bf   : > { %v1992_v0 = vsel %vm1990_vm4, %v8903_v9, %v1991_v18  ;;  %v2081_v41 = vmul.f32 %v2080_v12, %v2078_v29  ;;  %v2529_v57 = vshrl.u32 %v9138_v40, %v2526_v36  ;;  %v2165_v50 = vshll.u32 %v10739_v43, 30 }
 0x1c0   : > { %v1996_v28 = vsel %vm1989_vm5, %v1992_v0, %v1995_v34  ;;  %v2532_v13 = vshrl.u32 %v9139_v42, %v2526_v36  ;;  %v2535_v59 = vshrl.u32 %v9140_v44, %v2526_v36  ;;  %v2519_v37 = vor.u32 8388608, %v2518_v21 }
 0x1c1   : > { %v1997_v19 = vsel %vm1986_vm3, nan, %v1996_v28  ;;  %v2082_v31 = vxor.u32 2147483648, %v2081_v41  ;;  %v10756_v45 = vsub.s32 %v2162_v2, %v2165_v50  ;;  %v2527_v56 = vshrl.u32 %v9137_v38, %v2526_v36 }
 0x1c2   : > { %v2219_v16 = vadd.f32 %v1997_v19, %v523_v1  ;;  %v2530_v51 = vor.u32 %v2529_v57, %v2528_v24  ;;  %v2537_v22 = vshll.u32 %v9140_v44, %v2525_v60  ;;  %v2533_v4 = vor.u32 %v2532_v13, %v2531_v33 }
 0x1c3   : > { %v2083_v23 = vsel %vm2000_vm10, %v2082_v31, %v2081_v41  ;;  %v2168_v27 = vsub.s32 0, %v10756_v45  ;;  %v2538_v11 = vshrl.u32 %v9141_v46, %v2526_v36  ;;  %v2536_v14 = vor.u32 %v2535_v59, %v2534_v35 }
 0x1c4   : > { %8415 = vmatmul.mubr.f32.gmra.mxu0 %v2219_v16  ;;  %v2086_v7 = vsel %vm10719_vm0, %v10444_v25, %v2083_v23  ;;  %v2540_v15 = vshll.u32 %v9141_v46, %v2525_v60  ;;  %v2541_v48 = vshrl.u32 %v9142_v54, %v2526_v36  ;;  %vm2543_vm6 = vcmp.lt.s32.totalorder %v2524_v61, 1 }
 0x1c5   : > { %8906 = vcosq.f32 %v2086_v7  ;;  %v7985_v49 = vmin.u32 %v2168_v27, %v10756_v45  ;;  %v2539_v53 = vor.u32 %v2538_v11, %v2537_v22  ;;  %vm2104_vm7 = vcmp.lt.s32.totalorder %v10590_v8, 0 }
 0x1c6   : > { %8908 = vsinq.f32 %v2086_v7  ;;  %v2542_v55 = vor.u32 %v2541_v48, %v2540_v15  ;;  %vm2545_vm8 = vcmp.lt.s32.totalorder %v2524_v61, 3  ;;  %vm2546_vm10 = vcmp.lt.s32.totalorder %v2524_v61, 4 }
 0x1c7   : > { %v2722_v62 = vand.u32 2139095040, %v10768_v58  ;;  %v2158_v5 = vadd.s32 %v10713_v52, %v10725_v32  ;;  %v2170_v2 = vclz %v7985_v49  ;;  %vm2544_vm11 = vcmp.lt.s32.totalorder %v2524_v61, 2 }
 0x1c8   : > { %v2559_v20 = vshll.u32 %v2519_v37, 8  ;;  %v2188_v9 = vsub.s32 4, %v10739_v43  ;;  %v2548_v17 = vsel %vm2546_vm10, %v2536_v14, 2102212464  ;;  %v2551_v12 = vsel %vm2543_vm6, %v2530_v51, %v2533_v4 }
 0x1c9   : > { %v2552_v60 = vsel %vm2546_vm10, %v2539_v53, 920167782  ;;  %v7986_v63 = vadd.s32 4294967294, %v2170_v2  ;;  %v2547_v47 = vsel %vm2543_vm6, %v2527_v56, %v2530_v51  ;;  %v2555_v18 = vsel %vm2543_vm6, %v2533_v4, %v2536_v14 }
 0x1ca   : > { %v2553_v3 = vsel %vm2545_vm8, %v2536_v14, %v2552_v60  ;;  %v2549_v52 = vsel %vm2545_vm8, %v2533_v4, %v2548_v17  ;;  %v2556_v29 = vsel %vm2546_vm10, %v2542_v55, 1326507024  ;;  %v2723_v36 = vshrl.u32 %v2722_v62, 23  ;;  %v524_v55 = vld [vmem:[%s9714_s26 + $0x70] sm:$0xff] }
 0x1cb   : > { %v2554_v32 = vsel %vm2544_vm11, %v2551_v12, %v2553_v3  ;;  %vm7987_vm12 = vcmp.lt.s32.totalorder %v7986_v63, 0  ;;  %v2557_v34 = vsel %vm2545_vm8, %v2539_v53, %v2556_v29  ;;  %v2719_v24 = vand.u32 2147483647, %v10768_v58 }
 0x1cc   : > { %v10788_v21 = vmul.u32.u64.low %v2559_v20, %v2554_v32  ;;  %v10789_v1 = vmul.u32.u64.high %v2559_v20, %v2554_v32, %v10788_v21  ;;  %v2173_v0 = vsel %vm7987_vm12, 0, %v7986_v63  ;;  %v2558_v41 = vsel %vm2544_vm11, %v2555_v18, %v2557_v34 }
 0x1cd   : > { %v8017_v57 = vadd.s32 4294967169, %v2723_v36  ;;  %v2174_v26 = vsub.s32 32, %v2173_v0  ;;  %v2175_v28 = vshll.u32 %v10756_v45, %v2173_v0  ;;  %v2178_v50 = vsub.s32 4294967266, %v2173_v0 }
 0x1ce   : > { %v2550_v33 = vsel %vm2544_vm11, %v2547_v47, %v2549_v52  ;;  %vm10798_vm13 = vcmp.le.f32.partialorder %v2102_v10, 0.7853982  ;;  %v10802_v19 = vmul.u32.u64.low %v2559_v20, %v2558_v41  ;;  %v10803_v31 = vmul.u32.u64.high %v2559_v20, %v2558_v41, %v10802_v19 }
 0x1cf   : > { %v2729_v35 = vadd.s32 1, %v8017_v57  ;;  %v2176_v59 = vshrl.u32 %v2158_v5, %v2174_v26  ;;  %v2179_v16 = vadd.s32 127, %v2178_v50  ;;  %v2189_v37 = vsel %vm2104_vm7, %v2188_v9, %v10739_v43 }
 0x1d0   : > { %v2569_v45 = vadd.s32 1, %v10789_v1  ;;  %vm2093_vm9 = vcmp.lt.s32.totalorder %v10737_v39, 2  ;;  %vm2097_vm14 = vcmp.eq.s32.totalorder %v10737_v39, 2  ;;  %v2566_v10 = vmul.u32 %v2559_v20, %v2550_v33 }
 0x1d1   : > { %vm2730_vm0 = vcmp.gt.s32.totalorder %v2729_v35, 0  ;;  %v2177_v23 = vor.u32 %v2176_v59, %v2175_v28  ;;  %v2180_v56 = vshll.u32 %v2179_v16, 23  ;;  %v2726_v51 = vand.u32 8388607, %v2719_v24 }
 0x1d2   : > { %v8907_v61 = vpop.eup %8906  ;;  %v2731_v22 = vsel %vm2730_vm0, %v2729_v35, 0  ;;  %vm2094_vm15 = vcmp.eq.s32.totalorder %v10737_v39, 0  ;;  %v2191_v27 = vsel %vm10798_vm13, 0, %v2189_v37  ;;  %vm2568_vm1 = vc.u32 %v10803_v31, %v10788_v21 }
 0x1d3   : > { %v8909_v7 = vpop.eup %8908  ;;  %v2098_v43 = vxor.u32 2147483648, %v8907_v61  ;;  %v2181_v11 = vor.u32 4788187, %v2180_v56  ;;  %v2184_v14 = vcvt.s32.f32 %v2177_v23  ;;  %v2570_v15 = vsel %vm2568_vm1, %v2569_v45, %v10789_v1  ;;  %v10847_v45 = vld [vmem:[%s9349_s14 + $0x90] sm:$0xff] }
 0x1d4   : > { %v2095_v4 = vxor.u32 2147483648, %v8909_v7  ;;  %vm2090_vm2 = vweird.f32 %v10444_v25  ;;  %v2571_v49 = vadd.s32 %v2570_v15, %v2566_v10  ;;  %v2733_v53 = vand.u32 31, %v2731_v22 }
 0x1d5   : > { %v2099_v48 = vsel %vm2097_vm14, %v2098_v43, %v8909_v7  ;;  %v2182_v5 = vand.u32 2147483647, %v2181_v11  ;;  %v2195_v2 = vadd.s32 3, %v2191_v27  ;;  %v2727_v20 = vor.u32 8388608, %v2726_v51 }
 0x1d6   : > { %v2096_v62 = vsel %vm2094_vm15, %v8907_v61, %v2095_v4  ;;  %v2572_v17 = vadd.s32 536870912, %v2571_v49  ;;  %v2732_v12 = vshrl.u32 %v2731_v22, 5  ;;  %v2734_v60 = vsub.s32 32, %v2733_v53 }
 0x1d7   : > { %v2100_v9 = vsel %vm2093_vm9, %v2096_v62, %v2099_v48  ;;  %v2185_v47 = vmul.f32 %v2184_v14, %v2182_v5  ;;  %v2736_v25 = vshll.u32 %v9137_v38, %v2733_v53  ;;  %v2739_v3 = vshll.u32 %v9138_v40, %v2733_v53 }
 0x1d8   : > { %v2101_v63 = vsel %vm2090_vm2, nan, %v2100_v9  ;;  %v10827_v52 = vshrl.u32 %v2572_v17, 30  ;;  %v2737_v32 = vshrl.u32 %v9138_v40, %v2734_v60  ;;  %v2742_v29 = vshll.u32 %v9139_v42, %v2733_v53 }
 0x1d9   : > { %v2220_v18 = vadd.f32 %v2101_v63, %v524_v55  ;;  %v2186_v36 = vxor.u32 2147483648, %v2185_v47  ;;  %v2740_v39 = vshrl.u32 %v9139_v42, %v2734_v60  ;;  %v2743_v34 = vshrl.u32 %v9140_v44, %v2734_v60 }
 0x1da   : > { %v2745_v1 = vshll.u32 %v9140_v44, %v2733_v53  ;;  %v2574_v0 = vshll.u32 %v10827_v52, 30  ;;  %v2735_v41 = vshrl.u32 %v9137_v38, %v2734_v60  ;;  %v2746_v57 = vshrl.u32 %v9141_v46, %v2734_v60 }
 0x1db   : > { %8417 = vmatprep.mubr.f32.mxu0 %v2220_v18  ;;  %vm2751_vm3 = vcmp.lt.s32.totalorder %v2732_v12, 1  ;;  %v2187_v26 = vsel %vm2104_vm7, %v2186_v36, %v2185_v47  ;;  %v2738_v28 = vor.u32 %v2737_v32, %v2736_v25  ;;  %v2741_v50 = vor.u32 %v2740_v39, %v2739_v3 }
 0x1dc   : > { %v2748_v33 = vshll.u32 %v9141_v46, %v2733_v53  ;;  %v2190_v19 = vsel %vm10798_vm13, %v10590_v8, %v2187_v26  ;;  %v10843_v35 = vsub.s32 %v2571_v49, %v2574_v0  ;;  %v2744_v59 = vor.u32 %v2743_v34, %v2742_v29 }
 0x1dd   : > { %v2747_v16 = vor.u32 %v2746_v57, %v2745_v1  ;;  %8910 = vcosq.f32 %v2190_v19  ;;  %v2749_v37 = vshrl.u32 %v9142_v54, %v2734_v60  ;;  %vm2753_vm4 = vcmp.lt.s32.totalorder %v2732_v12, 3 }
 0x1de   : > { %vm2754_vm5 = vcmp.lt.s32.totalorder %v2732_v12, 4  ;;  %8912 = vsinq.f32 %v2190_v19  ;;  %v2577_v10 = vsub.s32 0, %v10843_v35  ;;  %vm2752_vm6 = vcmp.lt.s32.totalorder %v2732_v12, 2 }
 0x1df   : > { %v2767_v61 = vshll.u32 %v2727_v20, 8  ;;  %v2750_v23 = vor.u32 %v2749_v37, %v2748_v33  ;;  %v2756_v13 = vsel %vm2754_vm5, %v2744_v59, 2102212464  ;;  %v2759_v56 = vsel %vm2751_vm3, %v2738_v28, %v2741_v50  ;;  %v525_v37 = vld [vmem:[%s9714_s26 + $0x78] sm:$0xff] }
 0x1e0   : > { %v2760_v51 = vsel %vm2754_vm5, %v2747_v16, 920167782  ;;  %v8010_v22 = vmin.u32 %v2577_v10, %v10843_v35  ;;  %v2755_v7 = vsel %vm2751_vm3, %v2735_v41, %v2738_v28  ;;  %v2618_v27 = vand.u32 2139095040, %v10847_v45 }
 0x1e1   : > { %v2761_v43 = vsel %vm2753_vm4, %v2744_v59, %v2760_v51  ;;  %v2757_v4 = vsel %vm2753_vm4, %v2741_v50, %v2756_v13  ;;  %v2763_v14 = vsel %vm2751_vm3, %v2741_v50, %v2744_v59  ;;  %v2764_v15 = vsel %vm2754_vm5, %v2750_v23, 1326507024 }
 0x1e2   : > { %v2762_v11 = vsel %vm2752_vm6, %v2759_v56, %v2761_v43  ;;  %v2579_v48 = vclz %v8010_v22  ;;  %v2765_v49 = vsel %vm2753_vm4, %v2747_v16, %v2764_v15  ;;  %v2758_v5 = vsel %vm2752_vm6, %v2755_v7, %v2757_v4  ;;  %v10881_v16 = vld [vmem:[%s9349_s14 + $0x80] sm:$0xff] }
 0x1e3   : > { %v10862_v53 = vmul.u32.u64.low %v2767_v61, %v2762_v11  ;;  %v10863_v55 = vmul.u32.u64.high %v2767_v61, %v2762_v11, %v10862_v53  ;;  %v2766_v20 = vsel %vm2752_vm6, %v2763_v14, %v2765_v49  ;;  %v2619_v9 = vshrl.u32 %v2618_v27, 23 }
 0x1e4   : > { %v8011_v62 = vadd.s32 4294967294, %v2579_v48  ;;  %v2196_v17 = vand.u32 3, %v2195_v2  ;;  %v10868_v60 = vmul.u32.u64.low %v2767_v61, %v2766_v20  ;;  %v10869_v63 = vmul.u32.u64.high %v2767_v61, %v2766_v20, %v10868_v60 }
 0x1e5   : > { %v8013_v47 = vadd.s32 4294967169, %v2619_v9  ;;  %v2774_v3 = vmul.u32 %v2767_v61, %v2758_v5  ;;  %v2777_v18 = vadd.s32 1, %v10863_v55  ;;  %v2567_v32 = vadd.s32 %v10788_v21, %v10803_v31 }
 0x1e6   : > { %vm8012_vm7 = vcmp.lt.s32.totalorder %v8011_v62, 0  ;;  %vm2197_vm8 = vcmp.lt.s32.totalorder %v2196_v17, 2  ;;  %vm2198_vm10 = vcmp.eq.s32.totalorder %v2196_v17, 0  ;;  %vm2776_vm11 = vc.u32 %v10869_v63, %v10862_v53 }
 0x1e7   : > { %v2582_v25 = vsel %vm8012_vm7, 0, %v8011_v62  ;;  %v2625_v39 = vadd.s32 1, %v8013_v47  ;;  %vm2201_vm12 = vcmp.eq.s32.totalorder %v2196_v17, 2  ;;  %v2778_v34 = vsel %vm2776_vm11, %v2777_v18, %v10863_v55 }
 0x1e8   : > { %v2583_v29 = vsub.s32 32, %v2582_v25  ;;  %v2587_v36 = vsub.s32 4294967266, %v2582_v25  ;;  %v2779_v41 = vadd.s32 %v2778_v34, %v2774_v3  ;;  %v2615_v21 = vand.u32 2147483647, %v10847_v45 }
 0x1e9   : > { %vm2626_vm13 = vcmp.gt.s32.totalorder %v2625_v39, 0  ;;  %v2584_v26 = vshll.u32 %v10843_v35, %v2582_v25  ;;  %vm2194_vm9 = vweird.f32 %v10590_v8  ;;  %v2410_v8 = vand.u32 2139095040, %v10881_v16 }
 0x1ea   : > { %v8911_v2 = vpop.eup %8910  ;;  %v2588_v12 = vadd.s32 127, %v2587_v36  ;;  %v2627_v31 = vsel %vm2626_vm13, %v2625_v39, 0  ;;  %v2585_v28 = vshrl.u32 %v2567_v32, %v2583_v29  ;;  %v2780_v19 = vadd.s32 536870912, %v2779_v41 }
 0x1eb   : > { %v8913_v1 = vpop.eup %8912  ;;  %v2202_v0 = vxor.u32 2147483648, %v8911_v2  ;;  %v2629_v59 = vand.u32 31, %v2627_v31  ;;  %v2622_v13 = vand.u32 8388607, %v2615_v21  ;;  %v2628_v27 = vshrl.u32 %v2627_v31, 5 }
 0x1ec   : > { %v2199_v57 = vxor.u32 2147483648, %v8913_v1  ;;  %v2589_v50 = vshll.u32 %v2588_v12, 23  ;;  %v10886_v23 = vshrl.u32 %v2780_v19, 30  ;;  %v2586_v51 = vor.u32 %v2585_v28, %v2584_v26 }
 0x1ed   : > { %v2203_v33 = vsel %vm2201_vm12, %v2202_v0, %v8913_v1  ;;  %v2630_v35 = vsub.s32 32, %v2629_v59  ;;  %v2632_v4 = vshll.u32 %v9137_v38, %v2629_v59  ;;  %v2635_v14 = vshll.u32 %v9138_v40, %v2629_v59 }
 0x1ee   : > { %v2200_v10 = vsel %vm2198_vm10, %v8911_v2, %v2199_v57  ;;  %v2590_v22 = vor.u32 4788187, %v2589_v50  ;;  %v2782_v43 = vshll.u32 %v10886_v23, 30  ;;  %v2638_v48 = vshll.u32 %v9139_v42, %v2629_v59 }
 0x1ef   : > { %v2204_v61 = vsel %vm2197_vm8, %v2200_v10, %v2203_v33  ;;  %v2633_v11 = vshrl.u32 %v9138_v40, %v2630_v35  ;;  %v2636_v15 = vshrl.u32 %v9139_v42, %v2630_v35  ;;  %v2639_v55 = vshrl.u32 %v9140_v44, %v2630_v35 }
 0x1f0   : > { %v2205_v56 = vsel %vm2194_vm9, nan, %v2204_v61  ;;  %v10897_v49 = vsub.s32 %v2779_v41, %v2782_v43  ;;  %v2641_v62 = vshll.u32 %v9140_v44, %v2629_v59  ;;  %v2642_v5 = vshrl.u32 %v9141_v46, %v2630_v35 }
 0x1f1   : > { %v2221_v7 = vadd.f32 %v2205_v56, %v525_v37  ;;  %v2591_v20 = vand.u32 2147483647, %v2590_v22  ;;  %v2593_v9 = vcvt.s32.f32 %v2586_v51  ;;  %v2623_v17 = vor.u32 8388608, %v2622_v13 }
 0x1f2   : > { %vm2513_vm14 = vcmp.lt.s32.totalorder %v10692_v30, 0  ;;  %v2785_v60 = vsub.s32 0, %v10897_v49  ;;  %v2631_v47 = vshrl.u32 %v9137_v38, %v2630_v35  ;;  %v2634_v25 = vor.u32 %v2633_v11, %v2632_v4 }
 0x1f3   : > { %8418 = vmatmul.mubr.f32.gmra.mxu0 %v2221_v7  ;;  %v2411_v3 = vshrl.u32 %v2410_v8, 23  ;;  %v2637_v18 = vor.u32 %v2636_v15, %v2635_v14  ;;  %v2643_v32 = vor.u32 %v2642_v5, %v2641_v62  ;;  %v2644_v29 = vshll.u32 %v9141_v46, %v2629_v59 }
 0x1f4   : > { %v2645_v36 = vshrl.u32 %v9142_v54, %v2630_v35  ;;  %v2597_v39 = vsub.s32 4, %v10827_v52  ;;  %v8018_v2 = vmin.u32 %v2785_v60, %v10897_v49  ;;  %v2640_v12 = vor.u32 %v2639_v55, %v2638_v48 }
 0x1f5   : > { %vm2647_vm0 = vcmp.lt.s32.totalorder %v2628_v27, 1  ;;  %v2594_v34 = vmul.f32 %v2593_v9, %v2591_v20  ;;  %vm2649_vm15 = vcmp.lt.s32.totalorder %v2628_v27, 3  ;;  %vm2650_vm1 = vcmp.lt.s32.totalorder %v2628_v27, 4 }
 0x1f6   : > { %v2646_v1 = vor.u32 %v2645_v36, %v2644_v29  ;;  %v2787_v0 = vclz %v8018_v2  ;;  %vm2648_vm2 = vcmp.lt.s32.totalorder %v2628_v27, 2  ;;  %v2663_v41 = vshll.u32 %v2623_v17, 8 }
 0x1f7   : > { %v8005_v31 = vadd.s32 4294967169, %v2411_v3  ;;  %v2651_v57 = vsel %vm2647_vm0, %v2631_v47, %v2634_v25  ;;  %v2652_v26 = vsel %vm2650_vm1, %v2640_v12, 2102212464  ;;  %v2655_v28 = vsel %vm2647_vm0, %v2634_v25, %v2637_v18 }
 0x1f8   : > { %v2656_v50 = vsel %vm2650_vm1, %v2643_v32, 920167782  ;;  %v8019_v33 = vadd.s32 4294967294, %v2787_v0  ;;  %v2653_v19 = vsel %vm2649_vm15, %v2637_v18, %v2652_v26  ;;  %v2659_v37 = vsel %vm2647_vm0, %v2637_v18, %v2640_v12 }
 0x1f9   : > { %v2657_v59 = vsel %vm2649_vm15, %v2640_v12, %v2656_v50  ;;  %v2595_v10 = vxor.u32 2147483648, %v2594_v34  ;;  %v2775_v61 = vadd.s32 %v10862_v53, %v10869_v63  ;;  %v2660_v35 = vsel %vm2650_vm1, %v2646_v1, 1326507024 }
 0x1fa   : > { %v2658_v13 = vsel %vm2648_vm2, %v2655_v28, %v2657_v59  ;;  %vm8020_vm3 = vcmp.lt.s32.totalorder %v8019_v33, 0  ;;  %v2661_v56 = vsel %vm2649_vm15, %v2643_v32, %v2660_v35  ;;  %vm10927_vm4 = vcmp.le.f32.partialorder %v2511_v6, 0.7853982 }
 0x1fb   : > { %v10921_v51 = vmul.u32.u64.low %v2663_v41, %v2658_v13  ;;  %v10922_v22 = vmul.u32.u64.high %v2663_v41, %v2658_v13, %v10921_v51  ;;  %v2790_v7 = vsel %vm8020_vm3, 0, %v8019_v33  ;;  %v2654_v53 = vsel %vm2648_vm2, %v2651_v57, %v2653_v19 }
 0x1fc   : > { %v2662_v63 = vsel %vm2648_vm2, %v2659_v37, %v2661_v56  ;;  %v2791_v43 = vsub.s32 32, %v2790_v7  ;;  %v2792_v4 = vshll.u32 %v10897_v49, %v2790_v7  ;;  %v2795_v11 = vsub.s32 4294967266, %v2790_v7 }
 0x1fd   : > { %v2417_v14 = vadd.s32 1, %v8005_v31  ;;  %v2596_v15 = vsel %vm2513_vm14, %v2595_v10, %v2594_v34  ;;  %v2598_v6 = vsel %vm2513_vm14, %v2597_v39, %v10827_v52  ;;  %v2673_v27 = vadd.s32 1, %v10922_v22 }
 0x1fe   : > { %v10939_v48 = vmul.u32.u64.low %v2663_v41, %v2662_v63  ;;  %v10940_v55 = vmul.u32.u64.high %v2663_v41, %v2662_v63, %v10939_v48  ;;  %v2793_v62 = vshrl.u32 %v2775_v61, %v2791_v43  ;;  %v2796_v5 = vadd.s32 127, %v2795_v11  ;;  %v8398_v11 = vpop.f32.mrf.mxu0 }
 0x1ff   : > { %vm2418_vm5 = vcmp.gt.s32.totalorder %v2417_v14, 0  ;;  %v2670_v20 = vmul.u32 %v2663_v41, %v2654_v53  ;;  %v2599_v49 = vsel %vm10927_vm4, %v10692_v30, %v2596_v15  ;;  %v2600_v52 = vsel %vm10927_vm4, 0, %v2598_v6 }
 0x200   : > { %v2419_v9 = vsel %vm2418_vm5, %v2417_v14, 0  ;;  %v2794_v17 = vor.u32 %v2793_v62, %v2792_v4  ;;  %v2797_v60 = vshll.u32 %v2796_v5, 23  ;;  %vm2672_vm6 = vc.u32 %v10940_v55, %v10921_v51  ;;  %v10978_v4 = vld [vmem:[%s9349_s14 + $0xa8] sm:$0xff] }
 0x201   : > { %v2421_v47 = vand.u32 31, %v2419_v9  ;;  %v2407_v25 = vand.u32 2147483647, %v10881_v16  ;;  %v2674_v18 = vsel %vm2672_vm6, %v2673_v27, %v10922_v22  ;;  %8914 = vcosq.f32 %v2599_v49 }
 0x202   : > { %v2798_v3 = vor.u32 4788187, %v2797_v60  ;;  %v2801_v29 = vcvt.s32.f32 %v2794_v17  ;;  %v2675_v36 = vadd.s32 %v2674_v18, %v2670_v20  ;;  %8916 = vsinq.f32 %v2599_v49 }
 0x203   : > { %v2422_v32 = vsub.s32 32, %v2421_v47  ;;  %v2604_v30 = vadd.s32 3, %v2600_v52  ;;  %v2414_v12 = vand.u32 8388607, %v2407_v25  ;;  %v10954_v34 = vshrl.u32 %v2419_v9, 5 }
 0x204   : > { %v2799_v39 = vand.u32 2147483647, %v2798_v3  ;;  %v2676_v2 = vadd.s32 536870912, %v2675_v36  ;;  %v2424_v1 = vshll.u32 %v9137_v38, %v2421_v47  ;;  %v2427_v41 = vshll.u32 %v9138_v40, %v2421_v47 }
 0x205   : > { %v2425_v0 = vshrl.u32 %v9138_v40, %v2422_v32  ;;  %v2428_v31 = vshrl.u32 %v9139_v42, %v2422_v32  ;;  %v2430_v57 = vshll.u32 %v9139_v42, %v2421_v47  ;;  %v2431_v50 = vshrl.u32 %v9140_v44, %v2422_v32 }
 0x206   : > { %v2802_v26 = vmul.f32 %v2801_v29, %v2799_v39  ;;  %v10961_v28 = vshrl.u32 %v2676_v2, 30  ;;  %v2433_v33 = vshll.u32 %v9140_v44, %v2421_v47  ;;  %v10965_v19 = vand.u32 3, %v2604_v30 }
 0x207   : > { %vm2721_vm7 = vcmp.lt.s32.totalorder %v10768_v58, 0  ;;  %v2805_v59 = vsub.s32 4, %v10886_v23  ;;  %v2434_v37 = vshrl.u32 %v9141_v46, %v2422_v32  ;;  %v2415_v61 = vor.u32 8388608, %v2414_v12 }
 0x208   : > { %v2678_v10 = vshll.u32 %v10961_v28, 30  ;;  %v2423_v13 = vshrl.u32 %v9137_v38, %v2422_v32  ;;  %v2436_v35 = vshll.u32 %v9141_v46, %v2421_v47  ;;  %v2426_v56 = vor.u32 %v2425_v0, %v2424_v1 }
 0x209   : > { %v2429_v22 = vor.u32 %v2428_v31, %v2427_v41  ;;  %v2435_v8 = vor.u32 %v2434_v37, %v2433_v33  ;;  %v2437_v7 = vshrl.u32 %v9142_v54, %v2422_v32  ;;  %v2803_v53 = vxor.u32 2147483648, %v2802_v26 }
 0x20a   : > { %v10974_v63 = vsub.s32 %v2675_v36, %v2678_v10  ;;  %v2432_v43 = vor.u32 %v2431_v50, %v2430_v57  ;;  %vm2439_vm8 = vcmp.lt.s32.totalorder %v10954_v34, 1  ;;  %vm10982_vm10 = vcmp.le.f32.partialorder %v2719_v24, 0.7853982 }
 0x20b   : > { %v2806_v14 = vsel %vm2721_vm7, %v2805_v59, %v10886_v23  ;;  %v2438_v15 = vor.u32 %v2437_v7, %v2436_v35  ;;  %vm2441_vm11 = vcmp.lt.s32.totalorder %v10954_v34, 3  ;;  %vm2440_vm12 = vcmp.lt.s32.totalorder %v10954_v34, 2 }
 0x20c   : > { %v2681_v6 = vsub.s32 0, %v10974_v63  ;;  %vm2442_vm13 = vcmp.lt.s32.totalorder %v10954_v34, 4  ;;  %v2455_v48 = vshll.u32 %v2415_v61, 8  ;;  %v2447_v62 = vsel %vm2439_vm8, %v2426_v56, %v2429_v22 }
 0x20d   : > { %v2444_v24 = vsel %vm2442_vm13, %v2432_v43, 2102212464  ;;  %v2448_v5 = vsel %vm2442_vm13, %v2435_v8, 920167782  ;;  %v2930_v23 = vand.u32 2139095040, %v10978_v4  ;;  %vm2607_vm9 = vcmp.eq.s32.totalorder %v10965_v19, 0 }
 0x20e   : > { %v2804_v27 = vsel %vm2721_vm7, %v2803_v53, %v2802_v26  ;;  %vm2617_vm14 = vcmp.lt.s32.totalorder %v10847_v45, 0  ;;  %v8014_v20 = vmin.u32 %v2681_v6, %v10974_v63  ;;  %v2443_v9 = vsel %vm2439_vm8, %v2423_v13, %v2426_v56  ;;  %v8915_v17 = vpop.eup %8914 }
 0x20f   : > { %v2449_v49 = vsel %vm2441_vm11, %v2432_v43, %v2448_v5  ;;  %v2445_v60 = vsel %vm2441_vm11, %v2429_v22, %v2444_v24  ;;  %v2451_v52 = vsel %vm2439_vm8, %v2429_v22, %v2432_v43  ;;  %v2452_v3 = vsel %vm2442_vm13, %v2438_v15, 1326507024  ;;  %v8917_v18 = vpop.eup %8916 }
 0x210   : > { %v2450_v47 = vsel %vm2440_vm12, %v2447_v62, %v2449_v49  ;;  %vm2610_vm0 = vcmp.eq.s32.totalorder %v10965_v19, 2  ;;  %v2808_v32 = vsel %vm10982_vm10, 0, %v2806_v14  ;;  %v2683_v29 = vclz %v8014_v20  ;;  %v11069_v20 = vld [vmem:[%s9349_s14 + $0xa0] sm:$0xff] }
 0x211   : > { %v2927_v36 = vand.u32 2147483647, %v10978_v4  ;;  %v2807_v30 = vsel %vm10982_vm10, %v10768_v58, %v2804_v27  ;;  %v2453_v39 = vsel %vm2441_vm11, %v2435_v8, %v2452_v3  ;;  %vm2606_vm15 = vcmp.lt.s32.totalorder %v10965_v19, 2 }
 0x212   : > { %v11026_v2 = vmul.u32.u64.low %v2455_v48, %v2450_v47  ;;  %v11027_v12 = vmul.u32.u64.high %v2455_v48, %v2450_v47, %v11026_v2  ;;  %v8015_v1 = vadd.s32 4294967294, %v2683_v29  ;;  %v2446_v0 = vsel %vm2440_vm12, %v2443_v9, %v2445_v60 }
 0x213   : > { %v2454_v41 = vsel %vm2440_vm12, %v2451_v52, %v2453_v39  ;;  %v2931_v31 = vshrl.u32 %v2930_v23, 23  ;;  %v2671_v57 = vadd.s32 %v10921_v51, %v10940_v55  ;;  %v2701_v26 = vsub.s32 4, %v10961_v28 }
 0x214   : > { %v11038_v50 = vmul.u32.u64.low %v2455_v48, %v2454_v41  ;;  %v11039_v33 = vmul.u32.u64.high %v2455_v48, %v2454_v41, %v11038_v50  ;;  %v2608_v59 = vxor.u32 2147483648, %v8917_v18  ;;  %v2611_v37 = vxor.u32 2147483648, %v8915_v17 }
 0x215   : > { %vm8016_vm1 = vcmp.lt.s32.totalorder %v8015_v1, 0  ;;  %v8025_v10 = vadd.s32 4294967169, %v2931_v31  ;;  %8918 = vcosq.f32 %v2807_v30  ;;  %v2462_v13 = vmul.u32 %v2455_v48, %v2446_v0 }
 0x216   : > { %v2686_v61 = vsel %vm8016_vm1, 0, %v8015_v1  ;;  %v2465_v35 = vadd.s32 1, %v11027_v12  ;;  %v2812_v51 = vadd.s32 3, %v2808_v32  ;;  %vm11045_vm2 = vcmp.le.f32.partialorder %v2615_v21, 0.7853982 }
 0x217   : > { %v2687_v34 = vsub.s32 32, %v2686_v61  ;;  %v2688_v56 = vshll.u32 %v10974_v63, %v2686_v61  ;;  %v2691_v22 = vsub.s32 4294967266, %v2686_v61  ;;  %v2937_v8 = vadd.s32 1, %v8025_v10  ;;  %v11058_v21 = vld [vmem:[%s15159_s3] ss:$0 sm:$0xff] }
 0x218   : > { %v2702_v7 = vsel %vm2617_vm14, %v2701_v26, %v10961_v28  ;;  %vm2464_vm3 = vc.u32 %v11039_v33, %v11026_v2  ;;  %v2609_v14 = vsel %vm2607_vm9, %v8915_v17, %v2608_v59  ;;  %v2612_v28 = vsel %vm2610_vm0, %v2611_v37, %v8917_v18 }
 0x219   : > { %v2689_v53 = vshrl.u32 %v2671_v57, %v2687_v34  ;;  %v2692_v43 = vadd.s32 127, %v2691_v22  ;;  %v2466_v63 = vsel %vm2464_vm3, %v2465_v35, %v11027_v12  ;;  %vm2938_vm4 = vcmp.gt.s32.totalorder %v2937_v8, 0 }
 0x21a   : > { %v2467_v15 = vadd.s32 %v2466_v63, %v2462_v13  ;;  %v2939_v6 = vsel %vm2938_vm4, %v2937_v8, 0  ;;  %8920 = vsinq.f32 %v2807_v30  ;;  %v2934_v62 = vand.u32 8388607, %v2927_v36 }
 0x21b   : > { %v2690_v48 = vor.u32 %v2689_v53, %v2688_v56  ;;  %v2693_v24 = vshll.u32 %v2692_v43, 23  ;;  %v2704_v5 = vsel %vm11045_vm2, 0, %v2702_v7  ;;  %v2941_v27 = vand.u32 31, %v2939_v6 }
 0x21c   : > { %v2468_v23 = vadd.s32 536870912, %v2467_v15  ;;  %v11072_v9 = vadd.f32 %v8398_v11, %v11058_v21  ;;  %v11076_v60 = vsel %vm2606_vm15, %v2609_v14, %v2612_v28  ;;  %v11078_v47 = vand.u32 3, %v2812_v51  ;;  %v9106_v11 = vld [vmem:[%s9349_s14 + $0x88] sm:$0xff] }
 0x21d   : > { %v2694_v49 = vor.u32 4788187, %v2693_v24  ;;  %v2697_v17 = vcvt.s32.f32 %v2690_v48  ;;  %v2942_v3 = vsub.s32 32, %v2941_v27  ;;  %v11082_v32 = vadd.s32 3, %v2704_v5 }
 0x21e   : > { %v11080_v52 = vshrl.u32 %v2468_v23, 30  ;;  %v2935_v29 = vor.u32 8388608, %v2934_v62  ;;  %v2826_v30 = vand.u32 2139095040, %v11069_v20  ;;  %v11086_v12 = vshrl.u32 %v2939_v6, 5 }
 0x21f   : > { %v2695_v18 = vand.u32 2147483647, %v2694_v49  ;;  %v2944_v1 = vshll.u32 %v9137_v38, %v2941_v27  ;;  %v2947_v19 = vshll.u32 %v9138_v40, %v2941_v27  ;;  %v2945_v41 = vshrl.u32 %v9138_v40, %v2942_v3 }
 0x220   : > { %v2470_v39 = vshll.u32 %v11080_v52, 30  ;;  %v2948_v31 = vshrl.u32 %v9139_v42, %v2942_v3  ;;  %v2950_v57 = vshll.u32 %v9139_v42, %v2941_v27  ;;  %v2951_v50 = vshrl.u32 %v9140_v44, %v2942_v3 }
 0x221   : > { %v2698_v0 = vmul.f32 %v2697_v17, %v2695_v18  ;;  %v2953_v59 = vshll.u32 %v9140_v44, %v2941_v27  ;;  %v2954_v37 = vshrl.u32 %v9141_v46, %v2942_v3  ;;  %v2463_v13 = vadd.s32 %v11026_v2, %v11039_v33  ;;  %v2311_v17 = vpop.f32.mrf.mxu0 }
 0x222   : > { %v11093_v26 = vsub.s32 %v2467_v15, %v2470_v39  ;;  %v11098_v10 = vpop.eup %8918  ;;  %v2823_v35 = vand.u32 2147483647, %v11069_v20  ;;  %v2827_v34 = vshrl.u32 %v2826_v30, 23  ;;  %v2943_v22 = vshrl.u32 %v9137_v38, %v2942_v3 }
 0x223   : > { %v2699_v61 = vxor.u32 2147483648, %v2698_v0  ;;  %v2946_v8 = vor.u32 %v2945_v41, %v2944_v1  ;;  %v2949_v51 = vor.u32 %v2948_v31, %v2947_v19  ;;  %v2955_v53 = vor.u32 %v2954_v37, %v2953_v59  ;;  %v8401_v37 = vpop.f32.mrf.mxu0 }
 0x224   : > { %v2473_v56 = vsub.s32 0, %v11093_v26  ;;  %v2956_v43 = vshll.u32 %v9141_v46, %v2941_v27  ;;  %v2957_v63 = vshrl.u32 %v9142_v54, %v2942_v3  ;;  %vm2603_vm5 = vweird.f32 %v9106_v11 }
 0x225   : > { %v2700_v7 = vsel %vm2617_vm14, %v2699_v61, %v2698_v0  ;;  %vm2409_vm6 = vcmp.lt.s32.totalorder %v10881_v16, 0  ;;  %v2952_v33 = vor.u32 %v2951_v50, %v2950_v57  ;;  %vm2959_vm7 = vcmp.lt.s32.totalorder %v11086_v12, 1 }
 0x226   : > { %v8006_v2 = vmin.u32 %v2473_v56, %v11093_v26  ;;  %v11113_v14 = vshll.u32 %v2935_v29, 8  ;;  %v2819_v28 = vxor.u32 2147483648, %v11098_v10  ;;  %v2958_v15 = vor.u32 %v2957_v63, %v2956_v43 }
 0x227   : > { %vm2961_vm8 = vcmp.lt.s32.totalorder %v11086_v12, 3  ;;  %vm2962_vm10 = vcmp.lt.s32.totalorder %v11086_v12, 4  ;;  %v8921_v6 = vpop.eup %8920  ;;  %vm2815_vm11 = vcmp.eq.s32.totalorder %v11078_v47, 0  ;;  %vm2818_vm12 = vcmp.eq.s32.totalorder %v11078_v47, 2 }
 0x228   : > { %v2703_v48 = vsel %vm11045_vm2, %v10847_v45, %v2700_v7  ;;  %v2475_v24 = vclz %v8006_v2  ;;  %vm2960_vm13 = vcmp.lt.s32.totalorder %v11086_v12, 2  ;;  %v8021_v62 = vadd.s32 4294967169, %v2827_v34 }
 0x229   : > { %v2963_v5 = vsel %vm2959_vm7, %v2943_v22, %v2946_v8  ;;  %v2964_v23 = vsel %vm2962_vm10, %v2952_v33, 2102212464  ;;  %v2967_v27 = vsel %vm2959_vm7, %v2946_v8, %v2949_v51  ;;  %v2968_v49 = vsel %vm2962_vm10, %v2955_v53, 920167782 }
 0x22a   : > { %vm11134_vm9 = vcmp.le.f32.partialorder %v2407_v25, 0.7853982  ;;  %v8007_v3 = vadd.s32 4294967294, %v2475_v24  ;;  %v2965_v18 = vsel %vm2961_vm8, %v2949_v51, %v2964_v23  ;;  %v2969_v29 = vsel %vm2961_vm8, %v2952_v33, %v2968_v49 }
 0x22b   : > { %v2971_v30 = vsel %vm2959_vm7, %v2949_v51, %v2952_v33  ;;  %v2816_v39 = vxor.u32 2147483648, %v8921_v6  ;;  %v2493_v1 = vsub.s32 4, %v11080_v52  ;;  %v2970_v19 = vsel %vm2960_vm13, %v2967_v27, %v2969_v29 }
 0x22c   : > { %v2972_v25 = vsel %vm2962_vm10, %v2958_v15, 1326507024  ;;  %vm2814_vm14 = vcmp.lt.s32.totalorder %v11078_v47, 2  ;;  %vm8008_vm0 = vcmp.lt.s32.totalorder %v8007_v3, 0  ;;  %8922 = vcosq.f32 %v2703_v48  ;;  %v2321_v15 = vpop.f32.mrf.mxu0 }
 0x22d   : > { %v2973_v0 = vsel %vm2961_vm8, %v2955_v53, %v2972_v25  ;;  %v11153_v41 = vmul.u32.u64.low %v11113_v14, %v2970_v19  ;;  %v11154_v31 = vmul.u32.u64.high %v11113_v14, %v2970_v19, %v11153_v41  ;;  %v2478_v57 = vsel %vm8008_vm0, 0, %v8007_v3 }
 0x22e   : > { %v2966_v50 = vsel %vm2960_vm13, %v2963_v5, %v2965_v18  ;;  %v2974_v59 = vsel %vm2960_vm13, %v2971_v30, %v2973_v0  ;;  %v2479_v61 = vsub.s32 32, %v2478_v57  ;;  %v2480_v34 = vshll.u32 %v11093_v26, %v2478_v57 }
 0x22f   : > { %v2483_v56 = vsub.s32 4294967266, %v2478_v57  ;;  %v2833_v22 = vadd.s32 1, %v8021_v62  ;;  %8924 = vsinq.f32 %v2703_v48  ;;  %v2494_v8 = vsel %vm2409_vm6, %v2493_v1, %v11080_v52 }
 0x230   : > { %v11166_v51 = vmul.u32.u64.low %v11113_v14, %v2974_v59  ;;  %v11167_v7 = vmul.u32.u64.high %v11113_v14, %v2974_v59, %v11166_v51  ;;  %v2481_v53 = vshrl.u32 %v2463_v13, %v2479_v61  ;;  %v2985_v12 = vadd.s32 1, %v11154_v31 }
 0x231   : > { %v2484_v43 = vadd.s32 127, %v2483_v56  ;;  %vm2834_vm15 = vcmp.gt.s32.totalorder %v2833_v22, 0  ;;  %v2614_v63 = vsel %vm2603_vm5, nan, %v11076_v60  ;;  %v11173_v26 = vand.u32 3, %v11082_v32 }
 0x232   : > { %v2982_v2 = vmul.u32 %v11113_v14, %v2966_v50  ;;  %v2835_v33 = vsel %vm2834_vm15, %v2833_v22, 0  ;;  %v2482_v52 = vor.u32 %v2481_v53, %v2480_v34  ;;  %v2830_v24 = vand.u32 8388607, %v2823_v35 }
 0x233   : > { %v2485_v48 = vshll.u32 %v2484_v43, 23  ;;  %v2837_v13 = vand.u32 31, %v2835_v33  ;;  %v2817_v62 = vsel %vm2815_vm11, %v11098_v10, %v2816_v39  ;;  %v2820_v60 = vsel %vm2818_vm12, %v2819_v28, %v8921_v6 }
 0x234   : > { %v2496_v32 = vsel %vm11134_vm9, 0, %v2494_v8  ;;  %vm2984_vm1 = vc.u32 %v11167_v7, %v11153_v41  ;;  %v2489_v14 = vcvt.s32.f32 %v2482_v52  ;;  %v11189_v27 = vadd.f32 %v11058_v21, %v2311_v17 }
 0x235   : > { %v2486_v11 = vor.u32 4788187, %v2485_v48  ;;  %v2986_v5 = vsel %vm2984_vm1, %v2985_v12, %v11154_v31  ;;  %v2838_v23 = vsub.s32 32, %v2837_v13  ;;  %v11192_v49 = vadd.f32 %v8401_v37, %v11058_v21 }
 0x236   : > { %v11195_v10 = vadd.f32 %v11058_v21, %v2321_v15  ;;  %v2987_v28 = vadd.s32 %v2986_v5, %v2982_v2  ;;  %v11198_v6 = vmul.f32 %v2614_v63, %v11072_v9  ;;  %v2500_v18 = vadd.s32 3, %v2496_v32 }
 0x237   : > { %v2487_v3 = vand.u32 2147483647, %v2486_v11  ;;  %v2831_v29 = vor.u32 8388608, %v2830_v24  ;;  %v2821_v30 = vsel %vm2814_vm14, %v2817_v62, %v2820_v60  ;;  %v2840_v17 = vshll.u32 %v9137_v38, %v2837_v13 }
 0x238   : > { %v2988_v39 = vadd.s32 536870912, %v2987_v28  ;;  %v2841_v1 = vshrl.u32 %v9138_v40, %v2838_v23  ;;  %vm2811_vm2 = vweird.f32 %v10768_v58  ;;  %vm2714_vm3 = vcmp.eq.s32.totalorder %v11173_v26, 2 }
 0x239   : > { %v2490_v19 = vmul.f32 %v2489_v14, %v2487_v3  ;;  %v2836_v25 = vshrl.u32 %v2835_v33, 5  ;;  %v2843_v9 = vshll.u32 %v9138_v40, %v2837_v13  ;;  %v2844_v0 = vshrl.u32 %v9139_v42, %v2838_v23  ;;  %v8923_v59 = vpop.eup %8922 }
 0x23a   : > { %vm2711_vm4 = vcmp.eq.s32.totalorder %v11173_v26, 0  ;;  %v11209_v31 = vshrl.u32 %v2988_v39, 30  ;;  %v2846_v47 = vshll.u32 %v9139_v42, %v2837_v13  ;;  %v2847_v57 = vshrl.u32 %v9140_v44, %v2838_v23 }
 0x23b   : > { %v2849_v50 = vshll.u32 %v9140_v44, %v2837_v13  ;;  %v2491_v37 = vxor.u32 2147483648, %v2490_v19  ;;  %v11214_v61 = vand.u32 3, %v2500_v18  ;;  %v2850_v34 = vshrl.u32 %v9141_v46, %v2838_v23 }
 0x23c   : > { %v11217_v56 = vshll.u32 %v2831_v29, 8  ;;  %v2990_v22 = vshll.u32 %v11209_v31, 30  ;;  %v2839_v8 = vshrl.u32 %v9137_v38, %v2838_v23  ;;  %v2842_v51 = vor.u32 %v2841_v1, %v2840_v17  ;;  %v8925_v43 = vpop.eup %8924 }
 0x23d   : > { %v2852_v53 = vshll.u32 %v9141_v46, %v2837_v13  ;;  %v2492_v12 = vsel %vm2409_vm6, %v2491_v37, %v2490_v19  ;;  %v2845_v63 = vor.u32 %v2844_v0, %v2843_v9  ;;  %v2851_v2 = vor.u32 %v2850_v34, %v2849_v50  ;;  %v11231_v13 = vld [vmem:[%s9349_s14 + $0xb8] sm:$0xff] }
 0x23e   : > { %v2853_v33 = vshrl.u32 %v9142_v54, %v2838_v23  ;;  %v2495_v15 = vsel %vm11134_vm9, %v10881_v16, %v2492_v12  ;;  %v11228_v52 = vsub.s32 %v2987_v28, %v2990_v22  ;;  %v2848_v48 = vor.u32 %v2847_v57, %v2846_v47 }
 0x23f   : > { %vm2855_vm5 = vcmp.lt.s32.totalorder %v2836_v25, 1  ;;  %v2715_v24 = vxor.u32 2147483648, %v8923_v59  ;;  %8926 = vcosq.f32 %v2495_v15  ;;  %vm2857_vm7 = vcmp.lt.s32.totalorder %v2836_v25, 3 }
 0x240   : > { %v2854_v62 = vor.u32 %v2853_v33, %v2852_v53  ;;  %vm2707_vm6 = vweird.f32 %v10847_v45  ;;  %8928 = vsinq.f32 %v2495_v15  ;;  %v2993_v60 = vsub.s32 0, %v11228_v52 }
 0x241   : > { %vm2856_vm8 = vcmp.lt.s32.totalorder %v2836_v25, 2  ;;  %vm2858_vm10 = vcmp.lt.s32.totalorder %v2836_v25, 4  ;;  %v2712_v32 = vxor.u32 2147483648, %v8925_v43  ;;  %v2863_v11 = vsel %vm2855_vm5, %v2842_v51, %v2845_v63 }
 0x242   : > { %v2860_v55 = vsel %vm2858_vm10, %v2848_v48, 2102212464  ;;  %v2864_v14 = vsel %vm2858_vm10, %v2851_v2, 920167782  ;;  %v8026_v5 = vmin.u32 %v2993_v60, %v11228_v52  ;;  %v2859_v23 = vsel %vm2855_vm5, %v2839_v8, %v2842_v51 }
 0x243   : > { %v2865_v28 = vsel %vm2857_vm7, %v2848_v48, %v2864_v14  ;;  %v3138_v3 = vand.u32 2139095040, %v11231_v13  ;;  %v2861_v18 = vsel %vm2857_vm7, %v2845_v63, %v2860_v55  ;;  %v2867_v39 = vsel %vm2855_vm5, %v2845_v63, %v2848_v48 }
 0x244   : > { %v2866_v29 = vsel %vm2856_vm8, %v2863_v11, %v2865_v28  ;;  %v2868_v17 = vsel %vm2858_vm10, %v2854_v62, 1326507024  ;;  %v2822_v1 = vsel %vm2811_vm2, nan, %v2821_v30  ;;  %vm2710_vm11 = vcmp.lt.s32.totalorder %v11173_v26, 2 }
 0x245   : > { %v2716_v19 = vsel %vm2714_vm3, %v2715_v24, %v8925_v43  ;;  %vm2929_vm12 = vcmp.lt.s32.totalorder %v10978_v4, 0  ;;  %v2995_v9 = vclz %v8026_v5  ;;  %v2713_v0 = vsel %vm2711_vm4, %v8923_v59, %v2712_v32 }
 0x246   : > { %v2869_v47 = vsel %vm2857_vm7, %v2851_v2, %v2868_v17  ;;  %v11253_v57 = vmul.u32.u64.low %v11217_v56, %v2866_v29  ;;  %v11254_v50 = vmul.u32.u64.high %v11217_v56, %v2866_v29, %v11253_v57  ;;  %v2862_v30 = vsel %vm2856_vm8, %v2859_v23, %v2861_v18  ;;  %v11297_v29 = vld [vmem:[%s9349_s14 + $0xb0] sm:$0xff] }
 0x247   : > { %v8027_v58 = vadd.s32 4294967294, %v2995_v9  ;;  %v2870_v37 = vsel %vm2856_vm8, %v2867_v39, %v2869_v47  ;;  %v3139_v34 = vshrl.u32 %v3138_v3, 23  ;;  %v11260_v22 = vmul.f32 %v2822_v1, %v11192_v49 }
 0x248   : > { %vm2499_vm13 = vweird.f32 %v10881_v16  ;;  %vm2503_vm9 = vcmp.eq.s32.totalorder %v11214_v61, 0  ;;  %vm11266_vm14 = vcmp.le.f32.partialorder %v2927_v36, 0.7853982  ;;  %v2717_v25 = vsel %vm2710_vm11, %v2713_v0, %v2716_v19 }
 0x249   : > { %v11271_v8 = vmul.u32.u64.low %v11217_v56, %v2870_v37  ;;  %v11272_v51 = vmul.u32.u64.high %v11217_v56, %v2870_v37, %v11271_v8  ;;  %v2983_v49 = vadd.s32 %v11153_v41, %v11167_v7  ;;  %vm8028_vm0 = vcmp.lt.s32.totalorder %v8027_v58, 0 }
 0x24a   : > { %v8033_v53 = vadd.s32 4294967169, %v3139_v34  ;;  %v2998_v43 = vsel %vm8028_vm0, 0, %v8027_v58  ;;  %v3013_v12 = vsub.s32 4, %v11209_v31  ;;  %v2878_v36 = vmul.u32 %v11217_v56, %v2862_v30 }
 0x24b   : > { %v2881_v63 = vadd.s32 1, %v11254_v50  ;;  %v2999_v2 = vsub.s32 32, %v2998_v43  ;;  %v3000_v33 = vshll.u32 %v11228_v52, %v2998_v43  ;;  %v3003_v15 = vsub.s32 4294967266, %v2998_v43 }
 0x24c   : > { %v3145_v48 = vadd.s32 1, %v8033_v53  ;;  %v2718_v26 = vsel %vm2707_vm6, nan, %v2717_v25  ;;  %vm2506_vm15 = vcmp.eq.s32.totalorder %v11214_v61, 2  ;;  %vm2880_vm1 = vc.u32 %v11272_v51, %v11253_v57  ;;  %v8927_v7 = vpop.eup %8926 }
 0x24d   : > { %v3135_v41 = vand.u32 2147483647, %v11231_v13  ;;  %v3001_v24 = vshrl.u32 %v2983_v49, %v2999_v2  ;;  %v3004_v56 = vadd.s32 127, %v3003_v15  ;;  %v2882_v62 = vsel %vm2880_vm1, %v2881_v63, %v11254_v50  ;;  %v8929_v52 = vpop.eup %8928 }
 0x24e   : > { %vm3146_vm2 = vcmp.gt.s32.totalorder %v3145_v48, 0  ;;  %v2507_v60 = vxor.u32 2147483648, %v8927_v7  ;;  %v3014_v45 = vsel %vm2929_vm12, %v3013_v12, %v11209_v31  ;;  %v2883_v32 = vadd.s32 %v2882_v62, %v2878_v36 }
 0x24f   : > { %v3147_v55 = vsel %vm3146_vm2, %v3145_v48, 0  ;;  %vm2502_vm3 = vcmp.lt.s32.totalorder %v11214_v61, 2  ;;  %v2504_v11 = vxor.u32 2147483648, %v8929_v52  ;;  %v3002_v14 = vor.u32 %v3001_v24, %v3000_v33 }
 0x250   : > { %v3005_v5 = vshll.u32 %v3004_v56, 23  ;;  %v4073_v23 = vmul.f32 %v2718_v26, %v11195_v10  ;;  %v2508_v28 = vsel %vm2506_vm15, %v2507_v60, %v8929_v52  ;;  %v2884_v3 = vadd.s32 536870912, %v2883_v32 }
 0x251   : > { %v3149_v18 = vand.u32 31, %v3147_v55  ;;  %v2505_v39 = vsel %vm2503_vm9, %v8927_v7, %v2504_v11  ;;  %v3009_v17 = vcvt.s32.f32 %v3002_v14  ;;  %v3016_v1 = vsel %vm11266_vm14, 0, %v3014_v45 }
 0x252   : > { %v3006_v31 = vor.u32 4788187, %v3005_v5  ;;  %v2509_v19 = vsel %vm2502_vm3, %v2505_v39, %v2508_v28  ;;  %v11303_v9 = vshrl.u32 %v2884_v3, 30  ;;  %v3142_v10 = vand.u32 8388607, %v3135_v41 }
 0x253   : > { %v3150_v0 = vsub.s32 32, %v3149_v18  ;;  %v2510_v47 = vsel %vm2499_vm13, nan, %v2509_v19  ;;  %v11309_v58 = vshrl.u32 %v3147_v55, 5  ;;  %v3034_v61 = vand.u32 2139095040, %v11297_v29 }
 0x254   : > { %v3007_v50 = vand.u32 2147483647, %v3006_v31  ;;  %v4071_v30 = vmul.f32 %v2510_v47, %v11189_v27  ;;  %v2886_v37 = vshll.u32 %v11303_v9, 30  ;;  %v3152_v34 = vshll.u32 %v9137_v38, %v3149_v18 }
 0x255   : > { %v3155_v8 = vshll.u32 %v9138_v40, %v3149_v18  ;;  %v3153_v49 = vshrl.u32 %v9138_v40, %v3150_v0  ;;  %v3156_v53 = vshrl.u32 %v9139_v42, %v3150_v0  ;;  %v3158_v16 = vshll.u32 %v9139_v42, %v3149_v18 }
 0x256   : > { %v3010_v25 = vmul.f32 %v3009_v17, %v3007_v50  ;;  %8452 = vmatprep.mubr.f32.mxu1 %v4071_v30  ;;  %v11319_v43 = vsub.s32 %v2883_v32, %v2886_v37  ;;  %v3159_v12 = vshrl.u32 %v9140_v44, %v3150_v0  ;;  %v3161_v27 = vshll.u32 %v9140_v44, %v3149_v18 }
 0x257   : > { %v3162_v36 = vshrl.u32 %v9141_v46, %v3150_v0  ;;  %v11324_v2 = vadd.s32 3, %v3016_v1  ;;  %8453 = vmatmul.mubr.f32.vlgmr.msra.gmra.mxu1 %v11198_v6  ;;  %v3143_v33 = vor.u32 8388608, %v3142_v10  ;;  %v3035_v15 = vshrl.u32 %v3034_v61, 23 }
 0x258   : > { %v3011_v63 = vxor.u32 2147483648, %v3010_v25  ;;  %v2889_v48 = vsub.s32 0, %v11319_v43  ;;  %8455 = vmatprep.mubr.f32.mxu1 %v4073_v23  ;;  %v3151_v26 = vshrl.u32 %v9137_v38, %v3150_v0  ;;  %v3154_v7 = vor.u32 %v3153_v49, %v3152_v34 }
 0x259   : > { %v3157_v24 = vor.u32 %v3156_v53, %v3155_v8  ;;  %v3163_v62 = vor.u32 %v3162_v36, %v3161_v27  ;;  %v3164_v52 = vshll.u32 %v9141_v46, %v3149_v18  ;;  %v3165_v60 = vshrl.u32 %v9142_v54, %v3150_v0 }
 0x25a   : > { %v3012_v56 = vsel %vm2929_vm12, %v3011_v63, %v3010_v25  ;;  %vm2825_vm4 = vcmp.lt.s32.totalorder %v11069_v20, 0  ;;  %v8022_v6 = vmin.u32 %v2889_v48, %v11319_v43  ;;  %v3160_v45 = vor.u32 %v3159_v12, %v3158_v16  ;;  %v8404_v12 = vpop.f32.mrf.mxu0 }
 0x25b   : > { %vm3167_vm5 = vcmp.lt.s32.totalorder %v11309_v58, 1  ;;  %v3031_v32 = vand.u32 2147483647, %v11297_v29  ;;  %v3166_v55 = vor.u32 %v3165_v60, %v3164_v52  ;;  %vm3169_vm7 = vcmp.lt.s32.totalorder %v11309_v58, 3  ;;  %8456 = vmatmul.mubr.f32.gmra.mxu1 %v11260_v22 }
 0x25c   : > { %vm3170_vm6 = vcmp.lt.s32.totalorder %v11309_v58, 4  ;;  %v3183_v11 = vshll.u32 %v3143_v33, 8  ;;  %v3015_v14 = vsel %vm11266_vm14, %v10978_v4, %v3012_v56  ;;  %v2891_v5 = vclz %v8022_v6 }
 0x25d   : > { %vm3168_vm8 = vcmp.lt.s32.totalorder %v11309_v58, 2  ;;  %v8029_v23 = vadd.s32 4294967169, %v3035_v15  ;;  %v3171_v28 = vsel %vm3167_vm5, %v3151_v26, %v3154_v7  ;;  %v3172_v3 = vsel %vm3170_vm6, %v3160_v45, 2102212464 }
 0x25e   : > { %v3175_v18 = vsel %vm3167_vm5, %v3154_v7, %v3157_v24  ;;  %v3176_v22 = vsel %vm3170_vm6, %v3163_v62, 920167782  ;;  %v8023_v39 = vadd.s32 4294967294, %v2891_v5  ;;  %v3173_v59 = vsel %vm3169_vm7, %v3157_v24, %v3172_v3 }
 0x25f   : > { %v3177_v31 = vsel %vm3169_vm7, %v3160_v45, %v3176_v22  ;;  %v3179_v17 = vsel %vm3167_vm5, %v3157_v24, %v3160_v45  ;;  %v2879_v1 = vadd.s32 %v11253_v57, %v11272_v51  ;;  %v2909_v19 = vsub.s32 4, %v11303_v9 }
 0x260   : > { %v3178_v10 = vsel %vm3168_vm8, %v3175_v18, %v3177_v31  ;;  %v3180_v0 = vsel %vm3170_vm6, %v3166_v55, 1326507024  ;;  %vm8024_vm10 = vcmp.lt.s32.totalorder %v8023_v39, 0  ;;  %8930 = vcosq.f32 %v3015_v14 }
 0x261   : > { %v3181_v47 = vsel %vm3169_vm7, %v3163_v62, %v3180_v0  ;;  %v11367_v50 = vmul.u32.u64.low %v3183_v11, %v3178_v10  ;;  %v11368_v61 = vmul.u32.u64.high %v3183_v11, %v3178_v10, %v11367_v50  ;;  %v2894_v30 = vsel %vm8024_vm10, 0, %v8023_v39 }
 0x262   : > { %v3174_v57 = vsel %vm3168_vm8, %v3171_v28, %v3173_v59  ;;  %v3182_v51 = vsel %vm3168_vm8, %v3179_v17, %v3181_v47  ;;  %v2895_v37 = vsub.s32 32, %v2894_v30  ;;  %v2896_v34 = vshll.u32 %v11319_v43, %v2894_v30 }
 0x263   : > { %v2899_v8 = vsub.s32 4294967266, %v2894_v30  ;;  %v3041_v25 = vadd.s32 1, %v8029_v23  ;;  %8932 = vsinq.f32 %v3015_v14  ;;  %v2910_v49 = vsel %vm2825_vm4, %v2909_v19, %v11303_v9 }
 0x264   : > { %v11379_v53 = vmul.u32.u64.low %v3183_v11, %v3182_v51  ;;  %v11380_v16 = vmul.u32.u64.high %v3183_v11, %v3182_v51, %v11379_v53  ;;  %v2897_v27 = vshrl.u32 %v2879_v1, %v2895_v37  ;;  %v3193_v63 = vadd.s32 1, %v11368_v61 }
 0x265   : > { %v2900_v36 = vadd.s32 127, %v2899_v8  ;;  %vm3042_vm11 = vcmp.gt.s32.totalorder %v3041_v25, 0  ;;  %vm11385_vm12 = vcmp.le.f32.partialorder %v2823_v35, 0.7853982  ;;  %v3190_v43 = vmul.u32 %v3183_v11, %v3174_v57  ;;  %v2331_v35 = vpop.f32.mrf.mxu0 }
 0x266   : > { %v3043_v33 = vsel %vm3042_vm11, %v3041_v25, 0  ;;  %v2898_v15 = vor.u32 %v2897_v27, %v2896_v34  ;;  %v3038_v9 = vand.u32 8388607, %v3031_v32  ;;  %v11392_v7 = vand.u32 3, %v11324_v2 }
 0x267   : > { %v2901_v48 = vshll.u32 %v2900_v36, 23  ;;  %v3045_v26 = vand.u32 31, %v3043_v33  ;;  %v2912_v24 = vsel %vm11385_vm12, 0, %v2910_v49  ;;  %vm3192_vm13 = vc.u32 %v11380_v16, %v11367_v50 }
 0x268   : > { %v2905_v62 = vcvt.s32.f32 %v2898_v15  ;;  %v3194_v52 = vsel %vm3192_vm13, %v3193_v63, %v11368_v61  ;;  %v11400_v45 = vadd.f32 %v8404_v12, %v11058_v21  ;;  %v2916_v11 = vadd.s32 3, %v2912_v24 }
 0x269   : > { %v2902_v56 = vor.u32 4788187, %v2901_v48  ;;  %v3046_v60 = vsub.s32 32, %v3045_v26  ;;  %v3195_v6 = vadd.s32 %v3194_v52, %v3190_v43  ;;  %v3039_v2 = vor.u32 8388608, %v3038_v9  ;;  %v11433_v43 = vld [vmem:[%s9349_s14 + $0xc8] sm:$0xff] }
 0x26a   : > { %v11403_v14 = vadd.f32 %v11058_v21, %v2331_v35  ;;  %v3048_v23 = vshll.u32 %v9137_v38, %v3045_v26  ;;  %vm3026_vm9 = vcmp.eq.s32.totalorder %v11392_v7, 2  ;;  %v3044_v18 = vshrl.u32 %v3043_v33, 5 }
 0x26b   : > { %v2903_v55 = vand.u32 2147483647, %v2902_v56  ;;  %v3196_v5 = vadd.s32 536870912, %v3195_v6  ;;  %v3049_v28 = vshrl.u32 %v9138_v40, %v3046_v60  ;;  %v3051_v22 = vshll.u32 %v9138_v40, %v3045_v26 }
 0x26c   : > { %v3052_v39 = vshrl.u32 %v9139_v42, %v3046_v60  ;;  %vm3023_vm14 = vcmp.eq.s32.totalorder %v11392_v7, 0  ;;  %v3054_v21 = vshll.u32 %v9139_v42, %v3045_v26  ;;  %v3055_v31 = vshrl.u32 %v9140_v44, %v3046_v60 }
 0x26d   : > { %v2906_v3 = vmul.f32 %v2905_v62, %v2903_v55  ;;  %v11411_v59 = vshrl.u32 %v3196_v5, 30  ;;  %v3057_v17 = vshll.u32 %v9140_v44, %v3045_v26  ;;  %v8931_v1 = vpop.eup %8930  ;;  %v11416_v10 = vand.u32 3, %v2916_v11 }
 0x26e   : > { %v3058_v0 = vshrl.u32 %v9141_v46, %v3046_v60  ;;  %v11419_v47 = vshll.u32 %v3039_v2, 8  ;;  %v3047_v30 = vshrl.u32 %v9137_v38, %v3046_v60  ;;  %v3050_v57 = vor.u32 %v3049_v28, %v3048_v23 }
 0x26f   : > { %v2907_v19 = vxor.u32 2147483648, %v2906_v3  ;;  %v3198_v61 = vshll.u32 %v11411_v59, 30  ;;  %v3060_v51 = vshll.u32 %v9141_v46, %v3045_v26  ;;  %v3053_v8 = vor.u32 %v3052_v39, %v3051_v22 }
 0x270   : > { %v8933_v37 = vpop.eup %8932  ;;  %v3059_v25 = vor.u32 %v3058_v0, %v3057_v17  ;;  %v3061_v49 = vshrl.u32 %v9142_v54, %v3046_v60  ;;  %v3056_v27 = vor.u32 %v3055_v31, %v3054_v21  ;;  %vm3063_vm0 = vcmp.lt.s32.totalorder %v3044_v18, 1 }
 0x271   : > { %v2908_v34 = vsel %vm2825_vm4, %v2907_v19, %v2906_v3  ;;  %v11430_v12 = vsub.s32 %v3195_v6, %v3198_v61  ;;  %v3027_v36 = vxor.u32 2147483648, %v8931_v1  ;;  %vm3065_vm15 = vcmp.lt.s32.totalorder %v3044_v18, 3 }
 0x272   : > { %v2911_v53 = vsel %vm11385_vm12, %v11069_v20, %v2908_v34  ;;  %v3062_v63 = vor.u32 %v3061_v49, %v3060_v51  ;;  %vm3019_vm1 = vweird.f32 %v10978_v4  ;;  %vm3064_vm2 = vcmp.lt.s32.totalorder %v3044_v18, 2 }
 0x273   : > { %8934 = vcosq.f32 %v2911_v53  ;;  %v3201_v33 = vsub.s32 0, %v11430_v12  ;;  %vm3066_vm3 = vcmp.lt.s32.totalorder %v3044_v18, 4  ;;  %v3024_v15 = vxor.u32 2147483648, %v8933_v37 }
 0x274   : > { %8936 = vsinq.f32 %v2911_v53  ;;  %v3068_v58 = vsel %vm3066_vm3, %v3056_v27, 2102212464  ;;  %v3071_v48 = vsel %vm3063_vm0, %v3050_v57, %v3053_v8  ;;  %v3072_v9 = vsel %vm3066_vm3, %v3059_v25, 920167782 }
 0x275   : > { %v8034_v26 = vmin.u32 %v3201_v33, %v11430_v12  ;;  %v3067_v24 = vsel %vm3063_vm0, %v3047_v30, %v3050_v57  ;;  %v3073_v35 = vsel %vm3065_vm15, %v3056_v27, %v3072_v9  ;;  %v3346_v56 = vand.u32 2139095040, %v11433_v43 }
 0x276   : > { %v3069_v62 = vsel %vm3065_vm15, %v3053_v8, %v3068_v58  ;;  %v3074_v52 = vsel %vm3064_vm2, %v3071_v48, %v3073_v35  ;;  %v3075_v60 = vsel %vm3063_vm0, %v3053_v8, %v3056_v27  ;;  %v3076_v6 = vsel %vm3066_vm3, %v3062_v63, 1326507024 }
 0x277   : > { %vm3022_vm4 = vcmp.lt.s32.totalorder %v11392_v7, 2  ;;  %v3028_v55 = vsel %vm3026_vm9, %v3027_v36, %v8933_v37  ;;  %vm3137_vm5 = vcmp.lt.s32.totalorder %v11231_v13, 0  ;;  %v3203_v11 = vclz %v8034_v26 }
 0x278   : > { %v3025_v2 = vsel %vm3023_vm14, %v8931_v1, %v3024_v15  ;;  %v3077_v5 = vsel %vm3065_vm15, %v3059_v25, %v3076_v6  ;;  %v11453_v23 = vmul.u32.u64.low %v11419_v47, %v3074_v52  ;;  %v11454_v28 = vmul.u32.u64.high %v11419_v47, %v3074_v52, %v11453_v23 }
 0x279   : > { %v8035_v3 = vadd.s32 4294967294, %v3203_v11  ;;  %v3070_v22 = vsel %vm3064_vm2, %v3067_v24, %v3069_v62  ;;  %v3078_v39 = vsel %vm3064_vm2, %v3075_v60, %v3077_v5  ;;  %v3347_v21 = vshrl.u32 %v3346_v56, 23  ;;  %v11494_v24 = vld [vmem:[%s9349_s14 + $0xc0] sm:$0xff] }
 0x27a   : > { %vm2915_vm7 = vweird.f32 %v11069_v20  ;;  %vm2919_vm6 = vcmp.eq.s32.totalorder %v11416_v10, 0  ;;  %vm11463_vm8 = vcmp.le.f32.partialorder %v3135_v41, 0.7853982  ;;  %v3029_v19 = vsel %vm3022_vm4, %v3025_v2, %v3028_v55 }
 0x27b   : > { %v11468_v17 = vmul.u32.u64.low %v11419_v47, %v3078_v39  ;;  %v11469_v1 = vmul.u32.u64.high %v11419_v47, %v3078_v39, %v11468_v17  ;;  %v3191_v18 = vadd.s32 %v11367_v50, %v11380_v16  ;;  %vm8036_vm10 = vcmp.lt.s32.totalorder %v8035_v3, 0 }
 0x27c   : > { %v8041_v0 = vadd.s32 4294967169, %v3347_v21  ;;  %v3206_v61 = vsel %vm8036_vm10, 0, %v8035_v3  ;;  %v3221_v30 = vsub.s32 4, %v11411_v59  ;;  %v3086_v41 = vmul.u32 %v11419_v47, %v3070_v22 }
 0x27d   : > { %v3089_v57 = vadd.s32 1, %v11454_v28  ;;  %v3207_v51 = vsub.s32 32, %v3206_v61  ;;  %v3208_v37 = vshll.u32 %v11430_v12, %v3206_v61  ;;  %v3211_v34 = vsub.s32 4294967266, %v3206_v61 }
 0x27e   : > { %v3353_v8 = vadd.s32 1, %v8041_v0  ;;  %v3030_v7 = vsel %vm3019_vm1, nan, %v3029_v19  ;;  %vm2922_vm11 = vcmp.eq.s32.totalorder %v11416_v10, 2  ;;  %vm3088_vm12 = vc.u32 %v11469_v1, %v11453_v23 }
 0x27f   : > { %v3343_v50 = vand.u32 2147483647, %v11433_v43  ;;  %v3209_v25 = vshrl.u32 %v3191_v18, %v3207_v51  ;;  %v3212_v47 = vadd.s32 127, %v3211_v34  ;;  %v3090_v49 = vsel %vm3088_vm12, %v3089_v57, %v11454_v28 }
 0x280   : > { %v8935_v16 = vpop.eup %8934  ;;  %vm3354_vm13 = vcmp.gt.s32.totalorder %v3353_v8, 0  ;;  %v3222_v4 = vsel %vm3137_vm5, %v3221_v30, %v11411_v59  ;;  %v3091_v27 = vadd.s32 %v3090_v49, %v3086_v41  ;;  %vm2918_vm9 = vcmp.lt.s32.totalorder %v11416_v10, 2 }
 0x281   : > { %v8937_v53 = vpop.eup %8936  ;;  %v2923_v12 = vxor.u32 2147483648, %v8935_v16  ;;  %v3355_v36 = vsel %vm3354_vm13, %v3353_v8, 0  ;;  %v3210_v33 = vor.u32 %v3209_v25, %v3208_v37  ;;  %v3213_v15 = vshll.u32 %v3212_v47, 23 }
 0x282   : > { %v2920_v63 = vxor.u32 2147483648, %v8937_v53  ;;  %v4076_v58 = vmul.f32 %v3030_v7, %v11400_v45  ;;  %v3092_v9 = vadd.s32 536870912, %v3091_v27  ;;  %v3357_v26 = vand.u32 31, %v3355_v36 }
 0x283   : > { %v2924_v48 = vsel %vm2922_vm11, %v2923_v12, %v8937_v53  ;;  %v3214_v59 = vor.u32 4788187, %v3213_v15  ;;  %v3217_v56 = vcvt.s32.f32 %v3210_v33  ;;  %v3224_v62 = vsel %vm11463_vm8, 0, %v3222_v4 }
 0x284   : > { %v2921_v35 = vsel %vm2919_vm6, %v8935_v16, %v2920_v63  ;;  %v11500_v60 = vshrl.u32 %v3092_v9, 30  ;;  %v3350_v45 = vand.u32 8388607, %v3343_v50  ;;  %v3358_v6 = vsub.s32 32, %v3357_v26 }
 0x285   : > { %v2925_v52 = vsel %vm2918_vm9, %v2921_v35, %v2924_v48  ;;  %v3215_v11 = vand.u32 2147483647, %v3214_v59  ;;  %v3356_v2 = vshrl.u32 %v3355_v36, 5  ;;  %v3242_v10 = vand.u32 2139095040, %v11494_v24 }
 0x286   : > { %v2926_v55 = vsel %vm2915_vm7, nan, %v2925_v52  ;;  %v3094_v28 = vshll.u32 %v11500_v60, 30  ;;  %v3360_v3 = vshll.u32 %v9137_v38, %v3357_v26  ;;  %v3363_v22 = vshll.u32 %v9138_v40, %v3357_v26 }
 0x287   : > { %v4075_v5 = vmul.f32 %v2926_v55, %v11403_v14  ;;  %v3218_v39 = vmul.f32 %v3217_v56, %v3215_v11  ;;  %v3361_v21 = vshrl.u32 %v9138_v40, %v3358_v6  ;;  %v3364_v17 = vshrl.u32 %v9139_v42, %v3358_v6 }
 0x288   : > { %v3366_v20 = vshll.u32 %v9139_v42, %v3357_v26  ;;  %v11514_v19 = vsub.s32 %v3091_v27, %v3094_v28  ;;  %v3367_v18 = vshrl.u32 %v9140_v44, %v3358_v6  ;;  %v3369_v14 = vshll.u32 %v9140_v44, %v3357_v26 }
 0x289   : > { %8458 = vmatprep.mubr.f32.mxu1 %v4075_v5  ;;  %v3370_v0 = vshrl.u32 %v9141_v46, %v3358_v6  ;;  %v3219_v61 = vxor.u32 2147483648, %v3218_v39  ;;  %v11519_v30 = vadd.s32 3, %v3224_v62  ;;  %v3351_v41 = vor.u32 8388608, %v3350_v45 }
 0x28a   : > { %8459 = vmatmul.mubr.f32.gmra.mxu1 %v4076_v58  ;;  %v3243_v57 = vshrl.u32 %v3242_v10, 23  ;;  %v3097_v51 = vsub.s32 0, %v11514_v19  ;;  %v3359_v37 = vshrl.u32 %v9137_v38, %v3358_v6  ;;  %v3362_v34 = vor.u32 %v3361_v21, %v3360_v3 }
 0x28b   : > { %v3365_v8 = vor.u32 %v3364_v17, %v3363_v22  ;;  %v3220_v7 = vsel %vm3137_vm5, %v3219_v61, %v3218_v39  ;;  %v3371_v16 = vor.u32 %v3370_v0, %v3369_v14  ;;  %v3372_v25 = vshll.u32 %v9141_v46, %v3357_v26 }
 0x28c   : > { %v3373_v47 = vshrl.u32 %v9142_v54, %v3358_v6  ;;  %vm3033_vm14 = vcmp.lt.s32.totalorder %v11297_v29, 0  ;;  %v8030_v49 = vmin.u32 %v3097_v51, %v11514_v19  ;;  %v3368_v53 = vor.u32 %v3367_v18, %v3366_v20  ;;  %v8407_v20 = vpop.f32.mrf.mxu0 }
 0x28d   : > { %vm3375_vm0 = vcmp.lt.s32.totalorder %v3356_v2, 1  ;;  %v3239_v12 = vand.u32 2147483647, %v11494_v24  ;;  %vm3377_vm15 = vcmp.lt.s32.totalorder %v3356_v2, 3  ;;  %vm3378_vm1 = vcmp.lt.s32.totalorder %v3356_v2, 4 }
 0x28e   : > { %v3374_v4 = vor.u32 %v3373_v47, %v3372_v25  ;;  %v3391_v27 = vshll.u32 %v3351_v41, 8  ;;  %v3223_v36 = vsel %vm11463_vm8, %v11231_v13, %v3220_v7  ;;  %v3099_v63 = vclz %v8030_v49  ;;  %v11579_v49 = vld [vmem:[%s15159_s3] ss:$0 sm:$0xff] }
 0x28f   : > { %vm3376_vm2 = vcmp.lt.s32.totalorder %v3356_v2, 2  ;;  %v8037_v33 = vadd.s32 4294967169, %v3243_v57  ;;  %v3379_v15 = vsel %vm3375_vm0, %v3359_v37, %v3362_v34  ;;  %v3380_v58 = vsel %vm3378_vm1, %v3368_v53, 2102212464 }
 0x290   : > { %v3383_v48 = vsel %vm3375_vm0, %v3362_v34, %v3365_v8  ;;  %v3384_v9 = vsel %vm3378_vm1, %v3371_v16, 920167782  ;;  %v8031_v26 = vadd.s32 4294967294, %v3099_v63  ;;  %v3381_v35 = vsel %vm3377_vm15, %v3365_v8, %v3380_v58 }
 0x291   : > { %v3385_v59 = vsel %vm3377_vm15, %v3368_v53, %v3384_v9  ;;  %v3387_v56 = vsel %vm3375_vm0, %v3365_v8, %v3368_v53  ;;  %v3087_v31 = vadd.s32 %v11453_v23, %v11469_v1  ;;  %v3117_v62 = vsub.s32 4, %v11500_v60 }
 0x292   : > { %v3386_v52 = vsel %vm3376_vm2, %v3383_v48, %v3385_v59  ;;  %v3388_v45 = vsel %vm3378_vm1, %v3374_v4, 1326507024  ;;  %vm8032_vm3 = vcmp.lt.s32.totalorder %v8031_v26, 0  ;;  %8938 = vcosq.f32 %v3223_v36 }
 0x293   : > { %v3389_v6 = vsel %vm3377_vm15, %v3371_v16, %v3388_v45  ;;  %v11546_v55 = vmul.u32.u64.low %v3391_v27, %v3386_v52  ;;  %v11547_v11 = vmul.u32.u64.high %v3391_v27, %v3386_v52, %v11546_v55  ;;  %v3102_v10 = vsel %vm8032_vm3, 0, %v8031_v26 }
 0x294   : > { %v3382_v5 = vsel %vm3376_vm2, %v3379_v15, %v3381_v35  ;;  %v3390_v28 = vsel %vm3376_vm2, %v3387_v56, %v3389_v6  ;;  %v3103_v23 = vsub.s32 32, %v3102_v10  ;;  %v3104_v1 = vshll.u32 %v11514_v19, %v3102_v10 }
 0x295   : > { %v3107_v3 = vsub.s32 4294967266, %v3102_v10  ;;  %v3249_v22 = vadd.s32 1, %v8037_v33  ;;  %8940 = vsinq.f32 %v3223_v36  ;;  %v3118_v39 = vsel %vm3033_vm14, %v3117_v62, %v11500_v60 }
 0x296   : > { %v11556_v21 = vmul.u32.u64.low %v3391_v27, %v3390_v28  ;;  %v11557_v17 = vmul.u32.u64.high %v3391_v27, %v3390_v28, %v11556_v21  ;;  %v3105_v18 = vshrl.u32 %v3087_v31, %v3103_v23  ;;  %v3401_v0 = vadd.s32 1, %v11547_v11 }
 0x297   : > { %v3108_v14 = vadd.s32 127, %v3107_v3  ;;  %vm3250_vm4 = vcmp.gt.s32.totalorder %v3249_v22, 0  ;;  %vm11562_vm5 = vcmp.le.f32.partialorder %v3031_v32, 0.7853982  ;;  %v3398_v19 = vmul.u32 %v3391_v27, %v3382_v5  ;;  %v2341_v32 = vpop.f32.mrf.mxu0 }
 0x298   : > { %v3251_v61 = vsel %vm3250_vm4, %v3249_v22, 0  ;;  %v3106_v41 = vor.u32 %v3105_v18, %v3104_v1  ;;  %v3246_v60 = vand.u32 8388607, %v3239_v12  ;;  %v11569_v37 = vand.u32 3, %v11519_v30 }
 0x299   : > { %v3109_v57 = vshll.u32 %v3108_v14, 23  ;;  %v3253_v51 = vand.u32 31, %v3251_v61  ;;  %v3120_v34 = vsel %vm11562_vm5, 0, %v3118_v39  ;;  %vm3400_vm7 = vc.u32 %v11557_v17, %v11546_v55 }
 0x29a   : > { %v3113_v7 = vcvt.s32.f32 %v3106_v41  ;;  %v3402_v16 = vsel %vm3400_vm7, %v3401_v0, %v11547_v11  ;;  %v11582_v30 = vadd.f32 %v11579_v49, %v8407_v20  ;;  %v3124_v4 = vadd.s32 3, %v3120_v34 }
 0x29b   : > { %v3110_v8 = vor.u32 4788187, %v3109_v57  ;;  %v3254_v25 = vsub.s32 32, %v3253_v51  ;;  %v3403_v47 = vadd.s32 %v3402_v16, %v3398_v19  ;;  %v3247_v27 = vor.u32 8388608, %v3246_v60 }
 0x29c   : > { %v11585_v36 = vadd.f32 %v11579_v49, %v2341_v32  ;;  %v3256_v33 = vshll.u32 %v9137_v38, %v3253_v51  ;;  %vm3234_vm6 = vcmp.eq.s32.totalorder %v11569_v37, 2  ;;  %v3252_v48 = vshrl.u32 %v3251_v61, 5  ;;  %v11615_v61 = vld [vmem:[%s9349_s14 + $0xd8] sm:$0xff] }
 0x29d   : > { %v3111_v53 = vand.u32 2147483647, %v3110_v8  ;;  %v3404_v63 = vadd.s32 536870912, %v3403_v47  ;;  %v3257_v15 = vshrl.u32 %v9138_v40, %v3254_v25  ;;  %v3259_v9 = vshll.u32 %v9138_v40, %v3253_v51 }
 0x29e   : > { %v3260_v26 = vshrl.u32 %v9139_v42, %v3254_v25  ;;  %vm3231_vm8 = vcmp.eq.s32.totalorder %v11569_v37, 0  ;;  %v3262_v59 = vshll.u32 %v9139_v42, %v3253_v51  ;;  %v3263_v56 = vshrl.u32 %v9140_v44, %v3254_v25 }
 0x29f   : > { %v3114_v58 = vmul.f32 %v3113_v7, %v3111_v53  ;;  %v11593_v35 = vshrl.u32 %v3404_v63, 30  ;;  %v3265_v31 = vshll.u32 %v9140_v44, %v3253_v51  ;;  %v8939_v62 = vpop.eup %8938  ;;  %v11598_v45 = vand.u32 3, %v3124_v4 }
 0x2a0   : > { %v3266_v6 = vshrl.u32 %v9141_v46, %v3254_v25  ;;  %v11601_v11 = vshll.u32 %v3247_v27, 8  ;;  %v3255_v5 = vshrl.u32 %v9137_v38, %v3254_v25  ;;  %v3258_v28 = vor.u32 %v3257_v15, %v3256_v33 }
 0x2a1   : > { %v3115_v52 = vxor.u32 2147483648, %v3114_v58  ;;  %v3406_v10 = vshll.u32 %v11593_v35, 30  ;;  %v3268_v23 = vshll.u32 %v9141_v46, %v3253_v51  ;;  %v3261_v22 = vor.u32 %v3260_v26, %v3259_v9 }
 0x2a2   : > { %v8941_v1 = vpop.eup %8940  ;;  %v3267_v39 = vor.u32 %v3266_v6, %v3265_v31  ;;  %v3269_v21 = vshrl.u32 %v9142_v54, %v3254_v25  ;;  %v3264_v14 = vor.u32 %v3263_v56, %v3262_v59  ;;  %vm3271_vm10 = vcmp.lt.s32.totalorder %v3252_v48, 1 }
 0x2a3   : > { %v3116_v3 = vsel %vm3033_vm14, %v3115_v52, %v3114_v58  ;;  %v11612_v18 = vsub.s32 %v3403_v47, %v3406_v10  ;;  %v3235_v0 = vxor.u32 2147483648, %v8939_v62  ;;  %vm3273_vm11 = vcmp.lt.s32.totalorder %v3252_v48, 3 }
 0x2a4   : > { %v3119_v20 = vsel %vm11562_vm5, %v11297_v29, %v3116_v3  ;;  %v3270_v19 = vor.u32 %v3269_v21, %v3268_v23  ;;  %vm3227_vm12 = vweird.f32 %v11231_v13  ;;  %vm3272_vm13 = vcmp.lt.s32.totalorder %v3252_v48, 2 }
 0x2a5   : > { %8942 = vcosq.f32 %v3119_v20  ;;  %v3409_v41 = vsub.s32 0, %v11612_v18  ;;  %vm3274_vm9 = vcmp.lt.s32.totalorder %v3252_v48, 4  ;;  %v3232_v57 = vxor.u32 2147483648, %v8941_v1 }
 0x2a6   : > { %8944 = vsinq.f32 %v3119_v20  ;;  %v3276_v2 = vsel %vm3274_vm9, %v3264_v14, 2102212464  ;;  %v3279_v60 = vsel %vm3271_vm10, %v3258_v28, %v3261_v22  ;;  %v3280_v51 = vsel %vm3274_vm9, %v3267_v39, 920167782 }
 0x2a7   : > { %v8042_v34 = vmin.u32 %v3409_v41, %v11612_v18  ;;  %v3275_v32 = vsel %vm3271_vm10, %v3255_v5, %v3258_v28  ;;  %v3281_v8 = vsel %vm3273_vm11, %v3264_v14, %v3280_v51  ;;  %v3554_v7 = vand.u32 2139095040, %v11615_v61 }
 0x2a8   : > { %v3277_v16 = vsel %vm3273_vm11, %v3261_v22, %v3276_v2  ;;  %v3282_v25 = vsel %vm3272_vm13, %v3279_v60, %v3281_v8  ;;  %v3283_v47 = vsel %vm3271_vm10, %v3261_v22, %v3264_v14  ;;  %v3284_v53 = vsel %vm3274_vm9, %v3270_v19, 1326507024  ;;  %v11676_v8 = vld [vmem:[%s9349_s14 + $0xd0] sm:$0xff] }
 0x2a9   : > { %vm3230_vm14 = vcmp.lt.s32.totalorder %v11569_v37, 2  ;;  %v3236_v4 = vsel %vm3234_vm6, %v3235_v0, %v8941_v1  ;;  %vm3345_vm0 = vcmp.lt.s32.totalorder %v11433_v43, 0  ;;  %v3411_v27 = vclz %v8042_v34 }
 0x2aa   : > { %v3233_v63 = vsel %vm3231_vm8, %v8939_v62, %v3232_v57  ;;  %v3285_v33 = vsel %vm3273_vm11, %v3267_v39, %v3284_v53  ;;  %v11635_v15 = vmul.u32.u64.low %v11601_v11, %v3282_v25  ;;  %v11636_v58 = vmul.u32.u64.high %v11601_v11, %v3282_v25, %v11635_v15 }
 0x2ab   : > { %v8043_v9 = vadd.s32 4294967294, %v3411_v27  ;;  %v3278_v26 = vsel %vm3272_vm13, %v3275_v32, %v3277_v16  ;;  %v3286_v59 = vsel %vm3272_vm13, %v3283_v47, %v3285_v33  ;;  %v3555_v56 = vshrl.u32 %v3554_v7, 23 }
 0x2ac   : > { %vm3123_vm15 = vweird.f32 %v11297_v29  ;;  %vm3127_vm1 = vcmp.eq.s32.totalorder %v11598_v45, 0  ;;  %vm11645_vm2 = vcmp.le.f32.partialorder %v3343_v50, 0.7853982  ;;  %v3237_v6 = vsel %vm3230_vm14, %v3233_v63, %v3236_v4 }
 0x2ad   : > { %v11650_v62 = vmul.u32.u64.low %v11601_v11, %v3286_v59  ;;  %v11651_v52 = vmul.u32.u64.high %v11601_v11, %v3286_v59, %v11650_v62  ;;  %v3399_v48 = vadd.s32 %v11546_v55, %v11557_v17  ;;  %vm8044_vm3 = vcmp.lt.s32.totalorder %v8043_v9, 0 }
 0x2ae   : > { %v8049_v10 = vadd.s32 4294967169, %v3555_v56  ;;  %v3414_v5 = vsel %vm8044_vm3, 0, %v8043_v9  ;;  %v3429_v28 = vsub.s32 4, %v11593_v35  ;;  %v3294_v50 = vmul.u32 %v11601_v11, %v3278_v26 }
 0x2af   : > { %v3297_v23 = vadd.s32 1, %v11636_v58  ;;  %v3415_v1 = vsub.s32 32, %v3414_v5  ;;  %v3416_v3 = vshll.u32 %v11612_v18, %v3414_v5  ;;  %v3419_v22 = vsub.s32 4294967266, %v3414_v5 }
 0x2b0   : > { %v3561_v39 = vadd.s32 1, %v8049_v10  ;;  %v3238_v37 = vsel %vm3227_vm12, nan, %v3237_v6  ;;  %vm3130_vm4 = vcmp.eq.s32.totalorder %v11598_v45, 2  ;;  %vm3296_vm5 = vc.u32 %v11651_v52, %v11635_v15 }
 0x2b1   : > { %v3551_v55 = vand.u32 2147483647, %v11615_v61  ;;  %v3417_v21 = vshrl.u32 %v3399_v48, %v3415_v1  ;;  %v3420_v11 = vadd.s32 127, %v3419_v22  ;;  %v3298_v20 = vsel %vm3296_vm5, %v3297_v23, %v11636_v58 }
 0x2b2   : > { %v8943_v17 = vpop.eup %8942  ;;  %vm3562_vm7 = vcmp.gt.s32.totalorder %v3561_v39, 0  ;;  %v3430_v13 = vsel %vm3345_vm0, %v3429_v28, %v11593_v35  ;;  %v3299_v0 = vadd.s32 %v3298_v20, %v3294_v50  ;;  %vm3126_vm6 = vcmp.lt.s32.totalorder %v11598_v45, 2 }
 0x2b3   : > { %v8945_v18 = vpop.eup %8944  ;;  %v3131_v14 = vxor.u32 2147483648, %v8943_v17  ;;  %v3563_v19 = vsel %vm3562_vm7, %v3561_v39, 0  ;;  %v3418_v57 = vor.u32 %v3417_v21, %v3416_v3  ;;  %v3421_v2 = vshll.u32 %v3420_v11, 23 }
 0x2b4   : > { %v3128_v41 = vxor.u32 2147483648, %v8945_v18  ;;  %v4078_v60 = vmul.f32 %v3238_v37, %v11582_v30  ;;  %v3300_v34 = vadd.s32 536870912, %v3299_v0  ;;  %v3565_v32 = vand.u32 31, %v3563_v19 }
 0x2b5   : > { %v3132_v51 = vsel %vm3130_vm4, %v3131_v14, %v8945_v18  ;;  %v3422_v35 = vor.u32 4788187, %v3421_v2  ;;  %v3425_v16 = vcvt.s32.f32 %v3418_v57  ;;  %v3432_v25 = vsel %vm11645_vm2, 0, %v3430_v13 }
 0x2b6   : > { %v3129_v7 = vsel %vm3127_vm1, %v8943_v17, %v3128_v41  ;;  %v11682_v53 = vshrl.u32 %v3300_v34, 30  ;;  %v3558_v30 = vand.u32 8388607, %v3551_v55  ;;  %v3566_v4 = vsub.s32 32, %v3565_v32 }
 0x2b7   : > { %v3133_v47 = vsel %vm3126_vm6, %v3129_v7, %v3132_v51  ;;  %v3423_v63 = vand.u32 2147483647, %v3422_v35  ;;  %v3564_v33 = vshrl.u32 %v3563_v19, 5  ;;  %v3450_v45 = vand.u32 2139095040, %v11676_v8 }
 0x2b8   : > { %v3134_v27 = vsel %vm3123_vm15, nan, %v3133_v47  ;;  %v3302_v9 = vshll.u32 %v11682_v53, 30  ;;  %v3568_v26 = vshll.u32 %v9137_v38, %v3565_v32  ;;  %v3571_v59 = vshll.u32 %v9138_v40, %v3565_v32 }
 0x2b9   : > { %v4077_v58 = vmul.f32 %v3134_v27, %v11585_v36  ;;  %v3426_v56 = vmul.f32 %v3425_v16, %v3423_v63  ;;  %v3569_v62 = vshrl.u32 %v9138_v40, %v3566_v4  ;;  %v3572_v6 = vshrl.u32 %v9139_v42, %v3566_v4 }
 0x2ba   : > { %v3574_v29 = vshll.u32 %v9139_v42, %v3565_v32  ;;  %v11696_v48 = vsub.s32 %v3299_v0, %v3302_v9  ;;  %v3575_v10 = vshrl.u32 %v9140_v44, %v3566_v4  ;;  %v3577_v36 = vshll.u32 %v9140_v44, %v3565_v32 }
 0x2bb   : > { %8461 = vmatprep.mubr.f32.mxu1 %v4077_v58  ;;  %v3578_v5 = vshrl.u32 %v9141_v46, %v3566_v4  ;;  %v3427_v28 = vxor.u32 2147483648, %v3426_v56  ;;  %v11701_v50 = vadd.s32 3, %v3432_v25  ;;  %v3559_v23 = vor.u32 8388608, %v3558_v30 }
 0x2bc   : > { %8462 = vmatmul.mubr.f32.gmra.mxu1 %v4078_v60  ;;  %v3451_v1 = vshrl.u32 %v3450_v45, 23  ;;  %v3305_v3 = vsub.s32 0, %v11696_v48  ;;  %v3567_v22 = vshrl.u32 %v9137_v38, %v3566_v4  ;;  %v3570_v39 = vor.u32 %v3569_v62, %v3568_v26 }
 0x2bd   : > { %v3573_v37 = vor.u32 %v3572_v6, %v3571_v59  ;;  %v3428_v17 = vsel %vm3345_vm0, %v3427_v28, %v3426_v56  ;;  %v3579_v21 = vor.u32 %v3578_v5, %v3577_v36  ;;  %v3580_v11 = vshll.u32 %v9141_v46, %v3565_v32 }
 0x2be   : > { %v3581_v20 = vshrl.u32 %v9142_v54, %v3566_v4  ;;  %vm3241_vm8 = vcmp.lt.s32.totalorder %v11494_v24, 0  ;;  %v8038_v18 = vmin.u32 %v3305_v3, %v11696_v48  ;;  %v3576_v14 = vor.u32 %v3575_v10, %v3574_v29  ;;  %v8410_v10 = vpop.f32.mrf.mxu0 }
 0x2bf   : > { %vm3583_vm10 = vcmp.lt.s32.totalorder %v3564_v33, 1  ;;  %v3447_v13 = vand.u32 2147483647, %v11676_v8  ;;  %vm3585_vm11 = vcmp.lt.s32.totalorder %v3564_v33, 3  ;;  %vm3586_vm12 = vcmp.lt.s32.totalorder %v3564_v33, 4 }
 0x2c0   : > { %v3582_v0 = vor.u32 %v3581_v20, %v3580_v11  ;;  %v3599_v19 = vshll.u32 %v3559_v23, 8  ;;  %v3431_v41 = vsel %vm11645_vm2, %v11433_v43, %v3428_v17  ;;  %v3307_v57 = vclz %v8038_v18 }
 0x2c1   : > { %vm3584_vm13 = vcmp.lt.s32.totalorder %v3564_v33, 2  ;;  %v8045_v2 = vadd.s32 4294967169, %v3451_v1  ;;  %v3587_v60 = vsel %vm3583_vm10, %v3567_v22, %v3570_v39  ;;  %v3588_v51 = vsel %vm3586_vm12, %v3576_v14, 2102212464 }
 0x2c2   : > { %v3591_v34 = vsel %vm3583_vm10, %v3570_v39, %v3573_v37  ;;  %v3592_v32 = vsel %vm3586_vm12, %v3579_v21, 920167782  ;;  %v8039_v7 = vadd.s32 4294967294, %v3307_v57  ;;  %v3589_v35 = vsel %vm3585_vm11, %v3573_v37, %v3588_v51 }
 0x2c3   : > { %v3593_v16 = vsel %vm3585_vm11, %v3576_v14, %v3592_v32  ;;  %v3595_v25 = vsel %vm3583_vm10, %v3573_v37, %v3576_v14  ;;  %v3295_v31 = vadd.s32 %v11635_v15, %v11651_v52  ;;  %v3325_v47 = vsub.s32 4, %v11682_v53 }
 0x2c4   : > { %v3594_v30 = vsel %vm3584_vm13, %v3591_v34, %v3593_v16  ;;  %v3596_v4 = vsel %vm3586_vm12, %v3582_v0, 1326507024  ;;  %vm8040_vm9 = vcmp.lt.s32.totalorder %v8039_v7, 0  ;;  %8946 = vcosq.f32 %v3431_v41 }
 0x2c5   : > { %v3597_v27 = vsel %vm3585_vm11, %v3579_v21, %v3596_v4  ;;  %v11728_v63 = vmul.u32.u64.low %v3599_v19, %v3594_v30  ;;  %v11729_v45 = vmul.u32.u64.high %v3599_v19, %v3594_v30, %v11728_v63  ;;  %v3310_v58 = vsel %vm8040_vm9, 0, %v8039_v7 }
 0x2c6   : > { %v3590_v9 = vsel %vm3584_vm13, %v3587_v60, %v3589_v35  ;;  %v3598_v26 = vsel %vm3584_vm13, %v3595_v25, %v3597_v27  ;;  %v3311_v15 = vsub.s32 32, %v3310_v58  ;;  %v3312_v52 = vshll.u32 %v11696_v48, %v3310_v58 }
 0x2c7   : > { %v3315_v59 = vsub.s32 4294967266, %v3310_v58  ;;  %v3457_v56 = vadd.s32 1, %v8045_v2  ;;  %8948 = vsinq.f32 %v3431_v41  ;;  %v3326_v62 = vsel %vm3241_vm8, %v3325_v47, %v11682_v53 }
 0x2c8   : > { %v11738_v6 = vmul.u32.u64.low %v3599_v19, %v3598_v26  ;;  %v11739_v29 = vmul.u32.u64.high %v3599_v19, %v3598_v26, %v11738_v6  ;;  %v3313_v36 = vshrl.u32 %v3295_v31, %v3311_v15  ;;  %v3609_v28 = vadd.s32 1, %v11729_v45 }
 0x2c9   : > { %v3316_v5 = vadd.s32 127, %v3315_v59  ;;  %vm3458_vm14 = vcmp.gt.s32.totalorder %v3457_v56, 0  ;;  %vm11744_vm0 = vcmp.le.f32.partialorder %v3239_v12, 0.7853982  ;;  %v3606_v48 = vmul.u32 %v3599_v19, %v3590_v9  ;;  %v2351_v12 = vpop.f32.mrf.mxu0 }
 0x2ca   : > { %v3459_v23 = vsel %vm3458_vm14, %v3457_v56, 0  ;;  %v3314_v1 = vor.u32 %v3313_v36, %v3312_v52  ;;  %v3454_v53 = vand.u32 8388607, %v3447_v13  ;;  %v11751_v39 = vand.u32 3, %v11701_v50 }
 0x2cb   : > { %v3317_v3 = vshll.u32 %v3316_v5, 23  ;;  %v3461_v22 = vand.u32 31, %v3459_v23  ;;  %v3328_v37 = vsel %vm11744_vm0, 0, %v3326_v62  ;;  %vm3608_vm15 = vc.u32 %v11739_v29, %v11728_v63 }
 0x2cc   : > { %v3321_v21 = vcvt.s32.f32 %v3314_v1  ;;  %v3610_v11 = vsel %vm3608_vm15, %v3609_v28, %v11729_v45  ;;  %v11759_v14 = vadd.f32 %v11579_v49, %v8410_v10  ;;  %v3332_v19 = vadd.s32 3, %v3328_v37 }
 0x2cd   : > { %v3318_v17 = vor.u32 4788187, %v3317_v3  ;;  %v3462_v20 = vsub.s32 32, %v3461_v22  ;;  %v3611_v18 = vadd.s32 %v3610_v11, %v3606_v48  ;;  %v3455_v50 = vor.u32 8388608, %v3454_v53 }
 0x2ce   : > { %v11762_v41 = vadd.f32 %v11579_v49, %v2351_v12  ;;  %v3464_v2 = vshll.u32 %v9137_v38, %v3461_v22  ;;  %vm3442_vm1 = vcmp.eq.s32.totalorder %v11751_v39, 2  ;;  %v3460_v34 = vshrl.u32 %v3459_v23, 5  ;;  %v11792_v23 = vld [vmem:[%s9349_s14 + $0xe8] sm:$0xff] }
 0x2cf   : > { %v3319_v0 = vand.u32 2147483647, %v3318_v17  ;;  %v3612_v57 = vadd.s32 536870912, %v3611_v18  ;;  %v3465_v60 = vshrl.u32 %v9138_v40, %v3462_v20  ;;  %v3467_v32 = vshll.u32 %v9138_v40, %v3461_v22 }
 0x2d0   : > { %v3468_v7 = vshrl.u32 %v9139_v42, %v3462_v20  ;;  %vm3439_vm2 = vcmp.eq.s32.totalorder %v11751_v39, 0  ;;  %v3470_v16 = vshll.u32 %v9139_v42, %v3461_v22  ;;  %v3471_v25 = vshrl.u32 %v9140_v44, %v3462_v20 }
 0x2d1   : > { %v3322_v51 = vmul.f32 %v3321_v21, %v3319_v0  ;;  %v11770_v35 = vshrl.u32 %v3612_v57, 30  ;;  %v3473_v31 = vshll.u32 %v9140_v44, %v3461_v22  ;;  %v8947_v47 = vpop.eup %8946  ;;  %v11775_v4 = vand.u32 3, %v3332_v19 }
 0x2d2   : > { %v3474_v27 = vshrl.u32 %v9141_v46, %v3462_v20  ;;  %v11778_v45 = vshll.u32 %v3455_v50, 8  ;;  %v3463_v9 = vshrl.u32 %v9137_v38, %v3462_v20  ;;  %v3466_v26 = vor.u32 %v3465_v60, %v3464_v2 }
 0x2d3   : > { %v3323_v30 = vxor.u32 2147483648, %v3322_v51  ;;  %v3614_v58 = vshll.u32 %v11770_v35, 30  ;;  %v3476_v15 = vshll.u32 %v9141_v46, %v3461_v22  ;;  %v3469_v56 = vor.u32 %v3468_v7, %v3467_v32 }
 0x2d4   : > { %v8949_v52 = vpop.eup %8948  ;;  %v3475_v62 = vor.u32 %v3474_v27, %v3473_v31  ;;  %v3477_v6 = vshrl.u32 %v9142_v54, %v3462_v20  ;;  %v3472_v5 = vor.u32 %v3471_v25, %v3470_v16  ;;  %vm3479_vm3 = vcmp.lt.s32.totalorder %v3460_v34, 1 }
 0x2d5   : > { %v3324_v59 = vsel %vm3241_vm8, %v3323_v30, %v3322_v51  ;;  %v11789_v36 = vsub.s32 %v3611_v18, %v3614_v58  ;;  %v3443_v28 = vxor.u32 2147483648, %v8947_v47  ;;  %vm3481_vm4 = vcmp.lt.s32.totalorder %v3460_v34, 3 }
 0x2d6   : > { %v3327_v10 = vsel %vm11744_vm0, %v11494_v24, %v3324_v59  ;;  %v3478_v48 = vor.u32 %v3477_v6, %v3476_v15  ;;  %vm3435_vm5 = vweird.f32 %v11433_v43  ;;  %vm3480_vm7 = vcmp.lt.s32.totalorder %v3460_v34, 2 }
 0x2d7   : > { %8950 = vcosq.f32 %v3327_v10  ;;  %v3617_v1 = vsub.s32 0, %v11789_v36  ;;  %vm3482_vm6 = vcmp.lt.s32.totalorder %v3460_v34, 4  ;;  %v3440_v3 = vxor.u32 2147483648, %v8949_v52 }
 0x2d8   : > { %8952 = vsinq.f32 %v3327_v10  ;;  %v3484_v33 = vsel %vm3482_vm6, %v3472_v5, 2102212464  ;;  %v3487_v53 = vsel %vm3479_vm3, %v3466_v26, %v3469_v56  ;;  %v3488_v22 = vsel %vm3482_vm6, %v3475_v62, 920167782 }
 0x2d9   : > { %v8050_v37 = vmin.u32 %v3617_v1, %v11789_v36  ;;  %v3483_v12 = vsel %vm3479_vm3, %v3463_v9, %v3466_v26  ;;  %v3489_v17 = vsel %vm3481_vm4, %v3472_v5, %v3488_v22  ;;  %v3762_v21 = vand.u32 2139095040, %v11792_v23 }
 0x2da   : > { %v3485_v11 = vsel %vm3481_vm4, %v3469_v56, %v3484_v33  ;;  %v3490_v20 = vsel %vm3480_vm7, %v3487_v53, %v3489_v17  ;;  %v3491_v18 = vsel %vm3479_vm3, %v3469_v56, %v3472_v5  ;;  %v3492_v0 = vsel %vm3482_vm6, %v3478_v48, 1326507024  ;;  %v11853_v17 = vld [vmem:[%s9349_s14 + $0xe0] sm:$0xff] }
 0x2db   : > { %vm3438_vm8 = vcmp.lt.s32.totalorder %v11751_v39, 2  ;;  %v3444_v19 = vsel %vm3442_vm1, %v3443_v28, %v8949_v52  ;;  %vm3553_vm10 = vcmp.lt.s32.totalorder %v11615_v61, 0  ;;  %v3619_v50 = vclz %v8050_v37 }
 0x2dc   : > { %v3441_v57 = vsel %vm3439_vm2, %v8947_v47, %v3440_v3  ;;  %v3493_v2 = vsel %vm3481_vm4, %v3475_v62, %v3492_v0  ;;  %v11812_v60 = vmul.u32.u64.low %v11778_v45, %v3490_v20  ;;  %v11813_v51 = vmul.u32.u64.high %v11778_v45, %v3490_v20, %v11812_v60 }
 0x2dd   : > { %v8051_v32 = vadd.s32 4294967294, %v3619_v50  ;;  %v3486_v7 = vsel %vm3480_vm7, %v3483_v12, %v3485_v11  ;;  %v3494_v16 = vsel %vm3480_vm7, %v3491_v18, %v3493_v2  ;;  %v3763_v25 = vshrl.u32 %v3762_v21, 23 }
 0x2de   : > { %vm3331_vm11 = vweird.f32 %v11494_v24  ;;  %vm3335_vm12 = vcmp.eq.s32.totalorder %v11775_v4, 0  ;;  %vm11822_vm13 = vcmp.le.f32.partialorder %v3551_v55, 0.7853982  ;;  %v3445_v27 = vsel %vm3438_vm8, %v3441_v57, %v3444_v19 }
 0x2df   : > { %v11827_v47 = vmul.u32.u64.low %v11778_v45, %v3494_v16  ;;  %v11828_v30 = vmul.u32.u64.high %v11778_v45, %v3494_v16, %v11827_v47  ;;  %v3607_v34 = vadd.s32 %v11728_v63, %v11739_v29  ;;  %vm8052_vm9 = vcmp.lt.s32.totalorder %v8051_v32, 0 }
 0x2e0   : > { %v8057_v58 = vadd.s32 4294967169, %v3763_v25  ;;  %v3622_v9 = vsel %vm8052_vm9, 0, %v8051_v32  ;;  %v3637_v26 = vsub.s32 4, %v11770_v35  ;;  %v3502_v55 = vmul.u32 %v11778_v45, %v3486_v7 }
 0x2e1   : > { %v3505_v15 = vadd.s32 1, %v11813_v51  ;;  %v3623_v52 = vsub.s32 32, %v3622_v9  ;;  %v3624_v59 = vshll.u32 %v11789_v36, %v3622_v9  ;;  %v3627_v56 = vsub.s32 4294967266, %v3622_v9 }
 0x2e2   : > { %v3769_v62 = vadd.s32 1, %v8057_v58  ;;  %v3446_v39 = vsel %vm3435_vm5, nan, %v3445_v27  ;;  %vm3338_vm14 = vcmp.eq.s32.totalorder %v11775_v4, 2  ;;  %vm3504_vm0 = vc.u32 %v11828_v30, %v11812_v60 }
 0x2e3   : > { %v3759_v63 = vand.u32 2147483647, %v11792_v23  ;;  %v3625_v6 = vshrl.u32 %v3607_v34, %v3623_v52  ;;  %v3628_v45 = vadd.s32 127, %v3627_v56  ;;  %v3506_v10 = vsel %vm3504_vm0, %v3505_v15, %v11813_v51 }
 0x2e4   : > { %v8951_v29 = vpop.eup %8950  ;;  %vm3770_vm15 = vcmp.gt.s32.totalorder %v3769_v62, 0  ;;  %v3638_v43 = vsel %vm3553_vm10, %v3637_v26, %v11770_v35  ;;  %v3507_v28 = vadd.s32 %v3506_v10, %v3502_v55  ;;  %vm3334_vm1 = vcmp.lt.s32.totalorder %v11775_v4, 2 }
 0x2e5   : > { %v8953_v36 = vpop.eup %8952  ;;  %v3339_v5 = vxor.u32 2147483648, %v8951_v29  ;;  %v3771_v48 = vsel %vm3770_vm15, %v3769_v62, 0  ;;  %v3626_v3 = vor.u32 %v3625_v6, %v3624_v59  ;;  %v3629_v33 = vshll.u32 %v3628_v45, 23 }
 0x2e6   : > { %v3336_v1 = vxor.u32 2147483648, %v8953_v36  ;;  %v4080_v53 = vmul.f32 %v3446_v39, %v11759_v14  ;;  %v3508_v37 = vadd.s32 536870912, %v3507_v28  ;;  %v3773_v12 = vand.u32 31, %v3771_v48 }
 0x2e7   : > { %v3340_v22 = vsel %vm3338_vm14, %v3339_v5, %v8953_v36  ;;  %v3630_v35 = vor.u32 4788187, %v3629_v33  ;;  %v3633_v11 = vcvt.s32.f32 %v3626_v3  ;;  %v3640_v20 = vsel %vm11822_vm13, 0, %v3638_v43 }
 0x2e8   : > { %v3337_v21 = vsel %vm3335_vm12, %v8951_v29, %v3336_v1  ;;  %v11859_v0 = vshrl.u32 %v3508_v37, 30  ;;  %v3766_v14 = vand.u32 8388607, %v3759_v63  ;;  %v3774_v19 = vsub.s32 32, %v3773_v12 }
 0x2e9   : > { %v3341_v18 = vsel %vm3334_vm1, %v3337_v21, %v3340_v22  ;;  %v3631_v57 = vand.u32 2147483647, %v3630_v35  ;;  %v3772_v2 = vshrl.u32 %v3771_v48, 5  ;;  %v3658_v4 = vand.u32 2139095040, %v11853_v17 }
 0x2ea   : > { %v3342_v50 = vsel %vm3331_vm11, nan, %v3341_v18  ;;  %v3510_v32 = vshll.u32 %v11859_v0, 30  ;;  %v3776_v7 = vshll.u32 %v9137_v38, %v3773_v12  ;;  %v3779_v16 = vshll.u32 %v9138_v40, %v3773_v12 }
 0x2eb   : > { %v4079_v51 = vmul.f32 %v3342_v50, %v11762_v41  ;;  %v3634_v25 = vmul.f32 %v3633_v11, %v3631_v57  ;;  %v3777_v47 = vshrl.u32 %v9138_v40, %v3774_v19  ;;  %v3780_v27 = vshrl.u32 %v9139_v42, %v3774_v19 }
 0x2ec   : > { %v3782_v24 = vshll.u32 %v9139_v42, %v3773_v12  ;;  %v11873_v34 = vsub.s32 %v3507_v28, %v3510_v32  ;;  %v3783_v58 = vshrl.u32 %v9140_v44, %v3774_v19  ;;  %v3785_v41 = vshll.u32 %v9140_v44, %v3773_v12 }
 0x2ed   : > { %8464 = vmatprep.mubr.f32.mxu1 %v4079_v51  ;;  %v3786_v9 = vshrl.u32 %v9141_v46, %v3774_v19  ;;  %v3635_v26 = vxor.u32 2147483648, %v3634_v25  ;;  %v11878_v55 = vadd.s32 3, %v3640_v20  ;;  %v3767_v15 = vor.u32 8388608, %v3766_v14 }
 0x2ee   : > { %8465 = vmatmul.mubr.f32.gmra.mxu1 %v4080_v53  ;;  %v3659_v52 = vshrl.u32 %v3658_v4, 23  ;;  %v3513_v59 = vsub.s32 0, %v11873_v34  ;;  %v3775_v56 = vshrl.u32 %v9137_v38, %v3774_v19  ;;  %v3778_v62 = vor.u32 %v3777_v47, %v3776_v7  ;;  %v8413_v47 = vpop.f32.mrf.mxu0 }
 0x2ef   : > { %v3781_v39 = vor.u32 %v3780_v27, %v3779_v16  ;;  %v3636_v29 = vsel %vm3553_vm10, %v3635_v26, %v3634_v25  ;;  %v3787_v6 = vor.u32 %v3786_v9, %v3785_v41  ;;  %v3788_v45 = vshll.u32 %v9141_v46, %v3773_v12 }
 0x2f0   : > { %v3789_v10 = vshrl.u32 %v9142_v54, %v3774_v19  ;;  %vm3449_vm2 = vcmp.lt.s32.totalorder %v11676_v8, 0  ;;  %v8046_v36 = vmin.u32 %v3513_v59, %v11873_v34  ;;  %v3784_v5 = vor.u32 %v3783_v58, %v3782_v24 }
 0x2f1   : > { %vm3791_vm3 = vcmp.lt.s32.totalorder %v3772_v2, 1  ;;  %v3655_v43 = vand.u32 2147483647, %v11853_v17  ;;  %vm3793_vm4 = vcmp.lt.s32.totalorder %v3772_v2, 3  ;;  %vm3794_vm5 = vcmp.lt.s32.totalorder %v3772_v2, 4 }
 0x2f2   : > { %v3790_v28 = vor.u32 %v3789_v10, %v3788_v45  ;;  %v3807_v48 = vshll.u32 %v3767_v15, 8  ;;  %v3639_v1 = vsel %vm11822_vm13, %v11615_v61, %v3636_v29  ;;  %v3515_v3 = vclz %v8046_v36 }
 0x2f3   : > { %vm3792_vm7 = vcmp.lt.s32.totalorder %v3772_v2, 2  ;;  %v8053_v33 = vadd.s32 4294967169, %v3659_v52  ;;  %v3795_v53 = vsel %vm3791_vm3, %v3775_v56, %v3778_v62  ;;  %v3796_v22 = vsel %vm3794_vm5, %v3784_v5, 2102212464 }
 0x2f4   : > { %v3799_v37 = vsel %vm3791_vm3, %v3778_v62, %v3781_v39  ;;  %v3800_v12 = vsel %vm3794_vm5, %v3787_v6, 920167782  ;;  %v8047_v21 = vadd.s32 4294967294, %v3515_v3  ;;  %v3797_v35 = vsel %vm3793_vm4, %v3781_v39, %v3796_v22  ;;  %v2361_v62 = vpop.f32.mrf.mxu0 }
 0x2f5   : > { %v3801_v11 = vsel %vm3793_vm4, %v3784_v5, %v3800_v12  ;;  %v3803_v20 = vsel %vm3791_vm3, %v3781_v39, %v3784_v5  ;;  %v3503_v31 = vadd.s32 %v11812_v60, %v11828_v30  ;;  %v3533_v18 = vsub.s32 4, %v11859_v0 }
 0x2f6   : > { %v3802_v14 = vsel %vm3792_vm7, %v3799_v37, %v3801_v11  ;;  %v3804_v19 = vsel %vm3794_vm5, %v3790_v28, 1326507024  ;;  %vm8048_vm6 = vcmp.lt.s32.totalorder %v8047_v21, 0  ;;  %8954 = vcosq.f32 %v3639_v1 }
 0x2f7   : > { %v3805_v50 = vsel %vm3793_vm4, %v3787_v6, %v3804_v19  ;;  %v11905_v57 = vmul.u32.u64.low %v3807_v48, %v3802_v14  ;;  %v11906_v4 = vmul.u32.u64.high %v3807_v48, %v3802_v14, %v11905_v57  ;;  %v3518_v51 = vsel %vm8048_vm6, 0, %v8047_v21 }
 0x2f8   : > { %v3798_v32 = vsel %vm3792_vm7, %v3795_v53, %v3797_v35  ;;  %v3806_v7 = vsel %vm3792_vm7, %v3803_v20, %v3805_v50  ;;  %v3519_v60 = vsub.s32 32, %v3518_v51  ;;  %v3520_v30 = vshll.u32 %v11873_v34, %v3518_v51 }
 0x2f9   : > { %v3523_v16 = vsub.s32 4294967266, %v3518_v51  ;;  %v3665_v25 = vadd.s32 1, %v8053_v33  ;;  %8956 = vsinq.f32 %v3639_v1  ;;  %v3534_v27 = vsel %vm3449_vm2, %v3533_v18, %v11859_v0  ;;  %v8181_v18 = vld [vmem:[%s15158_s2 + $0x170] sm:$0xff] }
 0x2fa   : > { %v11915_v24 = vmul.u32.u64.low %v3807_v48, %v3806_v7  ;;  %v11916_v58 = vmul.u32.u64.high %v3807_v48, %v3806_v7, %v11915_v24  ;;  %v3521_v41 = vshrl.u32 %v3503_v31, %v3519_v60  ;;  %v3817_v26 = vadd.s32 1, %v11906_v4  ;;  %v8182_v31 = vld [vmem:[%s15158_s2 + $0x178] sm:$0xff] }
 0x2fb   : > { %v3524_v9 = vadd.s32 127, %v3523_v16  ;;  %vm3666_vm8 = vcmp.gt.s32.totalorder %v3665_v25, 0  ;;  %v3814_v2 = vmul.u32 %v3807_v48, %v3798_v32  ;;  %vm11921_vm10 = vcmp.le.f32.partialorder %v3447_v13, 0.7853982  ;;  %8476 = vmatprep.subr.mxu0 %v8182_v31  ;;  %8532 = vmatprep.subr.mxu1 %v8182_v31  ;;  %v8180_v16 = vld [vmem:[%s15158_s2 + $0x168] sm:$0xff] }
 0x2fc   : > { %v3667_v15 = vsel %vm3666_vm8, %v3665_v25, 0  ;;  %v3522_v52 = vor.u32 %v3521_v41, %v3520_v30  ;;  %v11926_v0 = vand.u32 3, %v11878_v55  ;;  %v3536_v39 = vsel %vm11921_vm10, 0, %v3534_v27  ;;  %8477 = vmatpush3.msra.mxu0 %v8182_v31  ;;  %8548 = vmatpush3.msra.mxu1 %v8182_v31 }
 0x2fd   : > { %v3525_v59 = vshll.u32 %v3524_v9, 23  ;;  %v3669_v56 = vand.u32 31, %v3667_v15  ;;  %vm3816_vm11 = vc.u32 %v11916_v58, %v11905_v57  ;;  %v3662_v29 = vand.u32 8388607, %v3655_v43  ;;  %8478 = vmatprep.subr.mxu0 %v8181_v18  ;;  %8533 = vmatprep.subr.mxu1 %v8181_v18 }
 0x2fe   : > { %v3529_v6 = vcvt.s32.f32 %v3522_v52  ;;  %v3818_v45 = vsel %vm3816_vm11, %v3817_v26, %v11906_v4  ;;  %v11936_v36 = vadd.f32 %v11579_v49, %v8413_v47  ;;  %v11939_v5 = vadd.f32 %v11579_v49, %v2361_v62  ;;  %8479 = vmatpush3.msra.mxu0 %v8181_v18  ;;  %8549 = vmatpush3.msra.mxu1 %v8181_v18  ;;  %v8178_v62 = vld [vmem:[%s15158_s2 + $0x158] sm:$0xff] }
 0x2ff   : > { %v3526_v13 = vor.u32 4788187, %v3525_v59  ;;  %v3670_v10 = vsub.s32 32, %v3669_v56  ;;  %v3819_v55 = vadd.s32 %v3818_v45, %v3814_v2  ;;  %v3540_v48 = vadd.s32 3, %v3536_v39  ;;  %8480 = vmatprep.subr.mxu0 %v8180_v16  ;;  %8534 = vmatprep.subr.mxu1 %v8180_v16 }
 0x300   : > { %v3672_v1 = vshll.u32 %v9137_v38, %v3669_v56  ;;  %v3675_v53 = vshll.u32 %v9138_v40, %v3669_v56  ;;  %vm3650_vm12 = vcmp.eq.s32.totalorder %v11926_v0, 2  ;;  %v3663_v12 = vor.u32 8388608, %v3662_v29  ;;  %8481 = vmatpush3.msra.mxu0 %v8180_v16  ;;  %8550 = vmatpush3.msra.mxu1 %v8180_v16 }
 0x301   : > { %v3527_v28 = vand.u32 2147483647, %v3526_v13  ;;  %v3820_v3 = vadd.s32 536870912, %v3819_v55  ;;  %v3673_v33 = vshrl.u32 %v9138_v40, %v3670_v10  ;;  %v3676_v22 = vshrl.u32 %v9139_v42, %v3670_v10 }
 0x302   : > { %v11946_v21 = vshrl.u32 %v3667_v15, 5  ;;  %vm3647_vm13 = vcmp.eq.s32.totalorder %v11926_v0, 0  ;;  %v3678_v35 = vshll.u32 %v9139_v42, %v3669_v56  ;;  %v3679_v11 = vshrl.u32 %v9140_v44, %v3670_v10  ;;  %v8179_v15 = vld [vmem:[%s15158_s2 + $0x160] sm:$0xff] }
 0x303   : > { %v3530_v37 = vmul.f32 %v3529_v6, %v3527_v28  ;;  %v11949_v49 = vshrl.u32 %v3820_v3, 30  ;;  %v3681_v20 = vshll.u32 %v9140_v44, %v3669_v56  ;;  %v11960_v14 = vpop.eup %8954  ;;  %v11962_v50 = vand.u32 3, %v3540_v48  ;;  %8482 = vmatprep.subr.mxu0 %v8179_v15  ;;  %8535 = vmatprep.subr.mxu1 %v8179_v15  ;;  %v8177_v48 = vld [vmem:[%s15158_s2 + $0x150] sm:$0xff] }
 0x304   : > { %v3671_v4 = vshrl.u32 %v9137_v38, %v3670_v10  ;;  %v3682_v51 = vshrl.u32 %v9141_v46, %v3670_v10  ;;  %v3674_v7 = vor.u32 %v3673_v33, %v3672_v1  ;;  %v3677_v60 = vor.u32 %v3676_v22, %v3675_v53  ;;  %8483 = vmatpush3.msra.mxu0 %v8179_v15 }
 0x305   : > { %v3531_v19 = vxor.u32 2147483648, %v3530_v37  ;;  %v3822_v32 = vshll.u32 %v11949_v49, 30  ;;  %v3684_v30 = vshll.u32 %v9141_v46, %v3669_v56  ;;  %v3685_v24 = vshrl.u32 %v9142_v54, %v3670_v10  ;;  %v11988_v56 = vld [vmem:[%s9349_s14 + $0xf8] sm:$0xff]  ;;  %8551 = vmatpush3.msra.mxu1 %v8179_v15  ;;  %8484 = vmatprep.subr.mxu0 %v8178_v62 }
 0x306   : > { %v8957_v25 = vpop.eup %8956  ;;  %v3683_v27 = vor.u32 %v3682_v51, %v3681_v20  ;;  %v11974_v41 = vshll.u32 %v3663_v12, 8  ;;  %v3680_v2 = vor.u32 %v3679_v11, %v3678_v35  ;;  %vm3687_vm9 = vcmp.lt.s32.totalorder %v11946_v21, 1  ;;  %8536 = vmatprep.subr.mxu1 %v8178_v62  ;;  %8485 = vmatpush3.msra.mxu0 %v8178_v62  ;;  %v8176_v12 = vld [vmem:[%s15158_s2 + $0x148] sm:$0xff] }
 0x307   : > { %v3532_v47 = vsel %vm3449_vm2, %v3531_v19, %v3530_v37  ;;  %v11979_v26 = vsub.s32 %v3819_v55, %v3822_v32  ;;  %v3651_v52 = vxor.u32 2147483648, %v11960_v14  ;;  %v3686_v59 = vor.u32 %v3685_v24, %v3684_v30  ;;  %8552 = vmatpush3.msra.mxu1 %v8178_v62  ;;  %8486 = vmatprep.subr.mxu0 %v8177_v48 }
 0x308   : > { %v3535_v9 = vsel %vm11921_vm10, %v11676_v8, %v3532_v47  ;;  %vm3689_vm14 = vcmp.lt.s32.totalorder %v11946_v21, 3  ;;  %vm3643_vm0 = vweird.f32 %v11615_v61  ;;  %vm3688_vm15 = vcmp.lt.s32.totalorder %v11946_v21, 2  ;;  %8537 = vmatprep.subr.mxu1 %v8177_v48  ;;  %8487 = vmatpush3.msra.mxu0 %v8177_v48  ;;  %v8172_v61 = vld [vmem:[%s15158_s2 + $0x128] sm:$0xff] }
 0x309   : > { %8958 = vcosq.f32 %v3535_v9  ;;  %v3825_v34 = vsub.s32 0, %v11979_v26  ;;  %vm3690_vm1 = vcmp.lt.s32.totalorder %v11946_v21, 4  ;;  %v3648_v39 = vxor.u32 2147483648, %v8957_v25  ;;  %8553 = vmatpush3.msra.mxu1 %v8177_v48  ;;  %8488 = vmatprep.subr.mxu0 %v8176_v12 }
 0x30a   : > { %8960 = vsinq.f32 %v3535_v9  ;;  %v3692_v29 = vsel %vm3690_vm1, %v3680_v2, 2102212464  ;;  %v3695_v13 = vsel %vm3687_vm9, %v3674_v7, %v3677_v60  ;;  %v3696_v6 = vsel %vm3690_vm1, %v3683_v27, 920167782  ;;  %8538 = vmatprep.subr.mxu1 %v8176_v12  ;;  %8489 = vmatpush3.msra.mxu0 %v8176_v12 }
 0x30b   : > { %v8058_v45 = vmin.u32 %v3825_v34, %v11979_v26  ;;  %v3691_v10 = vsel %vm3687_vm9, %v3671_v4, %v3674_v7  ;;  %v3697_v55 = vsel %vm3689_vm14, %v3680_v2, %v3696_v6  ;;  %v3970_v28 = vand.u32 2139095040, %v11988_v56  ;;  %8554 = vmatpush3.msra.mxu1 %v8176_v12 }
 0x30c   : > { %v3693_v1 = vsel %vm3689_vm14, %v3677_v60, %v3692_v29  ;;  %v3698_v3 = vsel %vm3688_vm15, %v3695_v13, %v3697_v55  ;;  %v3699_v33 = vsel %vm3687_vm9, %v3677_v60, %v3680_v2  ;;  %v3700_v53 = vsel %vm3690_vm1, %v3686_v59, 1326507024  ;;  %v8173_v2 = vld [vmem:[%s15158_s2 + $0x130] sm:$0xff] }
 0x30d   : > { %vm3646_vm2 = vcmp.lt.s32.totalorder %v11926_v0, 2  ;;  %v3652_v22 = vsel %vm3650_vm12, %v3651_v52, %v8957_v25  ;;  %vm3761_vm3 = vcmp.lt.s32.totalorder %v11792_v23, 0  ;;  %v3827_v37 = vclz %v8058_v45 }
 0x30e   : > { %v3649_v35 = vsel %vm3647_vm13, %v11960_v14, %v3648_v39  ;;  %v3701_v11 = vsel %vm3689_vm14, %v3683_v27, %v3700_v53  ;;  %v12033_v20 = vmul.u32.u64.low %v11974_v41, %v3698_v3  ;;  %v12034_v31 = vmul.u32.u64.high %v11974_v41, %v3698_v3, %v12033_v20  ;;  %v8175_v14 = vld [vmem:[%s15158_s2 + $0x140] sm:$0xff] }
 0x30f   : > { %v8059_v18 = vadd.s32 4294967294, %v3827_v37  ;;  %v3694_v19 = vsel %vm3688_vm15, %v3691_v10, %v3693_v1  ;;  %v3702_v4 = vsel %vm3688_vm15, %v3699_v33, %v3701_v11  ;;  %v3971_v51 = vshrl.u32 %v3970_v28, 23  ;;  %8490 = vmatprep.subr.mxu0 %v8175_v14  ;;  %8539 = vmatprep.subr.mxu1 %v8175_v14  ;;  %v8171_v28 = vld [vmem:[%s15158_s2 + $0x120] sm:$0xff]  ;;  %v12091_v33 = vld [vmem:[%s9349_s14 + $0xf0] sm:$0xff] }
 0x310   : > { %vm3539_vm4 = vweird.f32 %v11676_v8  ;;  %vm3543_vm5 = vcmp.eq.s32.totalorder %v11962_v50, 0  ;;  %vm12048_vm7 = vcmp.le.f32.partialorder %v3759_v63, 0.7853982  ;;  %v3653_v60 = vsel %vm3646_vm2, %v3649_v35, %v3652_v22  ;;  %v8174_v63 = vld [vmem:[%s15158_s2 + $0x138] sm:$0xff]  ;;  %8491 = vmatpush3.msra.mxu0 %v8175_v14  ;;  %8555 = vmatpush3.msra.mxu1 %v8175_v14 }
 0x311   : > { %v12053_v21 = vmul.u32.u64.low %v11974_v41, %v3702_v4  ;;  %v12054_v7 = vmul.u32.u64.high %v11974_v41, %v3702_v4, %v12053_v21  ;;  %v3815_v30 = vadd.s32 %v11905_v57, %v11916_v58  ;;  %vm8060_vm6 = vcmp.lt.s32.totalorder %v8059_v18, 0  ;;  %8492 = vmatprep.subr.mxu0 %v8174_v63  ;;  %8540 = vmatprep.subr.mxu1 %v8174_v63 }
 0x312   : > { %v8065_v16 = vadd.s32 4294967169, %v3971_v51  ;;  %v3830_v25 = vsel %vm8060_vm6, 0, %v8059_v18  ;;  %v3845_v47 = vsub.s32 4, %v11949_v49  ;;  %v3710_v27 = vmul.u32 %v11974_v41, %v3694_v19  ;;  %8493 = vmatpush3.msra.mxu0 %v8174_v63  ;;  %8556 = vmatpush3.msra.mxu1 %v8174_v63 }
 0x313   : > { %v3713_v24 = vadd.s32 1, %v12034_v31  ;;  %v3831_v0 = vsub.s32 32, %v3830_v25  ;;  %v3832_v57 = vshll.u32 %v11979_v26, %v3830_v25  ;;  %v3835_v58 = vsub.s32 4294967266, %v3830_v25  ;;  %8494 = vmatprep.subr.mxu0 %v8173_v2  ;;  %8541 = vmatprep.subr.mxu1 %v8173_v2 }
 0x314   : > { %v3977_v9 = vadd.s32 1, %v8065_v16  ;;  %v3654_v15 = vsel %vm3643_vm0, nan, %v3653_v60  ;;  %vm3546_vm8 = vcmp.eq.s32.totalorder %v11962_v50, 2  ;;  %vm3712_vm10 = vc.u32 %v12054_v7, %v12033_v20  ;;  %8495 = vmatpush3.msra.mxu0 %v8173_v2  ;;  %8557 = vmatpush3.msra.mxu1 %v8173_v2 }
 0x315   : > { %v3967_v41 = vand.u32 2147483647, %v11988_v56  ;;  %v3833_v52 = vshrl.u32 %v3815_v30, %v3831_v0  ;;  %v3836_v59 = vadd.s32 127, %v3835_v58  ;;  %v3714_v34 = vsel %vm3712_vm10, %v3713_v24, %v12034_v31  ;;  %8496 = vmatprep.subr.mxu0 %v8172_v61  ;;  %8542 = vmatprep.subr.mxu1 %v8172_v61 }
 0x316   : > { %v8959_v26 = vpop.eup %8958  ;;  %vm3978_vm11 = vcmp.gt.s32.totalorder %v3977_v9, 0  ;;  %v3846_v29 = vsel %vm3761_vm3, %v3845_v47, %v11949_v49  ;;  %v3715_v13 = vadd.s32 %v3714_v34, %v3710_v27  ;;  %vm3542_vm12 = vcmp.lt.s32.totalorder %v11962_v50, 2  ;;  %8497 = vmatpush3.msra.mxu0 %v8172_v61  ;;  %8558 = vmatpush3.msra.mxu1 %v8172_v61  ;;  %v8170_v50 = vld [vmem:[%s15158_s2 + $0x118] sm:$0xff] }
 0x317   : > { %v8961_v62 = vpop.eup %8960  ;;  %v3547_v39 = vxor.u32 2147483648, %v8959_v26  ;;  %v3979_v6 = vsel %vm3978_vm11, %v3977_v9, 0  ;;  %v3834_v10 = vor.u32 %v3833_v52, %v3832_v57  ;;  %v3837_v55 = vshll.u32 %v3836_v59, 23  ;;  %8498 = vmatprep.subr.mxu0 %v8171_v28  ;;  %8543 = vmatprep.subr.mxu1 %v8171_v28 }
 0x318   : > { %v3544_v45 = vxor.u32 2147483648, %v8961_v62  ;;  %v4082_v48 = vmul.f32 %v3654_v15, %v11936_v36  ;;  %v3716_v1 = vadd.s32 536870912, %v3715_v13  ;;  %v3981_v3 = vand.u32 31, %v3979_v6  ;;  %8499 = vmatpush3.msra.mxu0 %v8171_v28  ;;  %8559 = vmatpush3.msra.mxu1 %v8171_v28 }
 0x319   : > { %v3548_v49 = vsel %vm3546_vm8, %v3547_v39, %v8961_v62  ;;  %v3838_v22 = vor.u32 4788187, %v3837_v55  ;;  %v3841_v37 = vcvt.s32.f32 %v3834_v10  ;;  %v3848_v12 = vsel %vm12048_vm7, 0, %v3846_v29  ;;  %8500 = vmatprep.subr.mxu0 %v8170_v50  ;;  %8544 = vmatprep.subr.mxu1 %v8170_v50 }
 0x31a   : > { %v3545_v53 = vsel %vm3543_vm5, %v8959_v26, %v3544_v45  ;;  %v12099_v35 = vshrl.u32 %v3716_v1, 30  ;;  %v3974_v11 = vand.u32 8388607, %v3967_v41  ;;  %v3982_v31 = vsub.s32 32, %v3981_v3  ;;  %8501 = vmatpush3.msra.mxu0 %v8170_v50  ;;  %8560 = vmatpush3.msra.mxu1 %v8170_v50 }
 0x31b   : > { %v3549_v36 = vsel %vm3542_vm12, %v3545_v53, %v3548_v49  ;;  %v3839_v19 = vand.u32 2147483647, %v3838_v22  ;;  %v12105_v4 = vshrl.u32 %v3979_v6, 5  ;;  %v3866_v51 = vand.u32 2139095040, %v12091_v33 }
 0x31c   : > { %v3550_v18 = vsel %vm3539_vm4, nan, %v3549_v36  ;;  %v3718_v21 = vshll.u32 %v12099_v35, 30  ;;  %v3984_v60 = vshll.u32 %v9137_v38, %v3981_v3  ;;  %v3987_v8 = vshll.u32 %v9138_v40, %v3981_v3 }
 0x31d   : > { %v4081_v14 = vmul.f32 %v3550_v18, %v11939_v5  ;;  %v3842_v30 = vmul.f32 %v3841_v37, %v3839_v19  ;;  %v3985_v16 = vshrl.u32 %v9138_v40, %v3982_v31  ;;  %v3988_v63 = vshrl.u32 %v9139_v42, %v3982_v31 }
 0x31e   : > { %v3990_v25 = vshll.u32 %v9139_v42, %v3981_v3  ;;  %v12118_v47 = vsub.s32 %v3715_v13, %v3718_v21  ;;  %v3991_v5 = vshrl.u32 %v9140_v44, %v3982_v31  ;;  %v3993_v27 = vshll.u32 %v9140_v44, %v3981_v3 }
 0x31f   : > { %8467 = vmatprep.mubr.f32.mxu1 %v4081_v14  ;;  %v3994_v24 = vshrl.u32 %v9141_v46, %v3982_v31  ;;  %v3843_v0 = vxor.u32 2147483648, %v3842_v30  ;;  %v12123_v57 = vadd.s32 3, %v3848_v12  ;;  %v3975_v58 = vor.u32 8388608, %v3974_v11 }
 0x320   : > { %8468 = vmatmul.mubr.f32.gmra.mxu1 %v4082_v48  ;;  %v3867_v9 = vshrl.u32 %v3866_v51, 23  ;;  %v3721_v2 = vsub.s32 0, %v12118_v47  ;;  %v3983_v15 = vshrl.u32 %v9137_v38, %v3982_v31  ;;  %v3986_v26 = vor.u32 %v3985_v16, %v3984_v60 }
 0x321   : > { %v3989_v52 = vor.u32 %v3988_v63, %v3987_v8  ;;  %v3844_v59 = vsel %vm3761_vm3, %v3843_v0, %v3842_v30  ;;  %v3995_v34 = vor.u32 %v3994_v24, %v3993_v27  ;;  %v3996_v61 = vshll.u32 %v9141_v46, %v3981_v3 }
 0x322   : > { %v3997_v62 = vshrl.u32 %v9142_v54, %v3982_v31  ;;  %vm3657_vm13 = vcmp.lt.s32.totalorder %v11853_v17, 0  ;;  %v8054_v39 = vmin.u32 %v3721_v2, %v12118_v47  ;;  %v3992_v29 = vor.u32 %v3991_v5, %v3990_v25  ;;  %v8416_v25 = vpop.f32.mrf.mxu0 }
 0x323   : > { %vm3999_vm9 = vcmp.lt.s32.totalorder %v12105_v4, 1  ;;  %v3863_v13 = vand.u32 2147483647, %v12091_v33  ;;  %vm4001_vm14 = vcmp.lt.s32.totalorder %v12105_v4, 3  ;;  %vm4002_vm0 = vcmp.lt.s32.totalorder %v12105_v4, 4 }
 0x324   : > { %v3998_v6 = vor.u32 %v3997_v62, %v3996_v61  ;;  %v4015_v45 = vshll.u32 %v3975_v58, 8  ;;  %v3847_v10 = vsel %vm12048_vm7, %v11792_v23, %v3844_v59  ;;  %v3723_v55 = vclz %v8054_v39  ;;  %v12199_v39 = vld [vmem:[%s15159_s3] ss:$0 sm:$0xff] }
 0x325   : > { %vm4000_vm15 = vcmp.lt.s32.totalorder %v12105_v4, 2  ;;  %v8061_v28 = vadd.s32 4294967169, %v3867_v9  ;;  %v4003_v48 = vsel %vm3999_vm9, %v3983_v15, %v3986_v26  ;;  %v4004_v49 = vsel %vm4002_vm0, %v3992_v29, 2102212464 }
 0x326   : > { %v4007_v1 = vsel %vm3999_vm9, %v3986_v26, %v3989_v52  ;;  %v4008_v3 = vsel %vm4002_vm0, %v3995_v34, 920167782  ;;  %v8055_v53 = vadd.s32 4294967294, %v3723_v55  ;;  %v4005_v32 = vsel %vm4001_vm14, %v3989_v52, %v4004_v49 }
 0x327   : > { %v4009_v22 = vsel %vm4001_vm14, %v3992_v29, %v4008_v3  ;;  %v4011_v37 = vsel %vm3999_vm9, %v3989_v52, %v3992_v29  ;;  %v3711_v12 = vadd.s32 %v12033_v20, %v12054_v7  ;;  %v3741_v36 = vsub.s32 4, %v12099_v35 }
 0x328   : > { %v4010_v11 = vsel %vm4000_vm15, %v4007_v1, %v4009_v22  ;;  %v4012_v31 = vsel %vm4002_vm0, %v3998_v6, 1326507024  ;;  %vm8056_vm1 = vcmp.lt.s32.totalorder %v8055_v53, 0  ;;  %8962 = vcosq.f32 %v3847_v10 }
 0x329   : > { %v4013_v18 = vsel %vm4001_vm14, %v3995_v34, %v4012_v31  ;;  %v12164_v19 = vmul.u32.u64.low %v4015_v45, %v4010_v11  ;;  %v12165_v51 = vmul.u32.u64.high %v4015_v45, %v4010_v11, %v12164_v19  ;;  %v3726_v50 = vsel %vm8056_vm1, 0, %v8055_v53 }
 0x32a   : > { %v4006_v20 = vsel %vm4000_vm15, %v4003_v48, %v4005_v32  ;;  %v4014_v7 = vsel %vm4000_vm15, %v4011_v37, %v4013_v18  ;;  %v3727_v14 = vsub.s32 32, %v3726_v50  ;;  %v3728_v21 = vshll.u32 %v12118_v47, %v3726_v50 }
 0x32b   : > { %v3731_v60 = vsub.s32 4294967266, %v3726_v50  ;;  %v3873_v8 = vadd.s32 1, %v8061_v28  ;;  %8964 = vsinq.f32 %v3847_v10  ;;  %v3742_v30 = vsel %vm3657_vm13, %v3741_v36, %v12099_v35  ;;  %v8169_v10 = vld [vmem:[%s15158_s2 + $0x110] sm:$0xff] }
 0x32c   : > { %v12176_v16 = vmul.u32.u64.low %v4015_v45, %v4014_v7  ;;  %v12177_v63 = vmul.u32.u64.high %v4015_v45, %v4014_v7, %v12176_v16  ;;  %v3729_v5 = vshrl.u32 %v3711_v12, %v3727_v14  ;;  %v4025_v24 = vadd.s32 1, %v12165_v51  ;;  %8502 = vmatprep.subr.mxu0 %v8169_v10  ;;  %8545 = vmatprep.subr.mxu1 %v8169_v10 }
 0x32d   : > { %v3732_v27 = vadd.s32 127, %v3731_v60  ;;  %vm3874_vm2 = vcmp.gt.s32.totalorder %v3873_v8, 0  ;;  %vm12182_vm3 = vcmp.le.f32.partialorder %v3655_v43, 0.7853982  ;;  %v4022_v47 = vmul.u32 %v4015_v45, %v4006_v20  ;;  %v2371_v43 = vpop.f32.mrf.mxu0  ;;  %8503 = vmatpush3.msra.mxu0 %v8169_v10  ;;  %8561 = vmatpush3.msra.mxu1 %v8169_v10 }
 0x32e   : > { %v3875_v0 = vsel %vm3874_vm2, %v3873_v8, 0  ;;  %v3730_v58 = vor.u32 %v3729_v5, %v3728_v21  ;;  %v3870_v35 = vand.u32 8388607, %v3863_v13  ;;  %v12189_v15 = vand.u32 3, %v12123_v57 }
 0x32f   : > { %v3733_v9 = vshll.u32 %v3732_v27, 23  ;;  %v3877_v2 = vand.u32 31, %v3875_v0  ;;  %v3744_v26 = vsel %vm12182_vm3, 0, %v3742_v30  ;;  %vm4024_vm4 = vc.u32 %v12177_v63, %v12164_v19 }
 0x330   : > { %v3737_v59 = vcvt.s32.f32 %v3730_v58  ;;  %v4026_v34 = vsel %vm4024_vm4, %v4025_v24, %v12165_v51  ;;  %v12202_v57 = vadd.f32 %v12199_v39, %v8416_v25  ;;  %v3748_v6 = vadd.s32 3, %v3744_v26  ;;  %v12238_v58 = vld [vmem:[%s9349_s14 + $0x108] sm:$0xff] }
 0x331   : > { %v3734_v52 = vor.u32 4788187, %v3733_v9  ;;  %v3878_v61 = vsub.s32 32, %v3877_v2  ;;  %v4027_v62 = vadd.s32 %v4026_v34, %v4022_v47  ;;  %v3871_v45 = vor.u32 8388608, %v3870_v35 }
 0x332   : > { %v12208_v55 = vadd.f32 %v12199_v39, %v2371_v43  ;;  %v3880_v48 = vshll.u32 %v9137_v38, %v3877_v2  ;;  %vm3858_vm5 = vcmp.eq.s32.totalorder %v12189_v15, 2  ;;  %v3876_v3 = vshrl.u32 %v3875_v0, 5 }
 0x333   : > { %v3735_v29 = vand.u32 2147483647, %v3734_v52  ;;  %v4028_v28 = vadd.s32 536870912, %v4027_v62  ;;  %v3881_v49 = vshrl.u32 %v9138_v40, %v3878_v61  ;;  %v3883_v53 = vshll.u32 %v9138_v40, %v3877_v2 }
 0x334   : > { %v3884_v32 = vshrl.u32 %v9139_v42, %v3878_v61  ;;  %vm3855_vm7 = vcmp.eq.s32.totalorder %v12189_v15, 0  ;;  %v3886_v37 = vshll.u32 %v9139_v42, %v3877_v2  ;;  %v3887_v12 = vshrl.u32 %v9140_v44, %v3878_v61 }
 0x335   : > { %v3738_v1 = vmul.f32 %v3737_v59, %v3735_v29  ;;  %v12216_v22 = vshrl.u32 %v4028_v28, 30  ;;  %v3889_v36 = vshll.u32 %v9140_v44, %v3877_v2  ;;  %v8963_v11 = vpop.eup %8962  ;;  %v12221_v18 = vand.u32 3, %v3748_v6 }
 0x336   : > { %v3890_v51 = vshrl.u32 %v9141_v46, %v3878_v61  ;;  %v12224_v50 = vshll.u32 %v3871_v45, 8  ;;  %v3879_v7 = vshrl.u32 %v9137_v38, %v3878_v61  ;;  %v3882_v14 = vor.u32 %v3881_v49, %v3880_v48 }
 0x337   : > { %v3739_v31 = vxor.u32 2147483648, %v3738_v1  ;;  %v4030_v20 = vshll.u32 %v12216_v22, 30  ;;  %v3892_v21 = vshll.u32 %v9141_v46, %v3877_v2  ;;  %v3885_v30 = vor.u32 %v3884_v32, %v3883_v53 }
 0x338   : > { %v8965_v60 = vpop.eup %8964  ;;  %v3891_v16 = vor.u32 %v3890_v51, %v3889_v36  ;;  %v3893_v25 = vshrl.u32 %v9142_v54, %v3878_v61  ;;  %v3888_v24 = vor.u32 %v3887_v12, %v3886_v37  ;;  %vm3895_vm6 = vcmp.lt.s32.totalorder %v3876_v3, 1 }
 0x339   : > { %v3740_v8 = vsel %vm3657_vm13, %v3739_v31, %v3738_v1  ;;  %v12235_v27 = vsub.s32 %v4027_v62, %v4030_v20  ;;  %v3859_v47 = vxor.u32 2147483648, %v8963_v11  ;;  %vm3897_vm8 = vcmp.lt.s32.totalorder %v3876_v3, 3 }
 0x33a   : > { %v3743_v5 = vsel %vm12182_vm3, %v11853_v17, %v3740_v8  ;;  %v3894_v0 = vor.u32 %v3893_v25, %v3892_v21  ;;  %vm3851_vm10 = vweird.f32 %v11792_v23  ;;  %vm3896_vm11 = vcmp.lt.s32.totalorder %v3876_v3, 2 }
 0x33b   : > { %8966 = vcosq.f32 %v3743_v5  ;;  %v4033_v9 = vsub.s32 0, %v12235_v27  ;;  %vm3898_vm12 = vcmp.lt.s32.totalorder %v3876_v3, 4  ;;  %v3856_v35 = vxor.u32 2147483648, %v8965_v60 }
 0x33c   : > { %8968 = vsinq.f32 %v3743_v5  ;;  %v3900_v4 = vsel %vm3898_vm12, %v3888_v24, 2102212464  ;;  %v3903_v2 = vsel %vm3895_vm6, %v3882_v14, %v3885_v30  ;;  %v3904_v26 = vsel %vm3898_vm12, %v3891_v16, 920167782 }
 0x33d   : > { %v8066_v43 = vmin.u32 %v4033_v9, %v12235_v27  ;;  %v3899_v52 = vsel %vm3895_vm6, %v3879_v7, %v3882_v14  ;;  %v3905_v59 = vsel %vm3897_vm8, %v3888_v24, %v3904_v26  ;;  %v4381_v34 = vand.u32 2139095040, %v12238_v58 }
 0x33e   : > { %v3901_v61 = vsel %vm3897_vm8, %v3885_v30, %v3900_v4  ;;  %v3906_v62 = vsel %vm3896_vm11, %v3903_v2, %v3905_v59  ;;  %v3907_v29 = vsel %vm3895_vm6, %v3885_v30, %v3888_v24  ;;  %v3908_v6 = vsel %vm3898_vm12, %v3894_v0, 1326507024  ;;  %v12299_v59 = vld [vmem:[%s9349_s14 + $0x100] sm:$0xff] }
 0x33f   : > { %vm3854_vm13 = vcmp.lt.s32.totalorder %v12189_v15, 2  ;;  %v3860_v45 = vsel %vm3858_vm5, %v3859_v47, %v8965_v60  ;;  %vm3969_vm9 = vcmp.lt.s32.totalorder %v11988_v56, 0  ;;  %v4035_v10 = vclz %v8066_v43 }
 0x340   : > { %v3857_v28 = vsel %vm3855_vm7, %v8963_v11, %v3856_v35  ;;  %v3909_v48 = vsel %vm3897_vm8, %v3891_v16, %v3908_v6  ;;  %v12258_v49 = vmul.u32.u64.low %v12224_v50, %v3906_v62  ;;  %v12259_v1 = vmul.u32.u64.high %v12224_v50, %v3906_v62, %v12258_v49 }
 0x341   : > { %v8067_v53 = vadd.s32 4294967294, %v4035_v10  ;;  %v3902_v32 = vsel %vm3896_vm11, %v3899_v52, %v3901_v61  ;;  %v3910_v37 = vsel %vm3896_vm11, %v3907_v29, %v3909_v48  ;;  %v4382_v12 = vshrl.u32 %v4381_v34, 23 }
 0x342   : > { %vm3747_vm14 = vweird.f32 %v11853_v17  ;;  %vm3751_vm0 = vcmp.eq.s32.totalorder %v12221_v18, 0  ;;  %vm12268_vm15 = vcmp.le.f32.partialorder %v3967_v41, 0.7853982  ;;  %v3861_v51 = vsel %vm3854_vm13, %v3857_v28, %v3860_v45 }
 0x343   : > { %v12273_v11 = vmul.u32.u64.low %v12224_v50, %v3910_v37  ;;  %v12274_v31 = vmul.u32.u64.high %v12224_v50, %v3910_v37, %v12273_v11  ;;  %v4023_v3 = vadd.s32 %v12164_v19, %v12177_v63  ;;  %vm8068_vm1 = vcmp.lt.s32.totalorder %v8067_v53, 0 }
 0x344   : > { %v8107_v20 = vadd.s32 4294967169, %v4382_v12  ;;  %v4038_v7 = vsel %vm8068_vm1, 0, %v8067_v53  ;;  %v4053_v14 = vsub.s32 4, %v12216_v22  ;;  %v3918_v41 = vmul.u32 %v12224_v50, %v3902_v32 }
 0x345   : > { %v3921_v21 = vadd.s32 1, %v12259_v1  ;;  %v4039_v60 = vsub.s32 32, %v4038_v7  ;;  %v4040_v8 = vshll.u32 %v12235_v27, %v4038_v7  ;;  %v4043_v30 = vsub.s32 4294967266, %v4038_v7 }
 0x346   : > { %v4388_v16 = vadd.s32 1, %v8107_v20  ;;  %v3862_v15 = vsel %vm3851_vm10, nan, %v3861_v51  ;;  %vm3754_vm2 = vcmp.eq.s32.totalorder %v12221_v18, 2  ;;  %vm3920_vm3 = vc.u32 %v12274_v31, %v12258_v49 }
 0x347   : > { %v4378_v19 = vand.u32 2147483647, %v12238_v58  ;;  %v4041_v25 = vshrl.u32 %v4023_v3, %v4039_v60  ;;  %v4044_v50 = vadd.s32 127, %v4043_v30  ;;  %v3922_v5 = vsel %vm3920_vm3, %v3921_v21, %v12259_v1  ;;  %v8168_v1 = vld [vmem:[%s15158_s2 + $0x108] sm:$0xff] }
 0x348   : > { %v8967_v63 = vpop.eup %8966  ;;  %vm4389_vm4 = vcmp.gt.s32.totalorder %v4388_v16, 0  ;;  %v4054_v23 = vsel %vm3969_vm9, %v4053_v14, %v12216_v22  ;;  %v3923_v47 = vadd.s32 %v3922_v5, %v3918_v41  ;;  %vm3750_vm5 = vcmp.lt.s32.totalorder %v12221_v18, 2  ;;  %8504 = vmatprep.subr.mxu0 %v8168_v1  ;;  %8546 = vmatprep.subr.mxu1 %v8168_v1 }
 0x349   : > { %v8969_v27 = vpop.eup %8968  ;;  %v3755_v24 = vxor.u32 2147483648, %v8967_v63  ;;  %v4390_v0 = vsel %vm4389_vm4, %v4388_v16, 0  ;;  %v4042_v35 = vor.u32 %v4041_v25, %v4040_v8  ;;  %v4045_v4 = vshll.u32 %v4044_v50, 23  ;;  %8505 = vmatpush3.msra.mxu0 %v8168_v1  ;;  %8562 = vmatpush3.msra.mxu1 %v8168_v1 }
 0x34a   : > { %v3752_v9 = vxor.u32 2147483648, %v8969_v27  ;;  %v4084_v2 = vmul.f32 %v3862_v15, %v12202_v57  ;;  %v3924_v43 = vadd.s32 536870912, %v3923_v47  ;;  %v4392_v52 = vand.u32 31, %v4390_v0 }
 0x34b   : > { %v3756_v26 = vsel %vm3754_vm2, %v3755_v24, %v8969_v27  ;;  %v4046_v22 = vor.u32 4788187, %v4045_v4  ;;  %v4049_v61 = vcvt.s32.f32 %v4042_v35  ;;  %v4056_v62 = vsel %vm12268_vm15, 0, %v4054_v23 }
 0x34c   : > { %v3753_v34 = vsel %vm3751_vm0, %v8967_v63, %v3752_v9  ;;  %v12305_v6 = vshrl.u32 %v3924_v43, 30  ;;  %v4385_v57 = vand.u32 8388607, %v4378_v19  ;;  %v4393_v45 = vsub.s32 32, %v4392_v52 }
 0x34d   : > { %v3757_v29 = vsel %vm3750_vm5, %v3753_v34, %v3756_v26  ;;  %v4047_v28 = vand.u32 2147483647, %v4046_v22  ;;  %v12311_v48 = vshrl.u32 %v4390_v0, 5  ;;  %v4277_v18 = vand.u32 2139095040, %v12299_v59 }
 0x34e   : > { %v3758_v10 = vsel %vm3747_vm14, nan, %v3757_v29  ;;  %v3926_v32 = vshll.u32 %v12305_v6, 30  ;;  %v4395_v37 = vshll.u32 %v9137_v38, %v4392_v52  ;;  %v4398_v12 = vshll.u32 %v9138_v40, %v4392_v52 }
 0x34f   : > { %v4083_v53 = vmul.f32 %v3758_v10, %v12208_v55  ;;  %v4050_v17 = vmul.f32 %v4049_v61, %v4047_v28  ;;  %v4396_v11 = vshrl.u32 %v9138_v40, %v4393_v45  ;;  %v4399_v51 = vshrl.u32 %v9139_v42, %v4393_v45 }
 0x350   : > { %v4401_v3 = vshll.u32 %v9139_v42, %v4392_v52  ;;  %v12324_v20 = vsub.s32 %v3923_v47, %v3926_v32  ;;  %v4402_v55 = vshrl.u32 %v9140_v44, %v4393_v45  ;;  %v4404_v7 = vshll.u32 %v9140_v44, %v4392_v52 }
 0x351   : > { %8470 = vmatprep.mubr.f32.mxu1 %v4083_v53  ;;  %v4405_v14 = vshrl.u32 %v9141_v46, %v4393_v45  ;;  %v4051_v41 = vxor.u32 2147483648, %v4050_v17  ;;  %v12329_v21 = vadd.s32 3, %v4056_v62  ;;  %v4386_v60 = vor.u32 8388608, %v4385_v57 }
 0x352   : > { %8471 = vmatmul.mubr.f32.gmra.mxu1 %v4084_v2  ;;  %v4278_v8 = vshrl.u32 %v4277_v18, 23  ;;  %v3929_v30 = vsub.s32 0, %v12324_v20  ;;  %v4394_v16 = vshrl.u32 %v9137_v38, %v4393_v45  ;;  %v4397_v15 = vor.u32 %v4396_v11, %v4395_v37 }
 0x353   : > { %v4400_v63 = vor.u32 %v4399_v51, %v4398_v12  ;;  %v4052_v25 = vsel %vm3969_vm9, %v4051_v41, %v4050_v17  ;;  %v4406_v50 = vor.u32 %v4405_v14, %v4404_v7  ;;  %v4407_v5 = vshll.u32 %v9141_v46, %v4392_v52 }
 0x354   : > { %v4408_v27 = vshrl.u32 %v9142_v54, %v4393_v45  ;;  %vm3865_vm7 = vcmp.lt.s32.totalorder %v12091_v33, 0  ;;  %v8062_v24 = vmin.u32 %v3929_v30, %v12324_v20  ;;  %v4403_v23 = vor.u32 %v4402_v55, %v4401_v3  ;;  %v8419_v55 = vpop.f32.mrf.mxu0 }
 0x355   : > { %vm4410_vm6 = vcmp.lt.s32.totalorder %v12311_v48, 1  ;;  %v4274_v47 = vand.u32 2147483647, %v12299_v59  ;;  %vm4412_vm8 = vcmp.lt.s32.totalorder %v12311_v48, 3  ;;  %vm4413_vm10 = vcmp.lt.s32.totalorder %v12311_v48, 4 }
 0x356   : > { %v4409_v0 = vor.u32 %v4408_v27, %v4407_v5  ;;  %v4426_v9 = vshll.u32 %v4386_v60, 8  ;;  %v4055_v35 = vsel %vm12268_vm15, %v11988_v56, %v4052_v25  ;;  %v3931_v4 = vclz %v8062_v24 }
 0x357   : > { %vm4411_vm11 = vcmp.lt.s32.totalorder %v12311_v48, 2  ;;  %v8103_v2 = vadd.s32 4294967169, %v4278_v8  ;;  %v4414_v26 = vsel %vm4410_vm6, %v4394_v16, %v4397_v15  ;;  %v4415_v43 = vsel %vm4413_vm10, %v4403_v23, 2102212464 }
 0x358   : > { %v4418_v52 = vsel %vm4410_vm6, %v4397_v15, %v4400_v63  ;;  %v4419_v34 = vsel %vm4413_vm10, %v4406_v50, 920167782  ;;  %v8063_v22 = vadd.s32 4294967294, %v3931_v4  ;;  %v4416_v36 = vsel %vm4412_vm8, %v4400_v63, %v4415_v43 }
 0x359   : > { %v4420_v61 = vsel %vm4412_vm8, %v4403_v23, %v4419_v34  ;;  %v4422_v62 = vsel %vm4410_vm6, %v4400_v63, %v4403_v23  ;;  %v3919_v29 = vadd.s32 %v12258_v49, %v12274_v31  ;;  %v3949_v57 = vsub.s32 4, %v12305_v6 }
 0x35a   : > { %v4421_v45 = vsel %vm4411_vm11, %v4418_v52, %v4420_v61  ;;  %v4423_v10 = vsel %vm4413_vm10, %v4409_v0, 1326507024  ;;  %vm8064_vm12 = vcmp.lt.s32.totalorder %v8063_v22, 0  ;;  %8970 = vcosq.f32 %v4055_v35 }
 0x35b   : > { %v4424_v28 = vsel %vm4412_vm8, %v4406_v50, %v4423_v10  ;;  %v12370_v18 = vmul.u32.u64.low %v4426_v9, %v4421_v45  ;;  %v12371_v1 = vmul.u32.u64.high %v4426_v9, %v4421_v45, %v12370_v18  ;;  %v3934_v53 = vsel %vm8064_vm12, 0, %v8063_v22 }
 0x35c   : > { %v4417_v49 = vsel %vm4411_vm11, %v4414_v26, %v4416_v36  ;;  %v4425_v31 = vsel %vm4411_vm11, %v4422_v62, %v4424_v28  ;;  %v3935_v32 = vsub.s32 32, %v3934_v53  ;;  %v3936_v37 = vshll.u32 %v12324_v20, %v3934_v53 }
 0x35d   : > { %v3939_v12 = vsub.s32 4294967266, %v3934_v53  ;;  %v4284_v17 = vadd.s32 1, %v8103_v2  ;;  %8972 = vsinq.f32 %v4055_v35  ;;  %v3950_v11 = vsel %vm3865_vm7, %v3949_v57, %v12305_v6  ;;  %v8167_v35 = vld [vmem:[%s15158_s2 + $0x100] sm:$0xff] }
 0x35e   : > { %v12382_v51 = vmul.u32.u64.low %v4426_v9, %v4425_v31  ;;  %v12383_v3 = vmul.u32.u64.high %v4426_v9, %v4425_v31, %v12382_v51  ;;  %v3937_v7 = vshrl.u32 %v3919_v29, %v3935_v32  ;;  %v4436_v41 = vadd.s32 1, %v12371_v1  ;;  %8506 = vmatprep.subr.mxu0 %v8167_v35  ;;  %8547 = vmatprep.subr.mxu1 %v8167_v35 }
 0x35f   : > { %v3940_v14 = vadd.s32 127, %v3939_v12  ;;  %vm4285_vm13 = vcmp.gt.s32.totalorder %v4284_v17, 0  ;;  %vm12388_vm9 = vcmp.le.f32.partialorder %v3863_v13, 0.7853982  ;;  %v4433_v20 = vmul.u32 %v4426_v9, %v4417_v49  ;;  %v2381_v13 = vpop.f32.mrf.mxu0  ;;  %8507 = vmatpush3.msra.mxu0 %v8167_v35  ;;  %8563 = vmatpush3.msra.mxu1 %v8167_v35 }
 0x360   : > { %v4286_v60 = vsel %vm4285_vm13, %v4284_v17, 0  ;;  %v3938_v8 = vor.u32 %v3937_v7, %v3936_v37  ;;  %v4281_v6 = vand.u32 8388607, %v4274_v47  ;;  %v12395_v15 = vand.u32 3, %v12329_v21 }
 0x361   : > { %v3941_v30 = vshll.u32 %v3940_v14, 23  ;;  %v4288_v16 = vand.u32 31, %v4286_v60  ;;  %v3952_v63 = vsel %vm12388_vm9, 0, %v3950_v11  ;;  %vm4435_vm14 = vc.u32 %v12383_v3, %v12370_v18 }
 0x362   : > { %v3945_v50 = vcvt.s32.f32 %v3938_v8  ;;  %v4437_v5 = vsel %vm4435_vm14, %v4436_v41, %v12371_v1  ;;  %v12403_v23 = vadd.f32 %v12199_v39, %v8419_v55  ;;  %v3956_v9 = vadd.s32 3, %v3952_v63 }
 0x363   : > { %v3942_v25 = vor.u32 4788187, %v3941_v30  ;;  %v4289_v27 = vsub.s32 32, %v4288_v16  ;;  %v4438_v24 = vadd.s32 %v4437_v5, %v4433_v20  ;;  %v4282_v21 = vor.u32 8388608, %v4281_v6 }
 0x364   : > { %v12409_v4 = vadd.f32 %v12199_v39, %v2381_v13  ;;  %v4291_v26 = vshll.u32 %v9137_v38, %v4288_v16  ;;  %vm4066_vm0 = vcmp.eq.s32.totalorder %v12395_v15, 2  ;;  %v4287_v34 = vshrl.u32 %v4286_v60, 5  ;;  %v12439_v60 = vld [vmem:[%s9349_s14 + $0x118] sm:$0xff] }
 0x365   : > { %v3943_v0 = vand.u32 2147483647, %v3942_v25  ;;  %v4439_v2 = vadd.s32 536870912, %v4438_v24  ;;  %v4292_v43 = vshrl.u32 %v9138_v40, %v4289_v27  ;;  %v4294_v22 = vshll.u32 %v9138_v40, %v4288_v16 }
 0x366   : > { %v4295_v36 = vshrl.u32 %v9139_v42, %v4289_v27  ;;  %vm4063_vm15 = vcmp.eq.s32.totalorder %v12395_v15, 0  ;;  %v4297_v61 = vshll.u32 %v9139_v42, %v4288_v16  ;;  %v4298_v62 = vshrl.u32 %v9140_v44, %v4289_v27 }
 0x367   : > { %v3946_v52 = vmul.f32 %v3945_v50, %v3943_v0  ;;  %v12417_v39 = vshrl.u32 %v4439_v2, 30  ;;  %v4300_v29 = vshll.u32 %v9140_v44, %v4288_v16  ;;  %v8971_v57 = vpop.eup %8970  ;;  %v12422_v10 = vand.u32 3, %v3956_v9 }
 0x368   : > { %v4301_v28 = vshrl.u32 %v9141_v46, %v4289_v27  ;;  %v12425_v1 = vshll.u32 %v4282_v21, 8  ;;  %v4290_v49 = vshrl.u32 %v9137_v38, %v4289_v27  ;;  %v4293_v31 = vor.u32 %v4292_v43, %v4291_v26 }
 0x369   : > { %v3947_v45 = vxor.u32 2147483648, %v3946_v52  ;;  %v4441_v53 = vshll.u32 %v12417_v39, 30  ;;  %v4303_v32 = vshll.u32 %v9141_v46, %v4288_v16  ;;  %v4296_v17 = vor.u32 %v4295_v36, %v4294_v22 }
 0x36a   : > { %v8973_v37 = vpop.eup %8972  ;;  %v4302_v11 = vor.u32 %v4301_v28, %v4300_v29  ;;  %v4304_v51 = vshrl.u32 %v9142_v54, %v4289_v27  ;;  %v4299_v14 = vor.u32 %v4298_v62, %v4297_v61  ;;  %vm4306_vm1 = vcmp.lt.s32.totalorder %v4287_v34, 1 }
 0x36b   : > { %v3948_v12 = vsel %vm3865_vm7, %v3947_v45, %v3946_v52  ;;  %v12436_v7 = vsub.s32 %v4438_v24, %v4441_v53  ;;  %v4067_v41 = vxor.u32 2147483648, %v8971_v57  ;;  %vm4308_vm2 = vcmp.lt.s32.totalorder %v4287_v34, 3 }
 0x36c   : > { %v3951_v55 = vsel %vm12388_vm9, %v12091_v33, %v3948_v12  ;;  %v4305_v20 = vor.u32 %v4304_v51, %v4303_v32  ;;  %vm4059_vm3 = vweird.f32 %v11988_v56  ;;  %vm4307_vm4 = vcmp.lt.s32.totalorder %v4287_v34, 2 }
 0x36d   : > { %8974 = vcosq.f32 %v3951_v55  ;;  %v4444_v8 = vsub.s32 0, %v12436_v7  ;;  %vm4309_vm5 = vcmp.lt.s32.totalorder %v4287_v34, 4  ;;  %v4064_v30 = vxor.u32 2147483648, %v8973_v37 }
 0x36e   : > { %8976 = vsinq.f32 %v3951_v55  ;;  %v4311_v48 = vsel %vm4309_vm5, %v4299_v14, 2102212464  ;;  %v4314_v6 = vsel %vm4306_vm1, %v4293_v31, %v4296_v17  ;;  %v4315_v16 = vsel %vm4309_vm5, %v4302_v11, 920167782 }
 0x36f   : > { %v8108_v63 = vmin.u32 %v4444_v8, %v12436_v7  ;;  %v4310_v13 = vsel %vm4306_vm1, %v4290_v49, %v4293_v31  ;;  %v4316_v25 = vsel %vm4308_vm2, %v4299_v14, %v4315_v16  ;;  %v4589_v50 = vand.u32 2139095040, %v12439_v60 }
 0x370   : > { %v4312_v5 = vsel %vm4308_vm2, %v4296_v17, %v4311_v48  ;;  %v4317_v27 = vsel %vm4307_vm4, %v4314_v6, %v4316_v25  ;;  %v4318_v24 = vsel %vm4306_vm1, %v4296_v17, %v4299_v14  ;;  %v4319_v0 = vsel %vm4309_vm5, %v4305_v20, 1326507024 }
 0x371   : > { %vm4062_vm7 = vcmp.lt.s32.totalorder %v12395_v15, 2  ;;  %v4068_v9 = vsel %vm4066_vm0, %v4067_v41, %v8973_v37  ;;  %vm4380_vm6 = vcmp.lt.s32.totalorder %v12238_v58, 0  ;;  %v4446_v21 = vclz %v8108_v63 }
 0x372   : > { %v4065_v35 = vsel %vm4063_vm15, %v8971_v57, %v4064_v30  ;;  %v4320_v2 = vsel %vm4308_vm2, %v4302_v11, %v4319_v0  ;;  %v12459_v26 = vmul.u32.u64.low %v12425_v1, %v4317_v27  ;;  %v12460_v43 = vmul.u32.u64.high %v12425_v1, %v4317_v27, %v12459_v26 }
 0x373   : > { %v8109_v52 = vadd.s32 4294967294, %v4446_v21  ;;  %v4313_v22 = vsel %vm4307_vm4, %v4310_v13, %v4312_v5  ;;  %v4321_v36 = vsel %vm4307_vm4, %v4318_v24, %v4320_v2  ;;  %v4590_v61 = vshrl.u32 %v4589_v50, 23  ;;  %v12500_v13 = vld [vmem:[%s9349_s14 + $0x110] sm:$0xff] }
 0x374   : > { %vm3955_vm8 = vweird.f32 %v12091_v33  ;;  %vm3959_vm10 = vcmp.eq.s32.totalorder %v12422_v10, 0  ;;  %vm12469_vm11 = vcmp.le.f32.partialorder %v4378_v19, 0.7853982  ;;  %v4069_v45 = vsel %vm4062_vm7, %v4065_v35, %v4068_v9 }
 0x375   : > { %v12474_v29 = vmul.u32.u64.low %v12425_v1, %v4321_v36  ;;  %v12475_v57 = vmul.u32.u64.high %v12425_v1, %v4321_v36, %v12474_v29  ;;  %v4434_v34 = vadd.s32 %v12370_v18, %v12383_v3  ;;  %vm8110_vm12 = vcmp.lt.s32.totalorder %v8109_v52, 0 }
 0x376   : > { %v8115_v28 = vadd.s32 4294967169, %v4590_v61  ;;  %v4449_v53 = vsel %vm8110_vm12, 0, %v8109_v52  ;;  %v4464_v49 = vsub.s32 4, %v12417_v39  ;;  %v4329_v19 = vmul.u32 %v12425_v1, %v4313_v22 }
 0x377   : > { %v4332_v31 = vadd.s32 1, %v12460_v43  ;;  %v4450_v32 = vsub.s32 32, %v4449_v53  ;;  %v4451_v37 = vshll.u32 %v12436_v7, %v4449_v53  ;;  %v4454_v12 = vsub.s32 4294967266, %v4449_v53 }
 0x378   : > { %v4596_v17 = vadd.s32 1, %v8115_v28  ;;  %v4070_v15 = vsel %vm4059_vm3, nan, %v4069_v45  ;;  %vm3962_vm13 = vcmp.eq.s32.totalorder %v12422_v10, 2  ;;  %vm4331_vm9 = vc.u32 %v12475_v57, %v12459_v26 }
 0x379   : > { %v4586_v18 = vand.u32 2147483647, %v12439_v60  ;;  %v4452_v11 = vshrl.u32 %v4434_v34, %v4450_v32  ;;  %v4455_v1 = vadd.s32 127, %v4454_v12  ;;  %v4333_v51 = vsel %vm4331_vm9, %v4332_v31, %v12460_v43 }
 0x37a   : > { %v8975_v3 = vpop.eup %8974  ;;  %vm4597_vm14 = vcmp.gt.s32.totalorder %v4596_v17, 0  ;;  %v4465_v56 = vsel %vm4380_vm6, %v4464_v49, %v12417_v39  ;;  %v4334_v14 = vadd.s32 %v4333_v51, %v4329_v19  ;;  %vm3958_vm0 = vcmp.lt.s32.totalorder %v12422_v10, 2 }
 0x37b   : > { %v8977_v55 = vpop.eup %8976  ;;  %v3963_v7 = vxor.u32 2147483648, %v8975_v3  ;;  %v4598_v41 = vsel %vm4597_vm14, %v4596_v17, 0  ;;  %v4453_v8 = vor.u32 %v4452_v11, %v4451_v37  ;;  %v4456_v30 = vshll.u32 %v4455_v1, 23 }
 0x37c   : > { %v3960_v20 = vxor.u32 2147483648, %v8977_v55  ;;  %v4086_v48 = vmul.f32 %v4070_v15, %v12403_v23  ;;  %v4335_v16 = vadd.s32 536870912, %v4334_v14  ;;  %v4600_v63 = vand.u32 31, %v4598_v41 }
 0x37d   : > { %v3964_v6 = vsel %vm3962_vm13, %v3963_v7, %v8977_v55  ;;  %v4457_v39 = vor.u32 4788187, %v4456_v30  ;;  %v4460_v50 = vcvt.s32.f32 %v4453_v8  ;;  %v4467_v5 = vsel %vm12469_vm11, 0, %v4465_v56 }
 0x37e   : > { %v3961_v25 = vsel %vm3959_vm10, %v8975_v3, %v3960_v20  ;;  %v12506_v24 = vshrl.u32 %v4335_v16, 30  ;;  %v4593_v23 = vand.u32 8388607, %v4586_v18  ;;  %v4601_v0 = vsub.s32 32, %v4600_v63 }
 0x37f   : > { %v3965_v27 = vsel %vm3958_vm0, %v3961_v25, %v3964_v6  ;;  %v4458_v21 = vand.u32 2147483647, %v4457_v39  ;;  %v4599_v35 = vshrl.u32 %v4598_v41, 5  ;;  %v4485_v10 = vand.u32 2139095040, %v12500_v13 }
 0x380   : > { %v3966_v9 = vsel %vm3955_vm8, nan, %v3965_v27  ;;  %v4337_v43 = vshll.u32 %v12506_v24, 30  ;;  %v4603_v52 = vshll.u32 %v9137_v38, %v4600_v63  ;;  %v4606_v22 = vshll.u32 %v9138_v40, %v4600_v63 }
 0x381   : > { %v4085_v2 = vmul.f32 %v3966_v9, %v12409_v4  ;;  %v4461_v36 = vmul.f32 %v4460_v50, %v4458_v21  ;;  %v4604_v61 = vshrl.u32 %v9138_v40, %v4601_v0  ;;  %v4607_v29 = vshrl.u32 %v9139_v42, %v4601_v0 }
 0x382   : > { %v4609_v33 = vshll.u32 %v9139_v42, %v4600_v63  ;;  %v12520_v45 = vsub.s32 %v4334_v14, %v4337_v43  ;;  %v4610_v34 = vshrl.u32 %v9140_v44, %v4601_v0  ;;  %v4612_v4 = vshll.u32 %v9140_v44, %v4600_v63 }
 0x383   : > { %8473 = vmatprep.mubr.f32.mxu1 %v4085_v2  ;;  %v4613_v28 = vshrl.u32 %v9141_v46, %v4601_v0  ;;  %v4462_v53 = vxor.u32 2147483648, %v4461_v36  ;;  %v12525_v49 = vadd.s32 3, %v4467_v5  ;;  %v4594_v19 = vor.u32 8388608, %v4593_v23 }
 0x384   : > { %8474 = vmatmul.mubr.f32.gmra.mxu1 %v4086_v48  ;;  %v4486_v31 = vshrl.u32 %v4485_v10, 23  ;;  %v4340_v32 = vsub.s32 0, %v12520_v45  ;;  %v4602_v37 = vshrl.u32 %v9137_v38, %v4601_v0  ;;  %v4605_v12 = vor.u32 %v4604_v61, %v4603_v52 }
 0x385   : > { %v4608_v17 = vor.u32 %v4607_v29, %v4606_v22  ;;  %v4463_v15 = vsel %vm4380_vm6, %v4462_v53, %v4461_v36  ;;  %v4614_v3 = vor.u32 %v4613_v28, %v4612_v4  ;;  %v4615_v11 = vshll.u32 %v9141_v46, %v4600_v63 }
 0x386   : > { %v4616_v1 = vshrl.u32 %v9142_v54, %v4601_v0  ;;  %vm4276_vm15 = vcmp.lt.s32.totalorder %v12299_v59, 0  ;;  %v8104_v51 = vmin.u32 %v4340_v32, %v12520_v45  ;;  %v4611_v55 = vor.u32 %v4610_v34, %v4609_v33  ;;  %v8454_v33 = vpop.f32.mrf.mxu1 }
 0x387   : > { %vm4618_vm1 = vcmp.lt.s32.totalorder %v4599_v35, 1  ;;  %v4482_v7 = vand.u32 2147483647, %v12500_v13  ;;  %vm4620_vm2 = vcmp.lt.s32.totalorder %v4599_v35, 3  ;;  %vm4621_vm3 = vcmp.lt.s32.totalorder %v4599_v35, 4 }
 0x388   : > { %v4617_v56 = vor.u32 %v4616_v1, %v4615_v11  ;;  %v4634_v14 = vshll.u32 %v4594_v19, 8  ;;  %v4466_v41 = vsel %vm12469_vm11, %v12238_v58, %v4463_v15  ;;  %v4342_v20 = vclz %v8104_v51 }
 0x389   : > { %vm4619_vm4 = vcmp.lt.s32.totalorder %v4599_v35, 2  ;;  %v8111_v8 = vadd.s32 4294967169, %v4486_v31  ;;  %v4622_v30 = vsel %vm4618_vm1, %v4602_v37, %v4605_v12  ;;  %v4623_v48 = vsel %vm4621_vm3, %v4611_v55, 2102212464  ;;  %v12577_v37 = vld [vmem:[%s15159_s3 + $0x1] ss:$0 sm:$0xff] }
 0x38a   : > { %v4626_v6 = vsel %vm4618_vm1, %v4605_v12, %v4608_v17  ;;  %v4627_v16 = vsel %vm4621_vm3, %v4614_v3, 920167782  ;;  %v8105_v63 = vadd.s32 4294967294, %v4342_v20  ;;  %v4624_v25 = vsel %vm4620_vm2, %v4608_v17, %v4623_v48 }
 0x38b   : > { %v4628_v39 = vsel %vm4620_vm2, %v4611_v55, %v4627_v16  ;;  %v4630_v50 = vsel %vm4618_vm1, %v4608_v17, %v4611_v55  ;;  %v4330_v62 = vadd.s32 %v12459_v26, %v12475_v57  ;;  %v4360_v5 = vsub.s32 4, %v12506_v24  ;;  %v4178_v17 = vpop.f32.mrf.mxu1 }
 0x38c   : > { %v4629_v27 = vsel %vm4619_vm4, %v4626_v6, %v4628_v39  ;;  %v4631_v23 = vsel %vm4621_vm3, %v4617_v56, 1326507024  ;;  %vm8106_vm5 = vcmp.lt.s32.totalorder %v8105_v63, 0  ;;  %8978 = vcosq.f32 %v4466_v41 }
 0x38d   : > { %v4632_v0 = vsel %vm4620_vm2, %v4614_v3, %v4631_v23  ;;  %v12552_v9 = vmul.u32.u64.low %v4634_v14, %v4629_v27  ;;  %v12553_v21 = vmul.u32.u64.high %v4634_v14, %v4629_v27, %v12552_v9  ;;  %v4345_v10 = vsel %vm8106_vm5, 0, %v8105_v63 }
 0x38e   : > { %v4625_v2 = vsel %vm4619_vm4, %v4622_v30, %v4624_v25  ;;  %v4633_v43 = vsel %vm4619_vm4, %v4630_v50, %v4632_v0  ;;  %v4346_v26 = vsub.s32 32, %v4345_v10  ;;  %v4347_v57 = vshll.u32 %v12520_v45, %v4345_v10 }
 0x38f   : > { %v4350_v52 = vsub.s32 4294967266, %v4345_v10  ;;  %v4492_v22 = vadd.s32 1, %v8111_v8  ;;  %8980 = vsinq.f32 %v4466_v41  ;;  %v4361_v36 = vsel %vm4276_vm15, %v4360_v5, %v12506_v24 }
 0x390   : > { %v12562_v61 = vmul.u32.u64.low %v4634_v14, %v4633_v43  ;;  %v12563_v29 = vmul.u32.u64.high %v4634_v14, %v4633_v43, %v12562_v61  ;;  %v4348_v34 = vshrl.u32 %v4330_v62, %v4346_v26  ;;  %v4644_v28 = vadd.s32 1, %v12553_v21 }
 0x391   : > { %v4351_v4 = vadd.s32 127, %v4350_v52  ;;  %vm4493_vm7 = vcmp.gt.s32.totalorder %v4492_v22, 0  ;;  %vm12568_vm6 = vcmp.le.f32.partialorder %v4274_v47, 0.7853982  ;;  %v4641_v45 = vmul.u32 %v4634_v14, %v4625_v2 }
 0x392   : > { %v4494_v53 = vsel %vm4493_vm7, %v4492_v22, 0  ;;  %v4349_v19 = vor.u32 %v4348_v34, %v4347_v57  ;;  %v4489_v24 = vand.u32 8388607, %v4482_v7  ;;  %v12580_v12 = vand.u32 3, %v12525_v49 }
 0x393   : > { %v4352_v31 = vshll.u32 %v4351_v4, 23  ;;  %v4496_v32 = vand.u32 31, %v4494_v53  ;;  %v4363_v47 = vsel %vm12568_vm6, 0, %v4361_v36  ;;  %vm4643_vm8 = vc.u32 %v12563_v29, %v12552_v9 }
 0x394   : > { %v4356_v3 = vcvt.s32.f32 %v4349_v19  ;;  %v4645_v11 = vsel %vm4643_vm8, %v4644_v28, %v12553_v21  ;;  %v12588_v55 = vadd.f32 %v8454_v33, %v12577_v37  ;;  %v4367_v14 = vadd.s32 3, %v4363_v47 }
 0x395   : > { %v4353_v15 = vor.u32 4788187, %v4352_v31  ;;  %v4497_v1 = vsub.s32 32, %v4496_v32  ;;  %v4646_v51 = vadd.s32 %v4645_v11, %v4641_v45  ;;  %v4490_v49 = vor.u32 8388608, %v4489_v24 }
 0x396   : > { %v12591_v41 = vadd.f32 %v12577_v37, %v4178_v17  ;;  %v4499_v8 = vshll.u32 %v9137_v38, %v4496_v32  ;;  %vm4477_vm10 = vcmp.eq.s32.totalorder %v12580_v12, 2  ;;  %v4495_v6 = vshrl.u32 %v4494_v53, 5  ;;  %v12621_v53 = vld [vmem:[%s9349_s14 + $0x128] sm:$0xff] }
 0x397   : > { %v4354_v56 = vand.u32 2147483647, %v4353_v15  ;;  %v4647_v20 = vadd.s32 536870912, %v4646_v51  ;;  %v4500_v30 = vshrl.u32 %v9138_v40, %v4497_v1  ;;  %v4502_v16 = vshll.u32 %v9138_v40, %v4496_v32 }
 0x398   : > { %v4503_v63 = vshrl.u32 %v9139_v42, %v4497_v1  ;;  %vm4474_vm11 = vcmp.eq.s32.totalorder %v12580_v12, 0  ;;  %v4505_v39 = vshll.u32 %v9139_v42, %v4496_v32  ;;  %v4506_v50 = vshrl.u32 %v9140_v44, %v4497_v1 }
 0x399   : > { %v4357_v48 = vmul.f32 %v4356_v3, %v4354_v56  ;;  %v12599_v25 = vshrl.u32 %v4647_v20, 30  ;;  %v4508_v62 = vshll.u32 %v9140_v44, %v4496_v32  ;;  %v8979_v5 = vpop.eup %8978  ;;  %v12604_v23 = vand.u32 3, %v4367_v14 }
 0x39a   : > { %v4509_v0 = vshrl.u32 %v9141_v46, %v4497_v1  ;;  %v12607_v21 = vshll.u32 %v4490_v49, 8  ;;  %v4498_v2 = vshrl.u32 %v9137_v38, %v4497_v1  ;;  %v4501_v43 = vor.u32 %v4500_v30, %v4499_v8 }
 0x39b   : > { %v4358_v27 = vxor.u32 2147483648, %v4357_v48  ;;  %v4649_v10 = vshll.u32 %v12599_v25, 30  ;;  %v4511_v26 = vshll.u32 %v9141_v46, %v4496_v32  ;;  %v4504_v22 = vor.u32 %v4503_v63, %v4502_v16 }
 0x39c   : > { %v8981_v57 = vpop.eup %8980  ;;  %v4510_v36 = vor.u32 %v4509_v0, %v4508_v62  ;;  %v4512_v61 = vshrl.u32 %v9142_v54, %v4497_v1  ;;  %v4507_v4 = vor.u32 %v4506_v50, %v4505_v39  ;;  %vm4514_vm12 = vcmp.lt.s32.totalorder %v4495_v6, 1 }
 0x39d   : > { %v4359_v52 = vsel %vm4276_vm15, %v4358_v27, %v4357_v48  ;;  %v12618_v34 = vsub.s32 %v4646_v51, %v4649_v10  ;;  %v4478_v28 = vxor.u32 2147483648, %v8979_v5  ;;  %vm4516_vm13 = vcmp.lt.s32.totalorder %v4495_v6, 3 }
 0x39e   : > { %v4362_v33 = vsel %vm12568_vm6, %v12299_v59, %v4359_v52  ;;  %v4513_v45 = vor.u32 %v4512_v61, %v4511_v26  ;;  %vm4470_vm9 = vweird.f32 %v12238_v58  ;;  %vm4515_vm14 = vcmp.lt.s32.totalorder %v4495_v6, 2 }
 0x39f   : > { %8982 = vcosq.f32 %v4362_v33  ;;  %v4652_v19 = vsub.s32 0, %v12618_v34  ;;  %vm4517_vm0 = vcmp.lt.s32.totalorder %v4495_v6, 4  ;;  %v4475_v31 = vxor.u32 2147483648, %v8981_v57 }
 0x3a0   : > { %8984 = vsinq.f32 %v4362_v33  ;;  %v4519_v35 = vsel %vm4517_vm0, %v4507_v4, 2102212464  ;;  %v4522_v24 = vsel %vm4514_vm12, %v4501_v43, %v4504_v22  ;;  %v4523_v32 = vsel %vm4517_vm0, %v4510_v36, 920167782 }
 0x3a1   : > { %v8116_v47 = vmin.u32 %v4652_v19, %v12618_v34  ;;  %v4518_v17 = vsel %vm4514_vm12, %v4498_v2, %v4501_v43  ;;  %v4524_v15 = vsel %vm4516_vm13, %v4507_v4, %v4523_v32  ;;  %v4797_v3 = vand.u32 2139095040, %v12621_v53 }
 0x3a2   : > { %v4520_v11 = vsel %vm4516_vm13, %v4504_v22, %v4519_v35  ;;  %v4525_v1 = vsel %vm4515_vm14, %v4522_v24, %v4524_v15  ;;  %v4526_v51 = vsel %vm4514_vm12, %v4504_v22, %v4507_v4  ;;  %v4527_v56 = vsel %vm4517_vm0, %v4513_v45, 1326507024  ;;  %v12682_v15 = vld [vmem:[%s9349_s14 + $0x120] sm:$0xff] }
 0x3a3   : > { %vm4473_vm15 = vcmp.lt.s32.totalorder %v12580_v12, 2  ;;  %v4479_v14 = vsel %vm4477_vm10, %v4478_v28, %v8981_v57  ;;  %vm4588_vm1 = vcmp.lt.s32.totalorder %v12439_v60, 0  ;;  %v4654_v49 = vclz %v8116_v47 }
 0x3a4   : > { %v4476_v20 = vsel %vm4474_vm11, %v8979_v5, %v4475_v31  ;;  %v4528_v8 = vsel %vm4516_vm13, %v4510_v36, %v4527_v56  ;;  %v12641_v30 = vmul.u32.u64.low %v12607_v21, %v4525_v1  ;;  %v12642_v48 = vmul.u32.u64.high %v12607_v21, %v4525_v1, %v12641_v30 }
 0x3a5   : > { %v8117_v16 = vadd.s32 4294967294, %v4654_v49  ;;  %v4521_v63 = vsel %vm4515_vm14, %v4518_v17, %v4520_v11  ;;  %v4529_v39 = vsel %vm4515_vm14, %v4526_v51, %v4528_v8  ;;  %v4798_v50 = vshrl.u32 %v4797_v3, 23 }
 0x3a6   : > { %vm4366_vm2 = vweird.f32 %v12299_v59  ;;  %vm4370_vm3 = vcmp.eq.s32.totalorder %v12604_v23, 0  ;;  %vm12651_vm4 = vcmp.le.f32.partialorder %v4586_v18, 0.7853982  ;;  %v4480_v0 = vsel %vm4473_vm15, %v4476_v20, %v4479_v14 }
 0x3a7   : > { %v12656_v5 = vmul.u32.u64.low %v12607_v21, %v4529_v39  ;;  %v12657_v27 = vmul.u32.u64.high %v12607_v21, %v4529_v39, %v12656_v5  ;;  %v4642_v6 = vadd.s32 %v12552_v9, %v12563_v29  ;;  %vm8118_vm5 = vcmp.lt.s32.totalorder %v8117_v16, 0 }
 0x3a8   : > { %v8123_v10 = vadd.s32 4294967169, %v4798_v50  ;;  %v4657_v2 = vsel %vm8118_vm5, 0, %v8117_v16  ;;  %v4672_v43 = vsub.s32 4, %v12599_v25  ;;  %v4537_v18 = vmul.u32 %v12607_v21, %v4521_v63 }
 0x3a9   : > { %v4540_v26 = vadd.s32 1, %v12642_v48  ;;  %v4658_v57 = vsub.s32 32, %v4657_v2  ;;  %v4659_v52 = vshll.u32 %v12618_v34, %v4657_v2  ;;  %v4662_v22 = vsub.s32 4294967266, %v4657_v2 }
 0x3aa   : > { %v4804_v36 = vadd.s32 1, %v8123_v10  ;;  %v4481_v12 = vsel %vm4470_vm9, nan, %v4480_v0  ;;  %vm4373_vm7 = vcmp.eq.s32.totalorder %v12604_v23, 2  ;;  %vm4539_vm6 = vc.u32 %v12657_v27, %v12641_v30 }
 0x3ab   : > { %v4794_v9 = vand.u32 2147483647, %v12621_v53  ;;  %v4660_v61 = vshrl.u32 %v4642_v6, %v4658_v57  ;;  %v4663_v21 = vadd.s32 127, %v4662_v22  ;;  %v4541_v33 = vsel %vm4539_vm6, %v4540_v26, %v12642_v48 }
 0x3ac   : > { %v8983_v29 = vpop.eup %8982  ;;  %vm4805_vm8 = vcmp.gt.s32.totalorder %v4804_v36, 0  ;;  %v4673_v58 = vsel %vm4588_vm1, %v4672_v43, %v12599_v25  ;;  %v4542_v28 = vadd.s32 %v4541_v33, %v4537_v18  ;;  %vm4369_vm10 = vcmp.lt.s32.totalorder %v12604_v23, 2 }
 0x3ad   : > { %v8985_v34 = vpop.eup %8984  ;;  %v4374_v4 = vxor.u32 2147483648, %v8983_v29  ;;  %v4806_v45 = vsel %vm4805_vm8, %v4804_v36, 0  ;;  %v4661_v31 = vor.u32 %v4660_v61, %v4659_v52  ;;  %v4664_v35 = vshll.u32 %v4663_v21, 23 }
 0x3ae   : > { %v4371_v19 = vxor.u32 2147483648, %v8985_v34  ;;  %v5939_v24 = vmul.f32 %v4481_v12, %v12588_v55  ;;  %v4543_v47 = vadd.s32 536870912, %v4542_v28  ;;  %v4808_v17 = vand.u32 31, %v4806_v45 }
 0x3af   : > { %v4375_v32 = vsel %vm4373_vm7, %v4374_v4, %v8985_v34  ;;  %v4665_v25 = vor.u32 4788187, %v4664_v35  ;;  %v4668_v11 = vcvt.s32.f32 %v4661_v31  ;;  %v4675_v1 = vsel %vm12651_vm4, 0, %v4673_v58 }
 0x3b0   : > { %v4372_v3 = vsel %vm4370_vm3, %v8983_v29, %v4371_v19  ;;  %v12688_v56 = vshrl.u32 %v4543_v47, 30  ;;  %v4801_v55 = vand.u32 8388607, %v4794_v9  ;;  %v4809_v14 = vsub.s32 32, %v4808_v17 }
 0x3b1   : > { %v4376_v51 = vsel %vm4369_vm10, %v4372_v3, %v4375_v32  ;;  %v4666_v20 = vand.u32 2147483647, %v4665_v25  ;;  %v4807_v8 = vshrl.u32 %v4806_v45, 5  ;;  %v4693_v23 = vand.u32 2139095040, %v12682_v15 }
 0x3b2   : > { %v4377_v49 = vsel %vm4366_vm2, nan, %v4376_v51  ;;  %v4545_v16 = vshll.u32 %v12688_v56, 30  ;;  %v4811_v63 = vshll.u32 %v9137_v38, %v4808_v17  ;;  %v4814_v39 = vshll.u32 %v9138_v40, %v4808_v17 }
 0x3b3   : > { %v5938_v48 = vmul.f32 %v4377_v49, %v12591_v41  ;;  %v4669_v50 = vmul.f32 %v4668_v11, %v4666_v20  ;;  %v4812_v5 = vshrl.u32 %v9138_v40, %v4809_v14  ;;  %v4815_v0 = vshrl.u32 %v9139_v42, %v4809_v14 }
 0x3b4   : > { %v4817_v59 = vshll.u32 %v9139_v42, %v4808_v17  ;;  %v12702_v6 = vsub.s32 %v4542_v28, %v4545_v16  ;;  %v4818_v10 = vshrl.u32 %v9140_v44, %v4809_v14  ;;  %v4820_v41 = vshll.u32 %v9140_v44, %v4808_v17 }
 0x3b5   : > { %8508 = vmatprep.mubr.f32.mxu0 %v5938_v48  ;;  %v4821_v2 = vshrl.u32 %v9141_v46, %v4809_v14  ;;  %v4670_v43 = vxor.u32 2147483648, %v4669_v50  ;;  %v12707_v18 = vadd.s32 3, %v4675_v1  ;;  %v4802_v26 = vor.u32 8388608, %v4801_v55 }
 0x3b6   : > { %8509 = vmatmul.mubr.f32.vlgmr.msra.gmra.mxu0 %v5939_v24  ;;  %v4694_v57 = vshrl.u32 %v4693_v23, 23  ;;  %v4548_v52 = vsub.s32 0, %v12702_v6  ;;  %v4810_v22 = vshrl.u32 %v9137_v38, %v4809_v14  ;;  %v4813_v36 = vor.u32 %v4812_v5, %v4811_v63 }
 0x3b7   : > { %v4816_v12 = vor.u32 %v4815_v0, %v4814_v39  ;;  %v4671_v29 = vsel %vm4588_vm1, %v4670_v43, %v4669_v50  ;;  %v4822_v61 = vor.u32 %v4821_v2, %v4820_v41  ;;  %v4823_v21 = vshll.u32 %v9141_v46, %v4808_v17 }
 0x3b8   : > { %v4824_v33 = vshrl.u32 %v9142_v54, %v4809_v14  ;;  %vm4484_vm11 = vcmp.lt.s32.totalorder %v12500_v13, 0  ;;  %v8112_v34 = vmin.u32 %v4548_v52, %v12702_v6  ;;  %v4819_v4 = vor.u32 %v4818_v10, %v4817_v59  ;;  %v8457_v10 = vpop.f32.mrf.mxu1 }
 0x3b9   : > { %vm4826_vm12 = vcmp.lt.s32.totalorder %v4807_v8, 1  ;;  %v4690_v58 = vand.u32 2147483647, %v12682_v15  ;;  %vm4828_vm13 = vcmp.lt.s32.totalorder %v4807_v8, 3  ;;  %vm4829_vm9 = vcmp.lt.s32.totalorder %v4807_v8, 4 }
 0x3ba   : > { %v4825_v28 = vor.u32 %v4824_v33, %v4823_v21  ;;  %v4842_v45 = vshll.u32 %v4802_v26, 8  ;;  %v4674_v19 = vsel %vm12651_vm4, %v12439_v60, %v4671_v29  ;;  %v4550_v31 = vclz %v8112_v34 }
 0x3bb   : > { %vm4827_vm14 = vcmp.lt.s32.totalorder %v4807_v8, 2  ;;  %v8119_v35 = vadd.s32 4294967169, %v4694_v57  ;;  %v4830_v24 = vsel %vm4826_vm12, %v4810_v22, %v4813_v36  ;;  %v4831_v32 = vsel %vm4829_vm9, %v4819_v4, 2102212464 }
 0x3bc   : > { %v4834_v47 = vsel %vm4826_vm12, %v4813_v36, %v4816_v12  ;;  %v4835_v17 = vsel %vm4829_vm9, %v4822_v61, 920167782  ;;  %v8113_v3 = vadd.s32 4294967294, %v4550_v31  ;;  %v4832_v25 = vsel %vm4828_vm13, %v4816_v12, %v4831_v32 }
 0x3bd   : > { %v4836_v11 = vsel %vm4828_vm13, %v4819_v4, %v4835_v17  ;;  %v4838_v1 = vsel %vm4826_vm12, %v4816_v12, %v4819_v4  ;;  %v4538_v62 = vadd.s32 %v12641_v30, %v12657_v27  ;;  %v4568_v51 = vsub.s32 4, %v12688_v56 }
 0x3be   : > { %v4837_v55 = vsel %vm4827_vm14, %v4834_v47, %v4836_v11  ;;  %v4839_v14 = vsel %vm4829_vm9, %v4825_v28, 1326507024  ;;  %vm8114_vm0 = vcmp.lt.s32.totalorder %v8113_v3, 0  ;;  %8986 = vcosq.f32 %v4674_v19 }
 0x3bf   : > { %v4840_v49 = vsel %vm4828_vm13, %v4822_v61, %v4839_v14  ;;  %v12734_v20 = vmul.u32.u64.low %v4842_v45, %v4837_v55  ;;  %v12735_v23 = vmul.u32.u64.high %v4842_v45, %v4837_v55, %v12734_v20  ;;  %v4553_v48 = vsel %vm8114_vm0, 0, %v8113_v3 }
 0x3c0   : > { %v4833_v16 = vsel %vm4827_vm14, %v4830_v24, %v4832_v25  ;;  %v4841_v63 = vsel %vm4827_vm14, %v4838_v1, %v4840_v49  ;;  %v4554_v30 = vsub.s32 32, %v4553_v48  ;;  %v4555_v27 = vshll.u32 %v12702_v6, %v4553_v48 }
 0x3c1   : > { %v4558_v39 = vsub.s32 4294967266, %v4553_v48  ;;  %v4700_v50 = vadd.s32 1, %v8119_v35  ;;  %8988 = vsinq.f32 %v4674_v19  ;;  %v4569_v5 = vsel %vm4484_vm11, %v4568_v51, %v12688_v56 }
 0x3c2   : > { %v12744_v0 = vmul.u32.u64.low %v4842_v45, %v4841_v63  ;;  %v12745_v59 = vmul.u32.u64.high %v4842_v45, %v4841_v63, %v12744_v0  ;;  %v4556_v41 = vshrl.u32 %v4538_v62, %v4554_v30  ;;  %v4852_v43 = vadd.s32 1, %v12735_v23 }
 0x3c3   : > { %v4559_v2 = vadd.s32 127, %v4558_v39  ;;  %vm4701_vm15 = vcmp.gt.s32.totalorder %v4700_v50, 0  ;;  %vm12750_vm1 = vcmp.le.f32.partialorder %v4482_v7, 0.7853982  ;;  %v4849_v6 = vmul.u32 %v4842_v45, %v4833_v16  ;;  %v4188_v7 = vpop.f32.mrf.mxu1 }
 0x3c4   : > { %v4702_v26 = vsel %vm4701_vm15, %v4700_v50, 0  ;;  %v4557_v57 = vor.u32 %v4556_v41, %v4555_v27  ;;  %v4697_v56 = vand.u32 8388607, %v4690_v58  ;;  %v12757_v36 = vand.u32 3, %v12707_v18 }
 0x3c5   : > { %v4560_v52 = vshll.u32 %v4559_v2, 23  ;;  %v4704_v22 = vand.u32 31, %v4702_v26  ;;  %v4571_v12 = vsel %vm12750_vm1, 0, %v4569_v5  ;;  %vm4851_vm2 = vc.u32 %v12745_v59, %v12734_v20 }
 0x3c6   : > { %v4564_v61 = vcvt.s32.f32 %v4557_v57  ;;  %v4853_v21 = vsel %vm4851_vm2, %v4852_v43, %v12735_v23  ;;  %v12765_v4 = vadd.f32 %v8457_v10, %v12577_v37  ;;  %v4575_v45 = vadd.s32 3, %v4571_v12 }
 0x3c7   : > { %v4561_v29 = vor.u32 4788187, %v4560_v52  ;;  %v4705_v33 = vsub.s32 32, %v4704_v22  ;;  %v4854_v34 = vadd.s32 %v4853_v21, %v4849_v6  ;;  %v4698_v18 = vor.u32 8388608, %v4697_v56 }
 0x3c8   : > { %v12768_v19 = vadd.f32 %v12577_v37, %v4188_v7  ;;  %v4707_v35 = vshll.u32 %v9137_v38, %v4704_v22  ;;  %vm4685_vm3 = vcmp.eq.s32.totalorder %v12757_v36, 2  ;;  %v4703_v47 = vshrl.u32 %v4702_v26, 5  ;;  %v12798_v26 = vld [vmem:[%s9349_s14 + $0x138] sm:$0xff] }
 0x3c9   : > { %v4562_v28 = vand.u32 2147483647, %v4561_v29  ;;  %v4855_v31 = vadd.s32 536870912, %v4854_v34  ;;  %v4708_v24 = vshrl.u32 %v9138_v40, %v4705_v33  ;;  %v4710_v17 = vshll.u32 %v9138_v40, %v4704_v22 }
 0x3ca   : > { %v4711_v3 = vshrl.u32 %v9139_v42, %v4705_v33  ;;  %vm4682_vm4 = vcmp.eq.s32.totalorder %v12757_v36, 0  ;;  %v4713_v11 = vshll.u32 %v9139_v42, %v4704_v22  ;;  %v4714_v1 = vshrl.u32 %v9140_v44, %v4705_v33 }
 0x3cb   : > { %v4565_v32 = vmul.f32 %v4564_v61, %v4562_v28  ;;  %v12776_v25 = vshrl.u32 %v4855_v31, 30  ;;  %v4716_v62 = vshll.u32 %v9140_v44, %v4704_v22  ;;  %v8987_v51 = vpop.eup %8986  ;;  %v12781_v14 = vand.u32 3, %v4575_v45 }
 0x3cc   : > { %v4717_v49 = vshrl.u32 %v9141_v46, %v4705_v33  ;;  %v12784_v23 = vshll.u32 %v4698_v18, 8  ;;  %v4706_v16 = vshrl.u32 %v9137_v38, %v4705_v33  ;;  %v4709_v63 = vor.u32 %v4708_v24, %v4707_v35 }
 0x3cd   : > { %v4566_v55 = vxor.u32 2147483648, %v4565_v32  ;;  %v4857_v48 = vshll.u32 %v12776_v25, 30  ;;  %v4719_v30 = vshll.u32 %v9141_v46, %v4704_v22  ;;  %v4712_v50 = vor.u32 %v4711_v3, %v4710_v17 }
 0x3ce   : > { %v8989_v27 = vpop.eup %8988  ;;  %v4718_v5 = vor.u32 %v4717_v49, %v4716_v62  ;;  %v4720_v0 = vshrl.u32 %v9142_v54, %v4705_v33  ;;  %v4715_v2 = vor.u32 %v4714_v1, %v4713_v11  ;;  %vm4722_vm5 = vcmp.lt.s32.totalorder %v4703_v47, 1 }
 0x3cf   : > { %v4567_v39 = vsel %vm4484_vm11, %v4566_v55, %v4565_v32  ;;  %v12795_v41 = vsub.s32 %v4854_v34, %v4857_v48  ;;  %v4686_v43 = vxor.u32 2147483648, %v8987_v51  ;;  %vm4724_vm7 = vcmp.lt.s32.totalorder %v4703_v47, 3 }
 0x3d0   : > { %v4570_v10 = vsel %vm12750_vm1, %v12500_v13, %v4567_v39  ;;  %v4721_v6 = vor.u32 %v4720_v0, %v4719_v30  ;;  %vm4678_vm6 = vweird.f32 %v12439_v60  ;;  %vm4723_vm8 = vcmp.lt.s32.totalorder %v4703_v47, 2 }
 0x3d1   : > { %8990 = vcosq.f32 %v4570_v10  ;;  %v4860_v57 = vsub.s32 0, %v12795_v41  ;;  %vm4725_vm10 = vcmp.lt.s32.totalorder %v4703_v47, 4  ;;  %v4683_v52 = vxor.u32 2147483648, %v8989_v27 }
 0x3d2   : > { %8992 = vsinq.f32 %v4570_v10  ;;  %v4727_v8 = vsel %vm4725_vm10, %v4715_v2, 2102212464  ;;  %v4730_v56 = vsel %vm4722_vm5, %v4709_v63, %v4712_v50  ;;  %v4731_v22 = vsel %vm4725_vm10, %v4718_v5, 920167782 }
 0x3d3   : > { %v8124_v12 = vmin.u32 %v4860_v57, %v12795_v41  ;;  %v4726_v7 = vsel %vm4722_vm5, %v4706_v16, %v4709_v63  ;;  %v4732_v29 = vsel %vm4724_vm7, %v4715_v2, %v4731_v22  ;;  %v5005_v61 = vand.u32 2139095040, %v12798_v26 }
 0x3d4   : > { %v4728_v21 = vsel %vm4724_vm7, %v4712_v50, %v4727_v8  ;;  %v4733_v33 = vsel %vm4723_vm8, %v4730_v56, %v4732_v29  ;;  %v4734_v34 = vsel %vm4722_vm5, %v4712_v50, %v4715_v2  ;;  %v4735_v28 = vsel %vm4725_vm10, %v4721_v6, 1326507024  ;;  %v12859_v29 = vld [vmem:[%s9349_s14 + $0x130] sm:$0xff] }
 0x3d5   : > { %vm4681_vm11 = vcmp.lt.s32.totalorder %v12757_v36, 2  ;;  %v4687_v45 = vsel %vm4685_vm3, %v4686_v43, %v8989_v27  ;;  %vm4796_vm12 = vcmp.lt.s32.totalorder %v12621_v53, 0  ;;  %v4862_v18 = vclz %v8124_v12 }
 0x3d6   : > { %v4684_v31 = vsel %vm4682_vm4, %v8987_v51, %v4683_v52  ;;  %v4736_v35 = vsel %vm4724_vm7, %v4718_v5, %v4735_v28  ;;  %v12818_v24 = vmul.u32.u64.low %v12784_v23, %v4733_v33  ;;  %v12819_v32 = vmul.u32.u64.high %v12784_v23, %v4733_v33, %v12818_v24 }
 0x3d7   : > { %v8125_v17 = vadd.s32 4294967294, %v4862_v18  ;;  %v4729_v3 = vsel %vm4723_vm8, %v4726_v7, %v4728_v21  ;;  %v4737_v11 = vsel %vm4723_vm8, %v4734_v34, %v4736_v35  ;;  %v5006_v1 = vshrl.u32 %v5005_v61, 23 }
 0x3d8   : > { %vm4574_vm13 = vweird.f32 %v12500_v13  ;;  %vm4578_vm9 = vcmp.eq.s32.totalorder %v12781_v14, 0  ;;  %vm12828_vm14 = vcmp.le.f32.partialorder %v4794_v9, 0.7853982  ;;  %v4688_v49 = vsel %vm4681_vm11, %v4684_v31, %v4687_v45 }
 0x3d9   : > { %v12833_v51 = vmul.u32.u64.low %v12784_v23, %v4737_v11  ;;  %v12834_v55 = vmul.u32.u64.high %v12784_v23, %v4737_v11, %v12833_v51  ;;  %v4850_v47 = vadd.s32 %v12734_v20, %v12745_v59  ;;  %vm8126_vm0 = vcmp.lt.s32.totalorder %v8125_v17, 0 }
 0x3da   : > { %v8131_v48 = vadd.s32 4294967169, %v5006_v1  ;;  %v4865_v16 = vsel %vm8126_vm0, 0, %v8125_v17  ;;  %v4880_v63 = vsub.s32 4, %v12776_v25  ;;  %v4745_v9 = vmul.u32 %v12784_v23, %v4729_v3 }
 0x3db   : > { %v4748_v30 = vadd.s32 1, %v12819_v32  ;;  %v4866_v27 = vsub.s32 32, %v4865_v16  ;;  %v4867_v39 = vshll.u32 %v12795_v41, %v4865_v16  ;;  %v4870_v50 = vsub.s32 4294967266, %v4865_v16 }
 0x3dc   : > { %v5012_v5 = vadd.s32 1, %v8131_v48  ;;  %v4689_v36 = vsel %vm4678_vm6, nan, %v4688_v49  ;;  %vm4581_vm15 = vcmp.eq.s32.totalorder %v12781_v14, 2  ;;  %vm4747_vm1 = vc.u32 %v12834_v55, %v12818_v24 }
 0x3dd   : > { %v5002_v20 = vand.u32 2147483647, %v12798_v26  ;;  %v4868_v0 = vshrl.u32 %v4850_v47, %v4866_v27  ;;  %v4871_v23 = vadd.s32 127, %v4870_v50  ;;  %v4749_v10 = vsel %vm4747_vm1, %v4748_v30, %v12819_v32 }
 0x3de   : > { %v8991_v59 = vpop.eup %8990  ;;  %vm5013_vm2 = vcmp.gt.s32.totalorder %v5012_v5, 0  ;;  %v4881_v60 = vsel %vm4796_vm12, %v4880_v63, %v12776_v25  ;;  %v4750_v43 = vadd.s32 %v4749_v10, %v4745_v9  ;;  %vm4577_vm3 = vcmp.lt.s32.totalorder %v12781_v14, 2 }
 0x3df   : > { %v8993_v41 = vpop.eup %8992  ;;  %v4582_v2 = vxor.u32 2147483648, %v8991_v59  ;;  %v5014_v6 = vsel %vm5013_vm2, %v5012_v5, 0  ;;  %v4869_v52 = vor.u32 %v4868_v0, %v4867_v39  ;;  %v4872_v8 = vshll.u32 %v4871_v23, 23 }
 0x3e0   : > { %v4579_v57 = vxor.u32 2147483648, %v8993_v41  ;;  %v5941_v56 = vmul.f32 %v4689_v36, %v12765_v4  ;;  %v4751_v12 = vadd.s32 536870912, %v4750_v43  ;;  %v5016_v7 = vand.u32 31, %v5014_v6 }
 0x3e1   : > { %v4583_v22 = vsel %vm4581_vm15, %v4582_v2, %v8993_v41  ;;  %v4873_v25 = vor.u32 4788187, %v4872_v8  ;;  %v4876_v21 = vcvt.s32.f32 %v4869_v52  ;;  %v4883_v33 = vsel %vm12828_vm14, 0, %v4881_v60 }
 0x3e2   : > { %v4580_v61 = vsel %vm4578_vm9, %v8991_v59, %v4579_v57  ;;  %v12865_v28 = vshrl.u32 %v4751_v12, 30  ;;  %v5009_v4 = vand.u32 8388607, %v5002_v20  ;;  %v5017_v45 = vsub.s32 32, %v5016_v7 }
 0x3e3   : > { %v4584_v34 = vsel %vm4577_vm3, %v4580_v61, %v4583_v22  ;;  %v4874_v31 = vand.u32 2147483647, %v4873_v25  ;;  %v5015_v35 = vshrl.u32 %v5014_v6, 5  ;;  %v4901_v14 = vand.u32 2139095040, %v12859_v29 }
 0x3e4   : > { %v4585_v18 = vsel %vm4574_vm13, nan, %v4584_v34  ;;  %v4753_v17 = vshll.u32 %v12865_v28, 30  ;;  %v5019_v3 = vshll.u32 %v9137_v38, %v5016_v7  ;;  %v5022_v11 = vshll.u32 %v9138_v40, %v5016_v7 }
 0x3e5   : > { %v5940_v32 = vmul.f32 %v4585_v18, %v12768_v19  ;;  %v4877_v1 = vmul.f32 %v4876_v21, %v4874_v31  ;;  %v5020_v51 = vshrl.u32 %v9138_v40, %v5017_v45  ;;  %v5023_v49 = vshrl.u32 %v9139_v42, %v5017_v45 }
 0x3e6   : > { %v5025_v13 = vshll.u32 %v9139_v42, %v5016_v7  ;;  %v12879_v47 = vsub.s32 %v4750_v43, %v4753_v17  ;;  %v5026_v48 = vshrl.u32 %v9140_v44, %v5017_v45  ;;  %v5028_v19 = vshll.u32 %v9140_v44, %v5016_v7 }
 0x3e7   : > { %8511 = vmatprep.mubr.f32.mxu0 %v5940_v32  ;;  %v5029_v16 = vshrl.u32 %v9141_v46, %v5017_v45  ;;  %v4878_v63 = vxor.u32 2147483648, %v4877_v1  ;;  %v12884_v9 = vadd.s32 3, %v4883_v33  ;;  %v5010_v30 = vor.u32 8388608, %v5009_v4 }
 0x3e8   : > { %8512 = vmatmul.mubr.f32.gmra.mxu0 %v5941_v56  ;;  %v4902_v27 = vshrl.u32 %v4901_v14, 23  ;;  %v4756_v39 = vsub.s32 0, %v12879_v47  ;;  %v5018_v50 = vshrl.u32 %v9137_v38, %v5017_v45  ;;  %v5021_v5 = vor.u32 %v5020_v51, %v5019_v3 }
 0x3e9   : > { %v5024_v36 = vor.u32 %v5023_v49, %v5022_v11  ;;  %v4879_v59 = vsel %vm4796_vm12, %v4878_v63, %v4877_v1  ;;  %v5030_v0 = vor.u32 %v5029_v16, %v5028_v19  ;;  %v5031_v23 = vshll.u32 %v9141_v46, %v5016_v7 }
 0x3ea   : > { %v5032_v10 = vshrl.u32 %v9142_v54, %v5017_v45  ;;  %vm4692_vm4 = vcmp.lt.s32.totalorder %v12682_v15, 0  ;;  %v8120_v41 = vmin.u32 %v4756_v39, %v12879_v47  ;;  %v5027_v2 = vor.u32 %v5026_v48, %v5025_v13  ;;  %v8460_v48 = vpop.f32.mrf.mxu1 }
 0x3eb   : > { %vm5034_vm5 = vcmp.lt.s32.totalorder %v5015_v35, 1  ;;  %v4898_v60 = vand.u32 2147483647, %v12859_v29  ;;  %vm5036_vm7 = vcmp.lt.s32.totalorder %v5015_v35, 3  ;;  %vm5037_vm6 = vcmp.lt.s32.totalorder %v5015_v35, 4 }
 0x3ec   : > { %v5033_v43 = vor.u32 %v5032_v10, %v5031_v23  ;;  %v5050_v6 = vshll.u32 %v5010_v30, 8  ;;  %v4882_v57 = vsel %vm12828_vm14, %v12621_v53, %v4879_v59  ;;  %v4758_v52 = vclz %v8120_v41 }
 0x3ed   : > { %vm5035_vm8 = vcmp.lt.s32.totalorder %v5015_v35, 2  ;;  %v8127_v8 = vadd.s32 4294967169, %v4902_v27  ;;  %v5038_v56 = vsel %vm5034_vm5, %v5018_v50, %v5021_v5  ;;  %v5039_v22 = vsel %vm5037_vm6, %v5027_v2, 2102212464 }
 0x3ee   : > { %v5042_v12 = vsel %vm5034_vm5, %v5021_v5, %v5024_v36  ;;  %v5043_v7 = vsel %vm5037_vm6, %v5030_v0, 920167782  ;;  %v8121_v61 = vadd.s32 4294967294, %v4758_v52  ;;  %v5040_v25 = vsel %vm5036_vm7, %v5024_v36, %v5039_v22 }
 0x3ef   : > { %v5044_v21 = vsel %vm5036_vm7, %v5027_v2, %v5043_v7  ;;  %v5046_v33 = vsel %vm5034_vm5, %v5024_v36, %v5027_v2  ;;  %v4746_v62 = vadd.s32 %v12818_v24, %v12834_v55  ;;  %v4776_v34 = vsub.s32 4, %v12865_v28 }
 0x3f0   : > { %v5045_v4 = vsel %vm5035_vm8, %v5042_v12, %v5044_v21  ;;  %v5047_v45 = vsel %vm5037_vm6, %v5033_v43, 1326507024  ;;  %vm8122_vm10 = vcmp.lt.s32.totalorder %v8121_v61, 0  ;;  %8994 = vcosq.f32 %v4882_v57 }
 0x3f1   : > { %v5048_v18 = vsel %vm5036_vm7, %v5030_v0, %v5047_v45  ;;  %v12911_v31 = vmul.u32.u64.low %v5050_v6, %v5045_v4  ;;  %v12912_v14 = vmul.u32.u64.high %v5050_v6, %v5045_v4, %v12911_v31  ;;  %v4761_v32 = vsel %vm8122_vm10, 0, %v8121_v61 }
 0x3f2   : > { %v5041_v17 = vsel %vm5035_vm8, %v5038_v56, %v5040_v25  ;;  %v5049_v3 = vsel %vm5035_vm8, %v5046_v33, %v5048_v18  ;;  %v4762_v24 = vsub.s32 32, %v4761_v32  ;;  %v4763_v55 = vshll.u32 %v12879_v47, %v4761_v32 }
 0x3f3   : > { %v4766_v11 = vsub.s32 4294967266, %v4761_v32  ;;  %v4908_v1 = vadd.s32 1, %v8127_v8  ;;  %8996 = vsinq.f32 %v4882_v57  ;;  %v4777_v51 = vsel %vm4692_vm4, %v4776_v34, %v12865_v28 }
 0x3f4   : > { %v12921_v49 = vmul.u32.u64.low %v5050_v6, %v5049_v3  ;;  %v12922_v13 = vmul.u32.u64.high %v5050_v6, %v5049_v3, %v12921_v49  ;;  %v4764_v19 = vshrl.u32 %v4746_v62, %v4762_v24  ;;  %v5060_v63 = vadd.s32 1, %v12912_v14 }
 0x3f5   : > { %v4767_v16 = vadd.s32 127, %v4766_v11  ;;  %vm4909_vm11 = vcmp.gt.s32.totalorder %v4908_v1, 0  ;;  %vm12927_vm12 = vcmp.le.f32.partialorder %v4690_v58, 0.7853982  ;;  %v5057_v47 = vmul.u32 %v5050_v6, %v5041_v17  ;;  %v4198_v58 = vpop.f32.mrf.mxu1 }
 0x3f6   : > { %v4910_v30 = vsel %vm4909_vm11, %v4908_v1, 0  ;;  %v4765_v27 = vor.u32 %v4764_v19, %v4763_v55  ;;  %v4905_v28 = vand.u32 8388607, %v4898_v60  ;;  %v12934_v5 = vand.u32 3, %v12884_v9 }
 0x3f7   : > { %v4768_v39 = vshll.u32 %v4767_v16, 23  ;;  %v4912_v50 = vand.u32 31, %v4910_v30  ;;  %v4779_v36 = vsel %vm12927_vm12, 0, %v4777_v51  ;;  %vm5059_vm13 = vc.u32 %v12922_v13, %v12911_v31 }
 0x3f8   : > { %v4772_v0 = vcvt.s32.f32 %v4765_v27  ;;  %v5061_v23 = vsel %vm5059_vm13, %v5060_v63, %v12912_v14  ;;  %v12942_v2 = vadd.f32 %v8460_v48, %v12577_v37  ;;  %v4783_v6 = vadd.s32 3, %v4779_v36 }
 0x3f9   : > { %v4769_v59 = vor.u32 4788187, %v4768_v39  ;;  %v4913_v10 = vsub.s32 32, %v4912_v50  ;;  %v5062_v41 = vadd.s32 %v5061_v23, %v5057_v47  ;;  %v4906_v9 = vor.u32 8388608, %v4905_v28  ;;  %v12975_v47 = vld [vmem:[%s9349_s14 + $0x148] sm:$0xff] }
 0x3fa   : > { %v12945_v57 = vadd.f32 %v12577_v37, %v4198_v58  ;;  %v4915_v8 = vshll.u32 %v9137_v38, %v4912_v50  ;;  %vm4893_vm9 = vcmp.eq.s32.totalorder %v12934_v5, 2  ;;  %v4911_v12 = vshrl.u32 %v4910_v30, 5 }
 0x3fb   : > { %v4770_v43 = vand.u32 2147483647, %v4769_v59  ;;  %v5063_v52 = vadd.s32 536870912, %v5062_v41  ;;  %v4916_v56 = vshrl.u32 %v9138_v40, %v4913_v10  ;;  %v4918_v7 = vshll.u32 %v9138_v40, %v4912_v50 }
 0x3fc   : > { %v4919_v61 = vshrl.u32 %v9139_v42, %v4913_v10  ;;  %vm4890_vm14 = vcmp.eq.s32.totalorder %v12934_v5, 0  ;;  %v4921_v37 = vshll.u32 %v9139_v42, %v4912_v50  ;;  %v4922_v21 = vshrl.u32 %v9140_v44, %v4913_v10 }
 0x3fd   : > { %v4773_v22 = vmul.f32 %v4772_v0, %v4770_v43  ;;  %v12953_v25 = vshrl.u32 %v5063_v52, 30  ;;  %v4924_v33 = vshll.u32 %v9140_v44, %v4912_v50  ;;  %v8995_v62 = vpop.eup %8994  ;;  %v12958_v4 = vand.u32 3, %v4783_v6 }
 0x3fe   : > { %v4925_v45 = vshrl.u32 %v9141_v46, %v4913_v10  ;;  %v12961_v18 = vshll.u32 %v4906_v9, 8  ;;  %v4914_v32 = vshrl.u32 %v9137_v38, %v4913_v10  ;;  %v4917_v17 = vor.u32 %v4916_v56, %v4915_v8 }
 0x3ff   : > { %v4774_v34 = vxor.u32 2147483648, %v4773_v22  ;;  %v5065_v14 = vshll.u32 %v12953_v25, 30  ;;  %v4927_v3 = vshll.u32 %v9141_v46, %v4912_v50  ;;  %v4920_v11 = vor.u32 %v4919_v61, %v4918_v7 }
 0x400   : > { %v8997_v24 = vpop.eup %8996  ;;  %v4926_v1 = vor.u32 %v4925_v45, %v4924_v33  ;;  %v4928_v51 = vshrl.u32 %v9142_v54, %v4913_v10  ;;  %v4923_v19 = vor.u32 %v4922_v21, %v4921_v37  ;;  %vm4930_vm0 = vcmp.lt.s32.totalorder %v4911_v12, 1 }
 0x401   : > { %v4775_v55 = vsel %vm4692_vm4, %v4774_v34, %v4773_v22  ;;  %v12972_v48 = vsub.s32 %v5062_v41, %v5065_v14  ;;  %v4894_v16 = vxor.u32 2147483648, %v8995_v62  ;;  %vm4932_vm15 = vcmp.lt.s32.totalorder %v4911_v12, 3 }
 0x402   : > { %v4778_v49 = vsel %vm12927_vm12, %v12682_v15, %v4775_v55  ;;  %v4929_v63 = vor.u32 %v4928_v51, %v4927_v3  ;;  %vm4886_vm1 = vweird.f32 %v12621_v53  ;;  %vm4931_vm2 = vcmp.lt.s32.totalorder %v4911_v12, 2 }
 0x403   : > { %8998 = vcosq.f32 %v4778_v49  ;;  %v5068_v30 = vsub.s32 0, %v12972_v48  ;;  %vm4933_vm3 = vcmp.lt.s32.totalorder %v4911_v12, 4  ;;  %v4891_v27 = vxor.u32 2147483648, %v8997_v24 }
 0x404   : > { %9000 = vsinq.f32 %v4778_v49  ;;  %v4935_v35 = vsel %vm4933_vm3, %v4923_v19, 2102212464  ;;  %v4938_v39 = vsel %vm4930_vm0, %v4917_v17, %v4920_v11  ;;  %v4939_v28 = vsel %vm4933_vm3, %v4926_v1, 920167782 }
 0x405   : > { %v8132_v50 = vmin.u32 %v5068_v30, %v12972_v48  ;;  %v4934_v36 = vsel %vm4930_vm0, %v4914_v32, %v4917_v17  ;;  %v4940_v58 = vsel %vm4932_vm15, %v4923_v19, %v4939_v28  ;;  %v5213_v59 = vand.u32 2139095040, %v12975_v47 }
 0x406   : > { %v4936_v0 = vsel %vm4932_vm15, %v4920_v11, %v4935_v35  ;;  %v4941_v23 = vsel %vm4931_vm2, %v4938_v39, %v4940_v58  ;;  %v4942_v10 = vsel %vm4930_vm0, %v4920_v11, %v4923_v19  ;;  %v4943_v41 = vsel %vm4933_vm3, %v4929_v63, 1326507024 }
 0x407   : > { %vm4889_vm4 = vcmp.lt.s32.totalorder %v12934_v5, 2  ;;  %v4895_v43 = vsel %vm4893_vm9, %v4894_v16, %v8997_v24  ;;  %vm5004_vm5 = vcmp.lt.s32.totalorder %v12798_v26, 0  ;;  %v5070_v6 = vclz %v8132_v50 }
 0x408   : > { %v4892_v9 = vsel %vm4890_vm14, %v8995_v62, %v4891_v27  ;;  %v4944_v52 = vsel %vm4932_vm15, %v4926_v1, %v4943_v41  ;;  %v12995_v8 = vmul.u32.u64.low %v12961_v18, %v4941_v23  ;;  %v12996_v56 = vmul.u32.u64.high %v12961_v18, %v4941_v23, %v12995_v8 }
 0x409   : > { %v8133_v22 = vadd.s32 4294967294, %v5070_v6  ;;  %v4937_v7 = vsel %vm4931_vm2, %v4934_v36, %v4936_v0  ;;  %v4945_v61 = vsel %vm4931_vm2, %v4942_v10, %v4944_v52  ;;  %v5214_v37 = vshrl.u32 %v5213_v59, 23  ;;  %v13036_v36 = vld [vmem:[%s9349_s14 + $0x140] sm:$0xff] }
 0x40a   : > { %vm4782_vm7 = vweird.f32 %v12682_v15  ;;  %vm4786_vm6 = vcmp.eq.s32.totalorder %v12958_v4, 0  ;;  %vm13005_vm8 = vcmp.le.f32.partialorder %v5002_v20, 0.7853982  ;;  %v4896_v34 = vsel %vm4889_vm4, %v4892_v9, %v4895_v43 }
 0x40b   : > { %v13010_v33 = vmul.u32.u64.low %v12961_v18, %v4945_v61  ;;  %v13011_v62 = vmul.u32.u64.high %v12961_v18, %v4945_v61, %v13010_v33  ;;  %v5058_v12 = vadd.s32 %v12911_v31, %v12922_v13  ;;  %vm8134_vm10 = vcmp.lt.s32.totalorder %v8133_v22, 0 }
 0x40c   : > { %v8139_v45 = vadd.s32 4294967169, %v5214_v37  ;;  %v5073_v14 = vsel %vm8134_vm10, 0, %v8133_v22  ;;  %v5088_v32 = vsub.s32 4, %v12953_v25  ;;  %v4953_v20 = vmul.u32 %v12961_v18, %v4937_v7 }
 0x40d   : > { %v4956_v17 = vadd.s32 1, %v12996_v56  ;;  %v5074_v3 = vsub.s32 32, %v5073_v14  ;;  %v5075_v24 = vshll.u32 %v12972_v48, %v5073_v14  ;;  %v5078_v55 = vsub.s32 4294967266, %v5073_v14 }
 0x40e   : > { %v5220_v11 = vadd.s32 1, %v8139_v45  ;;  %v4897_v5 = vsel %vm4886_vm1, nan, %v4896_v34  ;;  %vm4789_vm11 = vcmp.eq.s32.totalorder %v12958_v4, 2  ;;  %vm4955_vm12 = vc.u32 %v13011_v62, %v12995_v8 }
 0x40f   : > { %v5210_v31 = vand.u32 2147483647, %v12975_v47  ;;  %v5076_v1 = vshrl.u32 %v5058_v12, %v5074_v3  ;;  %v5079_v18 = vadd.s32 127, %v5078_v55  ;;  %v4957_v51 = vsel %vm4955_vm12, %v4956_v17, %v12996_v56 }
 0x410   : > { %v8999_v13 = vpop.eup %8998  ;;  %vm5221_vm13 = vcmp.gt.s32.totalorder %v5220_v11, 0  ;;  %v5089_v53 = vsel %vm5004_vm5, %v5088_v32, %v12953_v25  ;;  %v4958_v19 = vadd.s32 %v4957_v51, %v4953_v20  ;;  %vm4785_vm9 = vcmp.lt.s32.totalorder %v12958_v4, 2 }
 0x411   : > { %v9001_v49 = vpop.eup %9000  ;;  %v4790_v48 = vxor.u32 2147483648, %v8999_v13  ;;  %v5222_v16 = vsel %vm5221_vm13, %v5220_v11, 0  ;;  %v5077_v30 = vor.u32 %v5076_v1, %v5075_v24  ;;  %v5080_v27 = vshll.u32 %v5079_v18, 23 }
 0x412   : > { %v4787_v63 = vxor.u32 2147483648, %v9001_v49  ;;  %v5943_v35 = vmul.f32 %v4897_v5, %v12942_v2  ;;  %v4959_v28 = vadd.s32 536870912, %v4958_v19  ;;  %v5224_v50 = vand.u32 31, %v5222_v16 }
 0x413   : > { %v4791_v39 = vsel %vm4789_vm11, %v4790_v48, %v9001_v49  ;;  %v5081_v25 = vor.u32 4788187, %v5080_v27  ;;  %v5084_v59 = vcvt.s32.f32 %v5077_v30  ;;  %v5091_v0 = vsel %vm13005_vm8, 0, %v5089_v53 }
 0x414   : > { %v4788_v58 = vsel %vm4786_vm6, %v8999_v13, %v4787_v63  ;;  %v13042_v10 = vshrl.u32 %v4959_v28, 30  ;;  %v5217_v2 = vand.u32 8388607, %v5210_v31  ;;  %v5225_v41 = vsub.s32 32, %v5224_v50 }
 0x415   : > { %v4792_v23 = vsel %vm4785_vm9, %v4788_v58, %v4791_v39  ;;  %v5082_v6 = vand.u32 2147483647, %v5081_v25  ;;  %v5223_v9 = vshrl.u32 %v5222_v16, 5  ;;  %v5109_v4 = vand.u32 2139095040, %v13036_v36 }
 0x416   : > { %v4793_v43 = vsel %vm4782_vm7, nan, %v4792_v23  ;;  %v4961_v56 = vshll.u32 %v13042_v10, 30  ;;  %v5227_v22 = vshll.u32 %v9137_v38, %v5224_v50  ;;  %v5230_v7 = vshll.u32 %v9138_v40, %v5224_v50 }
 0x417   : > { %v5942_v52 = vmul.f32 %v4793_v43, %v12945_v57  ;;  %v5085_v61 = vmul.f32 %v5084_v59, %v5082_v6  ;;  %v5228_v37 = vshrl.u32 %v9138_v40, %v5225_v41  ;;  %v5231_v33 = vshrl.u32 %v9139_v42, %v5225_v41 }
 0x418   : > { %v5233_v15 = vshll.u32 %v9139_v42, %v5224_v50  ;;  %v13056_v34 = vsub.s32 %v4958_v19, %v4961_v56  ;;  %v5234_v12 = vshrl.u32 %v9140_v44, %v5225_v41  ;;  %v5236_v57 = vshll.u32 %v9140_v44, %v5224_v50 }
 0x419   : > { %8514 = vmatprep.mubr.f32.mxu0 %v5942_v52  ;;  %v5237_v45 = vshrl.u32 %v9141_v46, %v5225_v41  ;;  %v5086_v14 = vxor.u32 2147483648, %v5085_v61  ;;  %v13061_v32 = vadd.s32 3, %v5091_v0  ;;  %v5218_v20 = vor.u32 8388608, %v5217_v2 }
 0x41a   : > { %8515 = vmatmul.mubr.f32.gmra.mxu0 %v5943_v35  ;;  %v5110_v17 = vshrl.u32 %v5109_v4, 23  ;;  %v4964_v3 = vsub.s32 0, %v13056_v34  ;;  %v5226_v24 = vshrl.u32 %v9137_v38, %v5225_v41  ;;  %v5229_v55 = vor.u32 %v5228_v37, %v5227_v22 }
 0x41b   : > { %v5232_v11 = vor.u32 %v5231_v33, %v5230_v7  ;;  %v5087_v5 = vsel %vm5004_vm5, %v5086_v14, %v5085_v61  ;;  %v5238_v13 = vor.u32 %v5237_v45, %v5236_v57  ;;  %v5239_v1 = vshll.u32 %v9141_v46, %v5224_v50 }
 0x41c   : > { %v5240_v18 = vshrl.u32 %v9142_v54, %v5225_v41  ;;  %vm4900_vm14 = vcmp.lt.s32.totalorder %v12859_v29, 0  ;;  %v8128_v51 = vmin.u32 %v4964_v3, %v13056_v34  ;;  %v5235_v49 = vor.u32 %v5234_v12, %v5233_v15  ;;  %v8463_v15 = vpop.f32.mrf.mxu1 }
 0x41d   : > { %vm5242_vm0 = vcmp.lt.s32.totalorder %v5223_v9, 1  ;;  %v5106_v48 = vand.u32 2147483647, %v13036_v36  ;;  %vm5244_vm15 = vcmp.lt.s32.totalorder %v5223_v9, 3  ;;  %vm5245_vm1 = vcmp.lt.s32.totalorder %v5223_v9, 4 }
 0x41e   : > { %v5241_v53 = vor.u32 %v5240_v18, %v5239_v1  ;;  %v5258_v19 = vshll.u32 %v5218_v20, 8  ;;  %v5090_v16 = vsel %vm13005_vm8, %v12798_v26, %v5087_v5  ;;  %v4966_v63 = vclz %v8128_v51  ;;  %v13121_v51 = vld [vmem:[%s15159_s3 + $0x1] ss:$0 sm:$0xff] }
 0x41f   : > { %vm5243_vm2 = vcmp.lt.s32.totalorder %v5223_v9, 2  ;;  %v8135_v30 = vadd.s32 4294967169, %v5110_v17  ;;  %v5246_v27 = vsel %vm5242_vm0, %v5226_v24, %v5229_v55  ;;  %v5247_v35 = vsel %vm5245_vm1, %v5235_v49, 2102212464 }
 0x420   : > { %v5250_v39 = vsel %vm5242_vm0, %v5229_v55, %v5232_v11  ;;  %v5251_v28 = vsel %vm5245_vm1, %v5238_v13, 920167782  ;;  %v8129_v50 = vadd.s32 4294967294, %v4966_v63  ;;  %v5248_v58 = vsel %vm5244_vm15, %v5232_v11, %v5247_v35 }
 0x421   : > { %v5252_v25 = vsel %vm5244_vm15, %v5235_v49, %v5251_v28  ;;  %v5254_v59 = vsel %vm5242_vm0, %v5232_v11, %v5235_v49  ;;  %v4954_v21 = vadd.s32 %v12995_v8, %v13011_v62  ;;  %v4984_v0 = vsub.s32 4, %v13042_v10 }
 0x422   : > { %v5253_v23 = vsel %vm5243_vm2, %v5250_v39, %v5252_v25  ;;  %v5255_v2 = vsel %vm5245_vm1, %v5241_v53, 1326507024  ;;  %vm8130_vm3 = vcmp.lt.s32.totalorder %v8129_v50, 0  ;;  %9002 = vcosq.f32 %v5090_v16 }
 0x423   : > { %v5256_v41 = vsel %vm5244_vm15, %v5238_v13, %v5255_v2  ;;  %v13088_v43 = vmul.u32.u64.low %v5258_v19, %v5253_v23  ;;  %v13089_v6 = vmul.u32.u64.high %v5258_v19, %v5253_v23, %v13088_v43  ;;  %v4969_v4 = vsel %vm8130_vm3, 0, %v8129_v50 }
 0x424   : > { %v5249_v52 = vsel %vm5243_vm2, %v5246_v27, %v5248_v58  ;;  %v5257_v56 = vsel %vm5243_vm2, %v5254_v59, %v5256_v41  ;;  %v4970_v8 = vsub.s32 32, %v4969_v4  ;;  %v4971_v62 = vshll.u32 %v13056_v34, %v4969_v4 }
 0x425   : > { %v4974_v22 = vsub.s32 4294967266, %v4969_v4  ;;  %v5116_v7 = vadd.s32 1, %v8135_v30  ;;  %9004 = vsinq.f32 %v5090_v16  ;;  %v4985_v61 = vsel %vm4900_vm14, %v4984_v0, %v13042_v10 }
 0x426   : > { %v13098_v37 = vmul.u32.u64.low %v5258_v19, %v5257_v56  ;;  %v13099_v33 = vmul.u32.u64.high %v5258_v19, %v5257_v56, %v13098_v37  ;;  %v4972_v12 = vshrl.u32 %v4954_v21, %v4970_v8  ;;  %v5268_v45 = vadd.s32 1, %v13089_v6 }
 0x427   : > { %v4975_v57 = vadd.s32 127, %v4974_v22  ;;  %vm5117_vm4 = vcmp.gt.s32.totalorder %v5116_v7, 0  ;;  %vm13104_vm5 = vcmp.le.f32.partialorder %v4898_v60, 0.7853982  ;;  %v5265_v34 = vmul.u32 %v5258_v19, %v5249_v52  ;;  %v4208_v60 = vpop.f32.mrf.mxu1 }
 0x428   : > { %v5118_v14 = vsel %vm5117_vm4, %v5116_v7, 0  ;;  %v4973_v20 = vor.u32 %v4972_v12, %v4971_v62  ;;  %v5113_v10 = vand.u32 8388607, %v5106_v48  ;;  %v13111_v24 = vand.u32 3, %v13061_v32 }
 0x429   : > { %v4976_v17 = vshll.u32 %v4975_v57, 23  ;;  %v5120_v3 = vand.u32 31, %v5118_v14  ;;  %v4987_v55 = vsel %vm13104_vm5, 0, %v4985_v61  ;;  %vm5267_vm7 = vc.u32 %v13099_v33, %v13088_v43 }
 0x42a   : > { %v4980_v5 = vcvt.s32.f32 %v4973_v20  ;;  %v5269_v13 = vsel %vm5267_vm7, %v5268_v45, %v13089_v6  ;;  %v13124_v32 = vadd.f32 %v13121_v51, %v8463_v15  ;;  %v4991_v53 = vadd.s32 3, %v4987_v55 }
 0x42b   : > { %v4977_v11 = vor.u32 4788187, %v4976_v17  ;;  %v5121_v1 = vsub.s32 32, %v5120_v3  ;;  %v5270_v18 = vadd.s32 %v5269_v13, %v5265_v34  ;;  %v5114_v19 = vor.u32 8388608, %v5113_v10 }
 0x42c   : > { %v13127_v16 = vadd.f32 %v13121_v51, %v4208_v60  ;;  %v5123_v30 = vshll.u32 %v9137_v38, %v5120_v3  ;;  %vm5101_vm6 = vcmp.eq.s32.totalorder %v13111_v24, 2  ;;  %v5119_v39 = vshrl.u32 %v5118_v14, 5  ;;  %v13157_v14 = vld [vmem:[%s9349_s14 + $0x158] sm:$0xff] }
 0x42d   : > { %v4978_v49 = vand.u32 2147483647, %v4977_v11  ;;  %v5271_v63 = vadd.s32 536870912, %v5270_v18  ;;  %v5124_v27 = vshrl.u32 %v9138_v40, %v5121_v1  ;;  %v5126_v28 = vshll.u32 %v9138_v40, %v5120_v3 }
 0x42e   : > { %v5127_v50 = vshrl.u32 %v9139_v42, %v5121_v1  ;;  %vm5098_vm8 = vcmp.eq.s32.totalorder %v13111_v24, 0  ;;  %v5129_v25 = vshll.u32 %v9139_v42, %v5120_v3  ;;  %v5130_v59 = vshrl.u32 %v9140_v44, %v5121_v1 }
 0x42f   : > { %v4981_v35 = vmul.f32 %v4980_v5, %v4978_v49  ;;  %v13135_v58 = vshrl.u32 %v5271_v63, 30  ;;  %v5132_v21 = vshll.u32 %v9140_v44, %v5120_v3  ;;  %v9003_v0 = vpop.eup %9002  ;;  %v13140_v2 = vand.u32 3, %v4991_v53 }
 0x430   : > { %v5133_v41 = vshrl.u32 %v9141_v46, %v5121_v1  ;;  %v13143_v6 = vshll.u32 %v5114_v19, 8  ;;  %v5122_v52 = vshrl.u32 %v9137_v38, %v5121_v1  ;;  %v5125_v56 = vor.u32 %v5124_v27, %v5123_v30 }
 0x431   : > { %v4982_v23 = vxor.u32 2147483648, %v4981_v35  ;;  %v5273_v4 = vshll.u32 %v13135_v58, 30  ;;  %v5135_v8 = vshll.u32 %v9141_v46, %v5120_v3  ;;  %v5128_v7 = vor.u32 %v5127_v50, %v5126_v28 }
 0x432   : > { %v9005_v62 = vpop.eup %9004  ;;  %v5134_v61 = vor.u32 %v5133_v41, %v5132_v21  ;;  %v5136_v37 = vshrl.u32 %v9142_v54, %v5121_v1  ;;  %v5131_v57 = vor.u32 %v5130_v59, %v5129_v25  ;;  %vm5138_vm10 = vcmp.lt.s32.totalorder %v5119_v39, 1 }
 0x433   : > { %v4983_v22 = vsel %vm4900_vm14, %v4982_v23, %v4981_v35  ;;  %v13154_v12 = vsub.s32 %v5270_v18, %v5273_v4  ;;  %v5102_v45 = vxor.u32 2147483648, %v9003_v0  ;;  %vm5140_vm11 = vcmp.lt.s32.totalorder %v5119_v39, 3 }
 0x434   : > { %v4986_v15 = vsel %vm13104_vm5, %v12859_v29, %v4983_v22  ;;  %v5137_v34 = vor.u32 %v5136_v37, %v5135_v8  ;;  %vm5094_vm12 = vweird.f32 %v12798_v26  ;;  %vm5139_vm13 = vcmp.lt.s32.totalorder %v5119_v39, 2 }
 0x435   : > { %9006 = vcosq.f32 %v4986_v15  ;;  %v5276_v20 = vsub.s32 0, %v13154_v12  ;;  %vm5141_vm9 = vcmp.lt.s32.totalorder %v5119_v39, 4  ;;  %v5099_v17 = vxor.u32 2147483648, %v9005_v62 }
 0x436   : > { %9008 = vsinq.f32 %v4986_v15  ;;  %v5143_v9 = vsel %vm5141_vm9, %v5131_v57, 2102212464  ;;  %v5146_v10 = vsel %vm5138_vm10, %v5125_v56, %v5128_v7  ;;  %v5147_v3 = vsel %vm5141_vm9, %v5134_v61, 920167782 }
 0x437   : > { %v8140_v55 = vmin.u32 %v5276_v20, %v13154_v12  ;;  %v5142_v60 = vsel %vm5138_vm10, %v5122_v52, %v5125_v56  ;;  %v5148_v11 = vsel %vm5140_vm11, %v5131_v57, %v5147_v3  ;;  %v5421_v5 = vand.u32 2139095040, %v13157_v14 }
 0x438   : > { %v5144_v13 = vsel %vm5140_vm11, %v5128_v7, %v5143_v9  ;;  %v5149_v1 = vsel %vm5139_vm13, %v5146_v10, %v5148_v11  ;;  %v5150_v18 = vsel %vm5138_vm10, %v5128_v7, %v5131_v57  ;;  %v5151_v49 = vsel %vm5141_vm9, %v5137_v34, 1326507024  ;;  %v13218_v11 = vld [vmem:[%s9349_s14 + $0x150] sm:$0xff] }
 0x439   : > { %vm5097_vm14 = vcmp.lt.s32.totalorder %v13111_v24, 2  ;;  %v5103_v53 = vsel %vm5101_vm6, %v5102_v45, %v9005_v62  ;;  %vm5212_vm0 = vcmp.lt.s32.totalorder %v12975_v47, 0  ;;  %v5278_v19 = vclz %v8140_v55 }
 0x43a   : > { %v5100_v63 = vsel %vm5098_vm8, %v9003_v0, %v5099_v17  ;;  %v5152_v30 = vsel %vm5140_vm11, %v5134_v61, %v5151_v49  ;;  %v13177_v27 = vmul.u32.u64.low %v13143_v6, %v5149_v1  ;;  %v13178_v35 = vmul.u32.u64.high %v13143_v6, %v5149_v1, %v13177_v27 }
 0x43b   : > { %v8141_v28 = vadd.s32 4294967294, %v5278_v19  ;;  %v5145_v50 = vsel %vm5139_vm13, %v5142_v60, %v5144_v13  ;;  %v5153_v25 = vsel %vm5139_vm13, %v5150_v18, %v5152_v30  ;;  %v5422_v59 = vshrl.u32 %v5421_v5, 23 }
 0x43c   : > { %vm4990_vm15 = vweird.f32 %v12859_v29  ;;  %vm4994_vm1 = vcmp.eq.s32.totalorder %v13140_v2, 0  ;;  %vm13187_vm2 = vcmp.le.f32.partialorder %v5210_v31, 0.7853982  ;;  %v5104_v41 = vsel %vm5097_vm14, %v5100_v63, %v5103_v53 }
 0x43d   : > { %v13192_v0 = vmul.u32.u64.low %v13143_v6, %v5153_v25  ;;  %v13193_v23 = vmul.u32.u64.high %v13143_v6, %v5153_v25, %v13192_v0  ;;  %v5266_v39 = vadd.s32 %v13088_v43, %v13099_v33  ;;  %vm8142_vm3 = vcmp.lt.s32.totalorder %v8141_v28, 0 }
 0x43e   : > { %v8147_v4 = vadd.s32 4294967169, %v5422_v59  ;;  %v5281_v52 = vsel %vm8142_vm3, 0, %v8141_v28  ;;  %v5296_v56 = vsub.s32 4, %v13135_v58  ;;  %v5161_v31 = vmul.u32 %v13143_v6, %v5145_v50 }
 0x43f   : > { %v5164_v8 = vadd.s32 1, %v13178_v35  ;;  %v5282_v62 = vsub.s32 32, %v5281_v52  ;;  %v5283_v22 = vshll.u32 %v13154_v12, %v5281_v52  ;;  %v5286_v7 = vsub.s32 4294967266, %v5281_v52 }
 0x440   : > { %v5428_v61 = vadd.s32 1, %v8147_v4  ;;  %v5105_v24 = vsel %vm5094_vm12, nan, %v5104_v41  ;;  %vm4997_vm4 = vcmp.eq.s32.totalorder %v13140_v2, 2  ;;  %vm5163_vm5 = vc.u32 %v13193_v23, %v13177_v27 }
 0x441   : > { %v5418_v43 = vand.u32 2147483647, %v13157_v14  ;;  %v5284_v37 = vshrl.u32 %v5266_v39, %v5282_v62  ;;  %v5287_v6 = vadd.s32 127, %v5286_v7  ;;  %v5165_v15 = vsel %vm5163_vm5, %v5164_v8, %v13178_v35 }
 0x442   : > { %v9007_v33 = vpop.eup %9006  ;;  %vm5429_vm7 = vcmp.gt.s32.totalorder %v5428_v61, 0  ;;  %v5297_v26 = vsel %vm5212_vm0, %v5296_v56, %v13135_v58  ;;  %v5166_v45 = vadd.s32 %v5165_v15, %v5161_v31  ;;  %vm4993_vm6 = vcmp.lt.s32.totalorder %v13140_v2, 2 }
 0x443   : > { %v9009_v12 = vpop.eup %9008  ;;  %v4998_v57 = vxor.u32 2147483648, %v9007_v33  ;;  %v5430_v34 = vsel %vm5429_vm7, %v5428_v61, 0  ;;  %v5285_v17 = vor.u32 %v5284_v37, %v5283_v22  ;;  %v5288_v9 = vshll.u32 %v5287_v6, 23 }
 0x444   : > { %v4995_v20 = vxor.u32 2147483648, %v9009_v12  ;;  %v5945_v10 = vmul.f32 %v5105_v24, %v13124_v32  ;;  %v5167_v55 = vadd.s32 536870912, %v5166_v45  ;;  %v5432_v60 = vand.u32 31, %v5430_v34 }
 0x445   : > { %v4999_v3 = vsel %vm4997_vm4, %v4998_v57, %v9009_v12  ;;  %v5289_v58 = vor.u32 4788187, %v5288_v9  ;;  %v5292_v13 = vcvt.s32.f32 %v5285_v17  ;;  %v5299_v1 = vsel %vm13187_vm2, 0, %v5297_v26 }
 0x446   : > { %v4996_v5 = vsel %vm4994_vm1, %v9007_v33, %v4995_v20  ;;  %v13224_v49 = vshrl.u32 %v5167_v55, 30  ;;  %v5425_v32 = vand.u32 8388607, %v5418_v43  ;;  %v5433_v53 = vsub.s32 32, %v5432_v60 }
 0x447   : > { %v5000_v18 = vsel %vm4993_vm6, %v4996_v5, %v4999_v3  ;;  %v5290_v63 = vand.u32 2147483647, %v5289_v58  ;;  %v5431_v30 = vshrl.u32 %v5430_v34, 5  ;;  %v5317_v2 = vand.u32 2139095040, %v13218_v11 }
 0x448   : > { %v5001_v19 = vsel %vm4990_vm15, nan, %v5000_v18  ;;  %v5169_v28 = vshll.u32 %v13224_v49, 30  ;;  %v5435_v50 = vshll.u32 %v9137_v38, %v5432_v60  ;;  %v5438_v25 = vshll.u32 %v9138_v40, %v5432_v60 }
 0x449   : > { %v5944_v35 = vmul.f32 %v5001_v19, %v13127_v16  ;;  %v5293_v59 = vmul.f32 %v5292_v13, %v5290_v63  ;;  %v5436_v0 = vshrl.u32 %v9138_v40, %v5433_v53  ;;  %v5439_v41 = vshrl.u32 %v9139_v42, %v5433_v53 }
 0x44a   : > { %v5441_v29 = vshll.u32 %v9139_v42, %v5432_v60  ;;  %v13238_v39 = vsub.s32 %v5166_v45, %v5169_v28  ;;  %v5442_v4 = vshrl.u32 %v9140_v44, %v5433_v53  ;;  %v5444_v16 = vshll.u32 %v9140_v44, %v5432_v60 }
 0x44b   : > { %8517 = vmatprep.mubr.f32.mxu0 %v5944_v35  ;;  %v5445_v52 = vshrl.u32 %v9141_v46, %v5433_v53  ;;  %v5294_v56 = vxor.u32 2147483648, %v5293_v59  ;;  %v13243_v31 = vadd.s32 3, %v5299_v1  ;;  %v5426_v8 = vor.u32 8388608, %v5425_v32 }
 0x44c   : > { %8518 = vmatmul.mubr.f32.gmra.mxu0 %v5945_v10  ;;  %v5318_v62 = vshrl.u32 %v5317_v2, 23  ;;  %v5172_v22 = vsub.s32 0, %v13238_v39  ;;  %v5434_v7 = vshrl.u32 %v9137_v38, %v5433_v53  ;;  %v5437_v61 = vor.u32 %v5436_v0, %v5435_v50 }
 0x44d   : > { %v5440_v24 = vor.u32 %v5439_v41, %v5438_v25  ;;  %v5295_v33 = vsel %vm5212_vm0, %v5294_v56, %v5293_v59  ;;  %v5446_v37 = vor.u32 %v5445_v52, %v5444_v16  ;;  %v5447_v6 = vshll.u32 %v9141_v46, %v5432_v60 }
 0x44e   : > { %v5448_v15 = vshrl.u32 %v9142_v54, %v5433_v53  ;;  %vm5108_vm8 = vcmp.lt.s32.totalorder %v13036_v36, 0  ;;  %v8136_v12 = vmin.u32 %v5172_v22, %v13238_v39  ;;  %v5443_v57 = vor.u32 %v5442_v4, %v5441_v29  ;;  %v8466_v4 = vpop.f32.mrf.mxu1 }
 0x44f   : > { %vm5450_vm10 = vcmp.lt.s32.totalorder %v5431_v30, 1  ;;  %v5314_v26 = vand.u32 2147483647, %v13218_v11  ;;  %vm5452_vm11 = vcmp.lt.s32.totalorder %v5431_v30, 3  ;;  %vm5453_vm12 = vcmp.lt.s32.totalorder %v5431_v30, 4 }
 0x450   : > { %v5449_v45 = vor.u32 %v5448_v15, %v5447_v6  ;;  %v5466_v34 = vshll.u32 %v5426_v8, 8  ;;  %v5298_v20 = vsel %vm13187_vm2, %v12975_v47, %v5295_v33  ;;  %v5174_v17 = vclz %v8136_v12 }
 0x451   : > { %vm5451_vm13 = vcmp.lt.s32.totalorder %v5431_v30, 2  ;;  %v8143_v9 = vadd.s32 4294967169, %v5318_v62  ;;  %v5454_v10 = vsel %vm5450_vm10, %v5434_v7, %v5437_v61  ;;  %v5455_v3 = vsel %vm5453_vm12, %v5443_v57, 2102212464 }
 0x452   : > { %v5458_v55 = vsel %vm5450_vm10, %v5437_v61, %v5440_v24  ;;  %v5459_v60 = vsel %vm5453_vm12, %v5446_v37, 920167782  ;;  %v8137_v5 = vadd.s32 4294967294, %v5174_v17  ;;  %v5456_v58 = vsel %vm5452_vm11, %v5440_v24, %v5455_v3 }
 0x453   : > { %v5460_v13 = vsel %vm5452_vm11, %v5443_v57, %v5459_v60  ;;  %v5462_v1 = vsel %vm5450_vm10, %v5440_v24, %v5443_v57  ;;  %v5162_v21 = vadd.s32 %v13177_v27, %v13193_v23  ;;  %v5192_v18 = vsub.s32 4, %v13224_v49 }
 0x454   : > { %v5461_v32 = vsel %vm5451_vm13, %v5458_v55, %v5460_v13  ;;  %v5463_v53 = vsel %vm5453_vm12, %v5449_v45, 1326507024  ;;  %vm8138_vm9 = vcmp.lt.s32.totalorder %v8137_v5, 0  ;;  %9010 = vcosq.f32 %v5298_v20 }
 0x455   : > { %v5464_v19 = vsel %vm5452_vm11, %v5446_v37, %v5463_v53  ;;  %v13270_v63 = vmul.u32.u64.low %v5466_v34, %v5461_v32  ;;  %v13271_v2 = vmul.u32.u64.high %v5466_v34, %v5461_v32, %v13270_v63  ;;  %v5177_v35 = vsel %vm8138_vm9, 0, %v8137_v5 }
 0x456   : > { %v5457_v28 = vsel %vm5451_vm13, %v5454_v10, %v5456_v58  ;;  %v5465_v50 = vsel %vm5451_vm13, %v5462_v1, %v5464_v19  ;;  %v5178_v27 = vsub.s32 32, %v5177_v35  ;;  %v5179_v23 = vshll.u32 %v13238_v39, %v5177_v35 }
 0x457   : > { %v5182_v25 = vsub.s32 4294967266, %v5177_v35  ;;  %v5324_v59 = vadd.s32 1, %v8143_v9  ;;  %9012 = vsinq.f32 %v5298_v20  ;;  %v5193_v0 = vsel %vm5108_vm8, %v5192_v18, %v13224_v49 }
 0x458   : > { %v13280_v41 = vmul.u32.u64.low %v5466_v34, %v5465_v50  ;;  %v13281_v29 = vmul.u32.u64.high %v5466_v34, %v5465_v50, %v13280_v41  ;;  %v5180_v16 = vshrl.u32 %v5162_v21, %v5178_v27  ;;  %v5476_v56 = vadd.s32 1, %v13271_v2 }
 0x459   : > { %v5183_v52 = vadd.s32 127, %v5182_v25  ;;  %vm5325_vm14 = vcmp.gt.s32.totalorder %v5324_v59, 0  ;;  %vm13286_vm0 = vcmp.le.f32.partialorder %v5106_v48, 0.7853982  ;;  %v5473_v39 = vmul.u32 %v5466_v34, %v5457_v28  ;;  %v4218_v48 = vpop.f32.mrf.mxu1 }
 0x45a   : > { %v5326_v8 = vsel %vm5325_vm14, %v5324_v59, 0  ;;  %v5181_v62 = vor.u32 %v5180_v16, %v5179_v23  ;;  %v5321_v49 = vand.u32 8388607, %v5314_v26  ;;  %v13293_v61 = vand.u32 3, %v13243_v31 }
 0x45b   : > { %v5184_v22 = vshll.u32 %v5183_v52, 23  ;;  %v5328_v7 = vand.u32 31, %v5326_v8  ;;  %v5195_v24 = vsel %vm13286_vm0, 0, %v5193_v0  ;;  %vm5475_vm15 = vc.u32 %v13281_v29, %v13270_v63 }
 0x45c   : > { %v5188_v37 = vcvt.s32.f32 %v5181_v62  ;;  %v5477_v6 = vsel %vm5475_vm15, %v5476_v56, %v13271_v2  ;;  %v13301_v57 = vadd.f32 %v13121_v51, %v8466_v4  ;;  %v5199_v34 = vadd.s32 3, %v5195_v24 }
 0x45d   : > { %v5185_v33 = vor.u32 4788187, %v5184_v22  ;;  %v5329_v15 = vsub.s32 32, %v5328_v7  ;;  %v5478_v12 = vadd.s32 %v5477_v6, %v5473_v39  ;;  %v5322_v31 = vor.u32 8388608, %v5321_v49 }
 0x45e   : > { %v13304_v20 = vadd.f32 %v13121_v51, %v4218_v48  ;;  %v5331_v9 = vshll.u32 %v9137_v38, %v5328_v7  ;;  %vm5309_vm1 = vcmp.eq.s32.totalorder %v13293_v61, 2  ;;  %v5327_v55 = vshrl.u32 %v5326_v8, 5  ;;  %v13334_v8 = vld [vmem:[%s9349_s14 + $0x168] sm:$0xff] }
 0x45f   : > { %v5186_v45 = vand.u32 2147483647, %v5185_v33  ;;  %v5479_v17 = vadd.s32 536870912, %v5478_v12  ;;  %v5332_v10 = vshrl.u32 %v9138_v40, %v5329_v15  ;;  %v5334_v60 = vshll.u32 %v9138_v40, %v5328_v7 }
 0x460   : > { %v5335_v5 = vshrl.u32 %v9139_v42, %v5329_v15  ;;  %vm5306_vm2 = vcmp.eq.s32.totalorder %v13293_v61, 0  ;;  %v5337_v13 = vshll.u32 %v9139_v42, %v5328_v7  ;;  %v5338_v1 = vshrl.u32 %v9140_v44, %v5329_v15 }
 0x461   : > { %v5189_v3 = vmul.f32 %v5188_v37, %v5186_v45  ;;  %v13312_v58 = vshrl.u32 %v5479_v17, 30  ;;  %v5340_v21 = vshll.u32 %v9140_v44, %v5328_v7  ;;  %v9011_v18 = vpop.eup %9010  ;;  %v13317_v53 = vand.u32 3, %v5199_v34 }
 0x462   : > { %v5341_v19 = vshrl.u32 %v9141_v46, %v5329_v15  ;;  %v13320_v2 = vshll.u32 %v5322_v31, 8  ;;  %v5330_v28 = vshrl.u32 %v9137_v38, %v5329_v15  ;;  %v5333_v50 = vor.u32 %v5332_v10, %v5331_v9 }
 0x463   : > { %v5190_v32 = vxor.u32 2147483648, %v5189_v3  ;;  %v5481_v35 = vshll.u32 %v13312_v58, 30  ;;  %v5343_v27 = vshll.u32 %v9141_v46, %v5328_v7  ;;  %v5336_v59 = vor.u32 %v5335_v5, %v5334_v60 }
 0x464   : > { %v9013_v23 = vpop.eup %9012  ;;  %v5342_v0 = vor.u32 %v5341_v19, %v5340_v21  ;;  %v5344_v41 = vshrl.u32 %v9142_v54, %v5329_v15  ;;  %v5339_v52 = vor.u32 %v5338_v1, %v5337_v13  ;;  %vm5346_vm3 = vcmp.lt.s32.totalorder %v5327_v55, 1 }
 0x465   : > { %v5191_v25 = vsel %vm5108_vm8, %v5190_v32, %v5189_v3  ;;  %v13331_v16 = vsub.s32 %v5478_v12, %v5481_v35  ;;  %v5310_v56 = vxor.u32 2147483648, %v9011_v18  ;;  %vm5348_vm4 = vcmp.lt.s32.totalorder %v5327_v55, 3 }
 0x466   : > { %v5194_v4 = vsel %vm13286_vm0, %v13036_v36, %v5191_v25  ;;  %v5345_v39 = vor.u32 %v5344_v41, %v5343_v27  ;;  %vm5302_vm5 = vweird.f32 %v12975_v47  ;;  %vm5347_vm7 = vcmp.lt.s32.totalorder %v5327_v55, 2 }
 0x467   : > { %9014 = vcosq.f32 %v5194_v4  ;;  %v5484_v62 = vsub.s32 0, %v13331_v16  ;;  %vm5349_vm6 = vcmp.lt.s32.totalorder %v5327_v55, 4  ;;  %v5307_v22 = vxor.u32 2147483648, %v9013_v23 }
 0x468   : > { %9016 = vsinq.f32 %v5194_v4  ;;  %v5351_v30 = vsel %vm5349_vm6, %v5339_v52, 2102212464  ;;  %v5354_v49 = vsel %vm5346_vm3, %v5333_v50, %v5336_v59  ;;  %v5355_v7 = vsel %vm5349_vm6, %v5342_v0, 920167782 }
 0x469   : > { %v8148_v24 = vmin.u32 %v5484_v62, %v13331_v16  ;;  %v5350_v48 = vsel %vm5346_vm3, %v5330_v28, %v5333_v50  ;;  %v5356_v33 = vsel %vm5348_vm4, %v5339_v52, %v5355_v7  ;;  %v5629_v37 = vand.u32 2139095040, %v13334_v8 }
 0x46a   : > { %v5352_v6 = vsel %vm5348_vm4, %v5336_v59, %v5351_v30  ;;  %v5357_v15 = vsel %vm5347_vm7, %v5354_v49, %v5356_v33  ;;  %v5358_v12 = vsel %vm5346_vm3, %v5336_v59, %v5339_v52  ;;  %v5359_v45 = vsel %vm5349_vm6, %v5345_v39, 1326507024  ;;  %v13395_v33 = vld [vmem:[%s9349_s14 + $0x160] sm:$0xff] }
 0x46b   : > { %vm5305_vm8 = vcmp.lt.s32.totalorder %v13293_v61, 2  ;;  %v5311_v34 = vsel %vm5309_vm1, %v5310_v56, %v9013_v23  ;;  %vm5420_vm10 = vcmp.lt.s32.totalorder %v13157_v14, 0  ;;  %v5486_v31 = vclz %v8148_v24 }
 0x46c   : > { %v5308_v17 = vsel %vm5306_vm2, %v9011_v18, %v5307_v22  ;;  %v5360_v9 = vsel %vm5348_vm4, %v5342_v0, %v5359_v45  ;;  %v13354_v10 = vmul.u32.u64.low %v13320_v2, %v5357_v15  ;;  %v13355_v3 = vmul.u32.u64.high %v13320_v2, %v5357_v15, %v13354_v10 }
 0x46d   : > { %v8149_v60 = vadd.s32 4294967294, %v5486_v31  ;;  %v5353_v5 = vsel %vm5347_vm7, %v5350_v48, %v5352_v6  ;;  %v5361_v13 = vsel %vm5347_vm7, %v5358_v12, %v5360_v9  ;;  %v5630_v1 = vshrl.u32 %v5629_v37, 23 }
 0x46e   : > { %vm5198_vm11 = vweird.f32 %v13036_v36  ;;  %vm5202_vm12 = vcmp.eq.s32.totalorder %v13317_v53, 0  ;;  %vm13364_vm13 = vcmp.le.f32.partialorder %v5418_v43, 0.7853982  ;;  %v5312_v19 = vsel %vm5305_vm8, %v5308_v17, %v5311_v34 }
 0x46f   : > { %v13369_v18 = vmul.u32.u64.low %v13320_v2, %v5361_v13  ;;  %v13370_v32 = vmul.u32.u64.high %v13320_v2, %v5361_v13, %v13369_v18  ;;  %v5474_v55 = vadd.s32 %v13270_v63, %v13281_v29  ;;  %vm8150_vm9 = vcmp.lt.s32.totalorder %v8149_v60, 0 }
 0x470   : > { %v8155_v35 = vadd.s32 4294967169, %v5630_v1  ;;  %v5489_v28 = vsel %vm8150_vm9, 0, %v8149_v60  ;;  %v5504_v50 = vsub.s32 4, %v13312_v58  ;;  %v5369_v43 = vmul.u32 %v13320_v2, %v5353_v5 }
 0x471   : > { %v5372_v27 = vadd.s32 1, %v13355_v3  ;;  %v5490_v23 = vsub.s32 32, %v5489_v28  ;;  %v5491_v25 = vshll.u32 %v13331_v16, %v5489_v28  ;;  %v5494_v59 = vsub.s32 4294967266, %v5489_v28 }
 0x472   : > { %v5636_v0 = vadd.s32 1, %v8155_v35  ;;  %v5313_v61 = vsel %vm5302_vm5, nan, %v5312_v19  ;;  %vm5205_vm14 = vcmp.eq.s32.totalorder %v13317_v53, 2  ;;  %vm5371_vm0 = vc.u32 %v13370_v32, %v13354_v10 }
 0x473   : > { %v5626_v63 = vand.u32 2147483647, %v13334_v8  ;;  %v5492_v41 = vshrl.u32 %v5474_v55, %v5490_v23  ;;  %v5495_v2 = vadd.s32 127, %v5494_v59  ;;  %v5373_v4 = vsel %vm5371_vm0, %v5372_v27, %v13355_v3 }
 0x474   : > { %v9015_v29 = vpop.eup %9014  ;;  %vm5637_vm15 = vcmp.gt.s32.totalorder %v5636_v0, 0  ;;  %v5505_v47 = vsel %vm5420_vm10, %v5504_v50, %v13312_v58  ;;  %v5374_v56 = vadd.s32 %v5373_v4, %v5369_v43  ;;  %vm5201_vm1 = vcmp.lt.s32.totalorder %v13317_v53, 2 }
 0x475   : > { %v9017_v16 = vpop.eup %9016  ;;  %v5206_v52 = vxor.u32 2147483648, %v9015_v29  ;;  %v5638_v39 = vsel %vm5637_vm15, %v5636_v0, 0  ;;  %v5493_v22 = vor.u32 %v5492_v41, %v5491_v25  ;;  %v5496_v30 = vshll.u32 %v5495_v2, 23 }
 0x476   : > { %v5203_v62 = vxor.u32 2147483648, %v9017_v16  ;;  %v5947_v49 = vmul.f32 %v5313_v61, %v13301_v57  ;;  %v5375_v24 = vadd.s32 536870912, %v5374_v56  ;;  %v5640_v48 = vand.u32 31, %v5638_v39 }
 0x477   : > { %v5207_v7 = vsel %vm5205_vm14, %v5206_v52, %v9017_v16  ;;  %v5497_v58 = vor.u32 4788187, %v5496_v30  ;;  %v5500_v6 = vcvt.s32.f32 %v5493_v22  ;;  %v5507_v15 = vsel %vm13364_vm13, 0, %v5505_v47 }
 0x478   : > { %v5204_v37 = vsel %vm5202_vm12, %v9015_v29, %v5203_v62  ;;  %v13401_v45 = vshrl.u32 %v5375_v24, 30  ;;  %v5633_v57 = vand.u32 8388607, %v5626_v63  ;;  %v5641_v34 = vsub.s32 32, %v5640_v48 }
 0x479   : > { %v5208_v12 = vsel %vm5201_vm1, %v5204_v37, %v5207_v7  ;;  %v5498_v17 = vand.u32 2147483647, %v5497_v58  ;;  %v5639_v9 = vshrl.u32 %v5638_v39, 5  ;;  %v5525_v53 = vand.u32 2139095040, %v13395_v33 }
 0x47a   : > { %v5209_v31 = vsel %vm5198_vm11, nan, %v5208_v12  ;;  %v5377_v60 = vshll.u32 %v13401_v45, 30  ;;  %v5643_v5 = vshll.u32 %v9137_v38, %v5640_v48  ;;  %v5646_v13 = vshll.u32 %v9138_v40, %v5640_v48 }
 0x47b   : > { %v5946_v3 = vmul.f32 %v5209_v31, %v13304_v20  ;;  %v5501_v1 = vmul.f32 %v5500_v6, %v5498_v17  ;;  %v5644_v18 = vshrl.u32 %v9138_v40, %v5641_v34  ;;  %v5647_v19 = vshrl.u32 %v9139_v42, %v5641_v34 }
 0x47c   : > { %v5649_v36 = vshll.u32 %v9139_v42, %v5640_v48  ;;  %v13415_v55 = vsub.s32 %v5374_v56, %v5377_v60  ;;  %v5650_v35 = vshrl.u32 %v9140_v44, %v5641_v34  ;;  %v5652_v20 = vshll.u32 %v9140_v44, %v5640_v48 }
 0x47d   : > { %8520 = vmatprep.mubr.f32.mxu1 %v5946_v3  ;;  %v5653_v28 = vshrl.u32 %v9141_v46, %v5641_v34  ;;  %v5502_v50 = vxor.u32 2147483648, %v5501_v1  ;;  %v13420_v43 = vadd.s32 3, %v5507_v15  ;;  %v5634_v27 = vor.u32 8388608, %v5633_v57 }
 0x47e   : > { %8521 = vmatmul.mubr.f32.vlgmr.msra.gmra.mxu1 %v5947_v49  ;;  %v5526_v23 = vshrl.u32 %v5525_v53, 23  ;;  %v5380_v25 = vsub.s32 0, %v13415_v55  ;;  %v5642_v59 = vshrl.u32 %v9137_v38, %v5641_v34  ;;  %v5645_v0 = vor.u32 %v5644_v18, %v5643_v5 }
 0x47f   : > { %v5648_v61 = vor.u32 %v5647_v19, %v5646_v13  ;;  %v5503_v29 = vsel %vm5420_vm10, %v5502_v50, %v5501_v1  ;;  %v5654_v41 = vor.u32 %v5653_v28, %v5652_v20  ;;  %v5655_v2 = vshll.u32 %v9141_v46, %v5640_v48 }
 0x480   : > { %v5656_v4 = vshrl.u32 %v9142_v54, %v5641_v34  ;;  %vm5316_vm2 = vcmp.lt.s32.totalorder %v13218_v11, 0  ;;  %v8144_v16 = vmin.u32 %v5380_v25, %v13415_v55  ;;  %v5651_v52 = vor.u32 %v5650_v35, %v5649_v36  ;;  %v8469_v35 = vpop.f32.mrf.mxu1 }
 0x481   : > { %vm5658_vm3 = vcmp.lt.s32.totalorder %v5639_v9, 1  ;;  %v5522_v47 = vand.u32 2147483647, %v13395_v33  ;;  %vm5660_vm4 = vcmp.lt.s32.totalorder %v5639_v9, 3  ;;  %vm5661_vm5 = vcmp.lt.s32.totalorder %v5639_v9, 4 }
 0x482   : > { %v5657_v56 = vor.u32 %v5656_v4, %v5655_v2  ;;  %v5674_v39 = vshll.u32 %v5634_v27, 8  ;;  %v5506_v62 = vsel %vm13364_vm13, %v13157_v14, %v5503_v29  ;;  %v5382_v22 = vclz %v8144_v16 }
 0x483   : > { %vm5659_vm7 = vcmp.lt.s32.totalorder %v5639_v9, 2  ;;  %v8151_v30 = vadd.s32 4294967169, %v5526_v23  ;;  %v5662_v49 = vsel %vm5658_vm3, %v5642_v59, %v5645_v0  ;;  %v5663_v7 = vsel %vm5661_vm5, %v5651_v52, 2102212464 }
 0x484   : > { %v5666_v24 = vsel %vm5658_vm3, %v5645_v0, %v5648_v61  ;;  %v5667_v48 = vsel %vm5661_vm5, %v5654_v41, 920167782  ;;  %v8145_v37 = vadd.s32 4294967294, %v5382_v22  ;;  %v5664_v58 = vsel %vm5660_vm4, %v5648_v61, %v5663_v7 }
 0x485   : > { %v5668_v6 = vsel %vm5660_vm4, %v5651_v52, %v5667_v48  ;;  %v5670_v15 = vsel %vm5658_vm3, %v5648_v61, %v5651_v52  ;;  %v5370_v21 = vadd.s32 %v13354_v10, %v13370_v32  ;;  %v5400_v12 = vsub.s32 4, %v13401_v45 }
 0x486   : > { %v5669_v57 = vsel %vm5659_vm7, %v5666_v24, %v5668_v6  ;;  %v5671_v34 = vsel %vm5661_vm5, %v5657_v56, 1326507024  ;;  %vm8146_vm6 = vcmp.lt.s32.totalorder %v8145_v37, 0  ;;  %9018 = vcosq.f32 %v5506_v62 }
 0x487   : > { %v5672_v31 = vsel %vm5660_vm4, %v5654_v41, %v5671_v34  ;;  %v13447_v17 = vmul.u32.u64.low %v5674_v39, %v5669_v57  ;;  %v13448_v53 = vmul.u32.u64.high %v5674_v39, %v5669_v57, %v13447_v17  ;;  %v5385_v3 = vsel %vm8146_vm6, 0, %v8145_v37 }
 0x488   : > { %v5665_v60 = vsel %vm5659_vm7, %v5662_v49, %v5664_v58  ;;  %v5673_v5 = vsel %vm5659_vm7, %v5670_v15, %v5672_v31  ;;  %v5386_v10 = vsub.s32 32, %v5385_v3  ;;  %v5387_v32 = vshll.u32 %v13415_v55, %v5385_v3 }
 0x489   : > { %v5390_v13 = vsub.s32 4294967266, %v5385_v3  ;;  %v5532_v1 = vadd.s32 1, %v8151_v30  ;;  %9020 = vsinq.f32 %v5506_v62  ;;  %v5401_v18 = vsel %vm5316_vm2, %v5400_v12, %v13401_v45 }
 0x48a   : > { %v13457_v19 = vmul.u32.u64.low %v5674_v39, %v5673_v5  ;;  %v13458_v36 = vmul.u32.u64.high %v5674_v39, %v5673_v5, %v13457_v19  ;;  %v5388_v20 = vshrl.u32 %v5370_v21, %v5386_v10  ;;  %v5684_v50 = vadd.s32 1, %v13448_v53 }
 0x48b   : > { %v5391_v28 = vadd.s32 127, %v5390_v13  ;;  %vm5533_vm8 = vcmp.gt.s32.totalorder %v5532_v1, 0  ;;  %vm13463_vm10 = vcmp.le.f32.partialorder %v5314_v26, 0.7853982  ;;  %v5681_v55 = vmul.u32 %v5674_v39, %v5665_v60  ;;  %v4228_v26 = vpop.f32.mrf.mxu1 }
 0x48c   : > { %v5534_v27 = vsel %vm5533_vm8, %v5532_v1, 0  ;;  %v5389_v23 = vor.u32 %v5388_v20, %v5387_v32  ;;  %v5529_v45 = vand.u32 8388607, %v5522_v47  ;;  %v13470_v0 = vand.u32 3, %v13420_v43 }
 0x48d   : > { %v5392_v25 = vshll.u32 %v5391_v28, 23  ;;  %v5536_v59 = vand.u32 31, %v5534_v27  ;;  %v5403_v61 = vsel %vm13463_vm10, 0, %v5401_v18  ;;  %vm5683_vm11 = vc.u32 %v13458_v36, %v13447_v17 }
 0x48e   : > { %v5396_v41 = vcvt.s32.f32 %v5389_v23  ;;  %v5685_v2 = vsel %vm5683_vm11, %v5684_v50, %v13448_v53  ;;  %v13478_v52 = vadd.f32 %v13121_v51, %v8469_v35  ;;  %v5407_v39 = vadd.s32 3, %v5403_v61 }
 0x48f   : > { %v5393_v29 = vor.u32 4788187, %v5392_v25  ;;  %v5537_v4 = vsub.s32 32, %v5536_v59  ;;  %v5686_v16 = vadd.s32 %v5685_v2, %v5681_v55  ;;  %v5530_v43 = vor.u32 8388608, %v5529_v45  ;;  %v13511_v55 = vld [vmem:[%s9349_s14 + $0x178] sm:$0xff] }
 0x490   : > { %v13481_v62 = vadd.f32 %v13121_v51, %v4228_v26  ;;  %v5539_v30 = vshll.u32 %v9137_v38, %v5536_v59  ;;  %vm5517_vm12 = vcmp.eq.s32.totalorder %v13470_v0, 2  ;;  %v5535_v24 = vshrl.u32 %v5534_v27, 5 }
 0x491   : > { %v5394_v56 = vand.u32 2147483647, %v5393_v29  ;;  %v5687_v22 = vadd.s32 536870912, %v5686_v16  ;;  %v5540_v49 = vshrl.u32 %v9138_v40, %v5537_v4  ;;  %v5542_v48 = vshll.u32 %v9138_v40, %v5536_v59 }
 0x492   : > { %v5543_v37 = vshrl.u32 %v9139_v42, %v5537_v4  ;;  %vm5514_vm13 = vcmp.eq.s32.totalorder %v13470_v0, 0  ;;  %v5545_v51 = vshll.u32 %v9139_v42, %v5536_v59  ;;  %v5546_v6 = vshrl.u32 %v9140_v44, %v5537_v4 }
 0x493   : > { %v5397_v7 = vmul.f32 %v5396_v41, %v5394_v56  ;;  %v13489_v58 = vshrl.u32 %v5687_v22, 30  ;;  %v5548_v15 = vshll.u32 %v9140_v44, %v5536_v59  ;;  %v9019_v21 = vpop.eup %9018  ;;  %v13494_v57 = vand.u32 3, %v5407_v39 }
 0x494   : > { %v5549_v34 = vshrl.u32 %v9141_v46, %v5537_v4  ;;  %v13497_v31 = vshll.u32 %v5530_v43, 8  ;;  %v5538_v3 = vshrl.u32 %v9137_v38, %v5537_v4  ;;  %v5541_v60 = vor.u32 %v5540_v49, %v5539_v30 }
 0x495   : > { %v5398_v12 = vxor.u32 2147483648, %v5397_v7  ;;  %v5689_v53 = vshll.u32 %v13489_v58, 30  ;;  %v5551_v5 = vshll.u32 %v9141_v46, %v5536_v59  ;;  %v5544_v13 = vor.u32 %v5543_v37, %v5542_v48 }
 0x496   : > { %v9021_v10 = vpop.eup %9020  ;;  %v5550_v1 = vor.u32 %v5549_v34, %v5548_v15  ;;  %v5552_v18 = vshrl.u32 %v9142_v54, %v5537_v4  ;;  %v5547_v20 = vor.u32 %v5546_v6, %v5545_v51  ;;  %vm5554_vm9 = vcmp.lt.s32.totalorder %v5535_v24, 1 }
 0x497   : > { %v5399_v32 = vsel %vm5316_vm2, %v5398_v12, %v5397_v7  ;;  %v13508_v35 = vsub.s32 %v5686_v16, %v5689_v53  ;;  %v5518_v28 = vxor.u32 2147483648, %v9019_v21  ;;  %vm5556_vm14 = vcmp.lt.s32.totalorder %v5535_v24, 3 }
 0x498   : > { %v5402_v19 = vsel %vm13463_vm10, %v13218_v11, %v5399_v32  ;;  %v5553_v50 = vor.u32 %v5552_v18, %v5551_v5  ;;  %vm5510_vm0 = vweird.f32 %v13157_v14  ;;  %vm5555_vm15 = vcmp.lt.s32.totalorder %v5535_v24, 2 }
 0x499   : > { %9022 = vcosq.f32 %v5402_v19  ;;  %v5692_v27 = vsub.s32 0, %v13508_v35  ;;  %vm5557_vm1 = vcmp.lt.s32.totalorder %v5535_v24, 4  ;;  %v5515_v23 = vxor.u32 2147483648, %v9021_v10 }
 0x49a   : > { %9024 = vsinq.f32 %v5402_v19  ;;  %v5559_v9 = vsel %vm5557_vm1, %v5547_v20, 2102212464  ;;  %v5562_v25 = vsel %vm5554_vm9, %v5541_v60, %v5544_v13  ;;  %v5563_v45 = vsel %vm5557_vm1, %v5550_v1, 920167782 }
 0x49b   : > { %v8156_v59 = vmin.u32 %v5692_v27, %v13508_v35  ;;  %v5558_v61 = vsel %vm5554_vm9, %v5538_v3, %v5541_v60  ;;  %v5564_v26 = vsel %vm5556_vm14, %v5547_v20, %v5563_v45  ;;  %v5837_v29 = vand.u32 2139095040, %v13511_v55 }
 0x49c   : > { %v5560_v41 = vsel %vm5556_vm14, %v5544_v13, %v5559_v9  ;;  %v5565_v2 = vsel %vm5555_vm15, %v5562_v25, %v5564_v26  ;;  %v5566_v4 = vsel %vm5554_vm9, %v5544_v13, %v5547_v20  ;;  %v5567_v16 = vsel %vm5557_vm1, %v5553_v50, 1326507024 }
 0x49d   : > { %vm5513_vm2 = vcmp.lt.s32.totalorder %v13470_v0, 2  ;;  %v5519_v56 = vsel %vm5517_vm12, %v5518_v28, %v9021_v10  ;;  %vm5628_vm3 = vcmp.lt.s32.totalorder %v13334_v8, 0  ;;  %v5694_v39 = vclz %v8156_v59 }
 0x49e   : > { %v5516_v43 = vsel %vm5514_vm13, %v9019_v21, %v5515_v23  ;;  %v5568_v22 = vsel %vm5556_vm14, %v5550_v1, %v5567_v16  ;;  %v13531_v30 = vmul.u32.u64.low %v13497_v31, %v5565_v2  ;;  %v13532_v49 = vmul.u32.u64.high %v13497_v31, %v5565_v2, %v13531_v30 }
 0x49f   : > { %v8157_v7 = vadd.s32 4294967294, %v5694_v39  ;;  %v5561_v48 = vsel %vm5555_vm15, %v5558_v61, %v5560_v41  ;;  %v5569_v37 = vsel %vm5555_vm15, %v5566_v4, %v5568_v22  ;;  %v5838_v51 = vshrl.u32 %v5837_v29, 23  ;;  %v13572_v61 = vld [vmem:[%s9349_s14 + $0x170] sm:$0xff] }
 0x4a0   : > { %vm5406_vm4 = vweird.f32 %v13218_v11  ;;  %vm5410_vm5 = vcmp.eq.s32.totalorder %v13494_v57, 0  ;;  %vm13541_vm7 = vcmp.le.f32.partialorder %v5626_v63, 0.7853982  ;;  %v5520_v12 = vsel %vm5513_vm2, %v5516_v43, %v5519_v56 }
 0x4a1   : > { %v13546_v15 = vmul.u32.u64.low %v13497_v31, %v5569_v37  ;;  %v13547_v21 = vmul.u32.u64.high %v13497_v31, %v5569_v37, %v13546_v15  ;;  %v5682_v24 = vadd.s32 %v13447_v17, %v13458_v36  ;;  %vm8158_vm6 = vcmp.lt.s32.totalorder %v8157_v7, 0 }
 0x4a2   : > { %v8163_v34 = vadd.s32 4294967169, %v5838_v51  ;;  %v5697_v53 = vsel %vm8158_vm6, 0, %v8157_v7  ;;  %v5712_v3 = vsub.s32 4, %v13489_v58  ;;  %v5577_v63 = vmul.u32 %v13497_v31, %v5561_v48 }
 0x4a3   : > { %v5580_v60 = vadd.s32 1, %v13532_v49  ;;  %v5698_v5 = vsub.s32 32, %v5697_v53  ;;  %v5699_v10 = vshll.u32 %v13508_v35, %v5697_v53  ;;  %v5702_v32 = vsub.s32 4294967266, %v5697_v53 }
 0x4a4   : > { %v5844_v13 = vadd.s32 1, %v8163_v34  ;;  %v5521_v0 = vsel %vm5510_vm0, nan, %v5520_v12  ;;  %vm5413_vm8 = vcmp.eq.s32.totalorder %v13494_v57, 2  ;;  %vm5579_vm10 = vc.u32 %v13547_v21, %v13531_v30 }
 0x4a5   : > { %v5834_v17 = vand.u32 2147483647, %v13511_v55  ;;  %v5700_v1 = vshrl.u32 %v5682_v24, %v5698_v5  ;;  %v5703_v31 = vadd.s32 127, %v5702_v32  ;;  %v5581_v18 = vsel %vm5579_vm10, %v5580_v60, %v13532_v49 }
 0x4a6   : > { %v9023_v36 = vpop.eup %9022  ;;  %vm5845_vm11 = vcmp.gt.s32.totalorder %v5844_v13, 0  ;;  %v5713_v14 = vsel %vm5628_vm3, %v5712_v3, %v13489_v58  ;;  %v5582_v20 = vadd.s32 %v5581_v18, %v5577_v63  ;;  %vm5409_vm12 = vcmp.lt.s32.totalorder %v13494_v57, 2 }
 0x4a7   : > { %v9025_v19 = vpop.eup %9024  ;;  %v5414_v35 = vxor.u32 2147483648, %v9023_v36  ;;  %v5846_v28 = vsel %vm5845_vm11, %v5844_v13, 0  ;;  %v5701_v27 = vor.u32 %v5700_v1, %v5699_v10  ;;  %v5704_v23 = vshll.u32 %v5703_v31, 23 }
 0x4a8   : > { %v5411_v50 = vxor.u32 2147483648, %v9025_v19  ;;  %v5949_v9 = vmul.f32 %v5521_v0, %v13478_v52  ;;  %v5583_v45 = vadd.s32 536870912, %v5582_v20  ;;  %v5848_v59 = vand.u32 31, %v5846_v28 }
 0x4a9   : > { %v5415_v25 = vsel %vm5413_vm8, %v5414_v35, %v9025_v19  ;;  %v5705_v58 = vor.u32 4788187, %v5704_v23  ;;  %v5708_v29 = vcvt.s32.f32 %v5701_v27  ;;  %v5715_v41 = vsel %vm13541_vm7, 0, %v5713_v14 }
 0x4aa   : > { %v5412_v26 = vsel %vm5410_vm5, %v9023_v36, %v5411_v50  ;;  %v13578_v4 = vshrl.u32 %v5583_v45, 30  ;;  %v5841_v52 = vand.u32 8388607, %v5834_v17  ;;  %v5849_v16 = vsub.s32 32, %v5848_v59 }
 0x4ab   : > { %v5416_v2 = vsel %vm5409_vm12, %v5412_v26, %v5415_v25  ;;  %v5706_v39 = vand.u32 2147483647, %v5705_v58  ;;  %v5847_v43 = vshrl.u32 %v5846_v28, 5  ;;  %v5733_v57 = vand.u32 2139095040, %v13572_v61 }
 0x4ac   : > { %v5417_v56 = vsel %vm5406_vm4, nan, %v5416_v2  ;;  %v5585_v49 = vshll.u32 %v13578_v4, 30  ;;  %v5851_v7 = vshll.u32 %v9137_v38, %v5848_v59  ;;  %v5854_v48 = vshll.u32 %v9138_v40, %v5848_v59 }
 0x4ad   : > { %v5948_v22 = vmul.f32 %v5417_v56, %v13481_v62  ;;  %v5709_v37 = vmul.f32 %v5708_v29, %v5706_v39  ;;  %v5852_v51 = vshrl.u32 %v9138_v40, %v5849_v16  ;;  %v5855_v15 = vshrl.u32 %v9139_v42, %v5849_v16 }
 0x4ae   : > { %v5857_v11 = vshll.u32 %v9139_v42, %v5848_v59  ;;  %v13592_v12 = vsub.s32 %v5582_v20, %v5585_v49  ;;  %v5858_v24 = vshrl.u32 %v9140_v44, %v5849_v16  ;;  %v5860_v62 = vshll.u32 %v9140_v44, %v5848_v59 }
 0x4af   : > { %8523 = vmatprep.mubr.f32.mxu1 %v5948_v22  ;;  %v5861_v34 = vshrl.u32 %v9141_v46, %v5849_v16  ;;  %v5710_v53 = vxor.u32 2147483648, %v5709_v37  ;;  %v13597_v3 = vadd.s32 3, %v5715_v41  ;;  %v5842_v63 = vor.u32 8388608, %v5841_v52 }
 0x4b0   : > { %8524 = vmatmul.mubr.f32.gmra.mxu1 %v5949_v9  ;;  %v5734_v60 = vshrl.u32 %v5733_v57, 23  ;;  %v5588_v5 = vsub.s32 0, %v13592_v12  ;;  %v5850_v10 = vshrl.u32 %v9137_v38, %v5849_v16  ;;  %v5853_v32 = vor.u32 %v5852_v51, %v5851_v7 }
 0x4b1   : > { %v5856_v13 = vor.u32 %v5855_v15, %v5854_v48  ;;  %v5711_v0 = vsel %vm5628_vm3, %v5710_v53, %v5709_v37  ;;  %v5862_v36 = vor.u32 %v5861_v34, %v5860_v62  ;;  %v5863_v1 = vshll.u32 %v9141_v46, %v5848_v59 }
 0x4b2   : > { %v5864_v31 = vshrl.u32 %v9142_v54, %v5849_v16  ;;  %vm5524_vm13 = vcmp.lt.s32.totalorder %v13395_v33, 0  ;;  %v8152_v18 = vmin.u32 %v5588_v5, %v13592_v12  ;;  %v5859_v19 = vor.u32 %v5858_v24, %v5857_v11  ;;  %v8472_v11 = vpop.f32.mrf.mxu1 }
 0x4b3   : > { %vm5866_vm9 = vcmp.lt.s32.totalorder %v5847_v43, 1  ;;  %v5730_v35 = vand.u32 2147483647, %v13572_v61  ;;  %vm5868_vm14 = vcmp.lt.s32.totalorder %v5847_v43, 3  ;;  %vm5869_vm0 = vcmp.lt.s32.totalorder %v5847_v43, 4 }
 0x4b4   : > { %v5865_v14 = vor.u32 %v5864_v31, %v5863_v1  ;;  %v5882_v20 = vshll.u32 %v5842_v63, 8  ;;  %v5714_v28 = vsel %vm13541_vm7, %v13334_v8, %v5711_v0  ;;  %v5590_v50 = vclz %v8152_v18  ;;  %v13657_v18 = vld [vmem:[%s15159_s3 + $0x1] ss:$0 sm:$0xff] }
 0x4b5   : > { %vm5867_vm15 = vcmp.lt.s32.totalorder %v5847_v43, 2  ;;  %v8159_v27 = vadd.s32 4294967169, %v5734_v60  ;;  %v5870_v23 = vsel %vm5866_vm9, %v5850_v10, %v5853_v32  ;;  %v5871_v9 = vsel %vm5869_vm0, %v5859_v19, 2102212464 }
 0x4b6   : > { %v5874_v25 = vsel %vm5866_vm9, %v5853_v32, %v5856_v13  ;;  %v5875_v45 = vsel %vm5869_vm0, %v5862_v36, 920167782  ;;  %v8153_v59 = vadd.s32 4294967294, %v5590_v50  ;;  %v5872_v26 = vsel %vm5868_vm14, %v5856_v13, %v5871_v9 }
 0x4b7   : > { %v5876_v58 = vsel %vm5868_vm14, %v5859_v19, %v5875_v45  ;;  %v5878_v29 = vsel %vm5866_vm9, %v5856_v13, %v5859_v19  ;;  %v5578_v6 = vadd.s32 %v13531_v30, %v13547_v21  ;;  %v5608_v41 = vsub.s32 4, %v13578_v4 }
 0x4b8   : > { %v5877_v2 = vsel %vm5867_vm15, %v5874_v25, %v5876_v58  ;;  %v5879_v52 = vsel %vm5869_vm0, %v5865_v14, 1326507024  ;;  %vm8154_vm1 = vcmp.lt.s32.totalorder %v8153_v59, 0  ;;  %9026 = vcosq.f32 %v5714_v28 }
 0x4b9   : > { %v5880_v16 = vsel %vm5868_vm14, %v5862_v36, %v5879_v52  ;;  %v13624_v56 = vmul.u32.u64.low %v5882_v20, %v5877_v2  ;;  %v13625_v39 = vmul.u32.u64.high %v5882_v20, %v5877_v2, %v13624_v56  ;;  %v5593_v57 = vsel %vm8154_vm1, 0, %v8153_v59 }
 0x4ba   : > { %v5873_v22 = vsel %vm5867_vm15, %v5870_v23, %v5872_v26  ;;  %v5881_v49 = vsel %vm5867_vm15, %v5878_v29, %v5880_v16  ;;  %v5594_v30 = vsub.s32 32, %v5593_v57  ;;  %v5595_v21 = vshll.u32 %v13592_v12, %v5593_v57 }
 0x4bb   : > { %v5598_v7 = vsub.s32 4294967266, %v5593_v57  ;;  %v5740_v48 = vadd.s32 1, %v8159_v27  ;;  %9028 = vsinq.f32 %v5714_v28  ;;  %v5609_v37 = vsel %vm5524_vm13, %v5608_v41, %v13578_v4 }
 0x4bc   : > { %v13634_v51 = vmul.u32.u64.low %v5882_v20, %v5881_v49  ;;  %v13635_v15 = vmul.u32.u64.high %v5882_v20, %v5881_v49, %v13634_v51  ;;  %v5596_v24 = vshrl.u32 %v5578_v6, %v5594_v30  ;;  %v5892_v34 = vadd.s32 1, %v13625_v39 }
 0x4bd   : > { %v5599_v62 = vadd.s32 127, %v5598_v7  ;;  %vm5741_vm2 = vcmp.gt.s32.totalorder %v5740_v48, 0  ;;  %vm13640_vm3 = vcmp.le.f32.partialorder %v5522_v47, 0.7853982  ;;  %v5889_v12 = vmul.u32 %v5882_v20, %v5873_v22  ;;  %v4238_v47 = vpop.f32.mrf.mxu1 }
 0x4be   : > { %v5742_v53 = vsel %vm5741_vm2, %v5740_v48, 0  ;;  %v5597_v63 = vor.u32 %v5596_v24, %v5595_v21  ;;  %v5737_v4 = vand.u32 8388607, %v5730_v35  ;;  %v13647_v10 = vand.u32 3, %v13597_v3 }
 0x4bf   : > { %v5600_v60 = vshll.u32 %v5599_v62, 23  ;;  %v5744_v5 = vand.u32 31, %v5742_v53  ;;  %v5611_v32 = vsel %vm13640_vm3, 0, %v5609_v37  ;;  %vm5891_vm4 = vc.u32 %v13635_v15, %v13624_v56 }
 0x4c0   : > { %v5604_v0 = vcvt.s32.f32 %v5597_v63  ;;  %v5893_v36 = vsel %vm5891_vm4, %v5892_v34, %v13625_v39  ;;  %v13660_v3 = vadd.f32 %v13657_v18, %v8472_v11  ;;  %v5615_v14 = vadd.s32 3, %v5611_v32 }
 0x4c1   : > { %v5601_v13 = vor.u32 4788187, %v5600_v60  ;;  %v5745_v1 = vsub.s32 32, %v5744_v5  ;;  %v5894_v31 = vadd.s32 %v5893_v36, %v5889_v12  ;;  %v5738_v20 = vor.u32 8388608, %v5737_v4 }
 0x4c2   : > { %v13663_v28 = vadd.f32 %v13657_v18, %v4238_v47  ;;  %v5747_v27 = vshll.u32 %v9137_v38, %v5744_v5  ;;  %vm5725_vm5 = vcmp.eq.s32.totalorder %v13647_v10, 2  ;;  %v5743_v25 = vshrl.u32 %v5742_v53, 5  ;;  %v13693_v53 = vld [vmem:[%s9349_s14 + $0x188] sm:$0xff] }
 0x4c3   : > { %v5602_v19 = vand.u32 2147483647, %v5601_v13  ;;  %v5895_v50 = vadd.s32 536870912, %v5894_v31  ;;  %v5748_v23 = vshrl.u32 %v9138_v40, %v5745_v1  ;;  %v5750_v45 = vshll.u32 %v9138_v40, %v5744_v5 }
 0x4c4   : > { %v5751_v59 = vshrl.u32 %v9139_v42, %v5745_v1  ;;  %vm5722_vm7 = vcmp.eq.s32.totalorder %v13647_v10, 0  ;;  %v5753_v58 = vshll.u32 %v9139_v42, %v5744_v5  ;;  %v5754_v29 = vshrl.u32 %v9140_v44, %v5745_v1 }
 0x4c5   : > { %v5605_v9 = vmul.f32 %v5604_v0, %v5602_v19  ;;  %v13671_v26 = vshrl.u32 %v5895_v50, 30  ;;  %v5756_v6 = vshll.u32 %v9140_v44, %v5744_v5  ;;  %v9027_v41 = vpop.eup %9026  ;;  %v13676_v52 = vand.u32 3, %v5615_v14 }
 0x4c6   : > { %v5757_v16 = vshrl.u32 %v9141_v46, %v5745_v1  ;;  %v13679_v39 = vshll.u32 %v5738_v20, 8  ;;  %v5746_v22 = vshrl.u32 %v9137_v38, %v5745_v1  ;;  %v5749_v49 = vor.u32 %v5748_v23, %v5747_v27 }
 0x4c7   : > { %v5606_v2 = vxor.u32 2147483648, %v5605_v9  ;;  %v5897_v57 = vshll.u32 %v13671_v26, 30  ;;  %v5759_v30 = vshll.u32 %v9141_v46, %v5744_v5  ;;  %v5752_v48 = vor.u32 %v5751_v59, %v5750_v45 }
 0x4c8   : > { %v9029_v21 = vpop.eup %9028  ;;  %v5758_v37 = vor.u32 %v5757_v16, %v5756_v6  ;;  %v5760_v51 = vshrl.u32 %v9142_v54, %v5745_v1  ;;  %v5755_v62 = vor.u32 %v5754_v29, %v5753_v58  ;;  %vm5762_vm6 = vcmp.lt.s32.totalorder %v5743_v25, 1 }
 0x4c9   : > { %v5607_v7 = vsel %vm5524_vm13, %v5606_v2, %v5605_v9  ;;  %v13690_v24 = vsub.s32 %v5894_v31, %v5897_v57  ;;  %v5726_v34 = vxor.u32 2147483648, %v9027_v41  ;;  %vm5764_vm8 = vcmp.lt.s32.totalorder %v5743_v25, 3 }
 0x4ca   : > { %v5610_v11 = vsel %vm13640_vm3, %v13395_v33, %v5607_v7  ;;  %v5761_v12 = vor.u32 %v5760_v51, %v5759_v30  ;;  %vm5718_vm10 = vweird.f32 %v13334_v8  ;;  %vm5763_vm11 = vcmp.lt.s32.totalorder %v5743_v25, 2 }
 0x4cb   : > { %9030 = vcosq.f32 %v5610_v11  ;;  %v5900_v63 = vsub.s32 0, %v13690_v24  ;;  %vm5765_vm12 = vcmp.lt.s32.totalorder %v5743_v25, 4  ;;  %v5723_v60 = vxor.u32 2147483648, %v9029_v21 }
 0x4cc   : > { %9032 = vsinq.f32 %v5610_v11  ;;  %v5767_v43 = vsel %vm5765_vm12, %v5755_v62, 2102212464  ;;  %v5770_v4 = vsel %vm5762_vm6, %v5749_v49, %v5752_v48  ;;  %v5771_v5 = vsel %vm5765_vm12, %v5758_v37, 920167782 }
 0x4cd   : > { %v8164_v32 = vmin.u32 %v5900_v63, %v13690_v24  ;;  %v5766_v47 = vsel %vm5762_vm6, %v5746_v22, %v5749_v49  ;;  %v5772_v13 = vsel %vm5764_vm8, %v5755_v62, %v5771_v5  ;;  %v6248_v0 = vand.u32 2139095040, %v13693_v53 }
 0x4ce   : > { %v5768_v36 = vsel %vm5764_vm8, %v5752_v48, %v5767_v43  ;;  %v5773_v1 = vsel %vm5763_vm11, %v5770_v4, %v5772_v13  ;;  %v5774_v31 = vsel %vm5762_vm6, %v5752_v48, %v5755_v62  ;;  %v5775_v19 = vsel %vm5765_vm12, %v5761_v12, 1326507024  ;;  %v13754_v13 = vld [vmem:[%s9349_s14 + $0x180] sm:$0xff] }
 0x4cf   : > { %vm5721_vm13 = vcmp.lt.s32.totalorder %v13647_v10, 2  ;;  %v5727_v14 = vsel %vm5725_vm5, %v5726_v34, %v9029_v21  ;;  %vm5836_vm9 = vcmp.lt.s32.totalorder %v13511_v55, 0  ;;  %v5902_v20 = vclz %v8164_v32 }
 0x4d0   : > { %v5724_v50 = vsel %vm5722_vm7, %v9027_v41, %v5723_v60  ;;  %v5776_v27 = vsel %vm5764_vm8, %v5758_v37, %v5775_v19  ;;  %v13713_v23 = vmul.u32.u64.low %v13679_v39, %v5773_v1  ;;  %v13714_v9 = vmul.u32.u64.high %v13679_v39, %v5773_v1, %v13713_v23 }
 0x4d1   : > { %v8165_v45 = vadd.s32 4294967294, %v5902_v20  ;;  %v5769_v59 = vsel %vm5763_vm11, %v5766_v47, %v5768_v36  ;;  %v5777_v58 = vsel %vm5763_vm11, %v5774_v31, %v5776_v27  ;;  %v6249_v29 = vshrl.u32 %v6248_v0, 23 }
 0x4d2   : > { %vm5614_vm14 = vweird.f32 %v13395_v33  ;;  %vm5618_vm0 = vcmp.eq.s32.totalorder %v13676_v52, 0  ;;  %vm13723_vm15 = vcmp.le.f32.partialorder %v5834_v17, 0.7853982  ;;  %v5728_v16 = vsel %vm5721_vm13, %v5724_v50, %v5727_v14 }
 0x4d3   : > { %v13728_v41 = vmul.u32.u64.low %v13679_v39, %v5777_v58  ;;  %v13729_v2 = vmul.u32.u64.high %v13679_v39, %v5777_v58, %v13728_v41  ;;  %v5890_v25 = vadd.s32 %v13624_v56, %v13635_v15  ;;  %vm8166_vm1 = vcmp.lt.s32.totalorder %v8165_v45, 0 }
 0x4d4   : > { %v8205_v57 = vadd.s32 4294967169, %v6249_v29  ;;  %v5905_v22 = vsel %vm8166_vm1, 0, %v8165_v45  ;;  %v5920_v49 = vsub.s32 4, %v13671_v26  ;;  %v5785_v17 = vmul.u32 %v13679_v39, %v5769_v59 }
 0x4d5   : > { %v5788_v30 = vadd.s32 1, %v13714_v9  ;;  %v5906_v21 = vsub.s32 32, %v5905_v22  ;;  %v5907_v7 = vshll.u32 %v13690_v24, %v5905_v22  ;;  %v5910_v48 = vsub.s32 4294967266, %v5905_v22 }
 0x4d6   : > { %v6255_v37 = vadd.s32 1, %v8205_v57  ;;  %v5729_v10 = vsel %vm5718_vm10, nan, %v5728_v16  ;;  %vm5621_vm2 = vcmp.eq.s32.totalorder %v13676_v52, 2  ;;  %vm5787_vm3 = vc.u32 %v13729_v2, %v13713_v23 }
 0x4d7   : > { %v6245_v56 = vand.u32 2147483647, %v13693_v53  ;;  %v5908_v51 = vshrl.u32 %v5890_v25, %v5906_v21  ;;  %v5911_v39 = vadd.s32 127, %v5910_v48  ;;  %v5789_v11 = vsel %vm5787_vm3, %v5788_v30, %v13714_v9 }
 0x4d8   : > { %v9031_v15 = vpop.eup %9030  ;;  %vm6256_vm4 = vcmp.gt.s32.totalorder %v6255_v37, 0  ;;  %v5921_v8 = vsel %vm5836_vm9, %v5920_v49, %v13671_v26  ;;  %v5790_v34 = vadd.s32 %v5789_v11, %v5785_v17  ;;  %vm5617_vm5 = vcmp.lt.s32.totalorder %v13676_v52, 2 }
 0x4d9   : > { %v9033_v24 = vpop.eup %9032  ;;  %v5622_v62 = vxor.u32 2147483648, %v9031_v15  ;;  %v6257_v12 = vsel %vm6256_vm4, %v6255_v37, 0  ;;  %v5909_v60 = vor.u32 %v5908_v51, %v5907_v7  ;;  %v5912_v43 = vshll.u32 %v5911_v39, 23 }
 0x4da   : > { %v5619_v63 = vxor.u32 2147483648, %v9033_v24  ;;  %v5951_v4 = vmul.f32 %v5729_v10, %v13660_v3  ;;  %v5791_v32 = vadd.s32 536870912, %v5790_v34  ;;  %v6259_v47 = vand.u32 31, %v6257_v12 }
 0x4db   : > { %v5623_v5 = vsel %vm5621_vm2, %v5622_v62, %v9033_v24  ;;  %v5913_v26 = vor.u32 4788187, %v5912_v43  ;;  %v5916_v36 = vcvt.s32.f32 %v5909_v60  ;;  %v5923_v1 = vsel %vm13723_vm15, 0, %v5921_v8 }
 0x4dc   : > { %v5620_v0 = vsel %vm5618_vm0, %v9031_v15, %v5619_v63  ;;  %v13760_v19 = vshrl.u32 %v5791_v32, 30  ;;  %v6252_v3 = vand.u32 8388607, %v6245_v56  ;;  %v6260_v14 = vsub.s32 32, %v6259_v47 }
 0x4dd   : > { %v5624_v31 = vsel %vm5617_vm5, %v5620_v0, %v5623_v5  ;;  %v5914_v50 = vand.u32 2147483647, %v5913_v26  ;;  %v6258_v27 = vshrl.u32 %v6257_v12, 5  ;;  %v6144_v52 = vand.u32 2139095040, %v13754_v13 }
 0x4de   : > { %v5625_v20 = vsel %vm5614_vm14, nan, %v5624_v31  ;;  %v5793_v45 = vshll.u32 %v13760_v19, 30  ;;  %v6262_v59 = vshll.u32 %v9137_v38, %v6259_v47  ;;  %v6265_v58 = vshll.u32 %v9138_v40, %v6259_v47 }
 0x4df   : > { %v5950_v9 = vmul.f32 %v5625_v20, %v13663_v28  ;;  %v5917_v29 = vmul.f32 %v5916_v36, %v5914_v50  ;;  %v6263_v41 = vshrl.u32 %v9138_v40, %v6260_v14  ;;  %v6266_v16 = vshrl.u32 %v9139_v42, %v6260_v14 }
 0x4e0   : > { %v6268_v33 = vshll.u32 %v9139_v42, %v6259_v47  ;;  %v13774_v25 = vsub.s32 %v5790_v34, %v5793_v45  ;;  %v6269_v57 = vshrl.u32 %v9140_v44, %v6260_v14  ;;  %v6271_v28 = vshll.u32 %v9140_v44, %v6259_v47 }
 0x4e1   : > { %8526 = vmatprep.mubr.f32.mxu1 %v5950_v9  ;;  %v6272_v22 = vshrl.u32 %v9141_v46, %v6260_v14  ;;  %v5918_v49 = vxor.u32 2147483648, %v5917_v29  ;;  %v13779_v17 = vadd.s32 3, %v5923_v1  ;;  %v6253_v30 = vor.u32 8388608, %v6252_v3 }
 0x4e2   : > { %8527 = vmatmul.mubr.f32.gmra.mxu1 %v5951_v4  ;;  %v6145_v21 = vshrl.u32 %v6144_v52, 23  ;;  %v5796_v7 = vsub.s32 0, %v13774_v25  ;;  %v6261_v48 = vshrl.u32 %v9137_v38, %v6260_v14  ;;  %v6264_v37 = vor.u32 %v6263_v41, %v6262_v59  ;;  %v8475_v41 = vpop.f32.mrf.mxu1 }
 0x4e3   : > { %v6267_v10 = vor.u32 %v6266_v16, %v6265_v58  ;;  %v5919_v15 = vsel %vm5836_vm9, %v5918_v49, %v5917_v29  ;;  %v6273_v51 = vor.u32 %v6272_v22, %v6271_v28  ;;  %v6274_v39 = vshll.u32 %v9141_v46, %v6259_v47 }
 0x4e4   : > { %v6275_v11 = vshrl.u32 %v9142_v54, %v6260_v14  ;;  %vm5732_vm7 = vcmp.lt.s32.totalorder %v13572_v61, 0  ;;  %v8160_v24 = vmin.u32 %v5796_v7, %v13774_v25  ;;  %v6270_v62 = vor.u32 %v6269_v57, %v6268_v33 }
 0x4e5   : > { %vm6277_vm6 = vcmp.lt.s32.totalorder %v6258_v27, 1  ;;  %v6141_v8 = vand.u32 2147483647, %v13754_v13  ;;  %vm6279_vm8 = vcmp.lt.s32.totalorder %v6258_v27, 3  ;;  %vm6280_vm10 = vcmp.lt.s32.totalorder %v6258_v27, 4 }
 0x4e6   : > { %v6276_v34 = vor.u32 %v6275_v11, %v6274_v39  ;;  %v6293_v12 = vshll.u32 %v6253_v30, 8  ;;  %v5922_v63 = vsel %vm13723_vm15, %v13511_v55, %v5919_v15  ;;  %v5798_v60 = vclz %v8160_v24  ;;  %v8510_v39 = vpop.f32.mrf.mxu0  ;;  %v13838_v11 = vld [vmem:[%s15159_s3 + $0x2] ss:$0 sm:$0xff] }
 0x4e7   : > { %vm6278_vm11 = vcmp.lt.s32.totalorder %v6258_v27, 2  ;;  %v8201_v43 = vadd.s32 4294967169, %v6145_v21  ;;  %v6281_v4 = vsel %vm6277_vm6, %v6261_v48, %v6264_v37  ;;  %v6282_v5 = vsel %vm6280_vm10, %v6270_v62, 2102212464 }
 0x4e8   : > { %v6285_v32 = vsel %vm6277_vm6, %v6264_v37, %v6267_v10  ;;  %v6286_v47 = vsel %vm6280_vm10, %v6273_v51, 920167782  ;;  %v8161_v0 = vadd.s32 4294967294, %v5798_v60  ;;  %v6283_v26 = vsel %vm6279_vm8, %v6267_v10, %v6282_v5 }
 0x4e9   : > { %v6287_v36 = vsel %vm6279_vm8, %v6270_v62, %v6286_v47  ;;  %v6289_v1 = vsel %vm6277_vm6, %v6267_v10, %v6270_v62  ;;  %v5786_v6 = vadd.s32 %v13713_v23, %v13729_v2  ;;  %v5816_v31 = vsub.s32 4, %v13760_v19  ;;  %v4248_v10 = vpop.f32.mrf.mxu1 }
 0x4ea   : > { %v6288_v3 = vsel %vm6278_vm11, %v6285_v32, %v6287_v36  ;;  %v6290_v14 = vsel %vm6280_vm10, %v6276_v34, 1326507024  ;;  %vm8162_vm12 = vcmp.lt.s32.totalorder %v8161_v0, 0  ;;  %9034 = vcosq.f32 %v5922_v63 }
 0x4eb   : > { %v6291_v20 = vsel %vm6279_vm8, %v6273_v51, %v6290_v14  ;;  %v13806_v50 = vmul.u32.u64.low %v6293_v12, %v6288_v3  ;;  %v13807_v52 = vmul.u32.u64.high %v6293_v12, %v6288_v3, %v13806_v50  ;;  %v5801_v9 = vsel %vm8162_vm12, 0, %v8161_v0 }
 0x4ec   : > { %v6284_v45 = vsel %vm6278_vm11, %v6281_v4, %v6283_v26  ;;  %v6292_v59 = vsel %vm6278_vm11, %v6289_v1, %v6291_v20  ;;  %v5802_v23 = vsub.s32 32, %v5801_v9  ;;  %v5803_v2 = vshll.u32 %v13774_v25, %v5801_v9 }
 0x4ed   : > { %v5806_v58 = vsub.s32 4294967266, %v5801_v9  ;;  %v6151_v29 = vadd.s32 1, %v8201_v43  ;;  %9036 = vsinq.f32 %v5922_v63  ;;  %v5817_v16 = vsel %vm5732_vm7, %v5816_v31, %v13760_v19 }
 0x4ee   : > { %v13816_v33 = vmul.u32.u64.low %v6293_v12, %v6292_v59  ;;  %v13817_v57 = vmul.u32.u64.high %v6293_v12, %v6292_v59, %v13816_v33  ;;  %v5804_v28 = vshrl.u32 %v5786_v6, %v5802_v23  ;;  %v6303_v49 = vadd.s32 1, %v13807_v52 }
 0x4ef   : > { %v5807_v22 = vadd.s32 127, %v5806_v58  ;;  %vm6152_vm13 = vcmp.gt.s32.totalorder %v6151_v29, 0  ;;  %vm13822_vm9 = vcmp.le.f32.partialorder %v5730_v35, 0.7853982  ;;  %v6300_v25 = vmul.u32 %v6293_v12, %v6284_v45 }
 0x4f0   : > { %v6153_v30 = vsel %vm6152_vm13, %v6151_v29, 0  ;;  %v5805_v21 = vor.u32 %v5804_v28, %v5803_v2  ;;  %v6148_v19 = vand.u32 8388607, %v6141_v8  ;;  %v13829_v37 = vand.u32 3, %v13779_v17 }
 0x4f1   : > { %v5808_v7 = vshll.u32 %v5807_v22, 23  ;;  %v6155_v48 = vand.u32 31, %v6153_v30  ;;  %v5819_v15 = vsel %vm13822_vm9, 0, %v5817_v16  ;;  %vm6302_vm14 = vc.u32 %v13817_v57, %v13806_v50 }
 0x4f2   : > { %v5812_v51 = vcvt.s32.f32 %v5805_v21  ;;  %v6304_v24 = vsel %vm6302_vm14, %v6303_v49, %v13807_v52  ;;  %v13842_v17 = vadd.f32 %v13657_v18, %v8475_v41  ;;  %v13845_v12 = vadd.f32 %v13657_v18, %v4248_v10 }
 0x4f3   : > { %v5809_v35 = vor.u32 4788187, %v5808_v7  ;;  %v6156_v62 = vsub.s32 32, %v6155_v48  ;;  %v6305_v34 = vadd.s32 %v6304_v24, %v6300_v25  ;;  %v5823_v60 = vadd.s32 3, %v5819_v15  ;;  %v13878_v7 = vld [vmem:[%s9349_s14 + $0x198] sm:$0xff] }
 0x4f4   : > { %v6149_v43 = vor.u32 8388608, %v6148_v19  ;;  %v13848_v4 = vadd.f32 %v8510_v39, %v13838_v11  ;;  %v6158_v32 = vshll.u32 %v9137_v38, %v6155_v48  ;;  %vm5933_vm0 = vcmp.eq.s32.totalorder %v13829_v37, 2 }
 0x4f5   : > { %v5810_v63 = vand.u32 2147483647, %v5809_v35  ;;  %v6306_v5 = vadd.s32 536870912, %v6305_v34  ;;  %v6159_v47 = vshrl.u32 %v9138_v40, %v6156_v62  ;;  %v6154_v26 = vshrl.u32 %v6153_v30, 5 }
 0x4f6   : > { %v6161_v36 = vshll.u32 %v9138_v40, %v6155_v48  ;;  %v6162_v18 = vshrl.u32 %v9139_v42, %v6156_v62  ;;  %vm5930_vm15 = vcmp.eq.s32.totalorder %v13829_v37, 0  ;;  %v6164_v6 = vshll.u32 %v9139_v42, %v6155_v48 }
 0x4f7   : > { %v5813_v0 = vmul.f32 %v5812_v51, %v5810_v63  ;;  %v13856_v1 = vshrl.u32 %v6306_v5, 30  ;;  %v6165_v31 = vshrl.u32 %v9140_v44, %v6156_v62  ;;  %v6167_v3 = vshll.u32 %v9140_v44, %v6155_v48  ;;  %v9035_v14 = vpop.eup %9034 }
 0x4f8   : > { %v13861_v52 = vand.u32 3, %v5823_v60  ;;  %v6168_v9 = vshrl.u32 %v9141_v46, %v6156_v62  ;;  %v13864_v45 = vshll.u32 %v6149_v43, 8  ;;  %v6157_v23 = vshrl.u32 %v9137_v38, %v6156_v62 }
 0x4f9   : > { %v5814_v20 = vxor.u32 2147483648, %v5813_v0  ;;  %v6308_v59 = vshll.u32 %v13856_v1, 30  ;;  %v6160_v2 = vor.u32 %v6159_v47, %v6158_v32  ;;  %v6170_v58 = vshll.u32 %v9141_v46, %v6155_v48 }
 0x4fa   : > { %v9037_v29 = vpop.eup %9036  ;;  %v6163_v16 = vor.u32 %v6162_v18, %v6161_v36  ;;  %v6169_v33 = vor.u32 %v6168_v9, %v6167_v3  ;;  %v6171_v28 = vshrl.u32 %v9142_v54, %v6156_v62  ;;  %v6166_v25 = vor.u32 %v6165_v31, %v6164_v6 }
 0x4fb   : > { %v5815_v41 = vsel %vm5732_vm7, %v5814_v20, %v5813_v0  ;;  %v13875_v49 = vsub.s32 %v6305_v34, %v6308_v59  ;;  %vm6173_vm1 = vcmp.lt.s32.totalorder %v6154_v26, 1  ;;  %v5934_v30 = vxor.u32 2147483648, %v9035_v14 }
 0x4fc   : > { %v5818_v22 = vsel %vm13822_vm9, %v13572_v61, %v5815_v41  ;;  %v6172_v21 = vor.u32 %v6171_v28, %v6170_v58  ;;  %vm6175_vm2 = vcmp.lt.s32.totalorder %v6154_v26, 3  ;;  %vm5926_vm3 = vweird.f32 %v13511_v55 }
 0x4fd   : > { %9038 = vcosq.f32 %v5818_v22  ;;  %v6311_v19 = vsub.s32 0, %v13875_v49  ;;  %vm6174_vm4 = vcmp.lt.s32.totalorder %v6154_v26, 2  ;;  %vm6176_vm5 = vcmp.lt.s32.totalorder %v6154_v26, 4 }
 0x4fe   : > { %9040 = vsinq.f32 %v5818_v22  ;;  %v5931_v48 = vxor.u32 2147483648, %v9037_v29  ;;  %v6178_v27 = vsel %vm6176_vm5, %v6166_v25, 2102212464  ;;  %v6181_v10 = vsel %vm6173_vm1, %v6160_v2, %v6163_v16 }
 0x4ff   : > { %v6182_v15 = vsel %vm6176_vm5, %v6169_v33, 920167782  ;;  %v8206_v35 = vmin.u32 %v6311_v19, %v13875_v49  ;;  %v6177_v51 = vsel %vm6173_vm1, %v6157_v23, %v6160_v2  ;;  %v6456_v24 = vand.u32 2139095040, %v13878_v7 }
 0x500   : > { %v6183_v39 = vsel %vm6175_vm2, %v6166_v25, %v6182_v15  ;;  %v6179_v62 = vsel %vm6175_vm2, %v6163_v16, %v6178_v27  ;;  %v6185_v63 = vsel %vm6173_vm1, %v6163_v16, %v6166_v25  ;;  %v6186_v60 = vsel %vm6176_vm5, %v6172_v21, 1326507024 }
 0x501   : > { %v6184_v34 = vsel %vm6174_vm4, %v6181_v10, %v6183_v39  ;;  %vm5929_vm7 = vcmp.lt.s32.totalorder %v13829_v37, 2  ;;  %v5935_v43 = vsel %vm5933_vm0, %v5934_v30, %v9037_v29  ;;  %vm6247_vm6 = vcmp.lt.s32.totalorder %v13693_v53, 0 }
 0x502   : > { %v6313_v5 = vclz %v8206_v35  ;;  %v5932_v32 = vsel %vm5930_vm15, %v9035_v14, %v5931_v48  ;;  %v6187_v47 = vsel %vm6175_vm2, %v6169_v33, %v6186_v60  ;;  %v6180_v6 = vsel %vm6174_vm4, %v6177_v51, %v6179_v62 }
 0x503   : > { %v13898_v0 = vmul.u32.u64.low %v13864_v45, %v6184_v34  ;;  %v13899_v36 = vmul.u32.u64.high %v13864_v45, %v6184_v34, %v13898_v0  ;;  %v6188_v31 = vsel %vm6174_vm4, %v6185_v63, %v6187_v47  ;;  %v6457_v3 = vshrl.u32 %v6456_v24, 23  ;;  %v13941_v24 = vld [vmem:[%s9349_s14 + $0x190] sm:$0xff] }
 0x504   : > { %v8207_v18 = vadd.s32 4294967294, %v6313_v5  ;;  %vm5822_vm8 = vweird.f32 %v13572_v61  ;;  %vm5826_vm10 = vcmp.eq.s32.totalorder %v13861_v52, 0  ;;  %vm13908_vm11 = vcmp.le.f32.partialorder %v6245_v56, 0.7853982 }
 0x505   : > { %v6331_v20 = vsub.s32 4, %v13856_v1  ;;  %v13914_v9 = vmul.u32.u64.low %v13864_v45, %v6188_v31  ;;  %v13915_v59 = vmul.u32.u64.high %v13864_v45, %v6188_v31, %v13914_v9  ;;  %v5936_v26 = vsel %vm5929_vm7, %v5932_v32, %v5935_v43 }
 0x506   : > { %v6301_v23 = vadd.s32 %v13806_v50, %v13817_v57  ;;  %vm8208_vm12 = vcmp.lt.s32.totalorder %v8207_v18, 0  ;;  %v8213_v2 = vadd.s32 4294967169, %v6457_v3  ;;  %v6196_v56 = vmul.u32 %v13864_v45, %v6180_v6 }
 0x507   : > { %v6316_v58 = vsel %vm8208_vm12, 0, %v8207_v18  ;;  %v6199_v29 = vadd.s32 1, %v13899_v36  ;;  %v6453_v41 = vand.u32 2147483647, %v13878_v7  ;;  %v5937_v37 = vsel %vm5926_vm3, nan, %v5936_v26 }
 0x508   : > { %v6317_v16 = vsub.s32 32, %v6316_v58  ;;  %v6318_v33 = vshll.u32 %v13875_v49, %v6316_v58  ;;  %v6321_v28 = vsub.s32 4294967266, %v6316_v58  ;;  %v6463_v22 = vadd.s32 1, %v8213_v2 }
 0x509   : > { %vm5829_vm13 = vcmp.eq.s32.totalorder %v13861_v52, 2  ;;  %v6332_v50 = vsel %vm6247_vm6, %v6331_v20, %v13856_v1  ;;  %vm6198_vm9 = vc.u32 %v13915_v59, %v13898_v0  ;;  %v6460_v19 = vand.u32 8388607, %v6453_v41 }
 0x50a   : > { %v9039_v57 = vpop.eup %9038  ;;  %v6319_v45 = vshrl.u32 %v6301_v23, %v6317_v16  ;;  %v6322_v25 = vadd.s32 127, %v6321_v28  ;;  %v6200_v49 = vsel %vm6198_vm9, %v6199_v29, %v13899_v36  ;;  %vm6464_vm14 = vcmp.gt.s32.totalorder %v6463_v22, 0 }
 0x50b   : > { %v9041_v30 = vpop.eup %9040  ;;  %v5830_v21 = vxor.u32 2147483648, %v9039_v57  ;;  %v6201_v55 = vadd.s32 %v6200_v49, %v6196_v56  ;;  %v6465_v48 = vsel %vm6464_vm14, %v6463_v22, 0  ;;  %vm5825_vm0 = vcmp.lt.s32.totalorder %v13861_v52, 2 }
 0x50c   : > { %v5827_v1 = vxor.u32 2147483648, %v9041_v30  ;;  %v6320_v27 = vor.u32 %v6319_v45, %v6318_v33  ;;  %v6323_v10 = vshll.u32 %v6322_v25, 23  ;;  %v5953_v15 = vmul.f32 %v5937_v37, %v13842_v17 }
 0x50d   : > { %v5831_v35 = vsel %vm5829_vm13, %v5830_v21, %v9041_v30  ;;  %v6202_v51 = vadd.s32 536870912, %v6201_v55  ;;  %v6467_v39 = vand.u32 31, %v6465_v48  ;;  %v6334_v60 = vsel %vm13908_vm11, 0, %v6332_v50 }
 0x50e   : > { %v5828_v62 = vsel %vm5826_vm10, %v9039_v57, %v5827_v1  ;;  %v6324_v34 = vor.u32 4788187, %v6323_v10  ;;  %v6327_v63 = vcvt.s32.f32 %v6320_v27  ;;  %v6461_v32 = vor.u32 8388608, %v6460_v19 }
 0x50f   : > { %v5832_v43 = vsel %vm5825_vm0, %v5828_v62, %v5831_v35  ;;  %v13947_v5 = vshrl.u32 %v6202_v51, 30  ;;  %v6468_v17 = vsub.s32 32, %v6467_v39  ;;  %v6466_v18 = vshrl.u32 %v6465_v48, 5 }
 0x510   : > { %v5833_v47 = vsel %vm5822_vm8, nan, %v5832_v43  ;;  %v6325_v36 = vand.u32 2147483647, %v6324_v34  ;;  %v6352_v6 = vand.u32 2139095040, %v13941_v24  ;;  %v6470_v3 = vshll.u32 %v9137_v38, %v6467_v39 }
 0x511   : > { %v5952_v52 = vmul.f32 %v5833_v47, %v13845_v12  ;;  %v6204_v31 = vshll.u32 %v13947_v5, 30  ;;  %v6473_v20 = vshll.u32 %v9138_v40, %v6467_v39  ;;  %v6471_v26 = vshrl.u32 %v9138_v40, %v6468_v17 }
 0x512   : > { %v6328_v9 = vmul.f32 %v6327_v63, %v6325_v36  ;;  %v6474_v23 = vshrl.u32 %v9139_v42, %v6468_v17  ;;  %v6476_v61 = vshll.u32 %v9139_v42, %v6467_v39  ;;  %v6477_v58 = vshrl.u32 %v9140_v44, %v6468_v17 }
 0x513   : > { %8529 = vmatprep.mubr.f32.mxu1 %v5952_v52  ;;  %v13959_v2 = vsub.s32 %v6201_v55, %v6204_v31  ;;  %v6479_v12 = vshll.u32 %v9140_v44, %v6467_v39  ;;  %v6480_v56 = vshrl.u32 %v9141_v46, %v6468_v17  ;;  %v6338_v16 = vadd.s32 3, %v6334_v60 }
 0x514   : > { %8530 = vmatmul.mubr.f32.gmra.mxu1 %v5953_v15  ;;  %v6329_v29 = vxor.u32 2147483648, %v6328_v9  ;;  %v13964_v33 = vshll.u32 %v6461_v32, 8  ;;  %v6353_v28 = vshrl.u32 %v6352_v6, 23  ;;  %v6469_v37 = vshrl.u32 %v9137_v38, %v6468_v17 }
 0x515   : > { %v6207_v22 = vsub.s32 0, %v13959_v2  ;;  %v6472_v50 = vor.u32 %v6471_v26, %v6470_v3  ;;  %v6475_v57 = vor.u32 %v6474_v23, %v6473_v20  ;;  %v6481_v25 = vor.u32 %v6480_v56, %v6479_v12 }
 0x516   : > { %v6330_v45 = vsel %vm6247_vm6, %v6329_v29, %v6328_v9  ;;  %v6482_v49 = vshll.u32 %v9141_v46, %v6467_v39  ;;  %v6483_v30 = vshrl.u32 %v9142_v54, %v6468_v17  ;;  %v6478_v19 = vor.u32 %v6477_v58, %v6476_v61 }
 0x517   : > { %v6333_v21 = vsel %vm13908_vm11, %v13693_v53, %v6330_v45  ;;  %v8202_v55 = vmin.u32 %v6207_v22, %v13959_v2  ;;  %vm6485_vm15 = vcmp.lt.s32.totalorder %v6466_v18, 1  ;;  %vm6487_vm1 = vcmp.lt.s32.totalorder %v6466_v18, 3 }
 0x518   : > { %9042 = vcosq.f32 %v6333_v21  ;;  %v6484_v48 = vor.u32 %v6483_v30, %v6482_v49  ;;  %vm6488_vm2 = vcmp.lt.s32.totalorder %v6466_v18, 4  ;;  %vm6486_vm3 = vcmp.lt.s32.totalorder %v6466_v18, 2 }
 0x519   : > { %9044 = vsinq.f32 %v6333_v21  ;;  %v6209_v1 = vclz %v8202_v55  ;;  %v8209_v27 = vadd.s32 4294967169, %v6353_v28  ;;  %v6489_v10 = vsel %vm6485_vm15, %v6469_v37, %v6472_v50 }
 0x51a   : > { %v6490_v15 = vsel %vm6488_vm2, %v6478_v19, 2102212464  ;;  %v6493_v35 = vsel %vm6485_vm15, %v6472_v50, %v6475_v57  ;;  %v6494_v51 = vsel %vm6488_vm2, %v6481_v25, 920167782  ;;  %v6497_v34 = vsel %vm6485_vm15, %v6475_v57, %v6478_v19 }
 0x51b   : > { %v8203_v14 = vadd.s32 4294967294, %v6209_v1  ;;  %v6491_v39 = vsel %vm6487_vm1, %v6475_v57, %v6490_v15  ;;  %v6495_v62 = vsel %vm6487_vm1, %v6478_v19, %v6494_v51  ;;  %v6197_v63 = vadd.s32 %v13898_v0, %v13915_v59 }
 0x51c   : > { %v6496_v60 = vsel %vm6486_vm3, %v6493_v35, %v6495_v62  ;;  %v6498_v43 = vsel %vm6488_vm2, %v6484_v48, 1326507024  ;;  %v6349_v32 = vand.u32 2147483647, %v13941_v24  ;;  %v6227_v52 = vsub.s32 4, %v13947_v5 }
 0x51d   : > { %vm8204_vm4 = vcmp.lt.s32.totalorder %v8203_v14, 0  ;;  %v6499_v17 = vsel %vm6487_vm1, %v6481_v25, %v6498_v43  ;;  %v13987_v47 = vmul.u32.u64.low %v13964_v33, %v6496_v60  ;;  %v13988_v36 = vmul.u32.u64.high %v13964_v33, %v6496_v60, %v13987_v47 }
 0x51e   : > { %v6212_v6 = vsel %vm8204_vm4, 0, %v8203_v14  ;;  %v6492_v31 = vsel %vm6486_vm3, %v6489_v10, %v6491_v39  ;;  %v6500_v0 = vsel %vm6486_vm3, %v6497_v34, %v6499_v17  ;;  %v6359_v9 = vadd.s32 1, %v8209_v27 }
 0x51f   : > { %v6213_v59 = vsub.s32 32, %v6212_v6  ;;  %v6214_v3 = vshll.u32 %v13959_v2, %v6212_v6  ;;  %v6217_v20 = vsub.s32 4294967266, %v6212_v6  ;;  %vm6337_vm5 = vweird.f32 %v13693_v53 }
 0x520   : > { %v6339_v26 = vand.u32 3, %v6338_v16  ;;  %vm6143_vm7 = vcmp.lt.s32.totalorder %v13754_v13, 0  ;;  %v13998_v23 = vmul.u32.u64.low %v13964_v33, %v6500_v0  ;;  %v13999_v61 = vmul.u32.u64.high %v13964_v33, %v6500_v0, %v13998_v23 }
 0x521   : > { %v6215_v58 = vshrl.u32 %v6197_v63, %v6213_v59  ;;  %v6218_v12 = vadd.s32 127, %v6217_v20  ;;  %v6511_v56 = vadd.s32 1, %v13988_v36  ;;  %vm6360_vm6 = vcmp.gt.s32.totalorder %v6359_v9, 0 }
 0x522   : > { %vm14004_vm8 = vcmp.le.f32.partialorder %v6141_v8, 0.7853982  ;;  %v6508_v2 = vmul.u32 %v13964_v33, %v6492_v31  ;;  %v14011_v29 = vand.u32 8388607, %v6349_v32  ;;  %v6361_v16 = vsel %vm6360_vm6, %v6359_v9, 0 }
 0x523   : > { %v6216_v28 = vor.u32 %v6215_v58, %v6214_v3  ;;  %v6219_v22 = vshll.u32 %v6218_v12, 23  ;;  %v6228_v37 = vsel %vm6143_vm7, %v6227_v52, %v13947_v5  ;;  %v6363_v50 = vand.u32 31, %v6361_v16  ;;  %v6045_v58 = vpop.f32.mrf.mxu0 }
 0x524   : > { %vm6340_vm10 = vcmp.lt.s32.totalorder %v6339_v26, 2  ;;  %vm6341_vm11 = vcmp.eq.s32.totalorder %v6339_v26, 0  ;;  %vm6344_vm12 = vcmp.eq.s32.totalorder %v6339_v26, 2  ;;  %vm6510_vm13 = vc.u32 %v13999_v61, %v13987_v47 }
 0x525   : > { %v9043_v8 = vpop.eup %9042  ;;  %v6220_v33 = vor.u32 4788187, %v6219_v22  ;;  %v6223_v57 = vcvt.s32.f32 %v6216_v28  ;;  %v6512_v45 = vsel %vm6510_vm13, %v6511_v56, %v13988_v36  ;;  %v6364_v25 = vsub.s32 32, %v6363_v50 }
 0x526   : > { %v9045_v49 = vpop.eup %9044  ;;  %v6345_v30 = vxor.u32 2147483648, %v9043_v8  ;;  %v6230_v21 = vsel %vm14004_vm8, 0, %v6228_v37  ;;  %v6513_v55 = vadd.s32 %v6512_v45, %v6508_v2  ;;  %v6357_v5 = vor.u32 8388608, %v14011_v29 }
 0x527   : > { %v6342_v19 = vxor.u32 2147483648, %v9045_v49  ;;  %v6221_v48 = vand.u32 2147483647, %v6220_v33  ;;  %v14022_v1 = vshrl.u32 %v6361_v16, 5  ;;  %v6366_v27 = vshll.u32 %v9137_v38, %v6363_v50  ;;  %v14062_v16 = vld [vmem:[%s9349_s14 + $0x1a8] sm:$0xff] }
 0x528   : > { %v6346_v10 = vsel %vm6344_vm12, %v6345_v30, %v9045_v49  ;;  %v6514_v15 = vadd.s32 536870912, %v6513_v55  ;;  %v6367_v35 = vshrl.u32 %v9138_v40, %v6364_v25  ;;  %v6369_v51 = vshll.u32 %v9138_v40, %v6363_v50 }
 0x529   : > { %v6343_v14 = vsel %vm6341_vm11, %v9043_v8, %v6342_v19  ;;  %v6224_v39 = vmul.f32 %v6223_v57, %v6221_v48  ;;  %v6370_v62 = vshrl.u32 %v9139_v42, %v6364_v25  ;;  %v6372_v34 = vshll.u32 %v9139_v42, %v6363_v50  ;;  %v8513_v8 = vpop.f32.mrf.mxu0 }
 0x52a   : > { %v6347_v63 = vsel %vm6340_vm10, %v6343_v14, %v6346_v10  ;;  %v14032_v60 = vshrl.u32 %v6514_v15, 30  ;;  %v6373_v43 = vshrl.u32 %v9140_v44, %v6364_v25  ;;  %v6375_v17 = vshll.u32 %v9140_v44, %v6363_v50 }
 0x52b   : > { %v6348_v36 = vsel %vm6337_vm5, nan, %v6347_v63  ;;  %v6225_v6 = vxor.u32 2147483648, %v6224_v39  ;;  %v6365_v52 = vshrl.u32 %v9137_v38, %v6364_v25  ;;  %v6376_v31 = vshrl.u32 %v9141_v46, %v6364_v25 }
 0x52c   : > { %v7806_v0 = vmul.f32 %v6348_v36, %v13848_v4  ;;  %v6516_v59 = vshll.u32 %v14032_v60, 30  ;;  %v6368_v3 = vor.u32 %v6367_v35, %v6366_v27  ;;  %v6378_v20 = vshll.u32 %v9141_v46, %v6363_v50 }
 0x52d   : > { %v6226_v9 = vsel %vm6143_vm7, %v6225_v6, %v6224_v39  ;;  %v6371_v26 = vor.u32 %v6370_v62, %v6369_v51  ;;  %v6377_v53 = vor.u32 %v6376_v31, %v6375_v17  ;;  %v6379_v23 = vshrl.u32 %v9142_v54, %v6364_v25 }
 0x52e   : > { %7822 = vst [vmem:[%s14041_s28 + $0x8] sm:$0xff] %v7806_v0  ;;  %v6229_v12 = vsel %vm14004_vm8, %v13754_v13, %v6226_v9  ;;  %v14057_v4 = vsub.s32 %v6513_v55, %v6516_v59  ;;  %v6374_v56 = vor.u32 %v6373_v43, %v6372_v34  ;;  %vm6381_vm9 = vcmp.lt.s32.totalorder %v14022_v1, 1 }
 0x52f   : > { %9046 = vcosq.f32 %v6229_v12  ;;  %v6234_v2 = vadd.s32 3, %v6230_v21  ;;  %v6380_v29 = vor.u32 %v6379_v23, %v6378_v20  ;;  %vm6383_vm14 = vcmp.lt.s32.totalorder %v14022_v1, 3 }
 0x530   : > { %9048 = vsinq.f32 %v6229_v12  ;;  %v6519_v28 = vsub.s32 0, %v14057_v4  ;;  %vm6382_vm0 = vcmp.lt.s32.totalorder %v14022_v1, 2  ;;  %vm6384_vm15 = vcmp.lt.s32.totalorder %v14022_v1, 4 }
 0x531   : > { %v6386_v18 = vsel %vm6384_vm15, %v6374_v56, 2102212464  ;;  %v6389_v22 = vsel %vm6381_vm9, %v6368_v3, %v6371_v26  ;;  %v6390_v37 = vsel %vm6384_vm15, %v6377_v53, 920167782  ;;  %v6397_v50 = vshll.u32 %v6357_v5, 8 }
 0x532   : > { %v8214_v33 = vmin.u32 %v6519_v28, %v14057_v4  ;;  %v6385_v57 = vsel %vm6381_vm9, %v6365_v52, %v6368_v3  ;;  %v6391_v45 = vsel %vm6383_vm14, %v6374_v56, %v6390_v37  ;;  %v6664_v25 = vand.u32 2139095040, %v14062_v16 }
 0x533   : > { %v6387_v49 = vsel %vm6383_vm14, %v6371_v26, %v6386_v18  ;;  %v6392_v30 = vsel %vm6382_vm0, %v6389_v22, %v6391_v45  ;;  %v6393_v21 = vsel %vm6381_vm9, %v6371_v26, %v6374_v56  ;;  %v6394_v55 = vsel %vm6384_vm15, %v6380_v29, 1326507024 }
 0x534   : > { %v6046_v5 = vadd.f32 %v13838_v11, %v6045_v58  ;;  %v6521_v19 = vclz %v8214_v33  ;;  %v14083_v48 = vadd.f32 %v8513_v8, %v13838_v11  ;;  %v6395_v27 = vsel %vm6383_vm14, %v6377_v53, %v6394_v55 }
 0x535   : > { %v14087_v10 = vmul.u32.u64.low %v6397_v50, %v6392_v30  ;;  %v14088_v15 = vmul.u32.u64.high %v6397_v50, %v6392_v30, %v14087_v10  ;;  %v6388_v51 = vsel %vm6382_vm0, %v6385_v57, %v6387_v49  ;;  %v6396_v14 = vsel %vm6382_vm0, %v6393_v21, %v6395_v27 }
 0x536   : > { %v8215_v35 = vadd.s32 4294967294, %v6521_v19  ;;  %v6665_v39 = vshrl.u32 %v6664_v25, 23  ;;  %vm6233_vm1 = vweird.f32 %v13754_v13  ;;  %v6235_v62 = vand.u32 3, %v6234_v2 }
 0x537   : > { %v6539_v34 = vsub.s32 4, %v14032_v60  ;;  %v14097_v63 = vmul.u32.u64.low %v6397_v50, %v6396_v14  ;;  %v14098_v43 = vmul.u32.u64.high %v6397_v50, %v6396_v14, %v14097_v63  ;;  %vm6455_vm2 = vcmp.lt.s32.totalorder %v13878_v7, 0 }
 0x538   : > { %v6509_v17 = vadd.s32 %v13987_v47, %v13999_v61  ;;  %vm8216_vm3 = vcmp.lt.s32.totalorder %v8215_v35, 0  ;;  %v8221_v36 = vadd.s32 4294967169, %v6665_v39  ;;  %v6404_v52 = vmul.u32 %v6397_v50, %v6388_v51  ;;  %v14122_v50 = vld [vmem:[%s9349_s14 + $0x1a0] sm:$0xff] }
 0x539   : > { %v6524_v6 = vsel %vm8216_vm3, 0, %v8215_v35  ;;  %v6407_v1 = vadd.s32 1, %v14088_v15  ;;  %v6661_v31 = vand.u32 2147483647, %v14062_v16  ;;  %vm6237_vm4 = vcmp.eq.s32.totalorder %v6235_v62, 0 }
 0x53a   : > { %v6525_v0 = vsub.s32 32, %v6524_v6  ;;  %v6526_v59 = vshll.u32 %v14057_v4, %v6524_v6  ;;  %v6529_v3 = vsub.s32 4294967266, %v6524_v6  ;;  %v6671_v20 = vadd.s32 1, %v8221_v36 }
 0x53b   : > { %vm6240_vm5 = vcmp.eq.s32.totalorder %v6235_v62, 2  ;;  %v6540_v9 = vsel %vm6455_vm2, %v6539_v34, %v14032_v60  ;;  %vm6406_vm7 = vc.u32 %v14098_v43, %v14087_v10  ;;  %v6668_v4 = vand.u32 8388607, %v6661_v31 }
 0x53c   : > { %v9047_v47 = vpop.eup %9046  ;;  %v6527_v61 = vshrl.u32 %v6509_v17, %v6525_v0  ;;  %v6530_v26 = vadd.s32 127, %v6529_v3  ;;  %v6408_v53 = vsel %vm6406_vm7, %v6407_v1, %v14088_v15  ;;  %vm6672_vm6 = vcmp.gt.s32.totalorder %v6671_v20, 0 }
 0x53d   : > { %v9049_v23 = vpop.eup %9048  ;;  %v6241_v58 = vxor.u32 2147483648, %v9047_v47  ;;  %v6409_v12 = vadd.s32 %v6408_v53, %v6404_v52  ;;  %v6673_v56 = vsel %vm6672_vm6, %v6671_v20, 0  ;;  %vm6236_vm8 = vcmp.lt.s32.totalorder %v6235_v62, 2 }
 0x53e   : > { %v6238_v2 = vxor.u32 2147483648, %v9049_v23  ;;  %v6528_v60 = vor.u32 %v6527_v61, %v6526_v59  ;;  %v6531_v29 = vshll.u32 %v6530_v26, 23  ;;  %vm14117_vm10 = vcmp.le.f32.partialorder %v6453_v41, 0.7853982 }
 0x53f   : > { %v6242_v28 = vsel %vm6240_vm5, %v6241_v58, %v9049_v23  ;;  %v6410_v22 = vadd.s32 536870912, %v6409_v12  ;;  %v6675_v37 = vand.u32 31, %v6673_v56  ;;  %v6542_v45 = vsel %vm14117_vm10, 0, %v6540_v9 }
 0x540   : > { %v6239_v8 = vsel %vm6237_vm4, %v9047_v47, %v6238_v2  ;;  %v6532_v33 = vor.u32 4788187, %v6531_v29  ;;  %v6535_v57 = vcvt.s32.f32 %v6528_v60  ;;  %v6669_v30 = vor.u32 8388608, %v6668_v4 }
 0x541   : > { %v6243_v25 = vsel %vm6236_vm8, %v6239_v8, %v6242_v28  ;;  %v14127_v49 = vshrl.u32 %v6410_v22, 30  ;;  %v6676_v41 = vsub.s32 32, %v6675_v37  ;;  %v6674_v19 = vshrl.u32 %v6673_v56, 5 }
 0x542   : > { %v6244_v21 = vsel %vm6233_vm1, nan, %v6243_v25  ;;  %v6533_v55 = vand.u32 2147483647, %v6532_v33  ;;  %v6560_v27 = vand.u32 2139095040, %v14122_v50  ;;  %v6678_v51 = vshll.u32 %v9137_v38, %v6675_v37 }
 0x543   : > { %v7805_v15 = vmul.f32 %v6244_v21, %v6046_v5  ;;  %v6412_v35 = vshll.u32 %v14127_v49, 30  ;;  %v6681_v14 = vshll.u32 %v9138_v40, %v6675_v37  ;;  %v6679_v62 = vshrl.u32 %v9138_v40, %v6676_v41 }
 0x544   : > { %v6536_v39 = vmul.f32 %v6535_v57, %v6533_v55  ;;  %v6682_v34 = vshrl.u32 %v9139_v42, %v6676_v41  ;;  %v6684_v63 = vshll.u32 %v9139_v42, %v6675_v37  ;;  %v6685_v17 = vshrl.u32 %v9140_v44, %v6676_v41 }
 0x545   : > { %7821 = vst [vmem:[%s14041_s28] sm:$0xff] %v7805_v15  ;;  %v14139_v13 = vsub.s32 %v6409_v12, %v6412_v35  ;;  %v6687_v5 = vshll.u32 %v9140_v44, %v6675_v37  ;;  %v6688_v36 = vshrl.u32 %v9141_v46, %v6676_v41  ;;  %v6546_v52 = vadd.s32 3, %v6542_v45 }
 0x546   : > { %v6537_v6 = vxor.u32 2147483648, %v6536_v39  ;;  %v14144_v1 = vshll.u32 %v6669_v30, 8  ;;  %v6561_v0 = vshrl.u32 %v6560_v27, 23  ;;  %v6677_v3 = vshrl.u32 %v9137_v38, %v6676_v41 }
 0x547   : > { %v6415_v59 = vsub.s32 0, %v14139_v13  ;;  %v6680_v20 = vor.u32 %v6679_v62, %v6678_v51  ;;  %v6683_v9 = vor.u32 %v6682_v34, %v6681_v14  ;;  %v6689_v61 = vor.u32 %v6688_v36, %v6687_v5 }
 0x548   : > { %v6538_v47 = vsel %vm6455_vm2, %v6537_v6, %v6536_v39  ;;  %v6690_v26 = vshll.u32 %v9141_v46, %v6675_v37  ;;  %v6691_v53 = vshrl.u32 %v9142_v54, %v6676_v41  ;;  %v6686_v12 = vor.u32 %v6685_v17, %v6684_v63 }
 0x549   : > { %v6541_v23 = vsel %vm14117_vm10, %v13878_v7, %v6538_v47  ;;  %v8210_v58 = vmin.u32 %v6415_v59, %v14139_v13  ;;  %vm6693_vm11 = vcmp.lt.s32.totalorder %v6674_v19, 1  ;;  %vm6695_vm12 = vcmp.lt.s32.totalorder %v6674_v19, 3 }
 0x54a   : > { %9050 = vcosq.f32 %v6541_v23  ;;  %v6692_v4 = vor.u32 %v6691_v53, %v6690_v26  ;;  %vm6696_vm13 = vcmp.lt.s32.totalorder %v6674_v19, 4  ;;  %vm6694_vm9 = vcmp.lt.s32.totalorder %v6674_v19, 2 }
 0x54b   : > { %9052 = vsinq.f32 %v6541_v23  ;;  %v6417_v56 = vclz %v8210_v58  ;;  %v8217_v2 = vadd.s32 4294967169, %v6561_v0  ;;  %v6697_v60 = vsel %vm6693_vm11, %v6677_v3, %v6680_v20 }
 0x54c   : > { %v6698_v29 = vsel %vm6696_vm13, %v6686_v12, 2102212464  ;;  %v6701_v28 = vsel %vm6693_vm11, %v6680_v20, %v6683_v9  ;;  %v6702_v22 = vsel %vm6696_vm13, %v6689_v61, 920167782  ;;  %v6705_v33 = vsel %vm6693_vm11, %v6683_v9, %v6686_v12 }
 0x54d   : > { %v8211_v18 = vadd.s32 4294967294, %v6417_v56  ;;  %v6699_v37 = vsel %vm6695_vm12, %v6683_v9, %v6698_v29  ;;  %v6703_v8 = vsel %vm6695_vm12, %v6686_v12, %v6702_v22  ;;  %v6405_v57 = vadd.s32 %v14087_v10, %v14098_v43 }
 0x54e   : > { %v6704_v45 = vsel %vm6694_vm9, %v6701_v28, %v6703_v8  ;;  %v6706_v25 = vsel %vm6696_vm13, %v6692_v4, 1326507024  ;;  %v6557_v30 = vand.u32 2147483647, %v14122_v50  ;;  %v6435_v15 = vsub.s32 4, %v14127_v49 }
 0x54f   : > { %vm8212_vm14 = vcmp.lt.s32.totalorder %v8211_v18, 0  ;;  %v6707_v41 = vsel %vm6695_vm12, %v6689_v61, %v6706_v25  ;;  %v14167_v21 = vmul.u32.u64.low %v14144_v1, %v6704_v45  ;;  %v14168_v55 = vmul.u32.u64.high %v14144_v1, %v6704_v45, %v14167_v21 }
 0x550   : > { %v6420_v27 = vsel %vm8212_vm14, 0, %v8211_v18  ;;  %v6700_v35 = vsel %vm6694_vm9, %v6697_v60, %v6699_v37  ;;  %v6708_v10 = vsel %vm6694_vm9, %v6705_v33, %v6707_v41  ;;  %v6567_v39 = vadd.s32 1, %v8217_v2 }
 0x551   : > { %v6421_v43 = vsub.s32 32, %v6420_v27  ;;  %v6422_v51 = vshll.u32 %v14139_v13, %v6420_v27  ;;  %v6425_v14 = vsub.s32 4294967266, %v6420_v27  ;;  %vm6545_vm0 = vweird.f32 %v13878_v7 }
 0x552   : > { %v6547_v62 = vand.u32 3, %v6546_v52  ;;  %vm6351_vm15 = vcmp.lt.s32.totalorder %v13941_v24, 0  ;;  %v14178_v34 = vmul.u32.u64.low %v14144_v1, %v6708_v10  ;;  %v14179_v63 = vmul.u32.u64.high %v14144_v1, %v6708_v10, %v14178_v34 }
 0x553   : > { %v6423_v17 = vshrl.u32 %v6405_v57, %v6421_v43  ;;  %v6426_v5 = vadd.s32 127, %v6425_v14  ;;  %v6719_v36 = vadd.s32 1, %v14168_v55  ;;  %vm6568_vm1 = vcmp.gt.s32.totalorder %v6567_v39, 0 }
 0x554   : > { %vm14184_vm2 = vcmp.le.f32.partialorder %v6349_v32, 0.7853982  ;;  %v6716_v13 = vmul.u32 %v14144_v1, %v6700_v35  ;;  %v14191_v6 = vand.u32 8388607, %v6557_v30  ;;  %v6569_v52 = vsel %vm6568_vm1, %v6567_v39, 0 }
 0x555   : > { %v6424_v0 = vor.u32 %v6423_v17, %v6422_v51  ;;  %v6427_v59 = vshll.u32 %v6426_v5, 23  ;;  %v6436_v3 = vsel %vm6351_vm15, %v6435_v15, %v14127_v49  ;;  %v6571_v20 = vand.u32 31, %v6569_v52  ;;  %v6055_v17 = vpop.f32.mrf.mxu0 }
 0x556   : > { %vm6548_vm3 = vcmp.lt.s32.totalorder %v6547_v62, 2  ;;  %vm6549_vm4 = vcmp.eq.s32.totalorder %v6547_v62, 0  ;;  %vm6552_vm5 = vcmp.eq.s32.totalorder %v6547_v62, 2  ;;  %vm6718_vm7 = vc.u32 %v14179_v63, %v14167_v21 }
 0x557   : > { %v9051_v32 = vpop.eup %9050  ;;  %v6428_v1 = vor.u32 4788187, %v6427_v59  ;;  %v6431_v9 = vcvt.s32.f32 %v6424_v0  ;;  %v6720_v47 = vsel %vm6718_vm7, %v6719_v36, %v14168_v55  ;;  %v6572_v61 = vsub.s32 32, %v6571_v20 }
 0x558   : > { %v9053_v26 = vpop.eup %9052  ;;  %v6553_v53 = vxor.u32 2147483648, %v9051_v32  ;;  %v6438_v23 = vsel %vm14184_vm2, 0, %v6436_v3  ;;  %v6721_v58 = vadd.s32 %v6720_v47, %v6716_v13  ;;  %v6565_v49 = vor.u32 8388608, %v14191_v6 }
 0x559   : > { %v6550_v12 = vxor.u32 2147483648, %v9053_v26  ;;  %v6429_v4 = vand.u32 2147483647, %v6428_v1  ;;  %v14202_v56 = vshrl.u32 %v6569_v52, 5  ;;  %v6574_v2 = vshll.u32 %v9137_v38, %v6571_v20  ;;  %v14235_v52 = vld [vmem:[%s9349_s14 + $0x1b8] sm:$0xff] }
 0x55a   : > { %v6554_v60 = vsel %vm6552_vm5, %v6553_v53, %v9053_v26  ;;  %v6722_v29 = vadd.s32 536870912, %v6721_v58  ;;  %v6575_v28 = vshrl.u32 %v9138_v40, %v6572_v61  ;;  %v6577_v22 = vshll.u32 %v9138_v40, %v6571_v20 }
 0x55b   : > { %v6551_v18 = vsel %vm6549_vm4, %v9051_v32, %v6550_v12  ;;  %v6432_v37 = vmul.f32 %v6431_v9, %v6429_v4  ;;  %v6578_v8 = vshrl.u32 %v9139_v42, %v6572_v61  ;;  %v6580_v33 = vshll.u32 %v9139_v42, %v6571_v20  ;;  %v8516_v32 = vpop.f32.mrf.mxu0 }
 0x55c   : > { %v6555_v57 = vsel %vm6548_vm3, %v6551_v18, %v6554_v60  ;;  %v14212_v45 = vshrl.u32 %v6722_v29, 30  ;;  %v6581_v25 = vshrl.u32 %v9140_v44, %v6572_v61  ;;  %v6583_v41 = vshll.u32 %v9140_v44, %v6571_v20 }
 0x55d   : > { %v6556_v55 = vsel %vm6545_vm0, nan, %v6555_v57  ;;  %v6433_v27 = vxor.u32 2147483648, %v6432_v37  ;;  %v6573_v15 = vshrl.u32 %v9137_v38, %v6572_v61  ;;  %v6584_v35 = vshrl.u32 %v9141_v46, %v6572_v61 }
 0x55e   : > { %v7808_v10 = vmul.f32 %v6556_v55, %v14083_v48  ;;  %v6724_v43 = vshll.u32 %v14212_v45, 30  ;;  %v6576_v51 = vor.u32 %v6575_v28, %v6574_v2  ;;  %v6586_v14 = vshll.u32 %v9141_v46, %v6571_v20 }
 0x55f   : > { %v6434_v39 = vsel %vm6351_vm15, %v6433_v27, %v6432_v37  ;;  %v6579_v62 = vor.u32 %v6578_v8, %v6577_v22  ;;  %v6585_v34 = vor.u32 %v6584_v35, %v6583_v41  ;;  %v6587_v7 = vshrl.u32 %v9142_v54, %v6572_v61 }
 0x560   : > { %7824 = vst [vmem:[%s14041_s28 + $0x18] sm:$0xff] %v7808_v10  ;;  %v6437_v5 = vsel %vm14184_vm2, %v13941_v24, %v6434_v39  ;;  %v14230_v48 = vsub.s32 %v6721_v58, %v6724_v43  ;;  %v6582_v36 = vor.u32 %v6581_v25, %v6580_v33  ;;  %vm6589_vm6 = vcmp.lt.s32.totalorder %v14202_v56, 1 }
 0x561   : > { %9054 = vcosq.f32 %v6437_v5  ;;  %v6442_v13 = vadd.s32 3, %v6438_v23  ;;  %v6588_v6 = vor.u32 %v6587_v7, %v6586_v14  ;;  %vm6591_vm8 = vcmp.lt.s32.totalorder %v14202_v56, 3 }
 0x562   : > { %9056 = vsinq.f32 %v6437_v5  ;;  %v6727_v0 = vsub.s32 0, %v14230_v48  ;;  %vm6590_vm10 = vcmp.lt.s32.totalorder %v14202_v56, 2  ;;  %vm6592_vm11 = vcmp.lt.s32.totalorder %v14202_v56, 4 }
 0x563   : > { %v6594_v19 = vsel %vm6592_vm11, %v6582_v36, 2102212464  ;;  %v6597_v59 = vsel %vm6589_vm6, %v6576_v51, %v6579_v62  ;;  %v6598_v3 = vsel %vm6592_vm11, %v6585_v34, 920167782  ;;  %v6605_v20 = vshll.u32 %v6565_v49, 8 }
 0x564   : > { %v8222_v1 = vmin.u32 %v6727_v0, %v14230_v48  ;;  %v6593_v9 = vsel %vm6589_vm6, %v6573_v15, %v6576_v51  ;;  %v6599_v47 = vsel %vm6591_vm8, %v6582_v36, %v6598_v3  ;;  %v6872_v61 = vand.u32 2139095040, %v14235_v52  ;;  %v14295_v3 = vld [vmem:[%s9349_s14 + $0x1b0] sm:$0xff] }
 0x565   : > { %v6595_v26 = vsel %vm6591_vm8, %v6579_v62, %v6594_v19  ;;  %v6600_v53 = vsel %vm6590_vm10, %v6597_v59, %v6599_v47  ;;  %v6601_v23 = vsel %vm6589_vm6, %v6579_v62, %v6582_v36  ;;  %v6602_v58 = vsel %vm6592_vm11, %v6588_v6, 1326507024 }
 0x566   : > { %v6056_v49 = vadd.f32 %v13838_v11, %v6055_v17  ;;  %v6729_v12 = vclz %v8222_v1  ;;  %v14256_v4 = vadd.f32 %v8516_v32, %v13838_v11  ;;  %v6603_v2 = vsel %vm6591_vm8, %v6585_v34, %v6602_v58 }
 0x567   : > { %v14260_v60 = vmul.u32.u64.low %v6605_v20, %v6600_v53  ;;  %v14261_v29 = vmul.u32.u64.high %v6605_v20, %v6600_v53, %v14260_v60  ;;  %v6596_v22 = vsel %vm6590_vm10, %v6593_v9, %v6595_v26  ;;  %v6604_v18 = vsel %vm6590_vm10, %v6601_v23, %v6603_v2 }
 0x568   : > { %v8223_v28 = vadd.s32 4294967294, %v6729_v12  ;;  %v6873_v37 = vshrl.u32 %v6872_v61, 23  ;;  %vm6441_vm12 = vweird.f32 %v13941_v24  ;;  %v6443_v8 = vand.u32 3, %v6442_v13 }
 0x569   : > { %v6747_v11 = vsub.s32 4, %v14212_v45  ;;  %v14270_v33 = vmul.u32.u64.low %v6605_v20, %v6604_v18  ;;  %v14271_v57 = vmul.u32.u64.high %v6605_v20, %v6604_v18, %v14270_v33  ;;  %vm6663_vm13 = vcmp.lt.s32.totalorder %v14062_v16, 0 }
 0x56a   : > { %v6717_v25 = vadd.s32 %v14167_v21, %v14179_v63  ;;  %vm8224_vm9 = vcmp.lt.s32.totalorder %v8223_v28, 0  ;;  %v8229_v41 = vadd.s32 4294967169, %v6873_v37  ;;  %v6612_v27 = vmul.u32 %v6605_v20, %v6596_v22 }
 0x56b   : > { %v6732_v55 = vsel %vm8224_vm9, 0, %v8223_v28  ;;  %v6615_v56 = vadd.s32 1, %v14261_v29  ;;  %v6869_v15 = vand.u32 2147483647, %v14235_v52  ;;  %vm6445_vm14 = vcmp.eq.s32.totalorder %v6443_v8, 0 }
 0x56c   : > { %v6733_v35 = vsub.s32 32, %v6732_v55  ;;  %v6734_v10 = vshll.u32 %v14230_v48, %v6732_v55  ;;  %v6737_v43 = vsub.s32 4294967266, %v6732_v55  ;;  %v6879_v51 = vadd.s32 1, %v8229_v41 }
 0x56d   : > { %vm6448_vm0 = vcmp.eq.s32.totalorder %v6443_v8, 2  ;;  %v6748_v14 = vsel %vm6663_vm13, %v6747_v11, %v14212_v45  ;;  %vm6614_vm15 = vc.u32 %v14271_v57, %v14260_v60  ;;  %v6876_v5 = vand.u32 8388607, %v6869_v15 }
 0x56e   : > { %v9055_v21 = vpop.eup %9054  ;;  %v6735_v63 = vshrl.u32 %v6717_v25, %v6733_v35  ;;  %v6738_v39 = vadd.s32 127, %v6737_v43  ;;  %v6616_v62 = vsel %vm6614_vm15, %v6615_v56, %v14261_v29  ;;  %vm6880_vm1 = vcmp.gt.s32.totalorder %v6879_v51, 0 }
 0x56f   : > { %v9057_v34 = vpop.eup %9056  ;;  %v6449_v7 = vxor.u32 2147483648, %v9055_v21  ;;  %v6617_v17 = vadd.s32 %v6616_v62, %v6612_v27  ;;  %v6881_v48 = vsel %vm6880_vm1, %v6879_v51, 0  ;;  %vm6444_vm2 = vcmp.lt.s32.totalorder %v6443_v8, 2 }
 0x570   : > { %v6446_v36 = vxor.u32 2147483648, %v9057_v34  ;;  %v6736_v45 = vor.u32 %v6735_v63, %v6734_v10  ;;  %v6739_v13 = vshll.u32 %v6738_v39, 23  ;;  %vm14290_vm3 = vcmp.le.f32.partialorder %v6661_v31, 0.7853982 }
 0x571   : > { %v6450_v6 = vsel %vm6448_vm0, %v6449_v7, %v9057_v34  ;;  %v6618_v19 = vadd.s32 536870912, %v6617_v17  ;;  %v6883_v59 = vand.u32 31, %v6881_v48  ;;  %v6750_v9 = vsel %vm14290_vm3, 0, %v6748_v14 }
 0x572   : > { %v6447_v20 = vsel %vm6445_vm14, %v9055_v21, %v6446_v36  ;;  %v6740_v32 = vor.u32 4788187, %v6739_v13  ;;  %v6743_v1 = vcvt.s32.f32 %v6736_v45  ;;  %v6877_v26 = vor.u32 8388608, %v6876_v5 }
 0x573   : > { %v6451_v47 = vsel %vm6444_vm2, %v6447_v20, %v6450_v6  ;;  %v14300_v61 = vshrl.u32 %v6618_v19, 30  ;;  %v6884_v31 = vsub.s32 32, %v6883_v59  ;;  %v6882_v58 = vshrl.u32 %v6881_v48, 5 }
 0x574   : > { %v6452_v53 = vsel %vm6441_vm12, nan, %v6451_v47  ;;  %v6741_v23 = vand.u32 2147483647, %v6740_v32  ;;  %v6768_v12 = vand.u32 2139095040, %v14295_v3  ;;  %v6886_v28 = vshll.u32 %v9137_v38, %v6883_v59 }
 0x575   : > { %v7807_v2 = vmul.f32 %v6452_v53, %v6056_v49  ;;  %v6620_v29 = vshll.u32 %v14300_v61, 30  ;;  %v6889_v22 = vshll.u32 %v9138_v40, %v6883_v59  ;;  %v6887_v37 = vshrl.u32 %v9138_v40, %v6884_v31 }
 0x576   : > { %v6744_v18 = vmul.f32 %v6743_v1, %v6741_v23  ;;  %v6890_v8 = vshrl.u32 %v9139_v42, %v6884_v31  ;;  %v6892_v11 = vshll.u32 %v9139_v42, %v6883_v59  ;;  %v6893_v33 = vshrl.u32 %v9140_v44, %v6884_v31 }
 0x577   : > { %7823 = vst [vmem:[%s14041_s28 + $0x10] sm:$0xff] %v7807_v2  ;;  %v14312_v24 = vsub.s32 %v6617_v17, %v6620_v29  ;;  %v6895_v49 = vshll.u32 %v9140_v44, %v6883_v59  ;;  %v6896_v25 = vshrl.u32 %v9141_v46, %v6884_v31  ;;  %v6754_v55 = vadd.s32 3, %v6750_v9 }
 0x578   : > { %v6745_v41 = vxor.u32 2147483648, %v6744_v18  ;;  %v14317_v27 = vshll.u32 %v6877_v26, 8  ;;  %v6769_v56 = vshrl.u32 %v6768_v12, 23  ;;  %v6885_v10 = vshrl.u32 %v9137_v38, %v6884_v31 }
 0x579   : > { %v6623_v35 = vsub.s32 0, %v14312_v24  ;;  %v6888_v43 = vor.u32 %v6887_v37, %v6886_v28  ;;  %v6891_v51 = vor.u32 %v6890_v8, %v6889_v22  ;;  %v6897_v21 = vor.u32 %v6896_v25, %v6895_v49 }
 0x57a   : > { %v6746_v14 = vsel %vm6663_vm13, %v6745_v41, %v6744_v18  ;;  %v6898_v63 = vshll.u32 %v9141_v46, %v6883_v59  ;;  %v6899_v39 = vshrl.u32 %v9142_v54, %v6884_v31  ;;  %v6894_v7 = vor.u32 %v6893_v33, %v6892_v11 }
 0x57b   : > { %v6749_v62 = vsel %vm14290_vm3, %v14062_v16, %v6746_v14  ;;  %v8218_v34 = vmin.u32 %v6623_v35, %v14312_v24  ;;  %vm6901_vm4 = vcmp.lt.s32.totalorder %v6882_v58, 1  ;;  %vm6903_vm5 = vcmp.lt.s32.totalorder %v6882_v58, 3 }
 0x57c   : > { %9058 = vcosq.f32 %v6749_v62  ;;  %v6900_v17 = vor.u32 %v6899_v39, %v6898_v63  ;;  %vm6904_vm7 = vcmp.lt.s32.totalorder %v6882_v58, 4  ;;  %vm6902_vm6 = vcmp.lt.s32.totalorder %v6882_v58, 2 }
 0x57d   : > { %9060 = vsinq.f32 %v6749_v62  ;;  %v6625_v5 = vclz %v8218_v34  ;;  %v8225_v48 = vadd.s32 4294967169, %v6769_v56  ;;  %v6905_v36 = vsel %vm6901_vm4, %v6885_v10, %v6888_v43 }
 0x57e   : > { %v6906_v45 = vsel %vm6904_vm7, %v6894_v7, 2102212464  ;;  %v6909_v13 = vsel %vm6901_vm4, %v6888_v43, %v6891_v51  ;;  %v6910_v6 = vsel %vm6904_vm7, %v6897_v21, 920167782  ;;  %v6913_v20 = vsel %vm6901_vm4, %v6891_v51, %v6894_v7 }
 0x57f   : > { %v8219_v0 = vadd.s32 4294967294, %v6625_v5  ;;  %v6907_v19 = vsel %vm6903_vm5, %v6891_v51, %v6906_v45  ;;  %v6911_v59 = vsel %vm6903_vm5, %v6894_v7, %v6910_v6  ;;  %v6613_v32 = vadd.s32 %v14260_v60, %v14271_v57 }
 0x580   : > { %v6912_v1 = vsel %vm6902_vm6, %v6909_v13, %v6911_v59  ;;  %v6914_v9 = vsel %vm6904_vm7, %v6900_v17, 1326507024  ;;  %v6765_v47 = vand.u32 2147483647, %v14295_v3  ;;  %v6643_v12 = vsub.s32 4, %v14300_v61 }
 0x581   : > { %vm8220_vm8 = vcmp.lt.s32.totalorder %v8219_v0, 0  ;;  %v6915_v26 = vsel %vm6903_vm5, %v6897_v21, %v6914_v9  ;;  %v14340_v31 = vmul.u32.u64.low %v14317_v27, %v6912_v1  ;;  %v14341_v53 = vmul.u32.u64.high %v14317_v27, %v6912_v1, %v14340_v31 }
 0x582   : > { %v6628_v23 = vsel %vm8220_vm8, 0, %v8219_v0  ;;  %v6908_v2 = vsel %vm6902_vm6, %v6905_v36, %v6907_v19  ;;  %v6916_v60 = vsel %vm6902_vm6, %v6913_v20, %v6915_v26  ;;  %v6775_v22 = vadd.s32 1, %v8225_v48 }
 0x583   : > { %v6629_v57 = vsub.s32 32, %v6628_v23  ;;  %v6630_v29 = vshll.u32 %v14312_v24, %v6628_v23  ;;  %v6633_v28 = vsub.s32 4294967266, %v6628_v23  ;;  %vm6753_vm10 = vweird.f32 %v14062_v16 }
 0x584   : > { %v6755_v18 = vand.u32 3, %v6754_v55  ;;  %vm6559_vm11 = vcmp.lt.s32.totalorder %v14122_v50, 0  ;;  %v14351_v37 = vmul.u32.u64.low %v14317_v27, %v6916_v60  ;;  %v14352_v8 = vmul.u32.u64.high %v14317_v27, %v6916_v60, %v14351_v37 }
 0x585   : > { %v6631_v11 = vshrl.u32 %v6613_v32, %v6629_v57  ;;  %v6634_v33 = vadd.s32 127, %v6633_v28  ;;  %v6927_v49 = vadd.s32 1, %v14341_v53  ;;  %vm6776_vm12 = vcmp.gt.s32.totalorder %v6775_v22, 0  ;;  %v6065_v37 = vpop.f32.mrf.mxu0 }
 0x586   : > { %vm14357_vm13 = vcmp.le.f32.partialorder %v6557_v30, 0.7853982  ;;  %v6924_v24 = vmul.u32 %v14317_v27, %v6908_v2  ;;  %v14364_v25 = vand.u32 8388607, %v6765_v47  ;;  %v6777_v41 = vsel %vm6776_vm12, %v6775_v22, 0 }
 0x587   : > { %v6632_v55 = vor.u32 %v6631_v11, %v6630_v29  ;;  %v6635_v56 = vshll.u32 %v6634_v33, 23  ;;  %v6644_v35 = vsel %vm6559_vm11, %v6643_v12, %v14300_v61  ;;  %v6779_v10 = vand.u32 31, %v6777_v41 }
 0x588   : > { %vm6756_vm9 = vcmp.lt.s32.totalorder %v6755_v18, 2  ;;  %vm6757_vm14 = vcmp.eq.s32.totalorder %v6755_v18, 0  ;;  %vm6760_vm0 = vcmp.eq.s32.totalorder %v6755_v18, 2  ;;  %vm6926_vm15 = vc.u32 %v14352_v8, %v14340_v31 }
 0x589   : > { %v9059_v30 = vpop.eup %9058  ;;  %v6636_v27 = vor.u32 4788187, %v6635_v56  ;;  %v6639_v43 = vcvt.s32.f32 %v6632_v55  ;;  %v6928_v51 = vsel %vm6926_vm15, %v6927_v49, %v14341_v53  ;;  %v6780_v14 = vsub.s32 32, %v6779_v10 }
 0x58a   : > { %v9061_v21 = vpop.eup %9060  ;;  %v6761_v63 = vxor.u32 2147483648, %v9059_v30  ;;  %v6646_v39 = vsel %vm14357_vm13, 0, %v6644_v35  ;;  %v6929_v62 = vadd.s32 %v6928_v51, %v6924_v24  ;;  %v6773_v61 = vor.u32 8388608, %v14364_v25  ;;  %v14408_v25 = vld [vmem:[%s9349_s14 + $0x1c8] sm:$0xff] }
 0x58b   : > { %v6758_v34 = vxor.u32 2147483648, %v9061_v21  ;;  %v6637_v7 = vand.u32 2147483647, %v6636_v27  ;;  %v14375_v17 = vshrl.u32 %v6777_v41, 5  ;;  %v6782_v5 = vshll.u32 %v9137_v38, %v6779_v10 }
 0x58c   : > { %v6762_v48 = vsel %vm6760_vm0, %v6761_v63, %v9061_v21  ;;  %v6930_v36 = vadd.s32 536870912, %v6929_v62  ;;  %v6783_v45 = vshrl.u32 %v9138_v40, %v6780_v14  ;;  %v6785_v13 = vshll.u32 %v9138_v40, %v6779_v10 }
 0x58d   : > { %v6759_v6 = vsel %vm6757_vm14, %v9059_v30, %v6758_v34  ;;  %v6640_v0 = vmul.f32 %v6639_v43, %v6637_v7  ;;  %v6786_v19 = vshrl.u32 %v9139_v42, %v6780_v14  ;;  %v6788_v59 = vshll.u32 %v9139_v42, %v6779_v10 }
 0x58e   : > { %v6763_v20 = vsel %vm6756_vm9, %v6759_v6, %v6762_v48  ;;  %v14385_v32 = vshrl.u32 %v6930_v36, 30  ;;  %v6789_v1 = vshrl.u32 %v9140_v44, %v6780_v14  ;;  %v6791_v9 = vshll.u32 %v9140_v44, %v6779_v10 }
 0x58f   : > { %v6764_v26 = vsel %vm6753_vm10, nan, %v6763_v20  ;;  %v6641_v53 = vxor.u32 2147483648, %v6640_v0  ;;  %v6781_v23 = vshrl.u32 %v9137_v38, %v6780_v14  ;;  %v6792_v12 = vshrl.u32 %v9141_v46, %v6780_v14 }
 0x590   : > { %v7810_v2 = vmul.f32 %v6764_v26, %v14256_v4  ;;  %v6932_v60 = vshll.u32 %v14385_v32, 30  ;;  %v6784_v57 = vor.u32 %v6783_v45, %v6782_v5  ;;  %v6794_v29 = vshll.u32 %v9141_v46, %v6779_v10  ;;  %v8519_v10 = vpop.f32.mrf.mxu0 }
 0x591   : > { %v6642_v28 = vsel %vm6559_vm11, %v6641_v53, %v6640_v0  ;;  %v6787_v22 = vor.u32 %v6786_v19, %v6785_v13  ;;  %v6793_v18 = vor.u32 %v6792_v12, %v6791_v9  ;;  %v6795_v16 = vshrl.u32 %v9142_v54, %v6780_v14 }
 0x592   : > { %7826 = vst [vmem:[%s14041_s28 + $0x28] sm:$0xff] %v7810_v2  ;;  %v6645_v11 = vsel %vm14357_vm13, %v14122_v50, %v6642_v28  ;;  %v14403_v4 = vsub.s32 %v6929_v62, %v6932_v60  ;;  %v6790_v33 = vor.u32 %v6789_v1, %v6788_v59  ;;  %vm6797_vm1 = vcmp.lt.s32.totalorder %v14375_v17, 1  ;;  %v14430_v62 = vld [vmem:[%s15159_s3 + $0x2] ss:$0 sm:$0xff] }
 0x593   : > { %9062 = vcosq.f32 %v6645_v11  ;;  %v6650_v49 = vadd.s32 3, %v6646_v39  ;;  %v6796_v24 = vor.u32 %v6795_v16, %v6794_v29  ;;  %vm6799_vm2 = vcmp.lt.s32.totalorder %v14375_v17, 3 }
 0x594   : > { %9064 = vsinq.f32 %v6645_v11  ;;  %v6935_v41 = vsub.s32 0, %v14403_v4  ;;  %vm6798_vm3 = vcmp.lt.s32.totalorder %v14375_v17, 2  ;;  %vm6800_vm4 = vcmp.lt.s32.totalorder %v14375_v17, 4 }
 0x595   : > { %v6802_v58 = vsel %vm6800_vm4, %v6790_v33, 2102212464  ;;  %v6805_v55 = vsel %vm6797_vm1, %v6784_v57, %v6787_v22  ;;  %v6806_v56 = vsel %vm6800_vm4, %v6793_v18, 920167782  ;;  %v6813_v35 = vshll.u32 %v6773_v61, 8 }
 0x596   : > { %v8230_v30 = vmin.u32 %v6935_v41, %v14403_v4  ;;  %v6801_v27 = vsel %vm6797_vm1, %v6781_v23, %v6784_v57  ;;  %v6807_v43 = vsel %vm6799_vm2, %v6790_v33, %v6806_v56  ;;  %v7080_v51 = vand.u32 2139095040, %v14408_v25 }
 0x597   : > { %v6803_v14 = vsel %vm6799_vm2, %v6787_v22, %v6802_v58  ;;  %v6808_v21 = vsel %vm6798_vm3, %v6805_v55, %v6807_v43  ;;  %v6809_v63 = vsel %vm6797_vm1, %v6787_v22, %v6790_v33  ;;  %v6810_v39 = vsel %vm6800_vm4, %v6796_v24, 1326507024 }
 0x598   : > { %v6066_v61 = vadd.f32 %v14430_v62, %v6065_v37  ;;  %v6937_v34 = vclz %v8230_v30  ;;  %v14434_v7 = vadd.f32 %v14430_v62, %v8519_v10  ;;  %v6811_v5 = vsel %vm6799_vm2, %v6793_v18, %v6810_v39 }
 0x599   : > { %v14438_v48 = vmul.u32.u64.low %v6813_v35, %v6808_v21  ;;  %v14439_v36 = vmul.u32.u64.high %v6813_v35, %v6808_v21, %v14438_v48  ;;  %v6804_v13 = vsel %vm6798_vm3, %v6801_v27, %v6803_v14  ;;  %v6812_v6 = vsel %vm6798_vm3, %v6809_v63, %v6811_v5 }
 0x59a   : > { %v8231_v45 = vadd.s32 4294967294, %v6937_v34  ;;  %v7081_v0 = vshrl.u32 %v7080_v51, 23  ;;  %vm6649_vm5 = vweird.f32 %v14122_v50  ;;  %v6651_v19 = vand.u32 3, %v6650_v49 }
 0x59b   : > { %v6955_v59 = vsub.s32 4, %v14385_v32  ;;  %v14448_v20 = vmul.u32.u64.low %v6813_v35, %v6812_v6  ;;  %v14449_v1 = vmul.u32.u64.high %v6813_v35, %v6812_v6, %v14448_v20  ;;  %vm6871_vm7 = vcmp.lt.s32.totalorder %v14235_v52, 0 }
 0x59c   : > { %v6925_v9 = vadd.s32 %v14340_v31, %v14352_v8  ;;  %vm8232_vm6 = vcmp.lt.s32.totalorder %v8231_v45, 0  ;;  %v8237_v26 = vadd.s32 4294967169, %v7081_v0  ;;  %v6820_v23 = vmul.u32 %v6813_v35, %v6804_v13  ;;  %v14473_v35 = vld [vmem:[%s9349_s14 + $0x1c0] sm:$0xff] }
 0x59d   : > { %v6940_v53 = vsel %vm8232_vm6, 0, %v8231_v45  ;;  %v6823_v17 = vadd.s32 1, %v14439_v36  ;;  %v7077_v12 = vand.u32 2147483647, %v14408_v25  ;;  %vm6653_vm8 = vcmp.eq.s32.totalorder %v6651_v19, 0 }
 0x59e   : > { %v6941_v2 = vsub.s32 32, %v6940_v53  ;;  %v6942_v60 = vshll.u32 %v14403_v4, %v6940_v53  ;;  %v6945_v57 = vsub.s32 4294967266, %v6940_v53  ;;  %v7087_v29 = vadd.s32 1, %v8237_v26 }
 0x59f   : > { %vm6656_vm10 = vcmp.eq.s32.totalorder %v6651_v19, 2  ;;  %v6956_v28 = vsel %vm6871_vm7, %v6955_v59, %v14385_v32  ;;  %vm6822_vm11 = vc.u32 %v14449_v1, %v14438_v48  ;;  %v7084_v4 = vand.u32 8388607, %v7077_v12 }
 0x5a0   : > { %v9063_v31 = vpop.eup %9062  ;;  %v6943_v8 = vshrl.u32 %v6925_v9, %v6941_v2  ;;  %v6946_v22 = vadd.s32 127, %v6945_v57  ;;  %v6824_v18 = vsel %vm6822_vm11, %v6823_v17, %v14439_v36  ;;  %vm7088_vm12 = vcmp.gt.s32.totalorder %v7087_v29, 0 }
 0x5a1   : > { %v9065_v16 = vpop.eup %9064  ;;  %v6657_v37 = vxor.u32 2147483648, %v9063_v31  ;;  %v6825_v11 = vadd.s32 %v6824_v18, %v6820_v23  ;;  %v7089_v33 = vsel %vm7088_vm12, %v7087_v29, 0  ;;  %vm6652_vm13 = vcmp.lt.s32.totalorder %v6651_v19, 2 }
 0x5a2   : > { %v6654_v49 = vxor.u32 2147483648, %v9065_v16  ;;  %v6944_v32 = vor.u32 %v6943_v8, %v6942_v60  ;;  %v6947_v24 = vshll.u32 %v6946_v22, 23  ;;  %vm14468_vm9 = vcmp.le.f32.partialorder %v6869_v15, 0.7853982 }
 0x5a3   : > { %v6658_v41 = vsel %vm6656_vm10, %v6657_v37, %v9065_v16  ;;  %v6826_v55 = vadd.s32 536870912, %v6825_v11  ;;  %v7091_v56 = vand.u32 31, %v7089_v33  ;;  %v6958_v43 = vsel %vm14468_vm9, 0, %v6956_v28 }
 0x5a4   : > { %v6655_v10 = vsel %vm6653_vm8, %v9063_v31, %v6654_v49  ;;  %v6948_v30 = vor.u32 4788187, %v6947_v24  ;;  %v6951_v27 = vcvt.s32.f32 %v6944_v32  ;;  %v7085_v21 = vor.u32 8388608, %v7084_v4 }
 0x5a5   : > { %v6659_v51 = vsel %vm6652_vm13, %v6655_v10, %v6658_v41  ;;  %v14478_v14 = vshrl.u32 %v6826_v55, 30  ;;  %v7092_v15 = vsub.s32 32, %v7091_v56  ;;  %v7090_v34 = vshrl.u32 %v7089_v33, 5 }
 0x5a6   : > { %v6660_v63 = vsel %vm6649_vm5, nan, %v6659_v51  ;;  %v6949_v39 = vand.u32 2147483647, %v6948_v30  ;;  %v6976_v5 = vand.u32 2139095040, %v14473_v35  ;;  %v7094_v13 = vshll.u32 %v9137_v38, %v7091_v56 }
 0x5a7   : > { %v7809_v36 = vmul.f32 %v6660_v63, %v6066_v61  ;;  %v6828_v45 = vshll.u32 %v14478_v14, 30  ;;  %v7097_v6 = vshll.u32 %v9138_v40, %v7091_v56  ;;  %v7095_v19 = vshrl.u32 %v9138_v40, %v7092_v15 }
 0x5a8   : > { %v6952_v0 = vmul.f32 %v6951_v27, %v6949_v39  ;;  %v7098_v59 = vshrl.u32 %v9139_v42, %v7092_v15  ;;  %v7100_v20 = vshll.u32 %v9139_v42, %v7091_v56  ;;  %v7101_v9 = vshrl.u32 %v9140_v44, %v7092_v15 }
 0x5a9   : > { %7825 = vst [vmem:[%s14041_s28 + $0x20] sm:$0xff] %v7809_v36  ;;  %v14490_v50 = vsub.s32 %v6825_v11, %v6828_v45  ;;  %v7103_v61 = vshll.u32 %v9140_v44, %v7091_v56  ;;  %v7104_v26 = vshrl.u32 %v9141_v46, %v7092_v15  ;;  %v6962_v23 = vadd.s32 3, %v6958_v43 }
 0x5aa   : > { %v6953_v53 = vxor.u32 2147483648, %v6952_v0  ;;  %v14495_v17 = vshll.u32 %v7085_v21, 8  ;;  %v6977_v2 = vshrl.u32 %v6976_v5, 23  ;;  %v7093_v57 = vshrl.u32 %v9137_v38, %v7092_v15 }
 0x5ab   : > { %v6831_v60 = vsub.s32 0, %v14490_v50  ;;  %v7096_v29 = vor.u32 %v7095_v19, %v7094_v13  ;;  %v7099_v28 = vor.u32 %v7098_v59, %v7097_v6  ;;  %v7105_v8 = vor.u32 %v7104_v26, %v7103_v61 }
 0x5ac   : > { %v6954_v31 = vsel %vm6871_vm7, %v6953_v53, %v6952_v0  ;;  %v7106_v22 = vshll.u32 %v9141_v46, %v7091_v56  ;;  %v7107_v18 = vshrl.u32 %v9142_v54, %v7092_v15  ;;  %v7102_v11 = vor.u32 %v7101_v9, %v7100_v20 }
 0x5ad   : > { %v6957_v16 = vsel %vm14468_vm9, %v14235_v52, %v6954_v31  ;;  %v8226_v37 = vmin.u32 %v6831_v60, %v14490_v50  ;;  %vm7109_vm14 = vcmp.lt.s32.totalorder %v7090_v34, 1  ;;  %vm7111_vm0 = vcmp.lt.s32.totalorder %v7090_v34, 3 }
 0x5ae   : > { %9066 = vcosq.f32 %v6957_v16  ;;  %v7108_v4 = vor.u32 %v7107_v18, %v7106_v22  ;;  %vm7112_vm15 = vcmp.lt.s32.totalorder %v7090_v34, 4  ;;  %vm7110_vm1 = vcmp.lt.s32.totalorder %v7090_v34, 2  ;;  %v6075_v34 = vpop.f32.mrf.mxu0 }
 0x5af   : > { %9068 = vsinq.f32 %v6957_v16  ;;  %v6833_v33 = vclz %v8226_v37  ;;  %v8233_v49 = vadd.s32 4294967169, %v6977_v2  ;;  %v7113_v32 = vsel %vm7109_vm14, %v7093_v57, %v7096_v29 }
 0x5b0   : > { %v7114_v24 = vsel %vm7112_vm15, %v7102_v11, 2102212464  ;;  %v7117_v41 = vsel %vm7109_vm14, %v7096_v29, %v7099_v28  ;;  %v7118_v55 = vsel %vm7112_vm15, %v7105_v8, 920167782  ;;  %v7121_v30 = vsel %vm7109_vm14, %v7099_v28, %v7102_v11 }
 0x5b1   : > { %v8227_v58 = vadd.s32 4294967294, %v6833_v33  ;;  %v7115_v56 = vsel %vm7111_vm0, %v7099_v28, %v7114_v24  ;;  %v7119_v10 = vsel %vm7111_vm0, %v7102_v11, %v7118_v55  ;;  %v6821_v27 = vadd.s32 %v14438_v48, %v14449_v1 }
 0x5b2   : > { %v7120_v43 = vsel %vm7110_vm1, %v7117_v41, %v7119_v10  ;;  %v7122_v51 = vsel %vm7112_vm15, %v7108_v4, 1326507024  ;;  %v6973_v21 = vand.u32 2147483647, %v14473_v35  ;;  %v6851_v36 = vsub.s32 4, %v14478_v14 }
 0x5b3   : > { %vm8228_vm2 = vcmp.lt.s32.totalorder %v8227_v58, 0  ;;  %v7123_v15 = vsel %vm7111_vm0, %v7105_v8, %v7122_v51  ;;  %v14518_v63 = vmul.u32.u64.low %v14495_v17, %v7120_v43  ;;  %v14519_v39 = vmul.u32.u64.high %v14495_v17, %v7120_v43, %v14518_v63 }
 0x5b4   : > { %v6836_v5 = vsel %vm8228_vm2, 0, %v8227_v58  ;;  %v7116_v45 = vsel %vm7110_vm1, %v7113_v32, %v7115_v56  ;;  %v7124_v48 = vsel %vm7110_vm1, %v7121_v30, %v7123_v15  ;;  %v6983_v0 = vadd.s32 1, %v8233_v49 }
 0x5b5   : > { %v6837_v1 = vsub.s32 32, %v6836_v5  ;;  %v6838_v13 = vshll.u32 %v14490_v50, %v6836_v5  ;;  %v6841_v6 = vsub.s32 4294967266, %v6836_v5  ;;  %vm6961_vm3 = vweird.f32 %v14235_v52 }
 0x5b6   : > { %v6963_v19 = vand.u32 3, %v6962_v23  ;;  %vm6767_vm4 = vcmp.lt.s32.totalorder %v14295_v3, 0  ;;  %v14529_v59 = vmul.u32.u64.low %v14495_v17, %v7124_v48  ;;  %v14530_v20 = vmul.u32.u64.high %v14495_v17, %v7124_v48, %v14529_v59 }
 0x5b7   : > { %v6839_v9 = vshrl.u32 %v6821_v27, %v6837_v1  ;;  %v6842_v61 = vadd.s32 127, %v6841_v6  ;;  %v7135_v26 = vadd.s32 1, %v14519_v39  ;;  %vm6984_vm5 = vcmp.gt.s32.totalorder %v6983_v0, 0 }
 0x5b8   : > { %vm14535_vm7 = vcmp.le.f32.partialorder %v6765_v47, 0.7853982  ;;  %v7132_v50 = vmul.u32 %v14495_v17, %v7116_v45  ;;  %v14542_v53 = vand.u32 8388607, %v6973_v21  ;;  %v6985_v23 = vsel %vm6984_vm5, %v6983_v0, 0 }
 0x5b9   : > { %v6840_v2 = vor.u32 %v6839_v9, %v6838_v13  ;;  %v6843_v60 = vshll.u32 %v6842_v61, 23  ;;  %v6852_v57 = vsel %vm6767_vm4, %v6851_v36, %v14478_v14  ;;  %v6987_v29 = vand.u32 31, %v6985_v23 }
 0x5ba   : > { %vm6964_vm6 = vcmp.lt.s32.totalorder %v6963_v19, 2  ;;  %vm6965_vm8 = vcmp.eq.s32.totalorder %v6963_v19, 0  ;;  %vm6968_vm10 = vcmp.eq.s32.totalorder %v6963_v19, 2  ;;  %vm7134_vm11 = vc.u32 %v14530_v20, %v14518_v63 }
 0x5bb   : > { %v9067_v47 = vpop.eup %9066  ;;  %v6844_v17 = vor.u32 4788187, %v6843_v60  ;;  %v6847_v28 = vcvt.s32.f32 %v6840_v2  ;;  %v7136_v31 = vsel %vm7134_vm11, %v7135_v26, %v14519_v39  ;;  %v6988_v8 = vsub.s32 32, %v6987_v29 }
 0x5bc   : > { %v9069_v22 = vpop.eup %9068  ;;  %v6969_v18 = vxor.u32 2147483648, %v9067_v47  ;;  %v6854_v16 = vsel %vm14535_vm7, 0, %v6852_v57  ;;  %v7137_v37 = vadd.s32 %v7136_v31, %v7132_v50  ;;  %v6981_v14 = vor.u32 8388608, %v14542_v53  ;;  %v14586_v53 = vld [vmem:[%s9349_s14 + $0x1d8] sm:$0xff] }
 0x5bd   : > { %v6966_v11 = vxor.u32 2147483648, %v9069_v22  ;;  %v6845_v4 = vand.u32 2147483647, %v6844_v17  ;;  %v14553_v33 = vshrl.u32 %v6985_v23, 5  ;;  %v6990_v49 = vshll.u32 %v9137_v38, %v6987_v29 }
 0x5be   : > { %v6970_v32 = vsel %vm6968_vm10, %v6969_v18, %v9069_v22  ;;  %v7138_v24 = vadd.s32 536870912, %v7137_v37  ;;  %v6991_v41 = vshrl.u32 %v9138_v40, %v6988_v8  ;;  %v6993_v55 = vshll.u32 %v9138_v40, %v6987_v29 }
 0x5bf   : > { %v6967_v58 = vsel %vm6965_vm8, %v9067_v47, %v6966_v11  ;;  %v6848_v56 = vmul.f32 %v6847_v28, %v6845_v4  ;;  %v6994_v10 = vshrl.u32 %v9139_v42, %v6988_v8  ;;  %v6996_v30 = vshll.u32 %v9139_v42, %v6987_v29  ;;  %v8522_v47 = vpop.f32.mrf.mxu1 }
 0x5c0   : > { %v6971_v27 = vsel %vm6964_vm6, %v6967_v58, %v6970_v32  ;;  %v14563_v43 = vshrl.u32 %v7138_v24, 30  ;;  %v6997_v51 = vshrl.u32 %v9140_v44, %v6988_v8  ;;  %v6999_v15 = vshll.u32 %v9140_v44, %v6987_v29 }
 0x5c1   : > { %v6972_v39 = vsel %vm6961_vm3, nan, %v6971_v27  ;;  %v6849_v5 = vxor.u32 2147483648, %v6848_v56  ;;  %v6989_v36 = vshrl.u32 %v9137_v38, %v6988_v8  ;;  %v7000_v45 = vshrl.u32 %v9141_v46, %v6988_v8 }
 0x5c2   : > { %v7812_v48 = vmul.f32 %v6972_v39, %v14434_v7  ;;  %v7140_v1 = vshll.u32 %v14563_v43, 30  ;;  %v6992_v13 = vor.u32 %v6991_v41, %v6990_v49  ;;  %v7002_v6 = vshll.u32 %v9141_v46, %v6987_v29 }
 0x5c3   : > { %v6850_v0 = vsel %vm6767_vm4, %v6849_v5, %v6848_v56  ;;  %v6995_v19 = vor.u32 %v6994_v10, %v6993_v55  ;;  %v7001_v59 = vor.u32 %v7000_v45, %v6999_v15  ;;  %v7003_v52 = vshrl.u32 %v9142_v54, %v6988_v8 }
 0x5c4   : > { %7828 = vst [vmem:[%s14041_s28 + $0x38] sm:$0xff] %v7812_v48  ;;  %v6853_v9 = vsel %vm14535_vm7, %v14295_v3, %v6850_v0  ;;  %v14581_v61 = vsub.s32 %v7137_v37, %v7140_v1  ;;  %v6998_v7 = vor.u32 %v6997_v51, %v6996_v30  ;;  %vm7005_vm12 = vcmp.lt.s32.totalorder %v14553_v33, 1 }
 0x5c5   : > { %9070 = vcosq.f32 %v6853_v9  ;;  %v6858_v26 = vadd.s32 3, %v6854_v16  ;;  %v7004_v50 = vor.u32 %v7003_v52, %v7002_v6  ;;  %vm7007_vm13 = vcmp.lt.s32.totalorder %v14553_v33, 3 }
 0x5c6   : > { %9072 = vsinq.f32 %v6853_v9  ;;  %v7143_v23 = vsub.s32 0, %v14581_v61  ;;  %vm7006_vm9 = vcmp.lt.s32.totalorder %v14553_v33, 2  ;;  %vm7008_vm14 = vcmp.lt.s32.totalorder %v14553_v33, 4 }
 0x5c7   : > { %v7010_v2 = vsel %vm7008_vm14, %v6998_v7, 2102212464  ;;  %v7013_v60 = vsel %vm7005_vm12, %v6992_v13, %v6995_v19  ;;  %v7014_v57 = vsel %vm7008_vm14, %v7001_v59, 920167782  ;;  %v7021_v29 = vshll.u32 %v6981_v14, 8 }
 0x5c8   : > { %v8238_v17 = vmin.u32 %v7143_v23, %v14581_v61  ;;  %v7009_v28 = vsel %vm7005_vm12, %v6989_v36, %v6992_v13  ;;  %v7015_v31 = vsel %vm7007_vm13, %v6998_v7, %v7014_v57  ;;  %v7288_v8 = vand.u32 2139095040, %v14586_v53 }
 0x5c9   : > { %v7011_v22 = vsel %vm7007_vm13, %v6995_v19, %v7010_v2  ;;  %v7016_v18 = vsel %vm7006_vm9, %v7013_v60, %v7015_v31  ;;  %v7017_v16 = vsel %vm7005_vm12, %v6995_v19, %v6998_v7  ;;  %v7018_v37 = vsel %vm7008_vm14, %v7004_v50, 1326507024 }
 0x5ca   : > { %v6076_v14 = vadd.f32 %v14430_v62, %v6075_v34  ;;  %v7145_v11 = vclz %v8238_v17  ;;  %v14607_v4 = vadd.f32 %v14430_v62, %v8522_v47  ;;  %v7019_v49 = vsel %vm7007_vm13, %v7001_v59, %v7018_v37 }
 0x5cb   : > { %v14611_v32 = vmul.u32.u64.low %v7021_v29, %v7016_v18  ;;  %v14612_v24 = vmul.u32.u64.high %v7021_v29, %v7016_v18, %v14611_v32  ;;  %v7012_v55 = vsel %vm7006_vm9, %v7009_v28, %v7011_v22  ;;  %v7020_v58 = vsel %vm7006_vm9, %v7017_v16, %v7019_v49 }
 0x5cc   : > { %v8239_v41 = vadd.s32 4294967294, %v7145_v11  ;;  %v7289_v56 = vshrl.u32 %v7288_v8, 23  ;;  %vm6857_vm0 = vweird.f32 %v14295_v3  ;;  %v6859_v10 = vand.u32 3, %v6858_v26 }
 0x5cd   : > { %v7163_v30 = vsub.s32 4, %v14563_v43  ;;  %v14621_v27 = vmul.u32.u64.low %v7021_v29, %v7020_v58  ;;  %v14622_v51 = vmul.u32.u64.high %v7021_v29, %v7020_v58, %v14621_v27  ;;  %vm7079_vm15 = vcmp.lt.s32.totalorder %v14408_v25, 0 }
 0x5ce   : > { %v7133_v15 = vadd.s32 %v14518_v63, %v14530_v20  ;;  %vm8240_vm1 = vcmp.lt.s32.totalorder %v8239_v41, 0  ;;  %v8245_v39 = vadd.s32 4294967169, %v7289_v56  ;;  %v7028_v36 = vmul.u32 %v7021_v29, %v7012_v55  ;;  %v14646_v29 = vld [vmem:[%s9349_s14 + $0x1d0] sm:$0xff] }
 0x5cf   : > { %v7148_v5 = vsel %vm8240_vm1, 0, %v8239_v41  ;;  %v7031_v33 = vadd.s32 1, %v14612_v24  ;;  %v7285_v45 = vand.u32 2147483647, %v14586_v53  ;;  %vm6861_vm2 = vcmp.eq.s32.totalorder %v6859_v10, 0 }
 0x5d0   : > { %v7149_v48 = vsub.s32 32, %v7148_v5  ;;  %v7150_v1 = vshll.u32 %v14581_v61, %v7148_v5  ;;  %v7153_v13 = vsub.s32 4294967266, %v7148_v5  ;;  %v7295_v6 = vadd.s32 1, %v8245_v39 }
 0x5d1   : > { %vm6864_vm3 = vcmp.eq.s32.totalorder %v6859_v10, 2  ;;  %v7164_v0 = vsel %vm7079_vm15, %v7163_v30, %v14563_v43  ;;  %vm7030_vm4 = vc.u32 %v14622_v51, %v14611_v32  ;;  %v7292_v7 = vand.u32 8388607, %v7285_v45 }
 0x5d2   : > { %v9071_v63 = vpop.eup %9070  ;;  %v7151_v20 = vshrl.u32 %v7133_v15, %v7149_v48  ;;  %v7154_v19 = vadd.s32 127, %v7153_v13  ;;  %v7032_v59 = vsel %vm7030_vm4, %v7031_v33, %v14612_v24  ;;  %vm7296_vm5 = vcmp.gt.s32.totalorder %v7295_v6, 0 }
 0x5d3   : > { %v9073_v52 = vpop.eup %9072  ;;  %v6865_v9 = vxor.u32 2147483648, %v9071_v63  ;;  %v7033_v61 = vadd.s32 %v7032_v59, %v7028_v36  ;;  %v7297_v26 = vsel %vm7296_vm5, %v7295_v6, 0  ;;  %vm6860_vm7 = vcmp.lt.s32.totalorder %v6859_v10, 2 }
 0x5d4   : > { %v6862_v50 = vxor.u32 2147483648, %v9073_v52  ;;  %v7152_v43 = vor.u32 %v7151_v20, %v7150_v1  ;;  %v7155_v23 = vshll.u32 %v7154_v19, 23  ;;  %vm14641_vm6 = vcmp.le.f32.partialorder %v7077_v12, 0.7853982 }
 0x5d5   : > { %v6866_v34 = vsel %vm6864_vm3, %v6865_v9, %v9073_v52  ;;  %v7034_v60 = vadd.s32 536870912, %v7033_v61  ;;  %v7299_v57 = vand.u32 31, %v7297_v26  ;;  %v7166_v31 = vsel %vm14641_vm6, 0, %v7164_v0 }
 0x5d6   : > { %v6863_v47 = vsel %vm6861_vm2, %v9071_v63, %v6862_v50  ;;  %v7156_v17 = vor.u32 4788187, %v7155_v23  ;;  %v7159_v28 = vcvt.s32.f32 %v7152_v43  ;;  %v7293_v18 = vor.u32 8388608, %v7292_v7 }
 0x5d7   : > { %v6867_v8 = vsel %vm6860_vm7, %v6863_v47, %v6866_v34  ;;  %v14651_v22 = vshrl.u32 %v7034_v60, 30  ;;  %v7300_v12 = vsub.s32 32, %v7299_v57  ;;  %v7298_v11 = vshrl.u32 %v7297_v26, 5 }
 0x5d8   : > { %v6868_v16 = vsel %vm6857_vm0, nan, %v6867_v8  ;;  %v7157_v37 = vand.u32 2147483647, %v7156_v17  ;;  %v7184_v49 = vand.u32 2139095040, %v14646_v29  ;;  %v7302_v55 = vshll.u32 %v9137_v38, %v7299_v57 }
 0x5d9   : > { %v7811_v24 = vmul.f32 %v6868_v16, %v6076_v14  ;;  %v7036_v41 = vshll.u32 %v14651_v22, 30  ;;  %v7305_v58 = vshll.u32 %v9138_v40, %v7299_v57  ;;  %v7303_v10 = vshrl.u32 %v9138_v40, %v7300_v12 }
 0x5da   : > { %v7160_v56 = vmul.f32 %v7159_v28, %v7157_v37  ;;  %v7306_v30 = vshrl.u32 %v9139_v42, %v7300_v12  ;;  %v7308_v27 = vshll.u32 %v9139_v42, %v7299_v57  ;;  %v7309_v15 = vshrl.u32 %v9140_v44, %v7300_v12 }
 0x5db   : > { %7827 = vst [vmem:[%s14041_s28 + $0x30] sm:$0xff] %v7811_v24  ;;  %v14663_v3 = vsub.s32 %v7033_v61, %v7036_v41  ;;  %v7311_v14 = vshll.u32 %v9140_v44, %v7299_v57  ;;  %v7312_v39 = vshrl.u32 %v9141_v46, %v7300_v12  ;;  %v7170_v36 = vadd.s32 3, %v7166_v31 }
 0x5dc   : > { %v7161_v5 = vxor.u32 2147483648, %v7160_v56  ;;  %v14668_v33 = vshll.u32 %v7293_v18, 8  ;;  %v7185_v48 = vshrl.u32 %v7184_v49, 23  ;;  %v7301_v13 = vshrl.u32 %v9137_v38, %v7300_v12 }
 0x5dd   : > { %v7039_v1 = vsub.s32 0, %v14663_v3  ;;  %v7304_v6 = vor.u32 %v7303_v10, %v7302_v55  ;;  %v7307_v0 = vor.u32 %v7306_v30, %v7305_v58  ;;  %v7313_v20 = vor.u32 %v7312_v39, %v7311_v14 }
 0x5de   : > { %v7162_v63 = vsel %vm7079_vm15, %v7161_v5, %v7160_v56  ;;  %v7314_v19 = vshll.u32 %v9141_v46, %v7299_v57  ;;  %v7315_v59 = vshrl.u32 %v9142_v54, %v7300_v12  ;;  %v7310_v61 = vor.u32 %v7309_v15, %v7308_v27 }
 0x5df   : > { %v7165_v52 = vsel %vm14641_vm6, %v14408_v25, %v7162_v63  ;;  %v8234_v9 = vmin.u32 %v7039_v1, %v14663_v3  ;;  %vm7317_vm8 = vcmp.lt.s32.totalorder %v7298_v11, 1  ;;  %vm7319_vm10 = vcmp.lt.s32.totalorder %v7298_v11, 3 }
 0x5e0   : > { %9074 = vcosq.f32 %v7165_v52  ;;  %v7316_v7 = vor.u32 %v7315_v59, %v7314_v19  ;;  %vm7320_vm11 = vcmp.lt.s32.totalorder %v7298_v11, 4  ;;  %vm7318_vm12 = vcmp.lt.s32.totalorder %v7298_v11, 2 }
 0x5e1   : > { %9076 = vsinq.f32 %v7165_v52  ;;  %v7041_v26 = vclz %v8234_v9  ;;  %v8241_v50 = vadd.s32 4294967169, %v7185_v48  ;;  %v7321_v43 = vsel %vm7317_vm8, %v7301_v13, %v7304_v6 }
 0x5e2   : > { %v7322_v23 = vsel %vm7320_vm11, %v7310_v61, 2102212464  ;;  %v7325_v34 = vsel %vm7317_vm8, %v7304_v6, %v7307_v0  ;;  %v7326_v60 = vsel %vm7320_vm11, %v7313_v20, 920167782  ;;  %v7329_v17 = vsel %vm7317_vm8, %v7307_v0, %v7310_v61 }
 0x5e3   : > { %v8235_v2 = vadd.s32 4294967294, %v7041_v26  ;;  %v7323_v57 = vsel %vm7319_vm10, %v7307_v0, %v7322_v23  ;;  %v7327_v47 = vsel %vm7319_vm10, %v7310_v61, %v7326_v60  ;;  %v7029_v28 = vadd.s32 %v14611_v32, %v14622_v51 }
 0x5e4   : > { %v7328_v31 = vsel %vm7318_vm12, %v7325_v34, %v7327_v47  ;;  %v7330_v8 = vsel %vm7320_vm11, %v7316_v7, 1326507024  ;;  %v7181_v18 = vand.u32 2147483647, %v14646_v29  ;;  %v7059_v24 = vsub.s32 4, %v14651_v22 }
 0x5e5   : > { %vm8236_vm13 = vcmp.lt.s32.totalorder %v8235_v2, 0  ;;  %v7331_v12 = vsel %vm7319_vm10, %v7313_v20, %v7330_v8  ;;  %v14691_v16 = vmul.u32.u64.low %v14668_v33, %v7328_v31  ;;  %v14692_v37 = vmul.u32.u64.high %v14668_v33, %v7328_v31, %v14691_v16 }
 0x5e6   : > { %v7044_v49 = vsel %vm8236_vm13, 0, %v8235_v2  ;;  %v7324_v41 = vsel %vm7318_vm12, %v7321_v43, %v7323_v57  ;;  %v7332_v32 = vsel %vm7318_vm12, %v7329_v17, %v7331_v12  ;;  %v7191_v56 = vadd.s32 1, %v8241_v50 }
 0x5e7   : > { %v7045_v51 = vsub.s32 32, %v7044_v49  ;;  %v7046_v55 = vshll.u32 %v14663_v3, %v7044_v49  ;;  %v7049_v58 = vsub.s32 4294967266, %v7044_v49  ;;  %vm7169_vm9 = vweird.f32 %v14408_v25 }
 0x5e8   : > { %v7171_v10 = vand.u32 3, %v7170_v36  ;;  %vm6975_vm14 = vcmp.lt.s32.totalorder %v14473_v35, 0  ;;  %v14702_v30 = vmul.u32.u64.low %v14668_v33, %v7332_v32  ;;  %v14703_v27 = vmul.u32.u64.high %v14668_v33, %v7332_v32, %v14702_v30 }
 0x5e9   : > { %v7047_v15 = vshrl.u32 %v7029_v28, %v7045_v51  ;;  %v7050_v14 = vadd.s32 127, %v7049_v58  ;;  %v7343_v39 = vadd.s32 1, %v14692_v37  ;;  %vm7192_vm0 = vcmp.gt.s32.totalorder %v7191_v56, 0 }
 0x5ea   : > { %vm14708_vm15 = vcmp.le.f32.partialorder %v6973_v21, 0.7853982  ;;  %v7340_v3 = vmul.u32 %v14668_v33, %v7324_v41  ;;  %v14715_v5 = vand.u32 8388607, %v7181_v18  ;;  %v7193_v36 = vsel %vm7192_vm0, %v7191_v56, 0 }
 0x5eb   : > { %v7048_v48 = vor.u32 %v7047_v15, %v7046_v55  ;;  %v7051_v1 = vshll.u32 %v7050_v14, 23  ;;  %v7060_v13 = vsel %vm6975_vm14, %v7059_v24, %v14651_v22  ;;  %v7195_v6 = vand.u32 31, %v7193_v36  ;;  %v6085_v15 = vpop.f32.mrf.mxu1 }
 0x5ec   : > { %vm7172_vm1 = vcmp.lt.s32.totalorder %v7171_v10, 2  ;;  %vm7173_vm2 = vcmp.eq.s32.totalorder %v7171_v10, 0  ;;  %vm7176_vm3 = vcmp.eq.s32.totalorder %v7171_v10, 2  ;;  %vm7342_vm4 = vc.u32 %v14703_v27, %v14691_v16 }
 0x5ed   : > { %v9075_v21 = vpop.eup %9074  ;;  %v7052_v33 = vor.u32 4788187, %v7051_v1  ;;  %v7055_v0 = vcvt.s32.f32 %v7048_v48  ;;  %v7344_v63 = vsel %vm7342_vm4, %v7343_v39, %v14692_v37  ;;  %v7196_v20 = vsub.s32 32, %v7195_v6 }
 0x5ee   : > { %v9077_v19 = vpop.eup %9076  ;;  %v7177_v59 = vxor.u32 2147483648, %v9075_v21  ;;  %v7062_v52 = vsel %vm14708_vm15, 0, %v7060_v13  ;;  %v7345_v9 = vadd.s32 %v7344_v63, %v7340_v3  ;;  %v7189_v22 = vor.u32 8388608, %v14715_v5 }
 0x5ef   : > { %v7174_v61 = vxor.u32 2147483648, %v9077_v19  ;;  %v7053_v7 = vand.u32 2147483647, %v7052_v33  ;;  %v14726_v26 = vshrl.u32 %v7193_v36, 5  ;;  %v7198_v50 = vshll.u32 %v9137_v38, %v7195_v6  ;;  %v14759_v36 = vld [vmem:[%s9349_s14 + $0x1e8] sm:$0xff] }
 0x5f0   : > { %v7178_v43 = vsel %vm7176_vm3, %v7177_v59, %v9077_v19  ;;  %v7346_v23 = vadd.s32 536870912, %v7345_v9  ;;  %v7199_v34 = vshrl.u32 %v9138_v40, %v7196_v20  ;;  %v7201_v60 = vshll.u32 %v9138_v40, %v7195_v6 }
 0x5f1   : > { %v7175_v2 = vsel %vm7173_vm2, %v9075_v21, %v7174_v61  ;;  %v7056_v57 = vmul.f32 %v7055_v0, %v7053_v7  ;;  %v7202_v47 = vshrl.u32 %v9139_v42, %v7196_v20  ;;  %v7204_v17 = vshll.u32 %v9139_v42, %v7195_v6  ;;  %v8525_v21 = vpop.f32.mrf.mxu1 }
 0x5f2   : > { %v7179_v28 = vsel %vm7172_vm1, %v7175_v2, %v7178_v43  ;;  %v14736_v31 = vshrl.u32 %v7346_v23, 30  ;;  %v7205_v8 = vshrl.u32 %v9140_v44, %v7196_v20  ;;  %v7207_v12 = vshll.u32 %v9140_v44, %v7195_v6 }
 0x5f3   : > { %v7180_v37 = vsel %vm7169_vm9, nan, %v7179_v28  ;;  %v7057_v49 = vxor.u32 2147483648, %v7056_v57  ;;  %v7197_v24 = vshrl.u32 %v9137_v38, %v7196_v20  ;;  %v7208_v41 = vshrl.u32 %v9141_v46, %v7196_v20 }
 0x5f4   : > { %v7814_v32 = vmul.f32 %v7180_v37, %v14607_v4  ;;  %v7348_v51 = vshll.u32 %v14736_v31, 30  ;;  %v7200_v55 = vor.u32 %v7199_v34, %v7198_v50  ;;  %v7210_v58 = vshll.u32 %v9141_v46, %v7195_v6 }
 0x5f5   : > { %v7058_v56 = vsel %vm6975_vm14, %v7057_v49, %v7056_v57  ;;  %v7203_v10 = vor.u32 %v7202_v47, %v7201_v60  ;;  %v7209_v30 = vor.u32 %v7208_v41, %v7207_v12  ;;  %v7211_v25 = vshrl.u32 %v9142_v54, %v7196_v20 }
 0x5f6   : > { %7830 = vst [vmem:[%s14041_s28 + $0x48] sm:$0xff] %v7814_v32  ;;  %v7061_v14 = vsel %vm14708_vm15, %v14473_v35, %v7058_v56  ;;  %v14754_v4 = vsub.s32 %v7345_v9, %v7348_v51  ;;  %v7206_v39 = vor.u32 %v7205_v8, %v7204_v17  ;;  %vm7213_vm5 = vcmp.lt.s32.totalorder %v14726_v26, 1 }
 0x5f7   : > { %9078 = vcosq.f32 %v7061_v14  ;;  %v7066_v3 = vadd.s32 3, %v7062_v52  ;;  %v7212_v5 = vor.u32 %v7211_v25, %v7210_v58  ;;  %vm7215_vm7 = vcmp.lt.s32.totalorder %v14726_v26, 3 }
 0x5f8   : > { %9080 = vsinq.f32 %v7061_v14  ;;  %v7351_v48 = vsub.s32 0, %v14754_v4  ;;  %vm7214_vm6 = vcmp.lt.s32.totalorder %v14726_v26, 2  ;;  %vm7216_vm8 = vcmp.lt.s32.totalorder %v14726_v26, 4 }
 0x5f9   : > { %v7218_v11 = vsel %vm7216_vm8, %v7206_v39, 2102212464  ;;  %v7221_v1 = vsel %vm7213_vm5, %v7200_v55, %v7203_v10  ;;  %v7222_v13 = vsel %vm7216_vm8, %v7209_v30, 920167782  ;;  %v7229_v6 = vshll.u32 %v7189_v22, 8 }
 0x5fa   : > { %v8246_v33 = vmin.u32 %v7351_v48, %v14754_v4  ;;  %v7217_v0 = vsel %vm7213_vm5, %v7197_v24, %v7200_v55  ;;  %v7223_v63 = vsel %vm7215_vm7, %v7206_v39, %v7222_v13  ;;  %v7496_v20 = vand.u32 2139095040, %v14759_v36  ;;  %v14819_v13 = vld [vmem:[%s9349_s14 + $0x1e0] sm:$0xff] }
 0x5fb   : > { %v7219_v19 = vsel %vm7215_vm7, %v7203_v10, %v7218_v11  ;;  %v7224_v59 = vsel %vm7214_vm6, %v7221_v1, %v7223_v63  ;;  %v7225_v52 = vsel %vm7213_vm5, %v7203_v10, %v7206_v39  ;;  %v7226_v9 = vsel %vm7216_vm8, %v7212_v5, 1326507024 }
 0x5fc   : > { %v6086_v22 = vadd.f32 %v14430_v62, %v6085_v15  ;;  %v7353_v61 = vclz %v8246_v33  ;;  %v14780_v7 = vadd.f32 %v14430_v62, %v8525_v21  ;;  %v7227_v50 = vsel %vm7215_vm7, %v7209_v30, %v7226_v9 }
 0x5fd   : > { %v14784_v43 = vmul.u32.u64.low %v7229_v6, %v7224_v59  ;;  %v14785_v23 = vmul.u32.u64.high %v7229_v6, %v7224_v59, %v14784_v43  ;;  %v7220_v60 = vsel %vm7214_vm6, %v7217_v0, %v7219_v19  ;;  %v7228_v2 = vsel %vm7214_vm6, %v7225_v52, %v7227_v50 }
 0x5fe   : > { %v8247_v34 = vadd.s32 4294967294, %v7353_v61  ;;  %v7497_v57 = vshrl.u32 %v7496_v20, 23  ;;  %vm7065_vm10 = vweird.f32 %v14473_v35  ;;  %v7067_v47 = vand.u32 3, %v7066_v3 }
 0x5ff   : > { %v7371_v62 = vsub.s32 4, %v14736_v31  ;;  %v14794_v17 = vmul.u32.u64.low %v7229_v6, %v7228_v2  ;;  %v14795_v28 = vmul.u32.u64.high %v7229_v6, %v7228_v2, %v14794_v17  ;;  %vm7287_vm11 = vcmp.lt.s32.totalorder %v14586_v53, 0 }
 0x600   : > { %v7341_v8 = vadd.s32 %v14691_v16, %v14703_v27  ;;  %vm8248_vm12 = vcmp.lt.s32.totalorder %v8247_v34, 0  ;;  %v8253_v12 = vadd.s32 4294967169, %v7497_v57  ;;  %v7236_v49 = vmul.u32 %v7229_v6, %v7220_v60 }
 0x601   : > { %v7356_v37 = vsel %vm8248_vm12, 0, %v8247_v34  ;;  %v7239_v26 = vadd.s32 1, %v14785_v23  ;;  %v7493_v24 = vand.u32 2147483647, %v14759_v36  ;;  %vm7069_vm13 = vcmp.eq.s32.totalorder %v7067_v47, 0 }
 0x602   : > { %v7357_v41 = vsub.s32 32, %v7356_v37  ;;  %v7358_v32 = vshll.u32 %v14754_v4, %v7356_v37  ;;  %v7361_v51 = vsub.s32 4294967266, %v7356_v37  ;;  %v7503_v55 = vadd.s32 1, %v8253_v12 }
 0x603   : > { %vm7072_vm9 = vcmp.eq.s32.totalorder %v7067_v47, 2  ;;  %v7372_v58 = vsel %vm7287_vm11, %v7371_v62, %v14736_v31  ;;  %vm7238_vm14 = vc.u32 %v14795_v28, %v14784_v43  ;;  %v7500_v14 = vand.u32 8388607, %v7493_v24 }
 0x604   : > { %v9079_v16 = vpop.eup %9078  ;;  %v7359_v27 = vshrl.u32 %v7341_v8, %v7357_v41  ;;  %v7362_v56 = vadd.s32 127, %v7361_v51  ;;  %v7240_v10 = vsel %vm7238_vm14, %v7239_v26, %v14785_v23  ;;  %vm7504_vm0 = vcmp.gt.s32.totalorder %v7503_v55, 0 }
 0x605   : > { %v9081_v30 = vpop.eup %9080  ;;  %v7073_v25 = vxor.u32 2147483648, %v9079_v16  ;;  %v7241_v15 = vadd.s32 %v7240_v10, %v7236_v49  ;;  %v7505_v4 = vsel %vm7504_vm0, %v7503_v55, 0  ;;  %vm7068_vm15 = vcmp.lt.s32.totalorder %v7067_v47, 2 }
 0x606   : > { %v7070_v39 = vxor.u32 2147483648, %v9081_v30  ;;  %v7360_v31 = vor.u32 %v7359_v27, %v7358_v32  ;;  %v7363_v3 = vshll.u32 %v7362_v56, 23  ;;  %vm14814_vm1 = vcmp.le.f32.partialorder %v7285_v45, 0.7853982 }
 0x607   : > { %v7074_v5 = vsel %vm7072_vm9, %v7073_v25, %v9081_v30  ;;  %v7242_v11 = vadd.s32 536870912, %v7241_v15  ;;  %v7507_v1 = vand.u32 31, %v7505_v4  ;;  %v7374_v0 = vsel %vm14814_vm1, 0, %v7372_v58 }
 0x608   : > { %v7071_v6 = vsel %vm7069_vm13, %v9079_v16, %v7070_v39  ;;  %v7364_v21 = vor.u32 4788187, %v7363_v3  ;;  %v7367_v33 = vcvt.s32.f32 %v7360_v31  ;;  %v7501_v19 = vor.u32 8388608, %v7500_v14 }
 0x609   : > { %v7075_v63 = vsel %vm7068_vm15, %v7071_v6, %v7074_v5  ;;  %v14824_v20 = vshrl.u32 %v7242_v11, 30  ;;  %v7508_v45 = vsub.s32 32, %v7507_v1  ;;  %v7506_v9 = vshrl.u32 %v7505_v4, 5 }
 0x60a   : > { %v7076_v59 = vsel %vm7065_vm10, nan, %v7075_v63  ;;  %v7365_v52 = vand.u32 2147483647, %v7364_v21  ;;  %v7392_v61 = vand.u32 2139095040, %v14819_v13  ;;  %v7510_v34 = vshll.u32 %v9137_v38, %v7507_v1 }
 0x60b   : > { %v7813_v50 = vmul.f32 %v7076_v59, %v6086_v22  ;;  %v7244_v23 = vshll.u32 %v14824_v20, 30  ;;  %v7513_v60 = vshll.u32 %v9138_v40, %v7507_v1  ;;  %v7511_v57 = vshrl.u32 %v9138_v40, %v7508_v45 }
 0x60c   : > { %v7368_v2 = vmul.f32 %v7367_v33, %v7365_v52  ;;  %v7514_v47 = vshrl.u32 %v9139_v42, %v7508_v45  ;;  %v7516_v62 = vshll.u32 %v9139_v42, %v7507_v1  ;;  %v7517_v17 = vshrl.u32 %v9140_v44, %v7508_v45 }
 0x60d   : > { %7829 = vst [vmem:[%s14041_s28 + $0x40] sm:$0xff] %v7813_v50  ;;  %v14836_v35 = vsub.s32 %v7241_v15, %v7244_v23  ;;  %v7519_v22 = vshll.u32 %v9140_v44, %v7507_v1  ;;  %v7520_v8 = vshrl.u32 %v9141_v46, %v7508_v45  ;;  %v7378_v37 = vadd.s32 3, %v7374_v0 }
 0x60e   : > { %v7369_v12 = vxor.u32 2147483648, %v7368_v2  ;;  %v14841_v49 = vshll.u32 %v7501_v19, 8  ;;  %v7393_v26 = vshrl.u32 %v7392_v61, 23  ;;  %v7509_v32 = vshrl.u32 %v9137_v38, %v7508_v45 }
 0x60f   : > { %v7247_v41 = vsub.s32 0, %v14836_v35  ;;  %v7512_v51 = vor.u32 %v7511_v57, %v7510_v34  ;;  %v7515_v55 = vor.u32 %v7514_v47, %v7513_v60  ;;  %v7521_v16 = vor.u32 %v7520_v8, %v7519_v22 }
 0x610   : > { %v7370_v58 = vsel %vm7287_vm11, %v7369_v12, %v7368_v2  ;;  %v7522_v27 = vshll.u32 %v9141_v46, %v7507_v1  ;;  %v7523_v56 = vshrl.u32 %v9142_v54, %v7508_v45  ;;  %v7518_v25 = vor.u32 %v7517_v17, %v7516_v62 }
 0x611   : > { %v7373_v10 = vsel %vm14814_vm1, %v14586_v53, %v7370_v58  ;;  %v8242_v30 = vmin.u32 %v7247_v41, %v14836_v35  ;;  %vm7525_vm2 = vcmp.lt.s32.totalorder %v7506_v9, 1  ;;  %vm7527_vm3 = vcmp.lt.s32.totalorder %v7506_v9, 3 }
 0x612   : > { %9082 = vcosq.f32 %v7373_v10  ;;  %v7524_v15 = vor.u32 %v7523_v56, %v7522_v27  ;;  %vm7528_vm4 = vcmp.lt.s32.totalorder %v7506_v9, 4  ;;  %vm7526_vm5 = vcmp.lt.s32.totalorder %v7506_v9, 2 }
 0x613   : > { %9084 = vsinq.f32 %v7373_v10  ;;  %v7249_v14 = vclz %v8242_v30  ;;  %v8249_v4 = vadd.s32 4294967169, %v7393_v26  ;;  %v7529_v39 = vsel %vm7525_vm2, %v7509_v32, %v7512_v51 }
 0x614   : > { %v7530_v31 = vsel %vm7528_vm4, %v7518_v25, 2102212464  ;;  %v7533_v3 = vsel %vm7525_vm2, %v7512_v51, %v7515_v55  ;;  %v7534_v5 = vsel %vm7528_vm4, %v7521_v16, 920167782  ;;  %v7537_v6 = vsel %vm7525_vm2, %v7515_v55, %v7518_v25 }
 0x615   : > { %v8243_v48 = vadd.s32 4294967294, %v7249_v14  ;;  %v7531_v11 = vsel %vm7527_vm3, %v7515_v55, %v7530_v31  ;;  %v7535_v1 = vsel %vm7527_vm3, %v7518_v25, %v7534_v5  ;;  %v7237_v21 = vadd.s32 %v14784_v43, %v14795_v28 }
 0x616   : > { %v7536_v33 = vsel %vm7526_vm5, %v7533_v3, %v7535_v1  ;;  %v7538_v0 = vsel %vm7528_vm4, %v7524_v15, 1326507024  ;;  %v7389_v63 = vand.u32 2147483647, %v14819_v13  ;;  %v7267_v61 = vsub.s32 4, %v14824_v20 }
 0x617   : > { %vm8244_vm7 = vcmp.lt.s32.totalorder %v8243_v48, 0  ;;  %v7539_v19 = vsel %vm7527_vm3, %v7521_v16, %v7538_v0  ;;  %v14864_v45 = vmul.u32.u64.low %v14841_v49, %v7536_v33  ;;  %v14865_v59 = vmul.u32.u64.high %v14841_v49, %v7536_v33, %v14864_v45 }
 0x618   : > { %v7252_v52 = vsel %vm8244_vm7, 0, %v8243_v48  ;;  %v7532_v50 = vsel %vm7526_vm5, %v7529_v39, %v7531_v11  ;;  %v7540_v43 = vsel %vm7526_vm5, %v7537_v6, %v7539_v19  ;;  %v7399_v60 = vadd.s32 1, %v8249_v4 }
 0x619   : > { %v7253_v28 = vsub.s32 32, %v7252_v52  ;;  %v7254_v23 = vshll.u32 %v14836_v35, %v7252_v52  ;;  %v7257_v34 = vsub.s32 4294967266, %v7252_v52  ;;  %vm7377_vm6 = vweird.f32 %v14586_v53 }
 0x61a   : > { %v7379_v2 = vand.u32 3, %v7378_v37  ;;  %vm7183_vm8 = vcmp.lt.s32.totalorder %v14646_v29, 0  ;;  %v14875_v57 = vmul.u32.u64.low %v14841_v49, %v7540_v43  ;;  %v14876_v47 = vmul.u32.u64.high %v14841_v49, %v7540_v43, %v14875_v57 }
 0x61b   : > { %v7255_v62 = vshrl.u32 %v7237_v21, %v7253_v28  ;;  %v7258_v17 = vadd.s32 127, %v7257_v34  ;;  %v7551_v22 = vadd.s32 1, %v14865_v59  ;;  %vm7400_vm10 = vcmp.gt.s32.totalorder %v7399_v60, 0 }
 0x61c   : > { %vm14881_vm11 = vcmp.le.f32.partialorder %v7181_v18, 0.7853982  ;;  %v7548_v35 = vmul.u32 %v14841_v49, %v7532_v50  ;;  %v14888_v8 = vand.u32 8388607, %v7389_v63  ;;  %v7401_v12 = vsel %vm7400_vm10, %v7399_v60, 0 }
 0x61d   : > { %v7256_v37 = vor.u32 %v7255_v62, %v7254_v23  ;;  %v7259_v26 = vshll.u32 %v7258_v17, 23  ;;  %v7268_v41 = vsel %vm7183_vm8, %v7267_v61, %v14824_v20  ;;  %v7403_v32 = vand.u32 31, %v7401_v12 }
 0x61e   : > { %vm7380_vm12 = vcmp.lt.s32.totalorder %v7379_v2, 2  ;;  %vm7381_vm13 = vcmp.eq.s32.totalorder %v7379_v2, 0  ;;  %vm7384_vm9 = vcmp.eq.s32.totalorder %v7379_v2, 2  ;;  %vm7550_vm14 = vc.u32 %v14876_v47, %v14864_v45 }
 0x61f   : > { %v9083_v18 = vpop.eup %9082  ;;  %v7260_v49 = vor.u32 4788187, %v7259_v26  ;;  %v7263_v51 = vcvt.s32.f32 %v7256_v37  ;;  %v7552_v55 = vsel %vm7550_vm14, %v7551_v22, %v14865_v59  ;;  %v7404_v58 = vsub.s32 32, %v7403_v32 }
 0x620   : > { %v9085_v16 = vpop.eup %9084  ;;  %v7385_v27 = vxor.u32 2147483648, %v9083_v18  ;;  %v7270_v56 = vsel %vm14881_vm11, 0, %v7268_v41  ;;  %v7553_v10 = vadd.s32 %v7552_v55, %v7548_v35  ;;  %v7397_v20 = vor.u32 8388608, %v14888_v8  ;;  %v14932_v35 = vld [vmem:[%s9349_s14 + $0x1f8] sm:$0xff]  ;;  %v6095_v8 = vpop.f32.mrf.mxu1 }
 0x621   : > { %v7382_v30 = vxor.u32 2147483648, %v9085_v16  ;;  %v7261_v25 = vand.u32 2147483647, %v7260_v49  ;;  %v14899_v15 = vshrl.u32 %v7401_v12, 5  ;;  %v7406_v14 = vshll.u32 %v9137_v38, %v7403_v32 }
 0x622   : > { %v7386_v4 = vsel %vm7384_vm9, %v7385_v27, %v9085_v16  ;;  %v7554_v39 = vadd.s32 536870912, %v7553_v10  ;;  %v7407_v31 = vshrl.u32 %v9138_v40, %v7404_v58  ;;  %v7409_v3 = vshll.u32 %v9138_v40, %v7403_v32 }
 0x623   : > { %v7383_v5 = vsel %vm7381_vm13, %v9083_v18, %v7382_v30  ;;  %v7264_v48 = vmul.f32 %v7263_v51, %v7261_v25  ;;  %v7410_v11 = vshrl.u32 %v9139_v42, %v7404_v58  ;;  %v7412_v1 = vshll.u32 %v9139_v42, %v7403_v32 }
 0x624   : > { %v7387_v6 = vsel %vm7380_vm12, %v7383_v5, %v7386_v4  ;;  %v14909_v21 = vshrl.u32 %v7554_v39, 30  ;;  %v7413_v33 = vshrl.u32 %v9140_v44, %v7404_v58  ;;  %v7415_v0 = vshll.u32 %v9140_v44, %v7403_v32 }
 0x625   : > { %v7388_v19 = vsel %vm7377_vm6, nan, %v7387_v6  ;;  %v7265_v59 = vxor.u32 2147483648, %v7264_v48  ;;  %v7405_v52 = vshrl.u32 %v9137_v38, %v7404_v58  ;;  %v7416_v61 = vshrl.u32 %v9141_v46, %v7404_v58 }
 0x626   : > { %v7816_v50 = vmul.f32 %v7388_v19, %v14780_v7  ;;  %v7556_v43 = vshll.u32 %v14909_v21, 30  ;;  %v7408_v28 = vor.u32 %v7407_v31, %v7406_v14  ;;  %v7418_v23 = vshll.u32 %v9141_v46, %v7403_v32 }
 0x627   : > { %v7266_v34 = vsel %vm7183_vm8, %v7265_v59, %v7264_v48  ;;  %v7411_v60 = vor.u32 %v7410_v11, %v7409_v3  ;;  %v7417_v2 = vor.u32 %v7416_v61, %v7415_v0  ;;  %v7419_v53 = vshrl.u32 %v9142_v54, %v7404_v58 }
 0x628   : > { %7832 = vst [vmem:[%s14041_s28 + $0x58] sm:$0xff] %v7816_v50  ;;  %v7269_v57 = vsel %vm14881_vm11, %v14646_v29, %v7266_v34  ;;  %v14927_v62 = vsub.s32 %v7553_v10, %v7556_v43  ;;  %v7414_v7 = vor.u32 %v7413_v33, %v7412_v1  ;;  %vm7421_vm0 = vcmp.lt.s32.totalorder %v14899_v15, 1 }
 0x629   : > { %9086 = vcosq.f32 %v7269_v57  ;;  %v7274_v17 = vadd.s32 3, %v7270_v56  ;;  %v7420_v22 = vor.u32 %v7419_v53, %v7418_v23  ;;  %vm7423_vm15 = vcmp.lt.s32.totalorder %v14899_v15, 3  ;;  %v8528_v56 = vpop.f32.mrf.mxu1 }
 0x62a   : > { %9088 = vsinq.f32 %v7269_v57  ;;  %v7559_v12 = vsub.s32 0, %v14927_v62  ;;  %vm7422_vm1 = vcmp.lt.s32.totalorder %v14899_v15, 2  ;;  %vm7424_vm2 = vcmp.lt.s32.totalorder %v14899_v15, 4 }
 0x62b   : > { %v7426_v9 = vsel %vm7424_vm2, %v7414_v7, 2102212464  ;;  %v7429_v37 = vsel %vm7421_vm0, %v7408_v28, %v7411_v60  ;;  %v7430_v26 = vsel %vm7424_vm2, %v7417_v2, 920167782  ;;  %v7437_v41 = vshll.u32 %v7397_v20, 8 }
 0x62c   : > { %v8254_v32 = vmin.u32 %v7559_v12, %v14927_v62  ;;  %v7425_v18 = vsel %vm7421_vm0, %v7405_v52, %v7408_v28  ;;  %v7431_v49 = vsel %vm7423_vm15, %v7414_v7, %v7430_v26  ;;  %v7704_v51 = vand.u32 2139095040, %v14932_v35  ;;  %v14954_v20 = vld [vmem:[%s15159_s3 + $0x2] ss:$0 sm:$0xff] }
 0x62d   : > { %v7427_v55 = vsel %vm7423_vm15, %v7411_v60, %v7426_v9  ;;  %v7432_v58 = vsel %vm7422_vm1, %v7429_v37, %v7431_v49  ;;  %v7433_v16 = vsel %vm7421_vm0, %v7411_v60, %v7414_v7  ;;  %v7434_v27 = vsel %vm7424_vm2, %v7420_v22, 1326507024 }
 0x62e   : > { %v7561_v10 = vclz %v8254_v32  ;;  %v6096_v30 = vadd.f32 %v14954_v20, %v6095_v8  ;;  %v7435_v25 = vsel %vm7423_vm15, %v7417_v2, %v7434_v27  ;;  %v7428_v31 = vsel %vm7422_vm1, %v7425_v18, %v7427_v55 }
 0x62f   : > { %v14959_v14 = vmul.u32.u64.low %v7437_v41, %v7432_v58  ;;  %v14960_v4 = vmul.u32.u64.high %v7437_v41, %v7432_v58, %v14959_v14  ;;  %v7436_v3 = vsel %vm7422_vm1, %v7433_v16, %v7435_v25  ;;  %v7705_v5 = vshrl.u32 %v7704_v51, 23 }
 0x630   : > { %v8255_v39 = vadd.s32 4294967294, %v7561_v10  ;;  %vm7273_vm3 = vweird.f32 %v14646_v29  ;;  %v7275_v48 = vand.u32 3, %v7274_v17  ;;  %v14969_v11 = vadd.f32 %v14954_v20, %v8528_v56 }
 0x631   : > { %v14971_v1 = vmul.u32.u64.low %v7437_v41, %v7436_v3  ;;  %v14972_v6 = vmul.u32.u64.high %v7437_v41, %v7436_v3, %v14971_v1  ;;  %vm7495_vm4 = vcmp.lt.s32.totalorder %v14759_v36, 0  ;;  %v7549_v33 = vadd.s32 %v14864_v45, %v14876_v47 }
 0x632   : > { %vm8256_vm5 = vcmp.lt.s32.totalorder %v8255_v39, 0  ;;  %v8261_v0 = vadd.s32 4294967169, %v7705_v5  ;;  %v7444_v15 = vmul.u32 %v7437_v41, %v7428_v31  ;;  %v7447_v59 = vadd.s32 1, %v14960_v4  ;;  %v14994_v41 = vld [vmem:[%s9349_s14 + $0x1f0] sm:$0xff] }
 0x633   : > { %v7564_v19 = vsel %vm8256_vm5, 0, %v8255_v39  ;;  %v7701_v52 = vand.u32 2147483647, %v14932_v35  ;;  %vm7277_vm7 = vcmp.eq.s32.totalorder %v7275_v48, 0  ;;  %vm7280_vm6 = vcmp.eq.s32.totalorder %v7275_v48, 2 }
 0x634   : > { %v7565_v61 = vsub.s32 32, %v7564_v19  ;;  %v7566_v50 = vshll.u32 %v14927_v62, %v7564_v19  ;;  %v7569_v43 = vsub.s32 4294967266, %v7564_v19  ;;  %v7711_v28 = vadd.s32 1, %v8261_v0 }
 0x635   : > { %v7579_v23 = vsub.s32 4, %v14909_v21  ;;  %vm7446_vm8 = vc.u32 %v14972_v6, %v14959_v14  ;;  %v7708_v62 = vand.u32 8388607, %v7701_v52  ;;  %vm7276_vm11 = vcmp.lt.s32.totalorder %v7275_v48, 2 }
 0x636   : > { %v9087_v45 = vpop.eup %9086  ;;  %v7567_v47 = vshrl.u32 %v7549_v33, %v7565_v61  ;;  %v7570_v34 = vadd.s32 127, %v7569_v43  ;;  %v7448_v60 = vsel %vm7446_vm8, %v7447_v59, %v14960_v4  ;;  %vm7712_vm10 = vcmp.gt.s32.totalorder %v7711_v28, 0 }
 0x637   : > { %v9089_v2 = vpop.eup %9088  ;;  %v7281_v53 = vxor.u32 2147483648, %v9087_v45  ;;  %v7449_v57 = vadd.s32 %v7448_v60, %v7444_v15  ;;  %v7713_v7 = vsel %vm7712_vm10, %v7711_v28, 0  ;;  %vm14989_vm12 = vcmp.le.f32.partialorder %v7493_v24, 0.7853982 }
 0x638   : > { %v7278_v17 = vxor.u32 2147483648, %v9089_v2  ;;  %v7568_v22 = vor.u32 %v7567_v47, %v7566_v50  ;;  %v7571_v8 = vshll.u32 %v7570_v34, 23  ;;  %v7715_v26 = vand.u32 31, %v7713_v7 }
 0x639   : > { %v7282_v12 = vsel %vm7280_vm6, %v7281_v53, %v9089_v2  ;;  %v7450_v37 = vadd.s32 536870912, %v7449_v57  ;;  %v7580_v51 = vsel %vm7495_vm4, %v7579_v23, %v14909_v21  ;;  %v7709_v24 = vor.u32 8388608, %v7708_v62 }
 0x63a   : > { %v7279_v32 = vsel %vm7277_vm7, %v9087_v45, %v7278_v17  ;;  %v7572_v18 = vor.u32 4788187, %v7571_v8  ;;  %v7575_v49 = vcvt.s32.f32 %v7568_v22  ;;  %v7716_v16 = vsub.s32 32, %v7715_v26 }
 0x63b   : > { %v7283_v55 = vsel %vm7276_vm11, %v7279_v32, %v7282_v12  ;;  %v15000_v58 = vshrl.u32 %v7450_v37, 30  ;;  %v7714_v10 = vshrl.u32 %v7713_v7, 5  ;;  %v7600_v25 = vand.u32 2139095040, %v14994_v41 }
 0x63c   : > { %v7284_v27 = vsel %vm7273_vm3, nan, %v7283_v55  ;;  %v7573_v56 = vand.u32 2147483647, %v7572_v18  ;;  %v7718_v31 = vshll.u32 %v9137_v38, %v7715_v26  ;;  %v7721_v21 = vshll.u32 %v9138_v40, %v7715_v26 }
 0x63d   : > { %v7815_v4 = vmul.f32 %v7284_v27, %v6096_v30  ;;  %v7452_v39 = vshll.u32 %v15000_v58, 30  ;;  %v7719_v5 = vshrl.u32 %v9138_v40, %v7716_v16  ;;  %v7722_v48 = vshrl.u32 %v9139_v42, %v7716_v16 }
 0x63e   : > { %v7576_v3 = vmul.f32 %v7575_v49, %v7573_v56  ;;  %v7724_v1 = vshll.u32 %v9139_v42, %v7715_v26  ;;  %v7725_v33 = vshrl.u32 %v9140_v44, %v7716_v16  ;;  %v7727_v30 = vshll.u32 %v9140_v44, %v7715_v26 }
 0x63f   : > { %7831 = vst [vmem:[%s14041_s28 + $0x50] sm:$0xff] %v7815_v4  ;;  %v15012_v29 = vsub.s32 %v7449_v57, %v7452_v39  ;;  %v7728_v0 = vshrl.u32 %v9141_v46, %v7716_v16  ;;  %v7582_v15 = vsel %vm14989_vm12, 0, %v7580_v51  ;;  %v15019_v59 = vshll.u32 %v7709_v24, 8 }
 0x640   : > { %v7577_v19 = vxor.u32 2147483648, %v7576_v3  ;;  %v7601_v61 = vshrl.u32 %v7600_v25, 23  ;;  %v7717_v43 = vshrl.u32 %v9137_v38, %v7716_v16  ;;  %v7720_v28 = vor.u32 %v7719_v5, %v7718_v31 }
 0x641   : > { %v7455_v50 = vsub.s32 0, %v15012_v29  ;;  %v7723_v23 = vor.u32 %v7722_v48, %v7721_v21  ;;  %v7729_v47 = vor.u32 %v7728_v0, %v7727_v30  ;;  %v7730_v34 = vshll.u32 %v9141_v46, %v7715_v26 }
 0x642   : > { %v7578_v45 = vsel %vm7495_vm4, %v7577_v19, %v7576_v3  ;;  %v7731_v60 = vshrl.u32 %v9142_v54, %v7716_v16  ;;  %v7726_v57 = vor.u32 %v7725_v33, %v7724_v1  ;;  %vm7733_vm13 = vcmp.lt.s32.totalorder %v7714_v10, 1 }
 0x643   : > { %v7581_v2 = vsel %vm14989_vm12, %v14759_v36, %v7578_v45  ;;  %v8250_v53 = vmin.u32 %v7455_v50, %v15012_v29  ;;  %vm7735_vm9 = vcmp.lt.s32.totalorder %v7714_v10, 3  ;;  %vm7736_vm14 = vcmp.lt.s32.totalorder %v7714_v10, 4 }
 0x644   : > { %9090 = vcosq.f32 %v7581_v2  ;;  %v7732_v62 = vor.u32 %v7731_v60, %v7730_v34  ;;  %vm7734_vm0 = vcmp.lt.s32.totalorder %v7714_v10, 2  ;;  %v8257_v17 = vadd.s32 4294967169, %v7601_v61 }
 0x645   : > { %9092 = vsinq.f32 %v7581_v2  ;;  %v7457_v7 = vclz %v8250_v53  ;;  %v7737_v22 = vsel %vm7733_vm13, %v7717_v43, %v7720_v28  ;;  %v7738_v8 = vsel %vm7736_vm14, %v7726_v57, 2102212464 }
 0x646   : > { %v7741_v12 = vsel %vm7733_vm13, %v7720_v28, %v7723_v23  ;;  %v7742_v9 = vsel %vm7736_vm14, %v7729_v47, 920167782  ;;  %v7739_v26 = vsel %vm7735_vm9, %v7723_v23, %v7738_v8  ;;  %v7745_v18 = vsel %vm7733_vm13, %v7723_v23, %v7726_v57 }
 0x647   : > { %v8251_v37 = vadd.s32 4294967294, %v7457_v7  ;;  %v7743_v32 = vsel %vm7735_vm9, %v7726_v57, %v7742_v9  ;;  %v7586_v49 = vadd.s32 3, %v7582_v15  ;;  %v7445_v51 = vadd.s32 %v14959_v14, %v14972_v6 }
 0x648   : > { %v7744_v55 = vsel %vm7734_vm0, %v7741_v12, %v7743_v32  ;;  %v7746_v24 = vsel %vm7736_vm14, %v7732_v62, 1326507024  ;;  %v7740_v4 = vsel %vm7734_vm0, %v7737_v22, %v7739_v26  ;;  %v7597_v31 = vand.u32 2147483647, %v14994_v41 }
 0x649   : > { %vm8252_vm15 = vcmp.lt.s32.totalorder %v8251_v37, 0  ;;  %v7747_v16 = vsel %vm7735_vm9, %v7729_v47, %v7746_v24  ;;  %v15044_v27 = vmul.u32.u64.low %v15019_v59, %v7744_v55  ;;  %v15045_v56 = vmul.u32.u64.high %v15019_v59, %v7744_v55, %v15044_v27 }
 0x64a   : > { %v7460_v25 = vsel %vm8252_vm15, 0, %v8251_v37  ;;  %v7748_v39 = vsel %vm7734_vm0, %v7745_v18, %v7747_v16  ;;  %v7607_v3 = vadd.s32 1, %v8257_v17  ;;  %vm7585_vm1 = vweird.f32 %v14759_v36 }
 0x64b   : > { %v7461_v14 = vsub.s32 32, %v7460_v25  ;;  %v7462_v6 = vshll.u32 %v15012_v29, %v7460_v25  ;;  %v7465_v21 = vsub.s32 4294967266, %v7460_v25  ;;  %v7587_v5 = vand.u32 3, %v7586_v49 }
 0x64c   : > { %vm7391_vm2 = vcmp.lt.s32.totalorder %v14819_v13, 0  ;;  %v15055_v48 = vmul.u32.u64.low %v15019_v59, %v7748_v39  ;;  %v15056_v1 = vmul.u32.u64.high %v15019_v59, %v7748_v39, %v15055_v48  ;;  %v7759_v10 = vadd.s32 1, %v15045_v56 }
 0x64d   : > { %v7463_v33 = vshrl.u32 %v7445_v51, %v7461_v14  ;;  %v7466_v30 = vadd.s32 127, %v7465_v21  ;;  %vm7608_vm3 = vcmp.gt.s32.totalorder %v7607_v3, 0  ;;  %v7475_v0 = vsub.s32 4, %v15000_v58 }
 0x64e   : > { %v7756_v29 = vmul.u32 %v15019_v59, %v7740_v4  ;;  %v15063_v19 = vand.u32 8388607, %v7597_v31  ;;  %v7609_v15 = vsel %vm7608_vm3, %v7607_v3, 0  ;;  %vm15067_vm4 = vcmp.le.f32.partialorder %v7389_v63, 0.7853982 }
 0x64f   : > { %v7464_v50 = vor.u32 %v7463_v33, %v7462_v6  ;;  %v7467_v43 = vshll.u32 %v7466_v30, 23  ;;  %v7611_v28 = vand.u32 31, %v7609_v15  ;;  %vm7588_vm5 = vcmp.lt.s32.totalorder %v7587_v5, 2 }
 0x650   : > { %vm7589_vm7 = vcmp.eq.s32.totalorder %v7587_v5, 0  ;;  %vm7592_vm6 = vcmp.eq.s32.totalorder %v7587_v5, 2  ;;  %vm7758_vm8 = vc.u32 %v15056_v1, %v15044_v27  ;;  %v7476_v2 = vsel %vm7391_vm2, %v7475_v0, %v15000_v58 }
 0x651   : > { %v9091_v59 = vpop.eup %9090  ;;  %v7468_v23 = vor.u32 4788187, %v7467_v43  ;;  %v7471_v45 = vcvt.s32.f32 %v7464_v50  ;;  %v7760_v47 = vsel %vm7758_vm8, %v7759_v10, %v15045_v56  ;;  %v7612_v34 = vsub.s32 32, %v7611_v28 }
 0x652   : > { %v9093_v60 = vpop.eup %9092  ;;  %v7593_v63 = vxor.u32 2147483648, %v9091_v59  ;;  %v7761_v53 = vadd.s32 %v7760_v47, %v7756_v29  ;;  %v7605_v57 = vor.u32 8388608, %v15063_v19  ;;  %v7610_v17 = vshrl.u32 %v7609_v15, 5 }
 0x653   : > { %v7590_v62 = vxor.u32 2147483648, %v9093_v60  ;;  %v7469_v7 = vand.u32 2147483647, %v7468_v23  ;;  %v7614_v22 = vshll.u32 %v9137_v38, %v7611_v28  ;;  %v7615_v9 = vshrl.u32 %v9138_v40, %v7612_v34 }
 0x654   : > { %v7594_v8 = vsel %vm7592_vm6, %v7593_v63, %v9093_v60  ;;  %v7762_v12 = vadd.s32 536870912, %v7761_v53  ;;  %v7617_v37 = vshll.u32 %v9138_v40, %v7611_v28  ;;  %v7618_v58 = vshrl.u32 %v9139_v42, %v7612_v34 }
 0x655   : > { %v7591_v26 = vsel %vm7589_vm7, %v9091_v59, %v7590_v62  ;;  %v7472_v32 = vmul.f32 %v7471_v45, %v7469_v7  ;;  %v7620_v18 = vshll.u32 %v9139_v42, %v7611_v28  ;;  %v7621_v55 = vshrl.u32 %v9140_v44, %v7612_v34 }
 0x656   : > { %v7595_v49 = vsel %vm7588_vm5, %v7591_v26, %v7594_v8  ;;  %v15086_v51 = vshrl.u32 %v7762_v12, 30  ;;  %v7623_v24 = vshll.u32 %v9140_v44, %v7611_v28  ;;  %v7613_v56 = vshrl.u32 %v9137_v38, %v7612_v34 }
 0x657   : > { %v7596_v16 = vsel %vm7585_vm1, nan, %v7595_v49  ;;  %v7473_v40 = vxor.u32 2147483648, %v7472_v32  ;;  %v7624_v25 = vshrl.u32 %v9141_v46, %v7612_v34  ;;  %v7616_v39 = vor.u32 %v7615_v9, %v7614_v22 }
 0x658   : > { %v7818_v4 = vmul.f32 %v7596_v16, %v14969_v11  ;;  %v7764_v42 = vshll.u32 %v15086_v51, 30  ;;  %v7626_v14 = vshll.u32 %v9141_v46, %v7611_v28  ;;  %v7619_v21 = vor.u32 %v7618_v58, %v7617_v37 }
 0x659   : > { %v7474_v6 = vsel %vm7391_vm2, %v7473_v40, %v7472_v32  ;;  %v7625_v44 = vor.u32 %v7624_v25, %v7623_v24  ;;  %v7627_v36 = vshrl.u32 %v9142_v54, %v7612_v34  ;;  %v7622_v5 = vor.u32 %v7621_v55, %v7620_v18 }
 0x65a   : > { %7834 = vst [vmem:[%s14041_s28 + $0x68] sm:$0xff] %v7818_v4  ;;  %v7477_v38 = vsel %vm15067_vm4, %v14819_v13, %v7474_v6  ;;  %v7765_v3 = vsub.s32 %v7761_v53, %v7764_v42  ;;  %vm7629_vm10 = vcmp.lt.s32.totalorder %v7610_v17, 1  ;;  %v7478_v11 = vsel %vm15067_vm4, 0, %v7476_v2 }
 0x65b   : > { %9094 = vcosq.f32 %v7477_v38  ;;  %v7628_v46 = vor.u32 %v7627_v36, %v7626_v14  ;;  %vm7631_vm11 = vcmp.lt.s32.totalorder %v7610_v17, 3  ;;  %vm7630_vm12 = vcmp.lt.s32.totalorder %v7610_v17, 2 }
 0x65c   : > { %9096 = vsinq.f32 %v7477_v38  ;;  %v7767_v48 = vsub.s32 0, %v7765_v3  ;;  %vm7632_vm13 = vcmp.lt.s32.totalorder %v7610_v17, 4  ;;  %v7637_v54 = vsel %vm7629_vm10, %v7616_v39, %v7619_v21  ;;  %v6105_v17 = vpop.f32.mrf.mxu1 }
 0x65d   : > { %v7634_v33 = vsel %vm7632_vm13, %v7622_v5, 2102212464  ;;  %v7638_v30 = vsel %vm7632_vm13, %v7625_v44, 920167782  ;;  %v7645_v10 = vshll.u32 %v7605_v57, 8  ;;  %v7633_v29 = vsel %vm7629_vm10, %v7613_v56, %v7616_v39 }
 0x65e   : > { %v8262_v0 = vmin.u32 %v7767_v48, %v7765_v3  ;;  %v7639_v19 = vsel %vm7631_vm11, %v7622_v5, %v7638_v30  ;;  %v7635_v15 = vsel %vm7631_vm11, %v7619_v21, %v7634_v33  ;;  %v7641_v50 = vsel %vm7629_vm10, %v7619_v21, %v7622_v5 }
 0x65f   : > { %v7640_v61 = vsel %vm7630_vm12, %v7637_v54, %v7639_v19  ;;  %v7642_v43 = vsel %vm7632_vm13, %v7628_v46, 1326507024  ;;  %v7482_v28 = vadd.s32 3, %v7478_v11  ;;  %v7636_v60 = vsel %vm7630_vm12, %v7633_v29, %v7635_v15 }
 0x660   : > { %v7769_v59 = vclz %v8262_v0  ;;  %v7643_v23 = vsel %vm7631_vm11, %v7625_v44, %v7642_v43  ;;  %v15113_v45 = vmul.u32.u64.low %v7645_v10, %v7640_v61  ;;  %v15114_v47 = vmul.u32.u64.high %v7645_v10, %v7640_v61, %v15113_v45 }
 0x661   : > { %v7644_v63 = vsel %vm7630_vm12, %v7641_v50, %v7643_v23  ;;  %v7483_v57 = vand.u32 3, %v7482_v28  ;;  %v7757_v62 = vadd.s32 %v15044_v27, %v15056_v1  ;;  %v7652_v22 = vmul.u32 %v7645_v10, %v7636_v60  ;;  %v8531_v60 = vpop.f32.mrf.mxu1 }
 0x662   : > { %v8263_v34 = vadd.s32 4294967294, %v7769_v59  ;;  %v15118_v2 = vmul.u32.u64.low %v7645_v10, %v7644_v63  ;;  %v15119_v53 = vmul.u32.u64.high %v7645_v10, %v7644_v63, %v15118_v2  ;;  %v7655_v8 = vadd.s32 1, %v15114_v47 }
 0x663   : > { %vm7488_vm0 = vcmp.eq.s32.totalorder %v7483_v57, 2  ;;  %vm7485_vm15 = vcmp.eq.s32.totalorder %v7483_v57, 0  ;;  %vm7484_vm1 = vcmp.lt.s32.totalorder %v7483_v57, 2  ;;  %v6106_v40 = vadd.f32 %v14954_v20, %v6105_v17 }
 0x664   : > { %vm8264_vm9 = vcmp.lt.s32.totalorder %v8263_v34, 0  ;;  %vm7654_vm14 = vc.u32 %v15119_v53, %v15113_v45  ;;  %vm7481_vm2 = vweird.f32 %v14819_v13  ;;  %vm7703_vm3 = vcmp.lt.s32.totalorder %v14932_v35, 0 }
 0x665   : > { %v7772_v7 = vsel %vm8264_vm9, 0, %v8263_v34  ;;  %v7656_v18 = vsel %vm7654_vm14, %v7655_v8, %v15114_v47  ;;  %v7787_v5 = vsub.s32 4, %v15086_v51  ;;  %vm7702_vm4 = vcmp.le.f32.partialorder %v7701_v52, 0.7853982 }
 0x666   : > { %v7773_v12 = vsub.s32 32, %v7772_v7  ;;  %v7774_v9 = vshll.u32 %v7765_v3, %v7772_v7  ;;  %v7777_v37 = vsub.s32 4294967266, %v7772_v7  ;;  %v7657_v1 = vadd.s32 %v7656_v18, %v7652_v22 }
 0x667   : > { %v7788_v33 = vsel %vm7703_vm3, %v7787_v5, %v15086_v51  ;;  %v7653_v15 = vadd.s32 %v15113_v45, %v15119_v53  ;;  %v6121_v7 = vadd.f32 %v14954_v20, %v8531_v60  ;;  %vm7793_vm10 = vweird.f32 %v14932_v35 }
 0x668   : > { %v9095_v26 = vpop.eup %9094  ;;  %v7775_v32 = vshrl.u32 %v7757_v62, %v7773_v12  ;;  %v7778_v58 = vadd.s32 127, %v7777_v37  ;;  %v7658_v25 = vadd.s32 536870912, %v7657_v1  ;;  %v7790_v0 = vsel %vm7702_vm4, 0, %v7788_v33 }
 0x669   : > { %v9097_v49 = vpop.eup %9096  ;;  %v7489_v27 = vxor.u32 2147483648, %v9095_v26  ;;  %v7794_v19 = vadd.s32 3, %v7790_v0  ;;  %vm7599_vm11 = vcmp.lt.s32.totalorder %v14994_v41, 0  ;;  %vm7598_vm12 = vcmp.le.f32.partialorder %v7597_v31, 0.7853982 }
 0x66a   : > { %v7486_v55 = vxor.u32 2147483648, %v9097_v49  ;;  %v7776_v24 = vor.u32 %v7775_v32, %v7774_v9  ;;  %v7779_v16 = vshll.u32 %v7778_v58, 23  ;;  %v7659_v6 = vshrl.u32 %v7658_v25, 30 }
 0x66b   : > { %v7490_v56 = vsel %vm7488_vm0, %v7489_v27, %v9097_v49  ;;  %v7795_v28 = vand.u32 3, %v7794_v19  ;;  %vm7689_vm0 = vweird.f32 %v14994_v41 }
 0x66c   : > { %v7487_v4 = vsel %vm7485_vm15, %v9095_v26, %v7486_v55  ;;  %v7780_v42 = vor.u32 4788187, %v7779_v16  ;;  %v7783_v39 = vcvt.s32.f32 %v7776_v24  ;;  %v7660_v38 = vshll.u32 %v7659_v6, 30  ;;  %v6115_v24 = vpop.f32.mrf.mxu1 }
 0x66d   : > { %v7491_v14 = vsel %vm7484_vm1, %v7487_v4, %v7490_v56  ;;  %vm7800_vm7 = vcmp.eq.s32.totalorder %v7795_v28, 2  ;;  %vm7797_vm6 = vcmp.eq.s32.totalorder %v7795_v28, 0  ;;  %vm7796_vm8 = vcmp.lt.s32.totalorder %v7795_v28, 2 }
 0x66e   : > { %v7492_v21 = vsel %vm7481_vm2, nan, %v7491_v14  ;;  %v7781_v44 = vand.u32 2147483647, %v7780_v42  ;;  %v7661_v11 = vsub.s32 %v7657_v1, %v7660_v38  ;;  %v7683_v37 = vsub.s32 4, %v7659_v6 }
 0x66f   : > { %v7817_v36 = vmul.f32 %v7492_v21, %v6106_v40  ;;  %v6116_v56 = vadd.f32 %v14954_v20, %v6115_v24 }
 0x670   : > { %v7784_v3 = vmul.f32 %v7783_v39, %v7781_v44  ;;  %v7663_v46 = vsub.s32 0, %v7661_v11  ;;  %v7684_v18 = vsel %vm7599_vm11, %v7683_v37, %v7659_v6 }
 0x671   : > { %7833 = vst [vmem:[%s14041_s28 + $0x60] sm:$0xff] %v7817_v36 }
 0x672   : > { %v7785_v13 = vxor.u32 2147483648, %v7784_v3  ;;  %v8258_v30 = vmin.u32 %v7663_v46, %v7661_v11 }
 0x674   : > { %v7786_v48 = vsel %vm7703_vm3, %v7785_v13, %v7784_v3  ;;  %v7665_v10 = vclz %v8258_v30 }
 0x675   : > { %v7789_v54 = vsel %vm7702_vm4, %v14932_v35, %v7786_v48  ;;  %v7686_v35 = vsel %vm7598_vm12, 0, %v7684_v18 }
 0x676   : > { %9098 = vcosq.f32 %v7789_v54  ;;  %v8259_v29 = vadd.s32 4294967294, %v7665_v10  ;;  %v7690_v27 = vadd.s32 3, %v7686_v35 }
 0x677   : > { %9100 = vsinq.f32 %v7789_v54 }
 0x678   : > { %vm8260_vm5 = vcmp.lt.s32.totalorder %v8259_v29, 0  ;;  %v7691_v1 = vand.u32 3, %v7690_v27 }
 0x679   : > { %v7668_v61 = vsel %vm8260_vm5, 0, %v8259_v29 }
 0x67a   : > { %v7669_v50 = vsub.s32 32, %v7668_v61  ;;  %v7670_v52 = vshll.u32 %v7661_v11, %v7668_v61  ;;  %v7673_v43 = vsub.s32 4294967266, %v7668_v61  ;;  %vm7696_vm13 = vcmp.eq.s32.totalorder %v7691_v1, 2 }
 0x67b   : > { %vm7693_vm9 = vcmp.eq.s32.totalorder %v7691_v1, 0  ;;  %vm7692_vm14 = vcmp.lt.s32.totalorder %v7691_v1, 2 }
 0x67c   : > { %v7671_v59 = vshrl.u32 %v7653_v15, %v7669_v50  ;;  %v7674_v23 = vadd.s32 127, %v7673_v43 }
 0x67e   : > { %v7672_v51 = vor.u32 %v7671_v59, %v7670_v52  ;;  %v7675_v47 = vshll.u32 %v7674_v23, 23 }
 0x680   : > { %v7676_v63 = vor.u32 4788187, %v7675_v47  ;;  %v7679_v2 = vcvt.s32.f32 %v7672_v51 }
 0x682   : > { %v7677_v53 = vand.u32 2147483647, %v7676_v63 }
 0x683   : > { %v9099_v34 = vpop.eup %9098 }
 0x684   : > { %v9101_v57 = vpop.eup %9100  ;;  %v7801_v62 = vxor.u32 2147483648, %v9099_v34  ;;  %v7680_v12 = vmul.f32 %v7679_v2, %v7677_v53 }
 0x685   : > { %v7798_v45 = vxor.u32 2147483648, %v9101_v57 }
 0x686   : > { %v7802_v22 = vsel %vm7800_vm7, %v7801_v62, %v9101_v57  ;;  %v7681_v17 = vxor.u32 2147483648, %v7680_v12 }
 0x687   : > { %v7799_v8 = vsel %vm7797_vm6, %v9099_v34, %v7798_v45 }
 0x688   : > { %v7803_v9 = vsel %vm7796_vm8, %v7799_v8, %v7802_v22  ;;  %v7682_v58 = vsel %vm7599_vm11, %v7681_v17, %v7680_v12 }
 0x689   : > { %v7804_v26 = vsel %vm7793_vm10, nan, %v7803_v9  ;;  %v7685_v49 = vsel %vm7598_vm12, %v14994_v41, %v7682_v58 }
 0x68a   : > { %v7820_v32 = vmul.f32 %v7804_v26, %v6121_v7  ;;  %9102 = vcosq.f32 %v7685_v49 }
 0x68b   : > { %9104 = vsinq.f32 %v7685_v49 }
 0x68c   : > { %7836 = vst [vmem:[%s14041_s28 + $0x78] sm:$0xff] %v7820_v32 }
 0x697   : > { %v9103_v55 = vpop.eup %9102 }
 0x698   : > { %v9105_v16 = vpop.eup %9104  ;;  %v7697_v40 = vxor.u32 2147483648, %v9103_v55 }
 0x699   : > { %v7694_v31 = vxor.u32 2147483648, %v9105_v16 }
 0x69a   : > { %v7698_v25 = vsel %vm7696_vm13, %v7697_v40, %v9105_v16 }
 0x69b   : > { %v7695_v4 = vsel %vm7693_vm9, %v9103_v55, %v7694_v31 }
 0x69c   : > { %v7699_v42 = vsel %vm7692_vm14, %v7695_v4, %v7698_v25 }
 0x69d   : > { %v7700_v39 = vsel %vm7689_vm0, nan, %v7699_v42 }
 0x69e   : > { %v7819_v14 = vmul.f32 %v7700_v39, %v6116_v56 }
 0x6a0   : > { %7835 = vst [vmem:[%s14041_s28 + $0x70] sm:$0xff] %v7819_v14 }
 0x6a1 PF: > { %p11_p9 = scmp.ge.s32.totalorder %s9185_s19, 4   ;;  %s15285_s15 = smov %s9131_s16 }
 0x6a2   : > { %s15286_s16 = smov %s9194_s22  ;;  %s15287_s17 = smov %s9185_s19 }
 0x6a3   :  { %13 = sbr.rel (!%p11_p9) target bundleno = 2 (0x2), region = 119 }

</bundles_post_ra>
